<compile_context>
chip_gen: v7x
topology: tpu7x:2x2x1
jax: 0.10.0
libtpu: 0.0.40
codegen_flags: <defaults>
</compile_context>

<pallas_src>
import jax
import jax.numpy as jnp
from jax import lax
from jax.experimental import pallas as pl
from jax.experimental.pallas import tpu as pltpu

HP = lax.Precision.HIGHEST
GROUPS = 32
EPS = 1e-5
LANES = 128


def _nbytes(shape, dtype):
    n = 1
    for d in shape:
        n *= int(d)
    return n * jnp.dtype(dtype).itemsize


# --------------------------- GroupNorm + SiLU -------------------------------
def _gn_silu(x2d, gamma, beta, M, Mt, C, H, W):
    """x2d: (H*W, C) f32.  M: (C, G) 0/1 membership, Mt = M.T.  Returns SiLU(GN(x))."""
    cg = C // GROUPS
    cnt = float(H * W * cg)
    HW = H * W
    # Single sweep: strip-wise accumulation of per-channel sum / sum-of-squares
    # (bounds the x*x temp to one strip instead of a full H*W x C buffer).
    n_strips = H // 8 if (H % 8 == 0 and H >= 16) else 1
    rs = HW // n_strips
    csum = jnp.zeros((1, C), jnp.float32)
    csq = jnp.zeros((1, C), jnp.float32)
    for s in range(n_strips):
        xs = x2d[s * rs:(s + 1) * rs, :]
        csum = csum + jnp.sum(xs, axis=0, keepdims=True)
        csq = csq + jnp.sum(xs * xs, axis=0, keepdims=True)
    # Tiny (1,C)@(C,G) reductions: keep f32/HIGHEST so the statistics stay
    # accurate (negligible MXU cost next to the convs).
    gsum = jnp.dot(csum, M, precision=HP, preferred_element_type=jnp.float32)
    gsq = jnp.dot(csq, M, precision=HP, preferred_element_type=jnp.float32)
    mean = gsum / cnt
    var = gsq / cnt - mean * mean
    inv = lax.rsqrt(var + EPS)
    mean_c = jnp.dot(mean, Mt, precision=HP, preferred_element_type=jnp.float32)
    inv_c = jnp.dot(inv, Mt, precision=HP, preferred_element_type=jnp.float32)
    y = (x2d - mean_c) * inv_c * gamma + beta
    return y * jax.nn.sigmoid(y)                                   # SiLU


# --------------------------- 3x3 SAME conv plans -----------------------------
def _conv3x3_plan(H, W, C, Co):
    """Plan for one 3x3 SAME conv (C -> Co), bf16 on the MXU, f32 accumulate.

    Returns (scratch_shape, scratch_dtype, weight_shape, prep_weight_fn, conv_fn)
    where conv_fn(h2d_f32, scratch_ref, w_ref, bias) -> (H*W, Co) f32.
    """
    if C % LANES == 0:
        # Lane-aligned channels (real SD sizes): dense bf16 im2col + one big-K
        # GEMM (K = 9*C), so the MXU accumulates over K in registers and the
        # output is stored once.
        K = 9 * C

        def prep(w):  # (3, 3, C, Co) HWIO -> (9*C, Co) bf16
            return jnp.asarray(w).reshape(K, Co).astype(jnp.bfloat16)

        def conv(h2d, col_ref, w_ref, bias):
            hb = h2d.astype(jnp.bfloat16).reshape(H, W, C)   # cast once
            # Every never-written (conv zero padding) location lies in the four
            # border strips; zero them each step so grid steps stay independent.
            zr = jnp.zeros((1, W, K), jnp.bfloat16)
            zc = jnp.zeros((H, 1, K), jnp.bfloat16)
            col_ref[pl.ds(0, 1), :, :] = zr
            col_ref[pl.ds(H - 1, 1), :, :] = zr
            col_ref[:, pl.ds(0, 1), :] = zc
            col_ref[:, pl.ds(W - 1, 1), :] = zc
            # 9-tap scatter: tap t = dy*3+dx at lane offset t*C (128-aligned
            # since C % 128 == 0 on this path).
            for dy in range(3):
                ry = dy - 1
                y0 = max(0, -ry)
                hv = H - abs(ry)
                for dx in range(3):
                    rx = dx - 1
                    x0 = max(0, -rx)
                    wv = W - abs(rx)
                    t = dy * 3 + dx
                    col_ref[pl.ds(y0, hv), pl.ds(x0, wv), pl.ds(t * C, C)] = \
                        hb[y0 + ry:y0 + ry + hv, x0 + rx:x0 + rx + wv, :]
            col = col_ref[...].reshape(H * W, K)
            return jnp.dot(col, w_ref[...],
                           preferred_element_type=jnp.float32) + bias

        return (H, W, K), jnp.bfloat16, (K, Co), prep, conv

    # Narrow channels (C % 128 != 0): zero-padded activation + 9 accumulated
    # tap GEMMs with K = C -> no per-tap lane-pad MXU waste.  Buffer stays f32
    # (tiny at these channel counts; windows are cast to bf16 at the dot).
    def prep(w):  # (3, 3, C, Co) -> (9, C, Co) bf16
        return jnp.asarray(w).reshape(9, C, Co).astype(jnp.bfloat16)

    def conv(h2d, pad_ref, w_ref, bias):
        zr = jnp.zeros((1, W + 2, C), jnp.float32)
        zc = jnp.zeros((H + 2, 1, C), jnp.float32)
        pad_ref[pl.ds(0, 1), :, :] = zr
        pad_ref[pl.ds(H + 1, 1), :, :] = zr
        pad_ref[:, pl.ds(0, 1), :] = zc
        pad_ref[:, pl.ds(W + 1, 1), :] = zc
        pad_ref[pl.ds(1, H), pl.ds(1, W), :] = h2d.reshape(H, W, C)
        acc = jnp.zeros((H * W, Co), jnp.float32)
        for dy in range(3):
            for dx in range(3):
                t = dy * 3 + dx
                win = pad_ref[pl.ds(dy, H), pl.ds(dx, W), :]        # (H, W, C)
                acc = acc + jnp.dot(
                    win.reshape(H * W, C).astype(jnp.bfloat16), w_ref[t],
                    preferred_element_type=jnp.float32)
        return acc + bias

    return (H + 2, W + 2, C), jnp.float32, (9, C, Co), prep, conv


# --------------------------- fused kernel ------------------------------------
def _make_kernel(H, W, Cin, Cout, has_proj, conv1, conv2):
    def kernel(x_ref, g1_ref, be1_ref, m1_ref, mt1_ref, w1_ref, b1_ref,
               g2_ref, be2_ref, m2_ref, mt2_ref, w2_ref, b2_ref, *rest):
        if has_proj:
            wr_ref, br_ref, out_ref, col1_ref, col2_ref = rest
        else:
            out_ref, col1_ref, col2_ref = rest

        x2d = x_ref[0].reshape(H * W, Cin)                  # (H*W, Cin) f32

        # GN1 -> SiLU -> conv_1 (3x3)
        h = _gn_silu(x2d, g1_ref[...], be1_ref[...],
                     m1_ref[...], mt1_ref[...], Cin, H, W)
        h = conv1(h, col1_ref, w1_ref, b1_ref[...])

        # GN2 -> SiLU -> conv_2 (3x3)
        h = _gn_silu(h, g2_ref[...], be2_ref[...],
                     m2_ref[...], mt2_ref[...], Cout, H, W)
        h = conv2(h, col2_ref, w2_ref, b2_ref[...])

        # Residual last: re-read x_ref right before the final add so the
        # residual value is not held live across both conv phases.
        xr = x_ref[0].reshape(H * W, Cin)
        if has_proj:
            res = jnp.dot(xr.astype(jnp.bfloat16), wr_ref[...],
                          preferred_element_type=jnp.float32) + br_ref[...]
        else:
            res = xr
        out_ref[0] = (h + res).reshape(H, W, Cout)

    return kernel


def _gn_masks(C):
    grp = jnp.arange(C, dtype=jnp.int32) // (C // GROUPS)
    M = (grp[:, None] == jnp.arange(GROUPS, dtype=jnp.int32)[None, :])
    M = M.astype(jnp.float32)                                   # (C, G)
    return M, M.T


def decoder_block(x, params):
    """x: (N, H, W, Cin) f32.  Returns (N, H, W, Cout) f32."""
    N, H, W, Cin = x.shape
    Cout = params["w1"].shape[-1]
    has_proj = Cin != Cout

    s1_shape, s1_dtype, w1_shape, prep1, conv1 = _conv3x3_plan(H, W, Cin, Cout)
    s2_shape, s2_dtype, w2_shape, prep2, conv2 = _conv3x3_plan(H, W, Cout, Cout)
    kernel = _make_kernel(H, W, Cin, Cout, has_proj, conv1, conv2)

    m1, mt1 = _gn_masks(Cin)
    m2, mt2 = _gn_masks(Cout)
    w1 = prep1(params["w1"])
    w2 = prep2(params["w2"])

    def const_spec(shape):
        nd = len(shape)
        return pl.BlockSpec(shape, lambda n: (0,) * nd)

    in_specs = [
        pl.BlockSpec((1, H, W, Cin), lambda n: (n, 0, 0, 0)),    # x
        const_spec((1, Cin)), const_spec((1, Cin)),              # gamma1, beta1
        const_spec((Cin, GROUPS)), const_spec((GROUPS, Cin)),    # M1, M1^T
        const_spec(w1_shape), const_spec((1, Cout)),             # w1, b1
        const_spec((1, Cout)), const_spec((1, Cout)),            # gamma2, beta2
        const_spec((Cout, GROUPS)), const_spec((GROUPS, Cout)),  # M2, M2^T
        const_spec(w2_shape), const_spec((1, Cout)),             # w2, b2
    ]
    args = [
        x,
        params["g1"].reshape(1, Cin), params["be1"].reshape(1, Cin),
        m1, mt1,
        w1, params["b1"].reshape(1, Cout),
        params["g2"].reshape(1, Cout), params["be2"].reshape(1, Cout),
        m2, mt2,
        w2, params["b2"].reshape(1, Cout),
    ]
    if has_proj:
        in_specs += [const_spec((Cin, Cout)), const_spec((1, Cout))]
        args += [params["wres"].astype(jnp.bfloat16),
                 params["bres"].reshape(1, Cout)]

    scratch_shapes = [pltpu.VMEM(s1_shape, s1_dtype),
                      pltpu.VMEM(s2_shape, s2_dtype)]

    # ---- generation-aware VMEM budget ---------------------------------------
    Cmax = max(Cin, Cout)
    foot = 0
    foot += 2 * _nbytes((1, H, W, Cin), jnp.float32)     # x block (dbl-buffered)
    foot += 2 * _nbytes((1, H, W, Cout), jnp.float32)    # out block (dbl-buffered)
    foot += 2 * (_nbytes(w1_shape, jnp.bfloat16) + _nbytes(w2_shape, jnp.bfloat16))
    foot += 4 * (_nbytes((Cin, GROUPS), jnp.float32) + _nbytes((Cout, GROUPS), jnp.float32))
    if has_proj:
        foot += 2 * _nbytes((Cin, Cout), jnp.bfloat16)
    foot += _nbytes(s1_shape, s1_dtype) + _nbytes(s2_shape, s2_dtype)
    # live in-kernel intermediates: h (f32), its bf16 copy, conv dot output /
    # accumulator, residual, GN strip temps.
    foot += 3 * _nbytes((H * W, Cmax), jnp.float32)
    foot += _nbytes((H * W, Cmax), jnp.bfloat16)
    foot += 2 << 20                                      # small params + slack
    try:
        cap = int(pltpu.get_tpu_info().vmem_capacity_bytes)
    except Exception:
        cap = 64 << 20                                   # conservative: v7x per-TC
    vmem_limit = int(min(int(cap * 0.9), max(32 << 20, 2 * foot)))

    return pl.pallas_call(
        kernel,
        out_shape=jax.ShapeDtypeStruct((N, H, W, Cout), jnp.float32),
        grid_spec=pltpu.PrefetchScalarGridSpec(
            num_scalar_prefetch=0,
            grid=(N,),
            in_specs=in_specs,
            out_specs=pl.BlockSpec((1, H, W, Cout), lambda n: (n, 0, 0, 0)),
            scratch_shapes=scratch_shapes,
        ),
        compiler_params=pltpu.CompilerParams(
            # Every grid step fully re-initialises its scratch, so the batch
            # axis is independent -> "parallel" (v7x megacore; neutral on 1-TC
            # v5e/v6e).
            dimension_semantics=("parallel",),
            vmem_limit_bytes=vmem_limit,
        ),
    )(*args)


# ---------------------- pure-JAX reference (for validation) ------------------
def _ref_forward(x, params):
    N, H, W, Cin = x.shape
    Cout = params["w1"].shape[-1]

    def gn(y, gamma, beta):
        C = y.shape[-1]
        yg = y.reshape(N, H, W, GROUPS, C // GROUPS)
        mean = yg.mean(axis=(1, 2, 4), keepdims=True)
        var = ((yg - mean) ** 2).mean(axis=(1, 2, 4), keepdims=True)
        yn = ((yg - mean) / jnp.sqrt(var + EPS)).reshape(N, H, W, C)
        return yn * gamma.reshape(1, 1, 1, C) + beta.reshape(1, 1, 1, C)

    def silu(y):
        return y * jax.nn.sigmoid(y)

    def conv(y, w, b):
        out = lax.conv_general_dilated(
            y, w, window_strides=(1, 1), padding="SAME",
            dimension_numbers=("NHWC", "HWIO", "NHWC"), precision=HP)
        return out + b.reshape(1, 1, 1, -1)

    h = silu(gn(x, params["g1"], params["be1"]))
    h = conv(h, params["w1"], params["b1"])
    h = silu(gn(h, params["g2"], params["be2"]))
    h = conv(h, params["w2"], params["b2"])
    if Cin != Cout:
        res = jnp.einsum("nhwc,cd->nhwd", x, params["wres"], precision=HP)
        res = res + params["bres"].reshape(1, 1, 1, -1)
    else:
        res = x
    return h + res


def _make_params(key, Cin, Cout):
    ks = jax.random.split(key, 10)
    p = {
        "g1":  1.0 + 0.1 * jax.random.normal(ks[1], (Cin,), jnp.float32),
        "be1": 0.1 * jax.random.normal(ks[2], (Cin,), jnp.float32),
        "w1":  0.05 * jax.random.normal(ks[3], (3, 3, Cin, Cout), jnp.float32),
        "b1":  0.02 * jax.random.normal(ks[4], (Cout,), jnp.float32),
        "g2":  1.0 + 0.1 * jax.random.normal(ks[5], (Cout,), jnp.float32),
        "be2": 0.1 * jax.random.normal(ks[6], (Cout,), jnp.float32),
        "w2":  0.05 * jax.random.normal(ks[7], (3, 3, Cout, Cout), jnp.float32),
        "b2":  0.02 * jax.random.normal(ks[8], (Cout,), jnp.float32),
    }
    if Cin != Cout:
        p["wres"] = 0.1 * jax.random.normal(ks[9], (Cin, Cout), jnp.float32)
        p["bres"] = jnp.zeros((Cout,), jnp.float32)
    return p


if __name__ == "__main__":
    key = jax.random.PRNGKey(0)
    N, H, W = 2, 16, 16
    # (32 -> 64): narrow-channel tap-GEMM path + 1x1 residual projection.
    # (128 -> 128): lane-aligned bf16 im2col path + identity residual.
    configs = [(32, 64), (128, 128)]
    for Cin, Cout in configs:
        kx, kp, key = jax.random.split(key, 3)
        x = jax.random.normal(kx, (N, H, W, Cin), jnp.float32)
        params = _make_params(kp, Cin, Cout)

        out = jax.block_until_ready(decoder_block(x, params))
        ref = jax.block_until_ready(_ref_forward(x, params))

        assert out.shape == (N, H, W, Cout), out.shape
        # Convs / residual projection run in bf16 on the MXU (f32 accumulate);
        # the f32 reference differs by a few 1e-3 at these magnitudes.
        err = float(jnp.max(jnp.abs(out - ref)))
        assert jnp.allclose(out, ref, rtol=3e-2, atol=3e-2), (Cin, Cout, err)

    print("KERNEL_OK")
</pallas_src>

<mosaic_0001>
module attributes {stable_mosaic.version = 11 : i64} {
  func.func @kernel(%arg0: i32, %arg1: memref<1x16x16x32xf32, #tpu.memory_space<vmem>>, %arg2: memref<1x32xf32, #tpu.memory_space<vmem>>, %arg3: memref<1x32xf32, #tpu.memory_space<vmem>>, %arg4: memref<32x32xf32, #tpu.memory_space<vmem>>, %arg5: memref<32x32xf32, #tpu.memory_space<vmem>>, %arg6: memref<9x32x64xbf16, #tpu.memory_space<vmem>>, %arg7: memref<1x64xf32, #tpu.memory_space<vmem>>, %arg8: memref<1x64xf32, #tpu.memory_space<vmem>>, %arg9: memref<1x64xf32, #tpu.memory_space<vmem>>, %arg10: memref<64x32xf32, #tpu.memory_space<vmem>>, %arg11: memref<32x64xf32, #tpu.memory_space<vmem>>, %arg12: memref<9x64x64xbf16, #tpu.memory_space<vmem>>, %arg13: memref<1x64xf32, #tpu.memory_space<vmem>>, %arg14: memref<32x64xbf16, #tpu.memory_space<vmem>>, %arg15: memref<1x64xf32, #tpu.memory_space<vmem>>, %arg16: memref<1x16x16x64xf32, #tpu.memory_space<vmem>>, %arg17: memref<18x18x32xf32, #tpu.memory_space<vmem>>, %arg18: memref<18x18x64xf32, #tpu.memory_space<vmem>>) attributes {dimension_semantics = [#tpu.dimension_semantics<parallel>], iteration_bounds = array<i64: 2>, scalar_prefetch = 0 : i64, scratch_operands = 2 : i64, tpu.core_type = #tpu.core_type<tc>, window_params = [{transform_indices = @transform_0, window_bounds = array<i64: 1, 16, 16, 32>}, {pipeline_mode = #tpu.pipeline_mode<synchronous>, transform_indices = @transform_1, window_bounds = array<i64: 1, 32>}, {pipeline_mode = #tpu.pipeline_mode<synchronous>, transform_indices = @transform_2, window_bounds = array<i64: 1, 32>}, {pipeline_mode = #tpu.pipeline_mode<synchronous>, transform_indices = @transform_3, window_bounds = array<i64: 32, 32>}, {pipeline_mode = #tpu.pipeline_mode<synchronous>, transform_indices = @transform_4, window_bounds = array<i64: 32, 32>}, {pipeline_mode = #tpu.pipeline_mode<synchronous>, transform_indices = @transform_5, window_bounds = array<i64: 9, 32, 64>}, {pipeline_mode = #tpu.pipeline_mode<synchronous>, transform_indices = @transform_6, window_bounds = array<i64: 1, 64>}, {pipeline_mode = #tpu.pipeline_mode<synchronous>, transform_indices = @transform_7, window_bounds = array<i64: 1, 64>}, {pipeline_mode = #tpu.pipeline_mode<synchronous>, transform_indices = @transform_8, window_bounds = array<i64: 1, 64>}, {pipeline_mode = #tpu.pipeline_mode<synchronous>, transform_indices = @transform_9, window_bounds = array<i64: 64, 32>}, {pipeline_mode = #tpu.pipeline_mode<synchronous>, transform_indices = @transform_10, window_bounds = array<i64: 32, 64>}, {pipeline_mode = #tpu.pipeline_mode<synchronous>, transform_indices = @transform_11, window_bounds = array<i64: 9, 64, 64>}, {pipeline_mode = #tpu.pipeline_mode<synchronous>, transform_indices = @transform_12, window_bounds = array<i64: 1, 64>}, {pipeline_mode = #tpu.pipeline_mode<synchronous>, transform_indices = @transform_13, window_bounds = array<i64: 32, 64>}, {pipeline_mode = #tpu.pipeline_mode<synchronous>, transform_indices = @transform_14, window_bounds = array<i64: 1, 64>}, {transform_indices = @transform_15, window_bounds = array<i64: 1, 16, 16, 64>}]} {
    %c0 = arith.constant 0 : index
    %c0_0 = arith.constant 0 : index
    %c0_1 = arith.constant 0 : index
    %c0_2 = arith.constant 0 : index
    %0 = vector.load %arg1[%c0, %c0_0, %c0_1, %c0_2] : memref<1x16x16x32xf32, #tpu.memory_space<vmem>>, vector<1x16x16x32xf32>
    %1 = vector.shape_cast %0 : vector<1x16x16x32xf32> to vector<16x16x32xf32>
    %2 = vector.shape_cast %1 : vector<16x16x32xf32> to vector<256x32xf32>
    %c0_3 = arith.constant 0 : index
    %c0_4 = arith.constant 0 : index
    %3 = vector.load %arg2[%c0_3, %c0_4] : memref<1x32xf32, #tpu.memory_space<vmem>>, vector<1x32xf32>
    %c0_5 = arith.constant 0 : index
    %c0_6 = arith.constant 0 : index
    %4 = vector.load %arg3[%c0_5, %c0_6] : memref<1x32xf32, #tpu.memory_space<vmem>>, vector<1x32xf32>
    %c0_7 = arith.constant 0 : index
    %c0_8 = arith.constant 0 : index
    %5 = vector.load %arg4[%c0_7, %c0_8] : memref<32x32xf32, #tpu.memory_space<vmem>>, vector<32x32xf32>
    %c0_9 = arith.constant 0 : index
    %c0_10 = arith.constant 0 : index
    %6 = vector.load %arg5[%c0_9, %c0_10] : memref<32x32xf32, #tpu.memory_space<vmem>>, vector<32x32xf32>
    %cst = arith.constant 0.000000e+00 : f32
    %7 = vector.broadcast %cst : f32 to vector<1x32xf32>
    %cst_11 = arith.constant 0.000000e+00 : f32
    %8 = vector.broadcast %cst_11 : f32 to vector<1x32xf32>
    %9 = vector.extract_strided_slice %2 {offsets = [0, 0], sizes = [128, 32], strides = [1, 1]} : vector<256x32xf32> to vector<128x32xf32>
    %cst_12 = arith.constant dense<0.000000e+00> : vector<32xf32>
    %10 = vector.multi_reduction <add>, %9, %cst_12 [0] : vector<128x32xf32> to vector<32xf32>
    %11 = vector.shape_cast %10 : vector<32xf32> to vector<1x32xf32>
    %12 = arith.addf %7, %11 : vector<1x32xf32>
    %13 = arith.mulf %9, %9 : vector<128x32xf32>
    %cst_13 = arith.constant dense<0.000000e+00> : vector<32xf32>
    %14 = vector.multi_reduction <add>, %13, %cst_13 [0] : vector<128x32xf32> to vector<32xf32>
    %15 = vector.shape_cast %14 : vector<32xf32> to vector<1x32xf32>
    %16 = arith.addf %8, %15 : vector<1x32xf32>
    %17 = vector.extract_strided_slice %2 {offsets = [128, 0], sizes = [128, 32], strides = [1, 1]} : vector<256x32xf32> to vector<128x32xf32>
    %cst_14 = arith.constant dense<0.000000e+00> : vector<32xf32>
    %18 = vector.multi_reduction <add>, %17, %cst_14 [0] : vector<128x32xf32> to vector<32xf32>
    %19 = vector.shape_cast %18 : vector<32xf32> to vector<1x32xf32>
    %20 = arith.addf %12, %19 : vector<1x32xf32>
    %21 = arith.mulf %17, %17 : vector<128x32xf32>
    %cst_15 = arith.constant dense<0.000000e+00> : vector<32xf32>
    %22 = vector.multi_reduction <add>, %21, %cst_15 [0] : vector<128x32xf32> to vector<32xf32>
    %23 = vector.shape_cast %22 : vector<32xf32> to vector<1x32xf32>
    %24 = arith.addf %16, %23 : vector<1x32xf32>
    %cst_16 = arith.constant dense<0.000000e+00> : vector<1x32xf32>
    %25 = tpu.matmul %20, %5, %cst_16 {dimension_numbers = #tpu.dot_dimension_numbers<[1], [0], [0], [1], [0, 0, 1, 1], [], []>, precision = #tpu.contract_precision<fp32>} : vector<1x32xf32>, vector<32x32xf32>, vector<1x32xf32> -> vector<1x32xf32>
    %cst_17 = arith.constant dense<0.000000e+00> : vector<1x32xf32>
    %26 = tpu.matmul %24, %5, %cst_17 {dimension_numbers = #tpu.dot_dimension_numbers<[1], [0], [0], [1], [0, 0, 1, 1], [], []>, precision = #tpu.contract_precision<fp32>} : vector<1x32xf32>, vector<32x32xf32>, vector<1x32xf32> -> vector<1x32xf32>
    %cst_18 = arith.constant 2.560000e+02 : f32
    %27 = vector.broadcast %cst_18 : f32 to vector<1x32xf32>
    %28 = arith.divf %25, %27 : vector<1x32xf32>
    %cst_19 = arith.constant 2.560000e+02 : f32
    %29 = vector.broadcast %cst_19 : f32 to vector<1x32xf32>
    %30 = arith.divf %26, %29 : vector<1x32xf32>
    %31 = arith.mulf %28, %28 : vector<1x32xf32>
    %32 = arith.subf %30, %31 : vector<1x32xf32>
    %cst_20 = arith.constant 9.99999974E-6 : f32
    %33 = vector.broadcast %cst_20 : f32 to vector<1x32xf32>
    %34 = arith.addf %32, %33 : vector<1x32xf32>
    %35 = math.rsqrt %34 : vector<1x32xf32>
    %cst_21 = arith.constant dense<0.000000e+00> : vector<1x32xf32>
    %36 = tpu.matmul %28, %6, %cst_21 {dimension_numbers = #tpu.dot_dimension_numbers<[1], [0], [0], [1], [0, 0, 1, 1], [], []>, precision = #tpu.contract_precision<fp32>} : vector<1x32xf32>, vector<32x32xf32>, vector<1x32xf32> -> vector<1x32xf32>
    %cst_22 = arith.constant dense<0.000000e+00> : vector<1x32xf32>
    %37 = tpu.matmul %35, %6, %cst_22 {dimension_numbers = #tpu.dot_dimension_numbers<[1], [0], [0], [1], [0, 0, 1, 1], [], []>, precision = #tpu.contract_precision<fp32>} : vector<1x32xf32>, vector<32x32xf32>, vector<1x32xf32> -> vector<1x32xf32>
    %38 = vector.broadcast %36 : vector<1x32xf32> to vector<256x32xf32>
    %39 = arith.subf %2, %38 : vector<256x32xf32>
    %40 = vector.broadcast %37 : vector<1x32xf32> to vector<256x32xf32>
    %41 = arith.mulf %39, %40 : vector<256x32xf32>
    %42 = vector.broadcast %3 : vector<1x32xf32> to vector<256x32xf32>
    %43 = arith.mulf %41, %42 : vector<256x32xf32>
    %44 = vector.broadcast %4 : vector<1x32xf32> to vector<256x32xf32>
    %45 = arith.addf %43, %44 : vector<256x32xf32>
    %46 = arith.negf %45 : vector<256x32xf32>
    %47 = math.exp %46 : vector<256x32xf32>
    %cst_23 = arith.constant 1.000000e+00 : f32
    %48 = vector.broadcast %cst_23 : f32 to vector<256x32xf32>
    %49 = arith.addf %48, %47 : vector<256x32xf32>
    %50 = arith.divf %48, %49 : vector<256x32xf32>
    %51 = arith.mulf %45, %50 : vector<256x32xf32>
    %c0_24 = arith.constant 0 : index
    %c0_25 = arith.constant 0 : index
    %52 = vector.load %arg7[%c0_24, %c0_25] : memref<1x64xf32, #tpu.memory_space<vmem>>, vector<1x64xf32>
    %cst_26 = arith.constant 0.000000e+00 : f32
    %53 = vector.broadcast %cst_26 : f32 to vector<1x18x32xf32>
    %cst_27 = arith.constant 0.000000e+00 : f32
    %54 = vector.broadcast %cst_27 : f32 to vector<18x1x32xf32>
    %c0_28 = arith.constant 0 : index
    %c0_29 = arith.constant 0 : index
    %c0_30 = arith.constant 0 : index
    %55 = vector.load %arg17[%c0_28, %c0_29, %c0_30] : memref<18x18x32xf32, #tpu.memory_space<vmem>>, vector<1x18x32xf32>
    tpu.vector_store %arg17[%c0_28, %c0_29, %c0_30], %53 {strides = array<i32>} : memref<18x18x32xf32, #tpu.memory_space<vmem>>, vector<1x18x32xf32>,
    %c17 = arith.constant 17 : index
    %c0_31 = arith.constant 0 : index
    %c0_32 = arith.constant 0 : index
    %56 = vector.load %arg17[%c17, %c0_31, %c0_32] : memref<18x18x32xf32, #tpu.memory_space<vmem>>, vector<1x18x32xf32>
    tpu.vector_store %arg17[%c17, %c0_31, %c0_32], %53 {strides = array<i32>} : memref<18x18x32xf32, #tpu.memory_space<vmem>>, vector<1x18x32xf32>,
    %c0_33 = arith.constant 0 : index
    %c0_34 = arith.constant 0 : index
    %c0_35 = arith.constant 0 : index
    %57 = vector.load %arg17[%c0_33, %c0_34, %c0_35] : memref<18x18x32xf32, #tpu.memory_space<vmem>>, vector<18x1x32xf32>
    tpu.vector_store %arg17[%c0_33, %c0_34, %c0_35], %54 {strides = array<i32>} : memref<18x18x32xf32, #tpu.memory_space<vmem>>, vector<18x1x32xf32>,
    %c0_36 = arith.constant 0 : index
    %c17_37 = arith.constant 17 : index
    %c0_38 = arith.constant 0 : index
    %58 = vector.load %arg17[%c0_36, %c17_37, %c0_38] : memref<18x18x32xf32, #tpu.memory_space<vmem>>, vector<18x1x32xf32>
    tpu.vector_store %arg17[%c0_36, %c17_37, %c0_38], %54 {strides = array<i32>} : memref<18x18x32xf32, #tpu.memory_space<vmem>>, vector<18x1x32xf32>,
    %59 = vector.shape_cast %51 : vector<256x32xf32> to vector<16x16x32xf32>
    %c1 = arith.constant 1 : index
    %c1_39 = arith.constant 1 : index
    %c0_40 = arith.constant 0 : index
    %60 = vector.load %arg17[%c1, %c1_39, %c0_40] : memref<18x18x32xf32, #tpu.memory_space<vmem>>, vector<16x16x32xf32>
    tpu.vector_store %arg17[%c1, %c1_39, %c0_40], %59 {strides = array<i32>} : memref<18x18x32xf32, #tpu.memory_space<vmem>>, vector<16x16x32xf32>,
    %cst_41 = arith.constant 0.000000e+00 : f32
    %61 = vector.broadcast %cst_41 : f32 to vector<256x64xf32>
    %c0_42 = arith.constant 0 : index
    %c0_43 = arith.constant 0 : index
    %c0_44 = arith.constant 0 : index
    %62 = vector.load %arg17[%c0_42, %c0_43, %c0_44] : memref<18x18x32xf32, #tpu.memory_space<vmem>>, vector<16x16x32xf32>
    %63 = vector.shape_cast %62 : vector<16x16x32xf32> to vector<256x32xf32>
    %64 = arith.truncf %63 : vector<256x32xf32> to vector<256x32xbf16>
    %c0_45 = arith.constant 0 : index
    %c0_46 = arith.constant 0 : index
    %c0_47 = arith.constant 0 : index
    %65 = vector.load %arg6[%c0_45, %c0_46, %c0_47] : memref<9x32x64xbf16, #tpu.memory_space<vmem>>, vector<1x32x64xbf16>
    %66 = vector.shape_cast %65 : vector<1x32x64xbf16> to vector<32x64xbf16>
    %cst_48 = arith.constant dense<0.000000e+00> : vector<256x64xf32>
    %67 = tpu.matmul %64, %66, %cst_48 {dimension_numbers = #tpu.dot_dimension_numbers<[1], [0], [0], [1], [0, 0, 1, 1], [], []>} : vector<256x32xbf16>, vector<32x64xbf16>, vector<256x64xf32> -> vector<256x64xf32>
    %68 = arith.addf %61, %67 : vector<256x64xf32>
    %c0_49 = arith.constant 0 : index
    %c1_50 = arith.constant 1 : index
    %c0_51 = arith.constant 0 : index
    %69 = vector.load %arg17[%c0_49, %c1_50, %c0_51] : memref<18x18x32xf32, #tpu.memory_space<vmem>>, vector<16x16x32xf32>
    %70 = vector.shape_cast %69 : vector<16x16x32xf32> to vector<256x32xf32>
    %71 = arith.truncf %70 : vector<256x32xf32> to vector<256x32xbf16>
    %c1_52 = arith.constant 1 : index
    %c0_53 = arith.constant 0 : index
    %c0_54 = arith.constant 0 : index
    %72 = vector.load %arg6[%c1_52, %c0_53, %c0_54] : memref<9x32x64xbf16, #tpu.memory_space<vmem>>, vector<1x32x64xbf16>
    %73 = vector.shape_cast %72 : vector<1x32x64xbf16> to vector<32x64xbf16>
    %cst_55 = arith.constant dense<0.000000e+00> : vector<256x64xf32>
    %74 = tpu.matmul %71, %73, %cst_55 {dimension_numbers = #tpu.dot_dimension_numbers<[1], [0], [0], [1], [0, 0, 1, 1], [], []>} : vector<256x32xbf16>, vector<32x64xbf16>, vector<256x64xf32> -> vector<256x64xf32>
    %75 = arith.addf %68, %74 : vector<256x64xf32>
    %c0_56 = arith.constant 0 : index
    %c2 = arith.constant 2 : index
    %c0_57 = arith.constant 0 : index
    %76 = vector.load %arg17[%c0_56, %c2, %c0_57] : memref<18x18x32xf32, #tpu.memory_space<vmem>>, vector<16x16x32xf32>
    %77 = vector.shape_cast %76 : vector<16x16x32xf32> to vector<256x32xf32>
    %78 = arith.truncf %77 : vector<256x32xf32> to vector<256x32xbf16>
    %c2_58 = arith.constant 2 : index
    %c0_59 = arith.constant 0 : index
    %c0_60 = arith.constant 0 : index
    %79 = vector.load %arg6[%c2_58, %c0_59, %c0_60] : memref<9x32x64xbf16, #tpu.memory_space<vmem>>, vector<1x32x64xbf16>
    %80 = vector.shape_cast %79 : vector<1x32x64xbf16> to vector<32x64xbf16>
    %cst_61 = arith.constant dense<0.000000e+00> : vector<256x64xf32>
    %81 = tpu.matmul %78, %80, %cst_61 {dimension_numbers = #tpu.dot_dimension_numbers<[1], [0], [0], [1], [0, 0, 1, 1], [], []>} : vector<256x32xbf16>, vector<32x64xbf16>, vector<256x64xf32> -> vector<256x64xf32>
    %82 = arith.addf %75, %81 : vector<256x64xf32>
    %c1_62 = arith.constant 1 : index
    %c0_63 = arith.constant 0 : index
    %c0_64 = arith.constant 0 : index
    %83 = vector.load %arg17[%c1_62, %c0_63, %c0_64] : memref<18x18x32xf32, #tpu.memory_space<vmem>>, vector<16x16x32xf32>
    %84 = vector.shape_cast %83 : vector<16x16x32xf32> to vector<256x32xf32>
    %85 = arith.truncf %84 : vector<256x32xf32> to vector<256x32xbf16>
    %c3 = arith.constant 3 : index
    %c0_65 = arith.constant 0 : index
    %c0_66 = arith.constant 0 : index
    %86 = vector.load %arg6[%c3, %c0_65, %c0_66] : memref<9x32x64xbf16, #tpu.memory_space<vmem>>, vector<1x32x64xbf16>
    %87 = vector.shape_cast %86 : vector<1x32x64xbf16> to vector<32x64xbf16>
    %cst_67 = arith.constant dense<0.000000e+00> : vector<256x64xf32>
    %88 = tpu.matmul %85, %87, %cst_67 {dimension_numbers = #tpu.dot_dimension_numbers<[1], [0], [0], [1], [0, 0, 1, 1], [], []>} : vector<256x32xbf16>, vector<32x64xbf16>, vector<256x64xf32> -> vector<256x64xf32>
    %89 = arith.addf %82, %88 : vector<256x64xf32>
    %c1_68 = arith.constant 1 : index
    %c1_69 = arith.constant 1 : index
    %c0_70 = arith.constant 0 : index
    %90 = vector.load %arg17[%c1_68, %c1_69, %c0_70] : memref<18x18x32xf32, #tpu.memory_space<vmem>>, vector<16x16x32xf32>
    %91 = vector.shape_cast %90 : vector<16x16x32xf32> to vector<256x32xf32>
    %92 = arith.truncf %91 : vector<256x32xf32> to vector<256x32xbf16>
    %c4 = arith.constant 4 : index
    %c0_71 = arith.constant 0 : index
    %c0_72 = arith.constant 0 : index
    %93 = vector.load %arg6[%c4, %c0_71, %c0_72] : memref<9x32x64xbf16, #tpu.memory_space<vmem>>, vector<1x32x64xbf16>
    %94 = vector.shape_cast %93 : vector<1x32x64xbf16> to vector<32x64xbf16>
    %cst_73 = arith.constant dense<0.000000e+00> : vector<256x64xf32>
    %95 = tpu.matmul %92, %94, %cst_73 {dimension_numbers = #tpu.dot_dimension_numbers<[1], [0], [0], [1], [0, 0, 1, 1], [], []>} : vector<256x32xbf16>, vector<32x64xbf16>, vector<256x64xf32> -> vector<256x64xf32>
    %96 = arith.addf %89, %95 : vector<256x64xf32>
    %c1_74 = arith.constant 1 : index
    %c2_75 = arith.constant 2 : index
    %c0_76 = arith.constant 0 : index
    %97 = vector.load %arg17[%c1_74, %c2_75, %c0_76] : memref<18x18x32xf32, #tpu.memory_space<vmem>>, vector<16x16x32xf32>
    %98 = vector.shape_cast %97 : vector<16x16x32xf32> to vector<256x32xf32>
    %99 = arith.truncf %98 : vector<256x32xf32> to vector<256x32xbf16>
    %c5 = arith.constant 5 : index
    %c0_77 = arith.constant 0 : index
    %c0_78 = arith.constant 0 : index
    %100 = vector.load %arg6[%c5, %c0_77, %c0_78] : memref<9x32x64xbf16, #tpu.memory_space<vmem>>, vector<1x32x64xbf16>
    %101 = vector.shape_cast %100 : vector<1x32x64xbf16> to vector<32x64xbf16>
    %cst_79 = arith.constant dense<0.000000e+00> : vector<256x64xf32>
    %102 = tpu.matmul %99, %101, %cst_79 {dimension_numbers = #tpu.dot_dimension_numbers<[1], [0], [0], [1], [0, 0, 1, 1], [], []>} : vector<256x32xbf16>, vector<32x64xbf16>, vector<256x64xf32> -> vector<256x64xf32>
    %103 = arith.addf %96, %102 : vector<256x64xf32>
    %c2_80 = arith.constant 2 : index
    %c0_81 = arith.constant 0 : index
    %c0_82 = arith.constant 0 : index
    %104 = vector.load %arg17[%c2_80, %c0_81, %c0_82] : memref<18x18x32xf32, #tpu.memory_space<vmem>>, vector<16x16x32xf32>
    %105 = vector.shape_cast %104 : vector<16x16x32xf32> to vector<256x32xf32>
    %106 = arith.truncf %105 : vector<256x32xf32> to vector<256x32xbf16>
    %c6 = arith.constant 6 : index
    %c0_83 = arith.constant 0 : index
    %c0_84 = arith.constant 0 : index
    %107 = vector.load %arg6[%c6, %c0_83, %c0_84] : memref<9x32x64xbf16, #tpu.memory_space<vmem>>, vector<1x32x64xbf16>
    %108 = vector.shape_cast %107 : vector<1x32x64xbf16> to vector<32x64xbf16>
    %cst_85 = arith.constant dense<0.000000e+00> : vector<256x64xf32>
    %109 = tpu.matmul %106, %108, %cst_85 {dimension_numbers = #tpu.dot_dimension_numbers<[1], [0], [0], [1], [0, 0, 1, 1], [], []>} : vector<256x32xbf16>, vector<32x64xbf16>, vector<256x64xf32> -> vector<256x64xf32>
    %110 = arith.addf %103, %109 : vector<256x64xf32>
    %c2_86 = arith.constant 2 : index
    %c1_87 = arith.constant 1 : index
    %c0_88 = arith.constant 0 : index
    %111 = vector.load %arg17[%c2_86, %c1_87, %c0_88] : memref<18x18x32xf32, #tpu.memory_space<vmem>>, vector<16x16x32xf32>
    %112 = vector.shape_cast %111 : vector<16x16x32xf32> to vector<256x32xf32>
    %113 = arith.truncf %112 : vector<256x32xf32> to vector<256x32xbf16>
    %c7 = arith.constant 7 : index
    %c0_89 = arith.constant 0 : index
    %c0_90 = arith.constant 0 : index
    %114 = vector.load %arg6[%c7, %c0_89, %c0_90] : memref<9x32x64xbf16, #tpu.memory_space<vmem>>, vector<1x32x64xbf16>
    %115 = vector.shape_cast %114 : vector<1x32x64xbf16> to vector<32x64xbf16>
    %cst_91 = arith.constant dense<0.000000e+00> : vector<256x64xf32>
    %116 = tpu.matmul %113, %115, %cst_91 {dimension_numbers = #tpu.dot_dimension_numbers<[1], [0], [0], [1], [0, 0, 1, 1], [], []>} : vector<256x32xbf16>, vector<32x64xbf16>, vector<256x64xf32> -> vector<256x64xf32>
    %117 = arith.addf %110, %116 : vector<256x64xf32>
    %c2_92 = arith.constant 2 : index
    %c2_93 = arith.constant 2 : index
    %c0_94 = arith.constant 0 : index
    %118 = vector.load %arg17[%c2_92, %c2_93, %c0_94] : memref<18x18x32xf32, #tpu.memory_space<vmem>>, vector<16x16x32xf32>
    %119 = vector.shape_cast %118 : vector<16x16x32xf32> to vector<256x32xf32>
    %120 = arith.truncf %119 : vector<256x32xf32> to vector<256x32xbf16>
    %c8 = arith.constant 8 : index
    %c0_95 = arith.constant 0 : index
    %c0_96 = arith.constant 0 : index
    %121 = vector.load %arg6[%c8, %c0_95, %c0_96] : memref<9x32x64xbf16, #tpu.memory_space<vmem>>, vector<1x32x64xbf16>
    %122 = vector.shape_cast %121 : vector<1x32x64xbf16> to vector<32x64xbf16>
    %cst_97 = arith.constant dense<0.000000e+00> : vector<256x64xf32>
    %123 = tpu.matmul %120, %122, %cst_97 {dimension_numbers = #tpu.dot_dimension_numbers<[1], [0], [0], [1], [0, 0, 1, 1], [], []>} : vector<256x32xbf16>, vector<32x64xbf16>, vector<256x64xf32> -> vector<256x64xf32>
    %124 = arith.addf %117, %123 : vector<256x64xf32>
    %125 = vector.broadcast %52 : vector<1x64xf32> to vector<256x64xf32>
    %126 = arith.addf %124, %125 : vector<256x64xf32>
    %c0_98 = arith.constant 0 : index
    %c0_99 = arith.constant 0 : index
    %127 = vector.load %arg8[%c0_98, %c0_99] : memref<1x64xf32, #tpu.memory_space<vmem>>, vector<1x64xf32>
    %c0_100 = arith.constant 0 : index
    %c0_101 = arith.constant 0 : index
    %128 = vector.load %arg9[%c0_100, %c0_101] : memref<1x64xf32, #tpu.memory_space<vmem>>, vector<1x64xf32>
    %c0_102 = arith.constant 0 : index
    %c0_103 = arith.constant 0 : index
    %129 = vector.load %arg10[%c0_102, %c0_103] : memref<64x32xf32, #tpu.memory_space<vmem>>, vector<64x32xf32>
    %c0_104 = arith.constant 0 : index
    %c0_105 = arith.constant 0 : index
    %130 = vector.load %arg11[%c0_104, %c0_105] : memref<32x64xf32, #tpu.memory_space<vmem>>, vector<32x64xf32>
    %cst_106 = arith.constant 0.000000e+00 : f32
    %131 = vector.broadcast %cst_106 : f32 to vector<1x64xf32>
    %cst_107 = arith.constant 0.000000e+00 : f32
    %132 = vector.broadcast %cst_107 : f32 to vector<1x64xf32>
    %133 = vector.extract_strided_slice %126 {offsets = [0, 0], sizes = [128, 64], strides = [1, 1]} : vector<256x64xf32> to vector<128x64xf32>
    %cst_108 = arith.constant dense<0.000000e+00> : vector<64xf32>
    %134 = vector.multi_reduction <add>, %133, %cst_108 [0] : vector<128x64xf32> to vector<64xf32>
    %135 = vector.shape_cast %134 : vector<64xf32> to vector<1x64xf32>
    %136 = arith.addf %131, %135 : vector<1x64xf32>
    %137 = arith.mulf %133, %133 : vector<128x64xf32>
    %cst_109 = arith.constant dense<0.000000e+00> : vector<64xf32>
    %138 = vector.multi_reduction <add>, %137, %cst_109 [0] : vector<128x64xf32> to vector<64xf32>
    %139 = vector.shape_cast %138 : vector<64xf32> to vector<1x64xf32>
    %140 = arith.addf %132, %139 : vector<1x64xf32>
    %141 = vector.extract_strided_slice %126 {offsets = [128, 0], sizes = [128, 64], strides = [1, 1]} : vector<256x64xf32> to vector<128x64xf32>
    %cst_110 = arith.constant dense<0.000000e+00> : vector<64xf32>
    %142 = vector.multi_reduction <add>, %141, %cst_110 [0] : vector<128x64xf32> to vector<64xf32>
    %143 = vector.shape_cast %142 : vector<64xf32> to vector<1x64xf32>
    %144 = arith.addf %136, %143 : vector<1x64xf32>
    %145 = arith.mulf %141, %141 : vector<128x64xf32>
    %cst_111 = arith.constant dense<0.000000e+00> : vector<64xf32>
    %146 = vector.multi_reduction <add>, %145, %cst_111 [0] : vector<128x64xf32> to vector<64xf32>
    %147 = vector.shape_cast %146 : vector<64xf32> to vector<1x64xf32>
    %148 = arith.addf %140, %147 : vector<1x64xf32>
    %cst_112 = arith.constant dense<0.000000e+00> : vector<1x32xf32>
    %149 = tpu.matmul %144, %129, %cst_112 {dimension_numbers = #tpu.dot_dimension_numbers<[1], [0], [0], [1], [0, 0, 1, 1], [], []>, precision = #tpu.contract_precision<fp32>} : vector<1x64xf32>, vector<64x32xf32>, vector<1x32xf32> -> vector<1x32xf32>
    %cst_113 = arith.constant dense<0.000000e+00> : vector<1x32xf32>
    %150 = tpu.matmul %148, %129, %cst_113 {dimension_numbers = #tpu.dot_dimension_numbers<[1], [0], [0], [1], [0, 0, 1, 1], [], []>, precision = #tpu.contract_precision<fp32>} : vector<1x64xf32>, vector<64x32xf32>, vector<1x32xf32> -> vector<1x32xf32>
    %cst_114 = arith.constant 5.120000e+02 : f32
    %151 = vector.broadcast %cst_114 : f32 to vector<1x32xf32>
    %152 = arith.divf %149, %151 : vector<1x32xf32>
    %cst_115 = arith.constant 5.120000e+02 : f32
    %153 = vector.broadcast %cst_115 : f32 to vector<1x32xf32>
    %154 = arith.divf %150, %153 : vector<1x32xf32>
    %155 = arith.mulf %152, %152 : vector<1x32xf32>
    %156 = arith.subf %154, %155 : vector<1x32xf32>
    %cst_116 = arith.constant 9.99999974E-6 : f32
    %157 = vector.broadcast %cst_116 : f32 to vector<1x32xf32>
    %158 = arith.addf %156, %157 : vector<1x32xf32>
    %159 = math.rsqrt %158 : vector<1x32xf32>
    %cst_117 = arith.constant dense<0.000000e+00> : vector<1x64xf32>
    %160 = tpu.matmul %152, %130, %cst_117 {dimension_numbers = #tpu.dot_dimension_numbers<[1], [0], [0], [1], [0, 0, 1, 1], [], []>, precision = #tpu.contract_precision<fp32>} : vector<1x32xf32>, vector<32x64xf32>, vector<1x64xf32> -> vector<1x64xf32>
    %cst_118 = arith.constant dense<0.000000e+00> : vector<1x64xf32>
    %161 = tpu.matmul %159, %130, %cst_118 {dimension_numbers = #tpu.dot_dimension_numbers<[1], [0], [0], [1], [0, 0, 1, 1], [], []>, precision = #tpu.contract_precision<fp32>} : vector<1x32xf32>, vector<32x64xf32>, vector<1x64xf32> -> vector<1x64xf32>
    %162 = vector.broadcast %160 : vector<1x64xf32> to vector<256x64xf32>
    %163 = arith.subf %126, %162 : vector<256x64xf32>
    %164 = vector.broadcast %161 : vector<1x64xf32> to vector<256x64xf32>
    %165 = arith.mulf %163, %164 : vector<256x64xf32>
    %166 = vector.broadcast %127 : vector<1x64xf32> to vector<256x64xf32>
    %167 = arith.mulf %165, %166 : vector<256x64xf32>
    %168 = vector.broadcast %128 : vector<1x64xf32> to vector<256x64xf32>
    %169 = arith.addf %167, %168 : vector<256x64xf32>
    %170 = arith.negf %169 : vector<256x64xf32>
    %171 = math.exp %170 : vector<256x64xf32>
    %cst_119 = arith.constant 1.000000e+00 : f32
    %172 = vector.broadcast %cst_119 : f32 to vector<256x64xf32>
    %173 = arith.addf %172, %171 : vector<256x64xf32>
    %174 = arith.divf %172, %173 : vector<256x64xf32>
    %175 = arith.mulf %169, %174 : vector<256x64xf32>
    %c0_120 = arith.constant 0 : index
    %c0_121 = arith.constant 0 : index
    %176 = vector.load %arg13[%c0_120, %c0_121] : memref<1x64xf32, #tpu.memory_space<vmem>>, vector<1x64xf32>
    %cst_122 = arith.constant 0.000000e+00 : f32
    %177 = vector.broadcast %cst_122 : f32 to vector<1x18x64xf32>
    %cst_123 = arith.constant 0.000000e+00 : f32
    %178 = vector.broadcast %cst_123 : f32 to vector<18x1x64xf32>
    %c0_124 = arith.constant 0 : index
    %c0_125 = arith.constant 0 : index
    %c0_126 = arith.constant 0 : index
    %179 = vector.load %arg18[%c0_124, %c0_125, %c0_126] : memref<18x18x64xf32, #tpu.memory_space<vmem>>, vector<1x18x64xf32>
    tpu.vector_store %arg18[%c0_124, %c0_125, %c0_126], %177 {strides = array<i32>} : memref<18x18x64xf32, #tpu.memory_space<vmem>>, vector<1x18x64xf32>,
    %c17_127 = arith.constant 17 : index
    %c0_128 = arith.constant 0 : index
    %c0_129 = arith.constant 0 : index
    %180 = vector.load %arg18[%c17_127, %c0_128, %c0_129] : memref<18x18x64xf32, #tpu.memory_space<vmem>>, vector<1x18x64xf32>
    tpu.vector_store %arg18[%c17_127, %c0_128, %c0_129], %177 {strides = array<i32>} : memref<18x18x64xf32, #tpu.memory_space<vmem>>, vector<1x18x64xf32>,
    %c0_130 = arith.constant 0 : index
    %c0_131 = arith.constant 0 : index
    %c0_132 = arith.constant 0 : index
    %181 = vector.load %arg18[%c0_130, %c0_131, %c0_132] : memref<18x18x64xf32, #tpu.memory_space<vmem>>, vector<18x1x64xf32>
    tpu.vector_store %arg18[%c0_130, %c0_131, %c0_132], %178 {strides = array<i32>} : memref<18x18x64xf32, #tpu.memory_space<vmem>>, vector<18x1x64xf32>,
    %c0_133 = arith.constant 0 : index
    %c17_134 = arith.constant 17 : index
    %c0_135 = arith.constant 0 : index
    %182 = vector.load %arg18[%c0_133, %c17_134, %c0_135] : memref<18x18x64xf32, #tpu.memory_space<vmem>>, vector<18x1x64xf32>
    tpu.vector_store %arg18[%c0_133, %c17_134, %c0_135], %178 {strides = array<i32>} : memref<18x18x64xf32, #tpu.memory_space<vmem>>, vector<18x1x64xf32>,
    %183 = vector.shape_cast %175 : vector<256x64xf32> to vector<16x16x64xf32>
    %c1_136 = arith.constant 1 : index
    %c1_137 = arith.constant 1 : index
    %c0_138 = arith.constant 0 : index
    %184 = vector.load %arg18[%c1_136, %c1_137, %c0_138] : memref<18x18x64xf32, #tpu.memory_space<vmem>>, vector<16x16x64xf32>
    tpu.vector_store %arg18[%c1_136, %c1_137, %c0_138], %183 {strides = array<i32>} : memref<18x18x64xf32, #tpu.memory_space<vmem>>, vector<16x16x64xf32>,
    %cst_139 = arith.constant 0.000000e+00 : f32
    %185 = vector.broadcast %cst_139 : f32 to vector<256x64xf32>
    %c0_140 = arith.constant 0 : index
    %c0_141 = arith.constant 0 : index
    %c0_142 = arith.constant 0 : index
    %186 = vector.load %arg18[%c0_140, %c0_141, %c0_142] : memref<18x18x64xf32, #tpu.memory_space<vmem>>, vector<16x16x64xf32>
    %187 = vector.shape_cast %186 : vector<16x16x64xf32> to vector<256x64xf32>
    %188 = arith.truncf %187 : vector<256x64xf32> to vector<256x64xbf16>
    %c0_143 = arith.constant 0 : index
    %c0_144 = arith.constant 0 : index
    %c0_145 = arith.constant 0 : index
    %189 = vector.load %arg12[%c0_143, %c0_144, %c0_145] : memref<9x64x64xbf16, #tpu.memory_space<vmem>>, vector<1x64x64xbf16>
    %190 = vector.shape_cast %189 : vector<1x64x64xbf16> to vector<64x64xbf16>
    %cst_146 = arith.constant dense<0.000000e+00> : vector<256x64xf32>
    %191 = tpu.matmul %188, %190, %cst_146 {dimension_numbers = #tpu.dot_dimension_numbers<[1], [0], [0], [1], [0, 0, 1, 1], [], []>} : vector<256x64xbf16>, vector<64x64xbf16>, vector<256x64xf32> -> vector<256x64xf32>
    %192 = arith.addf %185, %191 : vector<256x64xf32>
    %c0_147 = arith.constant 0 : index
    %c1_148 = arith.constant 1 : index
    %c0_149 = arith.constant 0 : index
    %193 = vector.load %arg18[%c0_147, %c1_148, %c0_149] : memref<18x18x64xf32, #tpu.memory_space<vmem>>, vector<16x16x64xf32>
    %194 = vector.shape_cast %193 : vector<16x16x64xf32> to vector<256x64xf32>
    %195 = arith.truncf %194 : vector<256x64xf32> to vector<256x64xbf16>
    %c1_150 = arith.constant 1 : index
    %c0_151 = arith.constant 0 : index
    %c0_152 = arith.constant 0 : index
    %196 = vector.load %arg12[%c1_150, %c0_151, %c0_152] : memref<9x64x64xbf16, #tpu.memory_space<vmem>>, vector<1x64x64xbf16>
    %197 = vector.shape_cast %196 : vector<1x64x64xbf16> to vector<64x64xbf16>
    %cst_153 = arith.constant dense<0.000000e+00> : vector<256x64xf32>
    %198 = tpu.matmul %195, %197, %cst_153 {dimension_numbers = #tpu.dot_dimension_numbers<[1], [0], [0], [1], [0, 0, 1, 1], [], []>} : vector<256x64xbf16>, vector<64x64xbf16>, vector<256x64xf32> -> vector<256x64xf32>
    %199 = arith.addf %192, %198 : vector<256x64xf32>
    %c0_154 = arith.constant 0 : index
    %c2_155 = arith.constant 2 : index
    %c0_156 = arith.constant 0 : index
    %200 = vector.load %arg18[%c0_154, %c2_155, %c0_156] : memref<18x18x64xf32, #tpu.memory_space<vmem>>, vector<16x16x64xf32>
    %201 = vector.shape_cast %200 : vector<16x16x64xf32> to vector<256x64xf32>
    %202 = arith.truncf %201 : vector<256x64xf32> to vector<256x64xbf16>
    %c2_157 = arith.constant 2 : index
    %c0_158 = arith.constant 0 : index
    %c0_159 = arith.constant 0 : index
    %203 = vector.load %arg12[%c2_157, %c0_158, %c0_159] : memref<9x64x64xbf16, #tpu.memory_space<vmem>>, vector<1x64x64xbf16>
    %204 = vector.shape_cast %203 : vector<1x64x64xbf16> to vector<64x64xbf16>
    %cst_160 = arith.constant dense<0.000000e+00> : vector<256x64xf32>
    %205 = tpu.matmul %202, %204, %cst_160 {dimension_numbers = #tpu.dot_dimension_numbers<[1], [0], [0], [1], [0, 0, 1, 1], [], []>} : vector<256x64xbf16>, vector<64x64xbf16>, vector<256x64xf32> -> vector<256x64xf32>
    %206 = arith.addf %199, %205 : vector<256x64xf32>
    %c1_161 = arith.constant 1 : index
    %c0_162 = arith.constant 0 : index
    %c0_163 = arith.constant 0 : index
    %207 = vector.load %arg18[%c1_161, %c0_162, %c0_163] : memref<18x18x64xf32, #tpu.memory_space<vmem>>, vector<16x16x64xf32>
    %208 = vector.shape_cast %207 : vector<16x16x64xf32> to vector<256x64xf32>
    %209 = arith.truncf %208 : vector<256x64xf32> to vector<256x64xbf16>
    %c3_164 = arith.constant 3 : index
    %c0_165 = arith.constant 0 : index
    %c0_166 = arith.constant 0 : index
    %210 = vector.load %arg12[%c3_164, %c0_165, %c0_166] : memref<9x64x64xbf16, #tpu.memory_space<vmem>>, vector<1x64x64xbf16>
    %211 = vector.shape_cast %210 : vector<1x64x64xbf16> to vector<64x64xbf16>
    %cst_167 = arith.constant dense<0.000000e+00> : vector<256x64xf32>
    %212 = tpu.matmul %209, %211, %cst_167 {dimension_numbers = #tpu.dot_dimension_numbers<[1], [0], [0], [1], [0, 0, 1, 1], [], []>} : vector<256x64xbf16>, vector<64x64xbf16>, vector<256x64xf32> -> vector<256x64xf32>
    %213 = arith.addf %206, %212 : vector<256x64xf32>
    %c1_168 = arith.constant 1 : index
    %c1_169 = arith.constant 1 : index
    %c0_170 = arith.constant 0 : index
    %214 = vector.load %arg18[%c1_168, %c1_169, %c0_170] : memref<18x18x64xf32, #tpu.memory_space<vmem>>, vector<16x16x64xf32>
    %215 = vector.shape_cast %214 : vector<16x16x64xf32> to vector<256x64xf32>
    %216 = arith.truncf %215 : vector<256x64xf32> to vector<256x64xbf16>
    %c4_171 = arith.constant 4 : index
    %c0_172 = arith.constant 0 : index
    %c0_173 = arith.constant 0 : index
    %217 = vector.load %arg12[%c4_171, %c0_172, %c0_173] : memref<9x64x64xbf16, #tpu.memory_space<vmem>>, vector<1x64x64xbf16>
    %218 = vector.shape_cast %217 : vector<1x64x64xbf16> to vector<64x64xbf16>
    %cst_174 = arith.constant dense<0.000000e+00> : vector<256x64xf32>
    %219 = tpu.matmul %216, %218, %cst_174 {dimension_numbers = #tpu.dot_dimension_numbers<[1], [0], [0], [1], [0, 0, 1, 1], [], []>} : vector<256x64xbf16>, vector<64x64xbf16>, vector<256x64xf32> -> vector<256x64xf32>
    %220 = arith.addf %213, %219 : vector<256x64xf32>
    %c1_175 = arith.constant 1 : index
    %c2_176 = arith.constant 2 : index
    %c0_177 = arith.constant 0 : index
    %221 = vector.load %arg18[%c1_175, %c2_176, %c0_177] : memref<18x18x64xf32, #tpu.memory_space<vmem>>, vector<16x16x64xf32>
    %222 = vector.shape_cast %221 : vector<16x16x64xf32> to vector<256x64xf32>
    %223 = arith.truncf %222 : vector<256x64xf32> to vector<256x64xbf16>
    %c5_178 = arith.constant 5 : index
    %c0_179 = arith.constant 0 : index
    %c0_180 = arith.constant 0 : index
    %224 = vector.load %arg12[%c5_178, %c0_179, %c0_180] : memref<9x64x64xbf16, #tpu.memory_space<vmem>>, vector<1x64x64xbf16>
    %225 = vector.shape_cast %224 : vector<1x64x64xbf16> to vector<64x64xbf16>
    %cst_181 = arith.constant dense<0.000000e+00> : vector<256x64xf32>
    %226 = tpu.matmul %223, %225, %cst_181 {dimension_numbers = #tpu.dot_dimension_numbers<[1], [0], [0], [1], [0, 0, 1, 1], [], []>} : vector<256x64xbf16>, vector<64x64xbf16>, vector<256x64xf32> -> vector<256x64xf32>
    %227 = arith.addf %220, %226 : vector<256x64xf32>
    %c2_182 = arith.constant 2 : index
    %c0_183 = arith.constant 0 : index
    %c0_184 = arith.constant 0 : index
    %228 = vector.load %arg18[%c2_182, %c0_183, %c0_184] : memref<18x18x64xf32, #tpu.memory_space<vmem>>, vector<16x16x64xf32>
    %229 = vector.shape_cast %228 : vector<16x16x64xf32> to vector<256x64xf32>
    %230 = arith.truncf %229 : vector<256x64xf32> to vector<256x64xbf16>
    %c6_185 = arith.constant 6 : index
    %c0_186 = arith.constant 0 : index
    %c0_187 = arith.constant 0 : index
    %231 = vector.load %arg12[%c6_185, %c0_186, %c0_187] : memref<9x64x64xbf16, #tpu.memory_space<vmem>>, vector<1x64x64xbf16>
    %232 = vector.shape_cast %231 : vector<1x64x64xbf16> to vector<64x64xbf16>
    %cst_188 = arith.constant dense<0.000000e+00> : vector<256x64xf32>
    %233 = tpu.matmul %230, %232, %cst_188 {dimension_numbers = #tpu.dot_dimension_numbers<[1], [0], [0], [1], [0, 0, 1, 1], [], []>} : vector<256x64xbf16>, vector<64x64xbf16>, vector<256x64xf32> -> vector<256x64xf32>
    %234 = arith.addf %227, %233 : vector<256x64xf32>
    %c2_189 = arith.constant 2 : index
    %c1_190 = arith.constant 1 : index
    %c0_191 = arith.constant 0 : index
    %235 = vector.load %arg18[%c2_189, %c1_190, %c0_191] : memref<18x18x64xf32, #tpu.memory_space<vmem>>, vector<16x16x64xf32>
    %236 = vector.shape_cast %235 : vector<16x16x64xf32> to vector<256x64xf32>
    %237 = arith.truncf %236 : vector<256x64xf32> to vector<256x64xbf16>
    %c7_192 = arith.constant 7 : index
    %c0_193 = arith.constant 0 : index
    %c0_194 = arith.constant 0 : index
    %238 = vector.load %arg12[%c7_192, %c0_193, %c0_194] : memref<9x64x64xbf16, #tpu.memory_space<vmem>>, vector<1x64x64xbf16>
    %239 = vector.shape_cast %238 : vector<1x64x64xbf16> to vector<64x64xbf16>
    %cst_195 = arith.constant dense<0.000000e+00> : vector<256x64xf32>
    %240 = tpu.matmul %237, %239, %cst_195 {dimension_numbers = #tpu.dot_dimension_numbers<[1], [0], [0], [1], [0, 0, 1, 1], [], []>} : vector<256x64xbf16>, vector<64x64xbf16>, vector<256x64xf32> -> vector<256x64xf32>
    %241 = arith.addf %234, %240 : vector<256x64xf32>
    %c2_196 = arith.constant 2 : index
    %c2_197 = arith.constant 2 : index
    %c0_198 = arith.constant 0 : index
    %242 = vector.load %arg18[%c2_196, %c2_197, %c0_198] : memref<18x18x64xf32, #tpu.memory_space<vmem>>, vector<16x16x64xf32>
    %243 = vector.shape_cast %242 : vector<16x16x64xf32> to vector<256x64xf32>
    %244 = arith.truncf %243 : vector<256x64xf32> to vector<256x64xbf16>
    %c8_199 = arith.constant 8 : index
    %c0_200 = arith.constant 0 : index
    %c0_201 = arith.constant 0 : index
    %245 = vector.load %arg12[%c8_199, %c0_200, %c0_201] : memref<9x64x64xbf16, #tpu.memory_space<vmem>>, vector<1x64x64xbf16>
    %246 = vector.shape_cast %245 : vector<1x64x64xbf16> to vector<64x64xbf16>
    %cst_202 = arith.constant dense<0.000000e+00> : vector<256x64xf32>
    %247 = tpu.matmul %244, %246, %cst_202 {dimension_numbers = #tpu.dot_dimension_numbers<[1], [0], [0], [1], [0, 0, 1, 1], [], []>} : vector<256x64xbf16>, vector<64x64xbf16>, vector<256x64xf32> -> vector<256x64xf32>
    %248 = arith.addf %241, %247 : vector<256x64xf32>
    %249 = vector.broadcast %176 : vector<1x64xf32> to vector<256x64xf32>
    %250 = arith.addf %248, %249 : vector<256x64xf32>
    %c0_203 = arith.constant 0 : index
    %c0_204 = arith.constant 0 : index
    %c0_205 = arith.constant 0 : index
    %c0_206 = arith.constant 0 : index
    %251 = vector.load %arg1[%c0_203, %c0_204, %c0_205, %c0_206] : memref<1x16x16x32xf32, #tpu.memory_space<vmem>>, vector<1x16x16x32xf32>
    %252 = vector.shape_cast %251 : vector<1x16x16x32xf32> to vector<16x16x32xf32>
    %253 = vector.shape_cast %252 : vector<16x16x32xf32> to vector<256x32xf32>
    %254 = arith.truncf %253 : vector<256x32xf32> to vector<256x32xbf16>
    %c0_207 = arith.constant 0 : index
    %c0_208 = arith.constant 0 : index
    %255 = vector.load %arg14[%c0_207, %c0_208] : memref<32x64xbf16, #tpu.memory_space<vmem>>, vector<32x64xbf16>
    %cst_209 = arith.constant dense<0.000000e+00> : vector<256x64xf32>
    %256 = tpu.matmul %254, %255, %cst_209 {dimension_numbers = #tpu.dot_dimension_numbers<[1], [0], [0], [1], [0, 0, 1, 1], [], []>} : vector<256x32xbf16>, vector<32x64xbf16>, vector<256x64xf32> -> vector<256x64xf32>
    %c0_210 = arith.constant 0 : index
    %c0_211 = arith.constant 0 : index
    %257 = vector.load %arg15[%c0_210, %c0_211] : memref<1x64xf32, #tpu.memory_space<vmem>>, vector<1x64xf32>
    %258 = vector.broadcast %257 : vector<1x64xf32> to vector<256x64xf32>
    %259 = arith.addf %256, %258 : vector<256x64xf32>
    %260 = arith.addf %250, %259 : vector<256x64xf32>
    %261 = vector.shape_cast %260 : vector<256x64xf32> to vector<16x16x64xf32>
    %c0_212 = arith.constant 0 : index
    %c0_213 = arith.constant 0 : index
    %c0_214 = arith.constant 0 : index
    %c0_215 = arith.constant 0 : index
    %262 = vector.load %arg16[%c0_212, %c0_213, %c0_214, %c0_215] : memref<1x16x16x64xf32, #tpu.memory_space<vmem>>, vector<1x16x16x64xf32>
    %263 = vector.shape_cast %262 : vector<1x16x16x64xf32> to vector<16x16x64xf32>
    %264 = vector.shape_cast %261 : vector<16x16x64xf32> to vector<1x16x16x64xf32>
    tpu.vector_store %arg16[%c0_212, %c0_213, %c0_214, %c0_215], %264 {strides = array<i32>} : memref<1x16x16x64xf32, #tpu.memory_space<vmem>>, vector<1x16x16x64xf32>,
    return
  }
  func.func @transform_0(%arg0: i32) -> (i32, i32, i32, i32) {
    %c0_i32 = arith.constant 0 : i32
    %c0_i32_0 = arith.constant 0 : i32
    %c0_i32_1 = arith.constant 0 : i32
    %c0_i32_2 = arith.constant 0 : i32
    return %arg0, %c0_i32, %c0_i32_0, %c0_i32_1 : i32, i32, i32, i32
  }
  func.func @transform_1(%arg0: i32) -> (i32, i32) {
    %c0_i32 = arith.constant 0 : i32
    %c0_i32_0 = arith.constant 0 : i32
    %c0_i32_1 = arith.constant 0 : i32
    return %c0_i32, %c0_i32_0 : i32, i32
  }
  func.func @transform_2(%arg0: i32) -> (i32, i32) {
    %c0_i32 = arith.constant 0 : i32
    %c0_i32_0 = arith.constant 0 : i32
    %c0_i32_1 = arith.constant 0 : i32
    return %c0_i32, %c0_i32_0 : i32, i32
  }
  func.func @transform_3(%arg0: i32) -> (i32, i32) {
    %c0_i32 = arith.constant 0 : i32
    %c0_i32_0 = arith.constant 0 : i32
    %c0_i32_1 = arith.constant 0 : i32
    return %c0_i32, %c0_i32_0 : i32, i32
  }
  func.func @transform_4(%arg0: i32) -> (i32, i32) {
    %c0_i32 = arith.constant 0 : i32
    %c0_i32_0 = arith.constant 0 : i32
    %c0_i32_1 = arith.constant 0 : i32
    return %c0_i32, %c0_i32_0 : i32, i32
  }
  func.func @transform_5(%arg0: i32) -> (i32, i32, i32) {
    %c0_i32 = arith.constant 0 : i32
    %c0_i32_0 = arith.constant 0 : i32
    %c0_i32_1 = arith.constant 0 : i32
    %c0_i32_2 = arith.constant 0 : i32
    return %c0_i32, %c0_i32_0, %c0_i32_1 : i32, i32, i32
  }
  func.func @transform_6(%arg0: i32) -> (i32, i32) {
    %c0_i32 = arith.constant 0 : i32
    %c0_i32_0 = arith.constant 0 : i32
    %c0_i32_1 = arith.constant 0 : i32
    return %c0_i32, %c0_i32_0 : i32, i32
  }
  func.func @transform_7(%arg0: i32) -> (i32, i32) {
    %c0_i32 = arith.constant 0 : i32
    %c0_i32_0 = arith.constant 0 : i32
    %c0_i32_1 = arith.constant 0 : i32
    return %c0_i32, %c0_i32_0 : i32, i32
  }
  func.func @transform_8(%arg0: i32) -> (i32, i32) {
    %c0_i32 = arith.constant 0 : i32
    %c0_i32_0 = arith.constant 0 : i32
    %c0_i32_1 = arith.constant 0 : i32
    return %c0_i32, %c0_i32_0 : i32, i32
  }
  func.func @transform_9(%arg0: i32) -> (i32, i32) {
    %c0_i32 = arith.constant 0 : i32
    %c0_i32_0 = arith.constant 0 : i32
    %c0_i32_1 = arith.constant 0 : i32
    return %c0_i32, %c0_i32_0 : i32, i32
  }
  func.func @transform_10(%arg0: i32) -> (i32, i32) {
    %c0_i32 = arith.constant 0 : i32
    %c0_i32_0 = arith.constant 0 : i32
    %c0_i32_1 = arith.constant 0 : i32
    return %c0_i32, %c0_i32_0 : i32, i32
  }
  func.func @transform_11(%arg0: i32) -> (i32, i32, i32) {
    %c0_i32 = arith.constant 0 : i32
    %c0_i32_0 = arith.constant 0 : i32
    %c0_i32_1 = arith.constant 0 : i32
    %c0_i32_2 = arith.constant 0 : i32
    return %c0_i32, %c0_i32_0, %c0_i32_1 : i32, i32, i32
  }
  func.func @transform_12(%arg0: i32) -> (i32, i32) {
    %c0_i32 = arith.constant 0 : i32
    %c0_i32_0 = arith.constant 0 : i32
    %c0_i32_1 = arith.constant 0 : i32
    return %c0_i32, %c0_i32_0 : i32, i32
  }
  func.func @transform_13(%arg0: i32) -> (i32, i32) {
    %c0_i32 = arith.constant 0 : i32
    %c0_i32_0 = arith.constant 0 : i32
    %c0_i32_1 = arith.constant 0 : i32
    return %c0_i32, %c0_i32_0 : i32, i32
  }
  func.func @transform_14(%arg0: i32) -> (i32, i32) {
    %c0_i32 = arith.constant 0 : i32
    %c0_i32_0 = arith.constant 0 : i32
    %c0_i32_1 = arith.constant 0 : i32
    return %c0_i32, %c0_i32_0 : i32, i32
  }
  func.func @transform_15(%arg0: i32) -> (i32, i32, i32, i32) {
    %c0_i32 = arith.constant 0 : i32
    %c0_i32_0 = arith.constant 0 : i32
    %c0_i32_1 = arith.constant 0 : i32
    %c0_i32_2 = arith.constant 0 : i32
    return %arg0, %c0_i32, %c0_i32_0, %c0_i32_1 : i32, i32, i32, i32
  }
}

</mosaic_0001>

<bundles_post_ra>
// kernel: tpu_custom_call.1
= control target key start
LH: loop header
LB: loop body
LE: loop exit
PB: predicated region body
PF: predicated region fallthrough
CT: control target
= control target key end

     0   :  { %s19960_s0 = inlined_call_operand.hbm [shape: f32[2,16,16,32], index: 0, kind: input, shape index: {}]   ;;  %s19961_s1 = inlined_call_operand.vmem [shape: f32[1,32], index: 1, kind: input, shape index: {}]   ;;  %s19962_s2 = inlined_call_operand.hbm [shape: f32[1,32], index: 2, kind: input, shape index: {}]   ;;  %s19963_s3 = inlined_call_operand.vmem [shape: f32[32,32], index: 3, kind: input, shape index: {}]   ;;  %s19964_s4 = inlined_call_operand.vmem [shape: f32[32,32], index: 4, kind: input, shape index: {}]   ;;  %s19965_s5 = inlined_call_operand.hbm [shape: bf16[9,32,64], index: 5, kind: input, shape index: {}]   ;;  %s19966_s6 = inlined_call_operand.hbm [shape: f32[1,64], index: 6, kind: input, shape index: {}]   ;;  %s19967_s7 = inlined_call_operand.hbm [shape: f32[1,64], index: 7, kind: input, shape index: {}]   ;;  %s19968_s8 = inlined_call_operand.hbm [shape: f32[1,64], index: 8, kind: input, shape index: {}]   ;;  %s19969_s9 = inlined_call_operand.vmem [shape: f32[64,32], index: 9, kind: input, shape index: {}]   ;;  %s19970_s10 = inlined_call_operand.vmem [shape: f32[32,64], index: 10, kind: input, shape index: {}]   ;;  %s19971_s11 = inlined_call_operand.hbm [shape: bf16[9,64,64], index: 11, kind: input, shape index: {}]   ;;  %s19972_s12 = inlined_call_operand.hbm [shape: f32[1,64], index: 12, kind: input, shape index: {}]   ;;  %s19973_s13 = inlined_call_operand.vmem [shape: bf16[32,64], index: 13, kind: input, shape index: {}]   ;;  %s19974_s14 = inlined_call_operand.vmem [shape: f32[1,64], index: 14, kind: input, shape index: {}]   ;;  %s19975_s15 = inlined_call_operand.hbm [shape: f32[2,16,16,64], index: 15, kind: output, shape index: {}]  }
   0x1   :  { %20016 = sst [smem:[#allocation32_spill]] %s19960_s0 }
   0x2   :  { %20017 = sst [smem:[#allocation33_spill]] %s19961_s1 }
   0x3   :  { %20018 = sst [smem:[#allocation34_spill]] %s19962_s2 }
   0x4   :  { %20019 = sst [smem:[#allocation35_spill]] %s19963_s3 }
   0x5   :  { %20020 = sst [smem:[#allocation36_spill]] %s19969_s9 }
   0x6   :  { %20021 = sst [smem:[#allocation37_spill]] %s19970_s10 }
   0x7   :  { %20022 = sst [smem:[#allocation38_spill]] %s19973_s13 }
   0x8   :  { %20023 = sst [smem:[#allocation39_spill]] %s19974_s14 }
   0x9   :  { %20024 = sst [smem:[#allocation40_spill]] %s19975_s15 }
   0xa   :  { %20 = vsyncpa [#allocation5], 0 }
   0xb   :  { %22 = vsyncpa [#allocation5 + $0x1], 0 }
   0xc   :  { %23 = vsyncpa [#allocation8], 0 }
   0xd   :  { %24 = vsyncpa [#allocation11], 0 }
   0xe   :  { %25 = vsyncpa [#allocation14], 0 }
   0xf   :  { %26 = vsyncpa [#allocation17], 0 }
  0x10   :  { %27 = vsyncpa [#allocation6], 0 }
  0x11   :  { %29 = vsyncpa [#allocation6 + $0x1], 0  ;;  %s16449_s18 = smov 0   ;;  %s16451_s19 = smov 0  }
  0x12   :  { %s16453_s20 = smov 0   ;;  %s16455_s21 = smov 0  }
  0x13 LB: > { %s16351_s22 = smov [#allocation7]   ;;  %s16470_s24 = sadd.s32 4294967295, %s16349_s21   ;;  %s16349_s21 = sphi %s16455_s21, %s20103_s21   ;;  %s16345_s20 = sphi %s16453_s20, %s20102_s20   ;;  %s16341_s19 = sphi %s16451_s19, %s20101_s19   ;;  %s16337_s18 = sphi %s16449_s18, %s20100_s18  }
  0x14   : > { %s402_s23 = sshll.u32 %s16351_s22, 4  ;;  %p12055_p0 = scmp.ge.s32.totalorder %s16349_s21, 1  ;;  %s16475_s23 = int_to_ptr.vmem [resolvable:$true] %s402_s23 }
  0x15   : > { %p19980_p1 = scmp.eq.s32.totalorder %s16470_s24, 0  ;;  %p386_p2 = scmp.lt.s32.totalorder %s16349_s21, 3 }
  0x16   : > { %s16352_s26 = smov [#allocation10]   ;;  %s16353_s28 = smov [#allocation13]  }
  0x17   : > { %p16477_p3 = pnand %p12055_p0, %p386_p2  ;;  %s432_s27 = sshll.u32 %s16352_s26, 4  ;;  %s16484_s27 = int_to_ptr.vmem [resolvable:$true] %s432_s27 }
  0x18   : > { %s454_s29 = sshll.u32 %s16353_s28, 4  ;;  %s16354_s16 = smov [#allocation9]   ;;  %s16492_s29 = int_to_ptr.vmem [resolvable:$true] %s454_s29 }
  0x19   : > { %s20025_s25 = scalar_select %p16477_p3, 1, 0 }
  0x1a   : > { %p15595_p5 = pneg %p16477_p3  ;;  %s16494_s17 = sshll.u32 %s16354_s16, 4  ;;  %s419_s17 = int_to_ptr.vmem [resolvable:$true] %s16494_s17 }
  0x1b   : > { %s20027_s2 = sld [smem:[#allocation34_spill]] }
  0x1c   : > { %p16488_p6 = pnand %p15595_p5, %p19980_p1 }
  0x1e   : > { %p16504_p8 = pneg %p16488_p6 }
  0x21   : > { %s16041_s14 = scalar_lea.hbm %s20027_s2, 16 }
  0x22   : > { %p16042_p7 = scmp.ne.s32.totalorder %s20027_s2, %s16041_s14  ;;  %p16048_p11 = scmp.lt.u32.totalorder %s16041_s14, %s20027_s2 }
  0x24   : > { %p16044_p9 = pnand %p16504_p8, %p16042_p7 }
  0x26   : > { %p16045_p10 = pneg %p16044_p9 }
  0x28   : > { %p16050_p12 = pnand %p16048_p11, %p16045_p10 }
  0x2a   : > { %16053 = shalt.err (!%p16050_p12)
}
  0x2b   : > { %s16054_s13 = scalar_lea.vmem %s16475_s23, 16  ;;  %s16061_s15 = scalar_lea.vmem %s16475_s23, 32 }
  0x2c   : > { %p16055_p13 = scmp.ne.s32.totalorder %s16475_s23, %s16054_s13  ;;  %p16062_p5 = scmp.lt.s32.totalorder %s16475_s23, %s16475_s23 }
  0x2d   : > { %p16063_p7 = scmp.lt.s32.totalorder %s16061_s15, %s16054_s13 }
  0x2e   : > { %p16057_p0 = pnand %p16055_p13, %p16504_p8 }
  0x2f   : > { %p16064_p9 = por %p16063_p7, %p16062_p5 }
  0x30   : > { %p16058_p2 = pneg %p16057_p0 }
  0x32   : > { %p16065_p4 = pnand %p16064_p9, %p16058_p2 }
  0x34   : > { %16068 = shalt.err (!%p16065_p4)
}
  0x35   : > { %15598 = dma.hbm_to_vmem [thread:$0]  (!%p16488_p6), %s20027_s2, 16, %s16475_s23, [#allocation8]  }
  0x36   : > { %s16069_s16 = scalar_lea.hbm %s19966_s6, 16 }
  0x37   : > { %p16070_p10 = scmp.ne.s32.totalorder %s19966_s6, %s16069_s16  ;;  %p16076_p4 = scmp.lt.u32.totalorder %s16069_s16, %s19966_s6 }
  0x39   : > { %p16072_p11 = pnand %p16070_p10, %p16504_p8 }
  0x3b   : > { %p16073_p12 = pneg %p16072_p11 }
  0x3d   : > { %p16078_p13 = pnand %p16076_p4, %p16073_p12 }
  0x3f   : > { %16081 = shalt.err (!%p16078_p13)
}
  0x40   : > { %s16082_s23 = scalar_lea.vmem %s16484_s27, 16  ;;  %s16089_s1 = scalar_lea.vmem %s16484_s27, 32 }
  0x41   : > { %p16083_p0 = scmp.ne.s32.totalorder %s16484_s27, %s16082_s23  ;;  %p16090_p7 = scmp.lt.s32.totalorder %s16484_s27, %s16484_s27 }
  0x42   : > { %p16091_p9 = scmp.lt.s32.totalorder %s16089_s1, %s16082_s23 }
  0x43   : > { %p16085_p2 = pnand %p16083_p0, %p16504_p8 }
  0x44   : > { %p16092_p10 = por %p16091_p9, %p16090_p7 }
  0x45   : > { %p16086_p5 = pneg %p16085_p2 }
  0x47   : > { %p16093_p11 = pnand %p16092_p10, %p16086_p5 }
  0x49   : > { %16096 = shalt.err (!%p16093_p11)
}
  0x4a   : > { %15604 = dma.hbm_to_vmem [thread:$0]  (!%p16488_p6), %s19966_s6, 16, %s16484_s27, [#allocation11]  }
  0x4b   : > { %s16097_s26 = scalar_lea.hbm %s19968_s8, 16 }
  0x4c   : > { %p16098_p12 = scmp.ne.s32.totalorder %s19968_s8, %s16097_s26  ;;  %p16104_p0 = scmp.lt.u32.totalorder %s16097_s26, %s19968_s8 }
  0x4e   : > { %p16100_p4 = pnand %p16098_p12, %p16504_p8 }
  0x50   : > { %p16101_p13 = pneg %p16100_p4 }
  0x52   : > { %p16106_p2 = pnand %p16104_p0, %p16101_p13 }
  0x54   : > { %16109 = shalt.err (!%p16106_p2)
}
  0x55   : > { %s16110_s27 = scalar_lea.vmem %s16492_s29, 16  ;;  %s16117_s1 = scalar_lea.vmem %s16492_s29, 32 }
  0x56   : > { %p16111_p5 = scmp.ne.s32.totalorder %s16492_s29, %s16110_s27  ;;  %p16118_p10 = scmp.lt.s32.totalorder %s16492_s29, %s16492_s29 }
  0x57   : > { %p16119_p11 = scmp.lt.s32.totalorder %s16117_s1, %s16110_s27 }
  0x58   : > { %p16113_p7 = pnand %p16111_p5, %p16504_p8 }
  0x59   : > { %p16120_p12 = por %p16119_p11, %p16118_p10 }
  0x5a   : > { %p16114_p9 = pneg %p16113_p7 }
  0x5c   : > { %p16121_p4 = pnand %p16120_p12, %p16114_p9 }
  0x5e   : > { %16124 = shalt.err (!%p16121_p4)
}
  0x5f   : > { %15610 = dma.hbm_to_vmem [thread:$0]  (!%p16488_p6), %s19968_s8, 16, %s16492_s29, [#allocation14]  }
  0x60   : > { %s16125_s26 = scalar_lea.hbm %s19965_s5, 2304 }
  0x61   : > { %p16126_p13 = scmp.ne.s32.totalorder %s19965_s5, %s16125_s26  ;;  %p16132_p5 = scmp.lt.u32.totalorder %s16125_s26, %s19965_s5 }
  0x63   : > { %p16128_p0 = pnand %p16126_p13, %p16504_p8 }
  0x65   : > { %p16129_p2 = pneg %p16128_p0 }
  0x67   : > { %p16134_p7 = pnand %p16132_p5, %p16129_p2 }
  0x69   : > { %16137 = shalt.err (!%p16134_p7)
}
  0x6a   : > { %s16138_s27 = scalar_lea.vmem %s419_s17, 2304  ;;  %p16146_p12 = scmp.lt.s32.totalorder %s419_s17, %s419_s17 }
  0x6b   : > { %p16139_p9 = scmp.ne.s32.totalorder %s419_s17, %s16138_s27  ;;  %p16147_p4 = scmp.lt.s32.totalorder %s16138_s27, %s16138_s27 }
  0x6d   : > { %p16141_p10 = pnand %p16139_p9, %p16504_p8  ;;  %p16148_p1 = por %p16147_p4, %p16146_p12 }
  0x6f   : > { %p16142_p11 = pneg %p16141_p10 }
  0x71   : > { %p16149_p3 = pnand %p16148_p1, %p16142_p11 }
  0x73   : > { %16152 = shalt.err (!%p16149_p3)
}
  0x74   : > { %s16355_s29 = smov 64   ;;  %s16356_s1 = smov 4  }
  0x75   : > { %15601 = dma.hbm_to_vmem [thread:$0]  (!%p16488_p6), %s19965_s5, 2304, %s419_s17, [#allocation8], %s16355_s29, %s16355_s29, %s16356_s1  }
  0x76   : > { %s16357_s14 = smov [#allocation12]   ;;  %s16358_s26 = smov [#allocation15]  }
  0x77   : > { %s443_s22 = sshll.u32 %s16357_s14, 4  ;;  %s470_s16 = sshll.u32 %s16358_s26, 4  ;;  %s444_s22 = int_to_ptr.vmem [resolvable:$true] %s443_s22  ;;  %s16596_s16 = int_to_ptr.vmem [resolvable:$true] %s470_s16 }
  0x78   : > { %s16153_s23 = scalar_lea.hbm %s19967_s7, 16 }
  0x79   : > { %p16154_p1 = scmp.ne.s32.totalorder %s19967_s7, %s16153_s23  ;;  %p16160_p0 = scmp.lt.u32.totalorder %s16153_s23, %s19967_s7 }
  0x7b   : > { %p16156_p3 = pnand %p16154_p1, %p16504_p8 }
  0x7d   : > { %p16157_p13 = pneg %p16156_p3 }
  0x7f   : > { %p16162_p2 = pnand %p16160_p0, %p16157_p13 }
  0x81   : > { %16165 = shalt.err (!%p16162_p2)
}
  0x82   : > { %s16166_s10 = scalar_lea.vmem %s444_s22, 16  ;;  %s16173_s14 = scalar_lea.vmem %s444_s22, 32 }
  0x83   : > { %p16167_p5 = scmp.ne.s32.totalorder %s444_s22, %s16166_s10  ;;  %p16174_p10 = scmp.lt.s32.totalorder %s444_s22, %s444_s22 }
  0x84   : > { %p16175_p11 = scmp.lt.s32.totalorder %s16173_s14, %s16166_s10 }
  0x85   : > { %p16169_p7 = pnand %p16167_p5, %p16504_p8 }
  0x86   : > { %p16176_p12 = por %p16175_p11, %p16174_p10 }
  0x87   : > { %p16170_p9 = pneg %p16169_p7 }
  0x89   : > { %p16177_p4 = pnand %p16176_p12, %p16170_p9 }
  0x8b   : > { %16180 = shalt.err (!%p16177_p4)
}
  0x8c   : > { %15607 = dma.hbm_to_vmem [thread:$0]  (!%p16488_p6), %s19967_s7, 16, %s444_s22, [#allocation11]  }
  0x8d   : > { %s16181_s23 = scalar_lea.hbm %s19971_s11, 4608 }
  0x8e   : > { %p16182_p1 = scmp.ne.s32.totalorder %s19971_s11, %s16181_s23  ;;  %p16188_p0 = scmp.lt.u32.totalorder %s16181_s23, %s19971_s11 }
  0x90   : > { %p16184_p3 = pnand %p16182_p1, %p16504_p8 }
  0x92   : > { %p16185_p13 = pneg %p16184_p3 }
  0x94   : > { %p16190_p2 = pnand %p16188_p0, %p16185_p13 }
  0x96   : > { %16193 = shalt.err (!%p16190_p2)
}
  0x97   : > { %s16194_s22 = scalar_lea.vmem %s16596_s16, 4608  ;;  %p16202_p10 = scmp.lt.s32.totalorder %s16596_s16, %s16596_s16 }
  0x98   : > { %p16195_p5 = scmp.ne.s32.totalorder %s16596_s16, %s16194_s22  ;;  %p16203_p11 = scmp.lt.s32.totalorder %s16194_s22, %s16194_s22 }
  0x9a   : > { %p16197_p7 = pnand %p16195_p5, %p16504_p8  ;;  %p16204_p12 = por %p16203_p11, %p16202_p10 }
  0x9c   : > { %p16198_p9 = pneg %p16197_p7 }
  0x9e   : > { %p16205_p4 = pnand %p16204_p12, %p16198_p9 }
  0xa0   : > { %16208 = shalt.err (!%p16205_p4)
}
  0xa1   : > { %15613 = dma.hbm_to_vmem [thread:$0]  (!%p16488_p6), %s19971_s11, 4608, %s16596_s16, [#allocation14], %s16355_s29, %s16355_s29, %s16356_s1  }
  0xa2   : > { %s16359_s26 = smov [#allocation16]   ;;  %s16209_s27 = scalar_lea.hbm %s19972_s12, 16 }
  0xa3   : > { %s484_s13 = sshll.u32 %s16359_s26, 4  ;;  %p16210_p1 = scmp.ne.s32.totalorder %s19972_s12, %s16209_s27  ;;  %s485_s13 = int_to_ptr.vmem [resolvable:$true] %s484_s13 }
  0xa4   : > { %p16216_p0 = scmp.lt.u32.totalorder %s16209_s27, %s19972_s12 }
  0xa5   : > { %p16212_p3 = pnand %p16210_p1, %p16504_p8 }
  0xa7   : > { %p16213_p13 = pneg %p16212_p3 }
  0xa9   : > { %p16218_p2 = pnand %p16216_p0, %p16213_p13 }
  0xab   : > { %16221 = shalt.err (!%p16218_p2)
}
  0xac   : > { %s16222_s29 = scalar_lea.vmem %s485_s13, 16  ;;  %s16229_s1 = scalar_lea.vmem %s485_s13, 32 }
  0xad   : > { %p16223_p5 = scmp.ne.s32.totalorder %s485_s13, %s16222_s29  ;;  %p16230_p10 = scmp.lt.s32.totalorder %s485_s13, %s485_s13 }
  0xae   : > { %p16231_p11 = scmp.lt.s32.totalorder %s16229_s1, %s16222_s29 }
  0xaf   : > { %p16225_p7 = pnand %p16223_p5, %p16504_p8 }
  0xb0   : > { %p16232_p12 = por %p16231_p11, %p16230_p10 }
  0xb1   : > { %p16226_p9 = pneg %p16225_p7 }
  0xb3   : > { %p16233_p4 = pnand %p16232_p12, %p16226_p9 }
  0xb5   : > { %16236 = shalt.err (!%p16233_p4)
}
  0xb6   : > { %15616 = dma.hbm_to_vmem [thread:$0]  (!%p16488_p6), %s19972_s12, 16, %s485_s13, [#allocation17]  }
  0xb7   : > { %s12054_s28 = sadd.s32 4294967294, %s16349_s21   ;;  %s16662_s30 = sadd.s32 1, %s16349_s21  }
  0xb8   : > { %s42_s2 = sadd.s32 1, %s16345_s20  ;;  %s39_s26 = ssub.s32 %s16349_s21, %s16662_s30 }
  0xb9   : > { %p49_p8 = scmp.ne.s32.totalorder %s16345_s20, %s16341_s19  ;;  %p40_p1 = scmp.eq.s32.totalorder %s39_s26, 0 }
  0xba   : > { %p50_p3 = scmp.eq.s32.totalorder %s16349_s21, 0  ;;  %p55_p13 = scmp.ne.s32.totalorder %s16341_s19, %s16337_s18 }
  0xbb   : > { %p373_p0 = scmp.eq.s32.totalorder %s16470_s24, 1  ;;  %p20029_p5 = scmp.eq.s32.totalorder %s16470_s24, 0 }
  0xbc   : > { %s16674_s15 = scalar_select %p40_p1, %s16345_s20, %s42_s2  }
  0xbd   : > { %p51_p2 = por %p50_p3, %p49_p8  ;;  %p16678_p7 = por %p20029_p5, %p55_p13 }
  0xbe   : > { %p16682_p6 = por %p373_p0, %p49_p8  ;;  %p379_p9 = scmp.eq.s32.totalorder %s12054_s28, 1 }
  0xbf   : > { %p15632_p10 = scmp.lt.s32.totalorder %s16349_s21, 2  ;;  %s501_s27 = sand.u32 1, %s16345_s20  }
  0xc0   : > { %s20031_s13 = scalar_select %p16682_p6, 1, 0 }
  0xc1   : > { %p16688_p11 = por %p379_p9, %p55_p13  ;;  %s12064_s17 = sshll.u32 %s501_s27, 8 }
  0xc2   : > { %s12513_s10 = sshll.u32 %s16349_s21, 12  ;;  %s20033_s0 = sld [smem:[#allocation32_spill]] }
  0xc3   : > { %s20032_s9 = scalar_select %p16688_p11, 1, 0 }
  0xc4   : > { %s505_s16 = scalar_lea.vmem [#allocation4], %s12064_s17  ;;  %p16698_p12 = pnand %p15632_p10, %p51_p2 }
  0xc5   : > { %s512_s14 = sshll.u32 %s505_s16, 4  ;;  %s16704_s2 = scalar_lea.sflag [#allocation5], %s501_s27  ;;  %s16702_s14 = int_to_ptr.vmem [resolvable:$true] %s512_s14 }
  0xc6   : > { %p16239_p8 = pneg %p16698_p12 }
  0xc8   : > { %s16696_s1 = scalar_lea.hbm %s20033_s0, %s12513_s10  ;;  %s16242_s22 = scalar_lea.hbm %s20033_s0, 8192 }
  0xc9   : > { %s16237_s26 = scalar_lea.hbm %s16696_s1, 4096  ;;  %p16243_p13 = scmp.lt.u32.totalorder %s16696_s1, %s20033_s0 }
  0xca   : > { %p16238_p4 = scmp.ne.s32.totalorder %s16696_s1, %s16237_s26  ;;  %p16244_p0 = scmp.lt.u32.totalorder %s16242_s22, %s16237_s26 }
  0xcb   : > { %p16246_p5 = scmp.lt.u32.totalorder %s16237_s26, %s16696_s1 }
  0xcc   : > { %p16240_p1 = pnand %p16239_p8, %p16238_p4  ;;  %p16245_p2 = por %p16244_p0, %p16243_p13 }
  0xce   : > { %p16241_p3 = pneg %p16240_p1  ;;  %p16247_p9 = por %p16246_p5, %p16245_p2 }
  0xd0   : > { %p16248_p10 = pnand %p16247_p9, %p16241_p3 }
  0xd2   : > { %16251 = shalt.err (!%p16248_p10)
}
  0xd3   : > { %s16252_s27 = scalar_lea.vmem %s16702_s14, 4096  ;;  %s16360_s17 = smov [#allocation4]  }
  0xd4   : > { %p16253_p4 = scmp.ne.s32.totalorder %s16702_s14, %s16252_s27  ;;  %s16257_s10 = sshll.u32 %s16360_s17, 4  ;;  %s16258_s10 = int_to_ptr.vmem [resolvable:$false] %s16257_s10 }
  0xd5   : > { %s16259_s29 = scalar_lea.vmem %s16258_s10, 8192  ;;  %p16260_p6 = scmp.lt.s32.totalorder %s16702_s14, %s16258_s10 }
  0xd6   : > { %p16255_p1 = pnand %p16253_p4, %p16239_p8  ;;  %p16261_p13 = scmp.lt.s32.totalorder %s16259_s29, %s16252_s27 }
  0xd8   : > { %p16256_p11 = pneg %p16255_p1  ;;  %p16262_p0 = por %p16261_p13, %p16260_p6 }
  0xda   : > { %p16263_p2 = pnand %p16262_p0, %p16256_p11 }
  0xdc   : > { %16266 = shalt.err (!%p16263_p2)
}
  0xdd   : > { %s16361_s26 = smov 128   ;;  %s16362_s22 = smov 8  }
  0xde   : > { %15620 = dma.hbm_to_vmem [thread:$0]  (!%p16698_p12), %s16696_s1, 4096, %s16702_s14, %s16704_s2, %s16361_s26, %s16361_s26, %s16362_s22  }
  0xdf   : > { %p20035_p8 = scmp.ne.s32.totalorder %s20025_s25, 0 }
  0xe1   : > { %524 = sbr.rel (%p20035_p8) target bundleno = 3228 (0xc9c), region = 80 }
  0xe8   : > { %s16735_s16 = sand.u32 1, %s16341_s19  }
  0xe9   : > { %s20000_s27 = sshll.u32 %s16735_s16, 8  ;;  %s527_s17 = scalar_lea.sflag [#allocation5], %s16735_s16 }
  0xea   : > { %s16741_s10 = scalar_lea.vmem [#allocation4], %s20000_s27 }
  0xeb   : > { %16312 = dma.done.wait (%p16678_p7), %s527_s17, 4096  }
  0xec   : > { %16314 = vsyncadd (%p16678_p7), %s527_s17, 4294963200  ;;  %p20036_p6 = scmp.eq.s32.totalorder %s16470_s24, 0 }
  0xee   : > { %16316 = dma.done.wait (%p20036_p6), [#allocation8], 2320   ;;  %p20037_p11 = pmov %p20036_p6 }
  0xef   : > { %p20038_p12 = pmov %p20036_p6 }
  0xf0   : > { %16318 = vsyncadd (%p20037_p11), [#allocation8], 4294964976 }
  0xf1   : > { %16320 = dma.done.wait (%p20038_p12), [#allocation11], 32   ;;  %p20039_p3 = pmov %p20036_p6 }
  0xf3   : > { %16322 = vsyncadd (%p20039_p3), [#allocation11], 4294967264  ;;  %p20040_p5 = pmov %p20039_p3 }
  0xf4   : > { %p20041_p9 = pmov %p20039_p3 }
  0xf5   : > { %16324 = dma.done.wait (%p20040_p5), [#allocation14], 4624  }
  0xf6   : > { %16326 = vsyncadd (%p20041_p9), [#allocation14], 4294962672  ;;  %p20042_p7 = pmov %p20039_p3 }
  0xf7   : > { %p20043_p10 = pmov %p20039_p3 }
  0xf8   : > { %16328 = dma.done.wait (%p20042_p7), [#allocation17], 16  }
  0xf9   : > { %16330 = vsyncadd (%p20043_p10), [#allocation17], 4294967280  ;;  %vm648_vm0 = vcmask 261120   ;;  %v19985_v0 = vmov 0.0|0.0   ;;  %v19983_v1 = vmov 0.0   ;;  %vm16365_vm1 = vmmov 0  }
  0xfa   : > { %14507 = vmatprep.subr.bf16.mxu0 %v19985_v0  ;;  %14543 = vmatprep.subr.bf16.mxu1 %v19985_v0  ;;  %3165 = vst.msk [vmem:[#allocation2] sm:$0xff] %vm648_vm0, %v19983_v1  ;;  %3166 = vst.msk [vmem:[#allocation2 + $0x8] sm:$0xff] %vm648_vm0, %v19983_v1  ;;  %s20044_s3 = sld [smem:[#allocation35_spill]]  ;;  %v16798_v9 = vld [vmem:[%s16741_s10] sm:$0xff]  ;;  %v16801_v10 = vld [vmem:[%s16741_s10 + $0x8] sm:$0xff]  ;;  %vm3167_vm2 = vcmask 254976  }
  0xfb   : > { %3170 = vst.msk [vmem:[#allocation2 + $0x198] sm:$0xff] %vm648_vm0, %v19983_v1  ;;  %3171 = vst.msk [vmem:[#allocation2 + $0x1a0] sm:$0xff] %vm648_vm0, %v19983_v1  ;;  %13171 = vmatprep.mubr.msk.f32.mxu0 %vm16365_vm1, %v19983_v1  ;;  %13237 = vmatprep.mubr.msk.f32.mxu1 %vm16365_vm1, %v19983_v1  ;;  %v16805_v12 = vld [vmem:[%s16741_s10 + $0x10] sm:$0xff]  ;;  %v16808_v13 = vld [vmem:[%s16741_s10 + $0x18] sm:$0xff]  ;;  %v649_v15 = vsel %vm648_vm0, %v16798_v9, 0.0  ;;  %v650_v16 = vsel %vm648_vm0, %v16801_v10, 0.0 }
  0xfc   : > { %v16811_v14 = vld [vmem:[%s16741_s10 + $0x20] sm:$0xff]  ;;  %v16822_v18 = vld [vmem:[%s16741_s10 + $0x28] sm:$0xff]  ;;  %v16825_v19 = vld [vmem:[%s16741_s10 + $0x30] sm:$0xff]  ;;  %v651_v21 = vadd.f32 %v650_v16, %v649_v15  ;;  %v652_v22 = vsel %vm648_vm0, %v16805_v12, 0.0  ;;  %v654_v27 = vsel %vm648_vm0, %v16808_v13, 0.0  ;;  %vm3173_vm3 = vcmask 253952  }
  0xfd   : > { %v16828_v20 = vld [vmem:[%s16741_s10 + $0x38] sm:$0xff]  ;;  %v16839_v24 = vld [vmem:[%s16741_s10 + $0x40] sm:$0xff]  ;;  %v16842_v25 = vld [vmem:[%s16741_s10 + $0x48] sm:$0xff]  ;;  %v656_v28 = vsel %vm648_vm0, %v16811_v14, 0.0  ;;  %v658_v33 = vsel %vm648_vm0, %v16822_v18, 0.0  ;;  %v660_v34 = vsel %vm648_vm0, %v16825_v19, 0.0 }
  0xfe   : > { %v16845_v26 = vld [vmem:[%s16741_s10 + $0x50] sm:$0xff]  ;;  %v16854_v29 = vld [vmem:[%s16741_s10 + $0x58] sm:$0xff]  ;;  %v16857_v30 = vld [vmem:[%s16741_s10 + $0x60] sm:$0xff]  ;;  %v653_v32 = vadd.f32 %v652_v22, %v651_v21  ;;  %v662_v35 = vsel %vm648_vm0, %v16828_v20, 0.0  ;;  %v664_v39 = vsel %vm648_vm0, %v16839_v24, 0.0  ;;  %v16883_v40 = vsel %vm648_vm0, %v16842_v25, 0.0 }
  0xff   : > { %v16860_v31 = vld [vmem:[%s16741_s10 + $0x68] sm:$0xff]  ;;  %v16871_v36 = vld [vmem:[%s16741_s10 + $0x70] sm:$0xff]  ;;  %v16874_v37 = vld [vmem:[%s16741_s10 + $0x78] sm:$0xff]  ;;  %v16887_v41 = vsel %vm648_vm0, %v16845_v26, 0.0  ;;  %v16900_v46 = vsel %vm648_vm0, %v16854_v29, 0.0  ;;  %v16904_v47 = vsel %vm648_vm0, %v16857_v30, 0.0 }
 0x100   : > { %v640_v2 = vld [vmem:[%s20044_s3] sm:$0xff]  ;;  %v16783_v3 = vld [vmem:[%s20044_s3 + $0x8] sm:$0xff]  ;;  %v16788_v4 = vld [vmem:[%s20044_s3 + $0x10] sm:$0xff]  ;;  %v655_v45 = vadd.f32 %v654_v27, %v653_v32  ;;  %v16908_v48 = vsel %vm648_vm0, %v16860_v31, 0.0  ;;  %v16940_v60 = vsel %vm648_vm0, %v16871_v36, 0.0  ;;  %v16944_v61 = vsel %vm648_vm0, %v16874_v37, 0.0 }
 0x101   : > { %v837_v5 = vand.u32 4294901760, %v640_v2  ;;  %v840_v6 = vand.u32 4294901760, %v16783_v3  ;;  %v16794_v7 = vld [vmem:[%s20044_s3 + $0x18] sm:$0xff]  ;;  %v19988_v8 = vand.u32 4294901760, %v16788_v4  ;;  %v16877_v38 = vld [vmem:[%s16741_s10 + $0x80] sm:$0xff]  ;;  %v16890_v42 = vld [vmem:[%s16741_s10 + $0x88] sm:$0xff] }
 0x102   : > { %v19987_v11 = vand.u32 4294901760, %v16794_v7  ;;  %v16893_v43 = vld [vmem:[%s16741_s10 + $0x90] sm:$0xff]  ;;  %v16896_v44 = vld [vmem:[%s16741_s10 + $0x98] sm:$0xff]  ;;  %v16911_v49 = vld [vmem:[%s16741_s10 + $0xa0] sm:$0xff]  ;;  %v741_v52 = vsel %vm648_vm0, %v16877_v38, 0.0  ;;  %v742_v53 = vsel %vm648_vm0, %v16890_v42, 0.0  ;;  %v657_v59 = vadd.f32 %v656_v28, %v655_v45 }
 0x103   : > { %v16819_v17 = vpack.c.bf16 %v840_v6, %v837_v5  ;;  %v16914_v50 = vld [vmem:[%s16741_s10 + $0xa8] sm:$0xff]  ;;  %v16917_v51 = vld [vmem:[%s16741_s10 + $0xb0] sm:$0xff]  ;;  %v744_v54 = vsel %vm648_vm0, %v16893_v43, 0.0  ;;  %v16925_v55 = vsub.f32 %v640_v2, %v837_v5  ;;  %v16930_v56 = vld [vmem:[%s16741_s10 + $0xb8] sm:$0xff]  ;;  %v743_v62 = vadd.f32 %v742_v53, %v741_v52  ;;  %s20064_s22 = sld [smem:[#allocation33_spill]]  ;;  %s20065_s23 = sld [smem:[#allocation36_spill]] }
 0x104   : > { %v16836_v23 = vpack.c.bf16 %v19987_v11, %v19988_v8  ;;  %v16933_v57 = vld [vmem:[%s16741_s10 + $0xc0] sm:$0xff]  ;;  %v16936_v58 = vld [vmem:[%s16741_s10 + $0xc8] sm:$0xff]  ;;  %v16948_v63 = vld [vmem:[%s16741_s10 + $0xd0] sm:$0xff]  ;;  %v746_v15 = vsel %vm648_vm0, %v16896_v44, 0.0  ;;  %v748_v16 = vsel %vm648_vm0, %v16911_v49, 0.0  ;;  %v750_v21 = vsel %vm648_vm0, %v16914_v50, 0.0 }
 0x105   : > { %20045 = vst [vmem:[#allocation25_spill] sm:$0xff] %v16819_v17  ;;  %14509 = vmatpush3.bf16.msra.mxu0 %v16819_v17  ;;  %14545 = vmatpush3.bf16.msra.mxu1 %v16819_v17  ;;  %v16951_v2 = vld [vmem:[%s16741_s10 + $0xd8] sm:$0xff]  ;;  %v16954_v5 = vld [vmem:[%s16741_s10 + $0xe0] sm:$0xff]  ;;  %v16965_v22 = vsub.f32 %v16783_v3, %v840_v6  ;;  %v16969_v27 = vld [vmem:[%s16741_s10 + $0xe8] sm:$0xff]  ;;  %v659_v45 = vadd.f32 %v658_v33, %v657_v59  ;;  %v752_v53 = vsel %vm648_vm0, %v16917_v51, 0.0  ;;  %v754_v1 = vsel %vm648_vm0, %v16930_v56, 0.0 }
 0x106   : > { %20046 = vst [vmem:[#allocation26_spill] sm:$0xff] %v16836_v23  ;;  %14510 = vmatprep.subr.bf16.mxu0 %v19985_v0  ;;  %14546 = vmatprep.subr.bf16.mxu1 %v19985_v0  ;;  %20048 = vst [vmem:[#allocation28_spill] sm:$0xff] %v16969_v27  ;;  %v16972_v28 = vld [vmem:[%s16741_s10 + $0xf0] sm:$0xff]  ;;  %v16975_v32 = vld [vmem:[%s16741_s10 + $0xf8] sm:$0xff]  ;;  %v745_v52 = vadd.f32 %v744_v54, %v743_v62  ;;  %v756_v3 = vsel %vm648_vm0, %v16933_v57, 0.0  ;;  %v758_v6 = vsel %vm648_vm0, %v16936_v58, 0.0 }
 0x107   : > { %20047 = vst [vmem:[#allocation27_spill] sm:$0xff] %v16965_v22  ;;  %20049 = vst [vmem:[#allocation29_spill] sm:$0xff] %v16972_v28  ;;  %v762_v11 = vsel %vm648_vm0, %v16951_v2, 0.0  ;;  %v661_v33 = vadd.f32 %v660_v34, %v659_v45  ;;  %v16991_v59 = vsel %vm648_vm0, %v16954_v5, 0.0  ;;  %v16995_v62 = vsel %vm648_vm0, %v16969_v27, 0.0  ;;  %s20077_s26 = sld [smem:[#allocation37_spill]] }
 0x108   : > { %20050 = vst [vmem:[#allocation30_spill] sm:$0xff] %v16975_v32  ;;  %v747_v54 = vadd.f32 %v746_v15, %v745_v52  ;;  %v16999_v8 = vsel %vm648_vm0, %v16972_v28, 0.0  ;;  %v19996_v17 = vand.u32 4294901760, %v16925_v55  ;;  %v19997_v34 = vand.u32 4294901760, %v16965_v22  ;;  %s20092_s29 = sld [smem:[#allocation38_spill]]  ;;  %s20093_s1 = sld [smem:[#allocation39_spill]] }
 0x109   : > { %14512 = vmatpush3.bf16.msra.mxu0 %v16836_v23  ;;  %14548 = vmatpush3.bf16.msra.mxu1 %v16836_v23  ;;  %v17003_v23 = vsel %vm648_vm0, %v16975_v32, 0.0  ;;  %v663_v15 = vadd.f32 %v662_v35, %v661_v33  ;;  %v687_v52 = vmul.f32 %v16798_v9, %v16798_v9  ;;  %v688_v32 = vmul.f32 %v16801_v10, %v16801_v10  ;;  %s20094_s14 = sshll.u32 %s16735_s16, 8  ;;  %s12514_s28 = sshll.u32 %s16470_s24, 12 }
 0x10a   : > { %14513 = vmatprep.subr.bf16.mxu0 %v19985_v0  ;;  %14549 = vmatprep.subr.bf16.mxu1 %v19985_v0  ;;  %v760_v0 = vsel %vm648_vm0, %v16948_v63, 0.0  ;;  %v749_v45 = vadd.f32 %v748_v16, %v747_v54  ;;  %v17012_v27 = vsub.f32 %v16925_v55, %v19996_v17  ;;  %v17017_v28 = vsub.f32 %v16965_v22, %v19997_v34  ;;  %s19765_s27 = scalar_lea.vmem [#allocation18], %s20094_s14  ;;  %s20095_s25 = sld [smem:[#allocation40_spill]] }
 0x10b   : > { %v689_v35 = vmul.f32 %v16805_v12, %v16805_v12  ;;  %v665_v16 = vadd.f32 %v664_v39, %v663_v15  ;;  %v690_v9 = vmul.f32 %v16808_v13, %v16808_v13  ;;  %v691_v54 = vmul.f32 %v16811_v14, %v16811_v14  ;;  %s11914_s2 = sshll.u32 %s19765_s27, 4  ;;  %p20096_p1 = scmp.ne.s32.totalorder %s20031_s13, 0  ;;  %s19910_s2 = int_to_ptr.vmem [resolvable:$true] %s11914_s2 }
 0x10c   : > { %v751_v33 = vadd.f32 %v750_v21, %v749_v45  ;;  %v920_v17 = vand.u32 4294901760, %v17012_v27  ;;  %v692_v34 = vmul.f32 %v16822_v18, %v16822_v18  ;;  %v693_v22 = vmul.f32 %v16825_v19, %v16825_v19  ;;  %s16366_s14 = smov [#allocation18]  }
 0x10d   : > { %v694_v10 = vmul.f32 %v16828_v20, %v16828_v20  ;;  %v667_v12 = vadd.f32 %v16883_v40, %v665_v16  ;;  %v695_v13 = vmul.f32 %v16839_v24, %v16839_v24  ;;  %v696_v14 = vmul.f32 %v16842_v25, %v16842_v25 }
 0x10e   : > { %v753_v39 = vadd.f32 %v752_v53, %v751_v33  ;;  %v927_v21 = vand.u32 4294901760, %v17017_v28  ;;  %v697_v18 = vmul.f32 %v16845_v26, %v16845_v26  ;;  %v698_v19 = vmul.f32 %v16854_v29, %v16854_v29  ;;  %v20058_v27 = vld [vmem:[#allocation27_spill] sm:$0xff] }
 0x10f   : > { %v703_v15 = vsel %vm648_vm0, %v687_v52, 0.0  ;;  %v669_v20 = vadd.f32 %v16887_v41, %v667_v12  ;;  %v704_v53 = vsel %vm648_vm0, %v688_v32, 0.0  ;;  %v706_v24 = vsel %vm648_vm0, %v689_v35, 0.0 }
 0x110   : > { %v755_v40 = vadd.f32 %v754_v1, %v753_v39  ;;  %v699_v25 = vmul.f32 %v16857_v30, %v16857_v30  ;;  %v700_v45 = vmul.f32 %v16860_v31, %v16860_v31  ;;  %v705_v16 = vadd.f32 %v704_v53, %v703_v15  ;;  %s19908_s24 = scalar_lea.hbm %s20095_s25, %s12514_s28  ;;  %s16271_s28 = sshll.u32 %s16366_s14, 4  ;;  %s16272_s28 = int_to_ptr.vmem [resolvable:$false] %s16271_s28 }
 0x111   : > { %v708_v26 = vsel %vm648_vm0, %v690_v9, 0.0  ;;  %v671_v29 = vadd.f32 %v16900_v46, %v669_v20  ;;  %v710_v52 = vsel %vm648_vm0, %v691_v54, 0.0  ;;  %v712_v1 = vsel %vm648_vm0, %v692_v34, 0.0  ;;  %p16274_p2 = scmp.lt.s32.totalorder %s19910_s2, %s16272_s28 }
 0x112   : > { %v757_v33 = vadd.f32 %v756_v3, %v755_v40  ;;  %v707_v41 = vadd.f32 %v706_v24, %v705_v16  ;;  %v714_v32 = vsel %vm648_vm0, %v693_v22, 0.0  ;;  %v716_v35 = vsel %vm648_vm0, %v694_v10, 0.0 }
 0x113   : > { %v718_v30 = vsel %vm648_vm0, %v695_v13, 0.0  ;;  %v673_v12 = vadd.f32 %v16904_v47, %v671_v29  ;;  %v720_v39 = vsel %vm648_vm0, %v696_v14, 0.0  ;;  %v722_v9 = vsel %vm648_vm0, %v697_v18, 0.0 }
 0x114   : > { %v759_v31 = vadd.f32 %v758_v6, %v757_v33  ;;  %v709_v46 = vadd.f32 %v708_v26, %v707_v41  ;;  %v724_v3 = vsel %vm648_vm0, %v698_v19, 0.0  ;;  %v726_v54 = vsel %vm648_vm0, %v699_v25, 0.0 }
 0x115   : > { %v17065_v34 = vsel %vm648_vm0, %v700_v45, 0.0  ;;  %v675_v22 = vadd.f32 %v16908_v48, %v673_v12  ;;  %v779_v6 = vmul.f32 %v16877_v38, %v16877_v38  ;;  %v780_v18 = vmul.f32 %v16890_v42, %v16890_v42 }
 0x116   : > { %v761_v10 = vadd.f32 %v760_v0, %v759_v31  ;;  %v711_v15 = vadd.f32 %v710_v52, %v709_v46  ;;  %v781_v19 = vmul.f32 %v16893_v43, %v16893_v43  ;;  %v701_v0 = vmul.f32 %v16871_v36, %v16871_v36 }
 0x117   : > { %v677_v13 = vadd.f32 %v16940_v60, %v675_v22  ;;  %v702_v42 = vmul.f32 %v16874_v37, %v16874_v37  ;;  %v795_v53 = vsel %vm648_vm0, %v779_v6, 0.0  ;;  %v785_v37 = vmul.f32 %v16917_v51, %v16917_v51 }
 0x118   : > { %v763_v47 = vadd.f32 %v762_v11, %v761_v10  ;;  %v713_v14 = vadd.f32 %v712_v1, %v711_v15  ;;  %v782_v11 = vmul.f32 %v16896_v44, %v16896_v44  ;;  %v798_v36 = vsel %vm648_vm0, %v781_v19, 0.0 }
 0x119   : > { %v679_v20 = vadd.f32 %v16944_v61, %v677_v13  ;;  %v783_v61 = vmul.f32 %v16911_v49, %v16911_v49  ;;  %v784_v44 = vmul.f32 %v16914_v50, %v16914_v50  ;;  %v786_v16 = vmul.f32 %v16930_v56, %v16930_v56 }
 0x11a   : > { %v765_v40 = vadd.f32 %v16991_v59, %v763_v47  ;;  %v715_v48 = vadd.f32 %v714_v32, %v713_v14  ;;  %v796_v59 = vsel %vm648_vm0, %v780_v18, 0.0  ;;  %v800_v49 = vsel %vm648_vm0, %v782_v11, 0.0 }
 0x11b   : > { %v680_v60 = vrot.slane %v679_v20, 4  ;;  %v787_v33 = vmul.f32 %v16933_v57, %v16933_v57  ;;  %v730_v50 = vsel %vm648_vm0, %v701_v0, 0.0  ;;  %v732_v1 = vsel %vm648_vm0, %v702_v42, 0.0 }
 0x11c   : > { %v767_v38 = vadd.f32 %v16995_v62, %v765_v40  ;;  %v717_v43 = vadd.f32 %v716_v35, %v715_v48  ;;  %v797_v62 = vadd.f32 %v796_v59, %v795_v53  ;;  %v802_v41 = vsel %vm648_vm0, %v783_v61, 0.0  ;;  %v20053_v53 = vld [vmem:[#allocation28_spill] sm:$0xff]  ;;  %v20054_v59 = vld [vmem:[#allocation29_spill] sm:$0xff] }
 0x11d   : > { %v681_v24 = vadd.f32 %v680_v60, %v679_v20  ;;  %v788_v56 = vmul.f32 %v16936_v58, %v16936_v58  ;;  %v804_v57 = vsel %vm648_vm0, %v784_v44, 0.0  ;;  %v806_v12 = vsel %vm648_vm0, %v785_v37, 0.0 }
 0x11e   : > { %v769_v25 = vadd.f32 %v16999_v8, %v767_v38  ;;  %v719_v45 = vadd.f32 %v718_v30, %v717_v43  ;;  %v799_v8 = vadd.f32 %v798_v36, %v797_v62  ;;  %v808_v46 = vsel %vm648_vm0, %v786_v16, 0.0  ;;  %v20055_v62 = vld [vmem:[#allocation30_spill] sm:$0xff] }
 0x11f   : > { %v682_v26 = vrot.slane %v681_v24, 2  ;;  %v810_v22 = vsel %vm648_vm0, %v787_v33, 0.0  ;;  %v790_v15 = vmul.f32 %v16951_v2, %v16951_v2  ;;  %v812_v6 = vsel %vm648_vm0, %v788_v56, 0.0 }
 0x120   : > { %v771_v29 = vadd.f32 %v17003_v23, %v769_v25  ;;  %v721_v52 = vadd.f32 %v720_v39, %v719_v45  ;;  %v801_v35 = vadd.f32 %v800_v49, %v799_v8  ;;  %v789_v23 = vmul.f32 %v16948_v63, %v16948_v63 }
 0x121   : > { %v683_v51 = vadd.f32 %v682_v26, %v681_v24  ;;  %v20051_v18 = vand.u32 4294901760, %v16788_v4  ;;  %v20052_v38 = vand.u32 4294901760, %v16794_v7  ;;  %v792_v43 = vmul.f32 %v20053_v53, %v20053_v53 }
 0x122   : > { %v772_v32 = vrot.slane %v771_v29, 4  ;;  %v723_v30 = vadd.f32 %v722_v9, %v721_v52  ;;  %v803_v39 = vadd.f32 %v802_v41, %v801_v35  ;;  %v791_v9 = vmul.f32 %v16954_v5, %v16954_v5 }
 0x123   : > { %v684_v58 = vrot.slane %v683_v51, 1  ;;  %v814_v14 = vsel %vm648_vm0, %v789_v23, 0.0  ;;  %v17120_v19 = vsub.f32 %v16788_v4, %v20051_v18  ;;  %v816_v5 = vsel %vm648_vm0, %v790_v15, 0.0 }
 0x124   : > { %v773_v31 = vadd.f32 %v772_v32, %v771_v29  ;;  %v725_v10 = vadd.f32 %v724_v3, %v723_v30  ;;  %v805_v63 = vadd.f32 %v804_v57, %v803_v39  ;;  %v17129_v42 = vsub.f32 %v16794_v7, %v20052_v38 }
 0x125   : > { %v685_v40 = vadd.f32 %v684_v58, %v683_v51  ;;  %v932_v60 = vand.u32 4294901760, %v17120_v19  ;;  %v793_v36 = vmul.f32 %v20054_v59, %v20054_v59  ;;  %v794_v45 = vmul.f32 %v20055_v62, %v20055_v62 }
 0x126   : > { %v774_v13 = vrot.slane %v773_v31, 2  ;;  %v727_v47 = vadd.f32 %v726_v54, %v725_v10  ;;  %v807_v20 = vadd.f32 %v806_v12, %v805_v63  ;;  %v818_v54 = vsel %vm648_vm0, %v791_v9, 0.0 }
 0x127   : > { %v939_v37 = vand.u32 4294901760, %v17129_v42  ;;  %v820_v49 = vsel %vm648_vm0, %v792_v43, 0.0  ;;  %v822_v29 = vsel %vm648_vm0, %v793_v36, 0.0  ;;  %v933_v33 = vsub.f32 %v17120_v19, %v932_v60  ;;  %v646_v36 = vld [vmem:[%s19964_s4 + $0x10] sm:$0xff] }
 0x128   : > { %v775_v3 = vadd.f32 %v774_v13, %v773_v31  ;;  %v729_v2 = vadd.f32 %v17065_v34, %v727_v47  ;;  %v809_v48 = vadd.f32 %v808_v46, %v807_v20  ;;  %v14514_v12 = vpack.c.bf16 %v927_v21, %v920_v17 }
 0x129   : > { %v940_v41 = vsub.f32 %v17129_v42, %v939_v37  ;;  %v934_v56 = vand.u32 4294901760, %v933_v33  ;;  %v20056_v58 = vmov 0.0   ;;  %v20057_v13 = vmov 0.0|0.0  }
 0x12a   : > { %v776_v0 = vrot.slane %v775_v3, 1  ;;  %v731_v11 = vadd.f32 %v730_v50, %v729_v2  ;;  %v811_v34 = vadd.f32 %v810_v22, %v809_v48  ;;  %v14520_v17 = vpack.c.bf16 %v20058_v27, %v16925_v55  ;;  %3168 = vst.msk [vmem:[#allocation2 + $0x10] sm:$0x3] %vm3167_vm2, %v20056_v58  ;;  %3172 = vst.msk [vmem:[#allocation2 + $0x1a8] sm:$0x3] %vm3167_vm2, %v20056_v58 }
 0x12b   : > { %v941_v57 = vand.u32 4294901760, %v940_v41  ;;  %v14535_v43 = vpack.c.bf16 %v939_v37, %v932_v60  ;;  %3174 = vst.msk [vmem:[#allocation2] sm:$0x1] %vm3173_vm3, %v20056_v58  ;;  %3175 = vst.msk [vmem:[#allocation2 + $0x18] sm:$0x1] %vm3173_vm3, %v20056_v58  ;;  %vm5985_vm4 = vcmask 523264  }
 0x12c   : > { %v777_v4 = vadd.f32 %v776_v0, %v775_v3  ;;  %v733_v61 = vadd.f32 %v732_v1, %v731_v11  ;;  %v813_v25 = vadd.f32 %v812_v6, %v811_v34  ;;  %v824_v1 = vsel %vm648_vm0, %v794_v45, 0.0  ;;  %3176 = vst.msk [vmem:[#allocation2 + $0x30] sm:$0x1] %vm3173_vm3, %v20056_v58  ;;  %3177 = vst.msk [vmem:[#allocation2 + $0x48] sm:$0x1] %vm3173_vm3, %v20056_v58 }
 0x12d   : > { %v14517_v15 = vpack.c.bf16 %v941_v57, %v934_v56  ;;  %v20061_v11 = vand.u32 4294901760, %v16925_v55  ;;  %v644_v55 = vld [vmem:[%s19964_s4] sm:$0xff]  ;;  %3178 = vst.msk [vmem:[#allocation2 + $0x60] sm:$0x1] %vm3173_vm3, %v20056_v58  ;;  %3179 = vst.msk [vmem:[#allocation2 + $0x78] sm:$0x1] %vm3173_vm3, %v20056_v58 }
 0x12e   : > { %v778_v24 = vadd.f32 %v777_v4, %v685_v40  ;;  %v734_v44 = vrot.slane %v733_v61, 4  ;;  %v815_v16 = vadd.f32 %v814_v14, %v813_v25  ;;  %v14523_v14 = vpack.c.bf16 %v17129_v42, %v17120_v19  ;;  %v20059_v40 = vld [vmem:[#allocation25_spill] sm:$0xff]  ;;  %v645_v19 = vld [vmem:[%s19964_s4 + $0x8] sm:$0xff]  ;;  %3180 = vst.msk [vmem:[#allocation2 + $0x90] sm:$0x1] %vm3173_vm3, %v20056_v58 }
 0x12f   : > { %v1820_v60 = vand.u32 4294901760, %v644_v55  ;;  %v1823_v42 = vand.u32 4294901760, %v645_v19  ;;  %v1826_v25 = vand.u32 4294901760, %v646_v36  ;;  %3181 = vst.msk [vmem:[#allocation2 + $0xa8] sm:$0x1] %vm3173_vm3, %v20056_v58  ;;  %vm8608_vm5 = vcmask 517120  }
 0x130   : > { %v834_v7 = vsel %vm648_vm0, %v778_v24, 0  ;;  %v817_v8 = vadd.f32 %v816_v5, %v815_v16  ;;  %v735_v50 = vadd.f32 %v734_v44, %v733_v61  ;;  %v20060_v5 = vld [vmem:[#allocation26_spill] sm:$0xff]  ;;  %v647_v24 = vld [vmem:[%s19964_s4 + $0x18] sm:$0xff]  ;;  %3182 = vst.msk [vmem:[#allocation2 + $0xc0] sm:$0x1] %vm3173_vm3, %v20056_v58  ;;  %vm8614_vm6 = vcmask 516096  }
 0x131   : > { %v17140_v26 = vand.u32 4294901760, %v834_v7  ;;  %v17229_v34 = vpack.c.bf16 %v1823_v42, %v1820_v60  ;;  %v1900_v61 = vsub.f32 %v644_v55, %v1820_v60  ;;  %v1907_v59 = vsub.f32 %v645_v19, %v1823_v42  ;;  %3183 = vst.msk [vmem:[#allocation2 + $0xd8] sm:$0x1] %vm3173_vm3, %v20056_v58  ;;  %3184 = vst.msk [vmem:[#allocation2 + $0xf0] sm:$0x1] %vm3173_vm3, %v20056_v58 }
 0x132   : > { %v819_v51 = vadd.f32 %v818_v54, %v817_v8  ;;  %v736_v23 = vrot.slane %v735_v50, 2  ;;  %v20062_v54 = vand.u32 4294901760, %v20058_v27  ;;  %v1829_v44 = vand.u32 4294901760, %v647_v24  ;;  %3185 = vst.msk [vmem:[#allocation2 + $0x108] sm:$0x1] %vm3173_vm3, %v20056_v58 }
 0x133   : > { %v906_v52 = vsub.f32 %v834_v7, %v17140_v26  ;;  %v1901_v62 = vand.u32 4294901760, %v1900_v61  ;;  %v1908_v45 = vand.u32 4294901760, %v1907_v59  ;;  %3186 = vst.msk [vmem:[#allocation2 + $0x120] sm:$0x1] %vm3173_vm3, %v20056_v58  ;;  %3187 = vst.msk [vmem:[#allocation2 + $0x138] sm:$0x1] %vm3173_vm3, %v20056_v58  ;;  %v2792_v55 = vlaneseq }
 0x134   : > { %v821_v35 = vadd.f32 %v820_v49, %v819_v51  ;;  %v737_v22 = vadd.f32 %v736_v23, %v735_v50  ;;  %v14532_v38 = vpack.c.bf16 %v20062_v54, %v20061_v11  ;;  %v17241_v37 = vpack.c.bf16 %v1829_v44, %v1826_v25  ;;  %v3295_v11 = vld [vmem:[#allocation2 + $0x1] sm:$0xff]  ;;  %3188 = vst.msk [vmem:[#allocation2 + $0x150] sm:$0x1] %vm3173_vm3, %v20056_v58 }
 0x135   : > { %v907_v32 = vand.u32 4294901760, %v906_v52  ;;  %v1902_v7 = vsub.f32 %v1900_v61, %v1901_v62  ;;  %v1909_v16 = vsub.f32 %v1907_v59, %v1908_v45  ;;  %v1914_v49 = vsub.f32 %v646_v36, %v1826_v25  ;;  %v17316_v54 = vld [vmem:[#allocation9] sm:$0xff]   ;;  %3189 = vst.msk [vmem:[#allocation2 + $0x168] sm:$0x1] %vm3173_vm3, %v20056_v58  ;;  %3190 = vst.msk [vmem:[#allocation2 + $0x180] sm:$0x1] %vm3173_vm3, %v20056_v58 }
 0x136   : > { %v823_v31 = vadd.f32 %v822_v29, %v821_v35  ;;  %v738_v63 = vrot.slane %v737_v22, 1  ;;  %v17243_v29 = vpack.c.bf16 %v1907_v59, %v1900_v61  ;;  %v17251_v23 = vpack.c.bf16 %v1908_v45, %v1901_v62  ;;  %3191 = vst.msk [vmem:[#allocation2 + $0x198] sm:$0x1] %vm3173_vm3, %v20056_v58  ;;  %3192 = vst.msk [vmem:[#allocation2 + $0x11] sm:$0x1] %vm3173_vm3, %v20056_v58  ;;  %v16006_v59 = vld [vmem:[%s16741_s10 + $0x28] sm:$0xff] }
 0x137   : > { %v908_v30 = vsub.f32 %v906_v52, %v907_v32  ;;  %v1903_v33 = vand.u32 4294901760, %v1902_v7  ;;  %v1910_v8 = vand.u32 4294901760, %v1909_v16  ;;  %3193 = vst.msk [vmem:[#allocation2 + $0x29] sm:$0x1] %vm3173_vm3, %v20056_v58  ;;  %3194 = vst.msk [vmem:[#allocation2 + $0x41] sm:$0x1] %vm3173_vm3, %v20056_v58 }
 0x138   : > { %v825_v46 = vadd.f32 %v824_v1, %v823_v31  ;;  %v739_v21 = vadd.f32 %v738_v63, %v737_v22  ;;  %3195 = vst.msk [vmem:[#allocation2 + $0x59] sm:$0x1] %vm3173_vm3, %v20056_v58  ;;  %3196 = vst.msk [vmem:[#allocation2 + $0x71] sm:$0x1] %vm3173_vm3, %v20056_v58  ;;  %v2793_v19 = vshrl.u32 %v2792_v55, 7  ;;  %v16009_v45 = vld [vmem:[%s16741_s10 + $0x40] sm:$0xff] }
 0x139   : > { %v909_v39 = vand.u32 4294901760, %v908_v30  ;;  %v14586_v41 = vpack.c.bf16 %v1910_v8, %v1903_v33  ;;  %3197 = vst.msk [vmem:[#allocation2 + $0x89] sm:$0x1] %vm3173_vm3, %v20056_v58  ;;  %3198 = vst.msk [vmem:[#allocation2 + $0xa1] sm:$0x1] %vm3173_vm3, %v20056_v58  ;;  %v16010_v7 = vld [vmem:[%s16741_s10 + $0x48] sm:$0xff] }
 0x13a   : > { %v826_v10 = vrot.slane %v825_v46, 4  ;;  %3199 = vst.msk [vmem:[#allocation2 + $0xb9] sm:$0x1] %vm3173_vm3, %v20056_v58  ;;  %3200 = vst.msk [vmem:[#allocation2 + $0xd1] sm:$0x1] %vm3173_vm3, %v20056_v58  ;;  %v17392_v60 = vsub.s32 0, %v2793_v19 }
 0x13b   : > { %13172 = vmatmul.mubr.f32.vlgmr.msra.gmra.mrb[0].mxu0 %v909_v39  ;;  %3201 = vst.msk [vmem:[#allocation2 + $0xe9] sm:$0x1] %vm3173_vm3, %v20056_v58  ;;  %3202 = vst.msk [vmem:[#allocation2 + $0x101] sm:$0x1] %vm3173_vm3, %v20056_v58  ;;  %v16013_v8 = vld [vmem:[%s16741_s10 + $0x60] sm:$0xff] }
 0x13c   : > { %14515 = vmatpush3.bf16.msra.mxu0 %v14514_v12  ;;  %13182 = vmatprep.mubr.msk.f32.mxu0 %vm16365_vm1, %v20056_v58  ;;  %v827_v9 = vadd.f32 %v826_v10, %v825_v46  ;;  %3203 = vst.msk [vmem:[#allocation2 + $0x119] sm:$0x1] %vm3173_vm3, %v20056_v58  ;;  %3204 = vst.msk [vmem:[#allocation2 + $0x131] sm:$0x1] %vm3173_vm3, %v20056_v58 }
 0x13d   : > { %14516 = vmatprep.subr.bf16.mxu0 %v20057_v13  ;;  %3205 = vst.msk [vmem:[#allocation2 + $0x149] sm:$0x1] %vm3173_vm3, %v20056_v58  ;;  %3206 = vst.msk [vmem:[#allocation2 + $0x161] sm:$0x1] %vm3173_vm3, %v20056_v58 }
 0x13e   : > { %v828_v47 = vrot.slane %v827_v9, 2  ;;  %3207 = vst.msk [vmem:[#allocation2 + $0x179] sm:$0x1] %vm3173_vm3, %v20056_v58  ;;  %3208 = vst.msk [vmem:[#allocation2 + $0x191] sm:$0x1] %vm3173_vm3, %v20056_v58 }
 0x13f   : > { %3209 = vst.msk [vmem:[#allocation2 + $0x1a9] sm:$0x1] %vm3173_vm3, %v20056_v58  ;;  %20063 = vst [vmem:[#allocation28_spill] sm:$0xff] %v17392_v60 }
 0x140   : > { %14518 = vmatpush3.bf16.msra.mxu0 %v14517_v15  ;;  %v829_v28 = vadd.f32 %v828_v47, %v827_v9  ;;  %8606 = vst.msk [vmem:[#allocation3] sm:$0xff] %vm5985_vm4, %v20056_v58  ;;  %8607 = vst.msk [vmem:[#allocation3 + $0x8] sm:$0xff] %vm5985_vm4, %v20056_v58 }
 0x141   : > { %14519 = vmatprep.subr.bf16.mxu0 %v20057_v13  ;;  %8611 = vst.msk [vmem:[#allocation3 + $0x198] sm:$0xff] %vm5985_vm4, %v20056_v58  ;;  %8612 = vst.msk [vmem:[#allocation3 + $0x1a0] sm:$0xff] %vm5985_vm4, %v20056_v58 }
 0x142   : > { %v830_v6 = vrot.slane %v829_v28, 1  ;;  %8609 = vst.msk [vmem:[#allocation3 + $0x10] sm:$0x3] %vm8608_vm5, %v20056_v58  ;;  %8613 = vst.msk [vmem:[#allocation3 + $0x1a8] sm:$0x3] %vm8608_vm5, %v20056_v58 }
 0x143   : > { %13183 = vmatmul.mubr.f32.vlgmr.msra.gmra.mrb[0].mxu0 %v17140_v26  ;;  %8645 = vst.msk [vmem:[#allocation3 + $0x131] sm:$0x1] %vm8614_vm6, %v20056_v58  ;;  %8615 = vst.msk [vmem:[#allocation3] sm:$0x1] %vm8614_vm6, %v20056_v58 }
 0x144   : > { %14521 = vmatpush3.bf16.msra.mxu0 %v14520_v17  ;;  %13193 = vmatprep.mubr.msk.f32.mxu0 %vm16365_vm1, %v20056_v58  ;;  %v831_v18 = vadd.f32 %v830_v6, %v829_v28  ;;  %8616 = vst.msk [vmem:[#allocation3 + $0x18] sm:$0x1] %vm8614_vm6, %v20056_v58  ;;  %8617 = vst.msk [vmem:[#allocation3 + $0x30] sm:$0x1] %vm8614_vm6, %v20056_v58 }
 0x145   : > { %14522 = vmatprep.subr.bf16.mxu0 %v20057_v13  ;;  %8618 = vst.msk [vmem:[#allocation3 + $0x48] sm:$0x1] %vm8614_vm6, %v20056_v58  ;;  %8619 = vst.msk [vmem:[#allocation3 + $0x60] sm:$0x1] %vm8614_vm6, %v20056_v58 }
 0x146   : > { %v832_v3 = vadd.f32 %v831_v18, %v739_v21  ;;  %8620 = vst.msk [vmem:[#allocation3 + $0x78] sm:$0x1] %vm8614_vm6, %v20056_v58  ;;  %8621 = vst.msk [vmem:[#allocation3 + $0x90] sm:$0x1] %vm8614_vm6, %v20056_v58 }
 0x147   : > { %8622 = vst.msk [vmem:[#allocation3 + $0xa8] sm:$0x1] %vm8614_vm6, %v20056_v58  ;;  %8623 = vst.msk [vmem:[#allocation3 + $0xc0] sm:$0x1] %vm8614_vm6, %v20056_v58 }
 0x148   : > { %14524 = vmatpush3.bf16.msra.mxu0 %v14523_v14  ;;  %v1322_v20 = vsel %vm648_vm0, %v832_v3, 0  ;;  %8624 = vst.msk [vmem:[#allocation3 + $0xd8] sm:$0x1] %vm8614_vm6, %v20056_v58  ;;  %8625 = vst.msk [vmem:[#allocation3 + $0xf0] sm:$0x1] %vm8614_vm6, %v20056_v58 }
 0x149   : > { %14525 = vmatprep.subr.bf16.mxu0 %v20057_v13  ;;  %v1393_v2 = vand.u32 4294901760, %v1322_v20  ;;  %8626 = vst.msk [vmem:[#allocation3 + $0x108] sm:$0x1] %vm8614_vm6, %v20056_v58  ;;  %8627 = vst.msk [vmem:[#allocation3 + $0x120] sm:$0x1] %vm8614_vm6, %v20056_v58 }
 0x14a   : > { %8628 = vst.msk [vmem:[#allocation3 + $0x138] sm:$0x1] %vm8614_vm6, %v20056_v58  ;;  %8629 = vst.msk [vmem:[#allocation3 + $0x150] sm:$0x1] %vm8614_vm6, %v20056_v58 }
 0x14b   : > { %13194 = vmatmul.mubr.f32.vlgmr.msra.gmra.mrb[0].mxu0 %v906_v52  ;;  %v1394_v0 = vsub.f32 %v1322_v20, %v1393_v2  ;;  %v1915_v52 = vand.u32 4294901760, %v1914_v49  ;;  %8630 = vst.msk [vmem:[#allocation3 + $0x168] sm:$0x1] %vm8614_vm6, %v20056_v58  ;;  %8631 = vst.msk [vmem:[#allocation3 + $0x180] sm:$0x1] %vm8614_vm6, %v20056_v58 }
 0x14c   : > { %14527 = vmatpush3.bf16.msra.mxu0 %v20059_v40  ;;  %13204 = vmatprep.mubr.msk.f32.mxu0 %vm16365_vm1, %v20056_v58  ;;  %8632 = vst.msk [vmem:[#allocation3 + $0x198] sm:$0x1] %vm8614_vm6, %v20056_v58  ;;  %8633 = vst.msk [vmem:[#allocation3 + $0x11] sm:$0x1] %vm8614_vm6, %v20056_v58 }
 0x14d   : > { %14528 = vmatprep.subr.bf16.mxu0 %v20057_v13  ;;  %v1395_v48 = vand.u32 4294901760, %v1394_v0  ;;  %v1916_v51 = vsub.f32 %v1914_v49, %v1915_v52  ;;  %8634 = vst.msk [vmem:[#allocation3 + $0x29] sm:$0x1] %vm8614_vm6, %v20056_v58  ;;  %8635 = vst.msk [vmem:[#allocation3 + $0x41] sm:$0x1] %vm8614_vm6, %v20056_v58 }
 0x14e   : > { %8636 = vst.msk [vmem:[#allocation3 + $0x59] sm:$0x1] %vm8614_vm6, %v20056_v58  ;;  %8637 = vst.msk [vmem:[#allocation3 + $0x71] sm:$0x1] %vm8614_vm6, %v20056_v58 }
 0x14f   : > { %v1396_v4 = vsub.f32 %v1394_v0, %v1395_v48  ;;  %v1917_v56 = vand.u32 4294901760, %v1916_v51  ;;  %8638 = vst.msk [vmem:[#allocation3 + $0x89] sm:$0x1] %vm8614_vm6, %v20056_v58  ;;  %8639 = vst.msk [vmem:[#allocation3 + $0xa1] sm:$0x1] %vm8614_vm6, %v20056_v58 }
 0x150   : > { %14530 = vmatpush3.bf16.msra.mxu0 %v20060_v5  ;;  %8640 = vst.msk [vmem:[#allocation3 + $0xb9] sm:$0x1] %vm8614_vm6, %v20056_v58  ;;  %8641 = vst.msk [vmem:[#allocation3 + $0xd1] sm:$0x1] %vm8614_vm6, %v20056_v58 }
 0x151   : > { %14531 = vmatprep.subr.bf16.mxu0 %v20057_v13  ;;  %v1397_v53 = vand.u32 4294901760, %v1396_v4  ;;  %8642 = vst.msk [vmem:[#allocation3 + $0xe9] sm:$0x1] %vm8614_vm6, %v20056_v58  ;;  %8643 = vst.msk [vmem:[#allocation3 + $0x101] sm:$0x1] %vm8614_vm6, %v20056_v58 }
 0x152   : > { %8644 = vst.msk [vmem:[#allocation3 + $0x119] sm:$0x1] %vm8614_vm6, %v20056_v58  ;;  %8646 = vst.msk [vmem:[#allocation3 + $0x149] sm:$0x1] %vm8614_vm6, %v20056_v58 }
 0x153   : > { %13205 = vmatmul.mubr.f32.vlgmr.msra.gmra.mrb[0].mxu0 %v907_v32  ;;  %13238 = vmatmul.mubr.f32.vlgmr.msra.gmra.mrb[0].mxu1 %v1397_v53  ;;  %8647 = vst.msk [vmem:[#allocation3 + $0x161] sm:$0x1] %vm8614_vm6, %v20056_v58  ;;  %8648 = vst.msk [vmem:[#allocation3 + $0x179] sm:$0x1] %vm8614_vm6, %v20056_v58 }
 0x154   : > { %14533 = vmatpush3.bf16.msra.mxu0 %v14532_v38  ;;  %13215 = vmatprep.mubr.msk.f32.mxu0 %vm16365_vm1, %v20056_v58  ;;  %8649 = vst.msk [vmem:[#allocation3 + $0x191] sm:$0x1] %vm8614_vm6, %v20056_v58  ;;  %8650 = vst.msk [vmem:[#allocation3 + $0x1a9] sm:$0x1] %vm8614_vm6, %v20056_v58 }
 0x155   : > { %14534 = vmatprep.subr.bf16.mxu0 %v20057_v13  ;;  %14551 = vmatpush3.bf16.msra.mxu1 %v14514_v12 }
 0x156   : > { %13248 = vmatprep.mubr.msk.f32.mxu1 %vm16365_vm1, %v20056_v58  ;;  %14552 = vmatprep.subr.bf16.mxu1 %v20057_v13 }
 0x158   : > { %14536 = vmatpush3.bf16.msra.mxu0 %v14535_v43 }
 0x159   : > { %14537 = vmatprep.subr.bf16.mxu0 %v20057_v13  ;;  %14554 = vmatpush3.bf16.msra.mxu1 %v14517_v15 }
 0x15a   : > { %14555 = vmatprep.subr.bf16.mxu1 %v20057_v13 }
 0x15b   : > { %13216 = vmatmul.mubr.f32.vlgmr.msra.gmra.mrb[0].mxu0 %v17140_v26 }
 0x15c   : > { %14539 = vmatpush3.bf16.msra.mxu0 %v20059_v40  ;;  %13226 = vmatprep.mubr.msk.f32.mxu0 %vm16365_vm1, %v20056_v58 }
 0x15d   : > { %13249 = vmatmul.mubr.f32.vlgmr.msra.gmra.mrb[0].mxu1 %v1393_v2  ;;  %14540 = vmatprep.subr.bf16.mxu0 %v20057_v13 }
 0x15e   : > { %14557 = vmatpush3.bf16.msra.mxu1 %v14520_v17  ;;  %13259 = vmatprep.mubr.msk.f32.mxu1 %vm16365_vm1, %v20056_v58 }
 0x15f   : > { %14558 = vmatprep.subr.bf16.mxu1 %v20057_v13 }
 0x160   : > { %14542 = vmatpush3.bf16.msra.mxu0 %v20060_v5 }
 0x161   : > { %14579 = vmatprep.subr.bf16.mxu0 %v20057_v13 }
 0x162   : > { %14560 = vmatpush3.bf16.msra.mxu1 %v14523_v14 }
 0x163   : > { %14561 = vmatprep.subr.bf16.mxu1 %v20057_v13  ;;  %13227 = vmatmul.mubr.f32.vlgmr.msra.gmra.mrb[0].mxu0 %v17140_v26  ;;  %v1921_v26 = vsub.f32 %v647_v24, %v1829_v44  ;;  %v16007_v24 = vld [vmem:[%s16741_s10 + $0x30] sm:$0xff]  ;;  %v16008_v44 = vld [vmem:[%s16741_s10 + $0x38] sm:$0xff] }
 0x164   : > { %13303 = vmatprep.mubr.msk.f32.mxu0 %vm16365_vm1, %v20056_v58  ;;  %14581 = vmatpush3.bf16.msra.mxu0 %v17229_v34 }
 0x165   : > { %13260 = vmatmul.mubr.f32.vlgmr.msra.gmra.mrb[0].mxu1 %v1394_v0  ;;  %14582 = vmatprep.subr.bf16.mxu0 %v20057_v13  ;;  %v1922_v50 = vand.u32 4294901760, %v1921_v26  ;;  %v17248_v1 = vpack.c.bf16 %v1921_v26, %v1914_v49  ;;  %v16011_v49 = vld [vmem:[%s16741_s10 + $0x50] sm:$0xff] }
 0x166   : > { %14563 = vmatpush3.bf16.msra.mxu1 %v20059_v40  ;;  %13270 = vmatprep.mubr.msk.f32.mxu1 %vm16365_vm1, %v20056_v58 }
 0x167   : > { %14564 = vmatprep.subr.bf16.mxu1 %v20057_v13  ;;  %v1923_v32 = vsub.f32 %v1921_v26, %v1922_v50  ;;  %v17253_v57 = vpack.c.bf16 %v1922_v50, %v1915_v52  ;;  %v16014_v50 = vld [vmem:[%s16741_s10 + $0x68] sm:$0xff] }
 0x168   : > { %14584 = vmatpush3.bf16.msra.mxu0 %v17241_v37 }
 0x169   : > { %14585 = vmatprep.subr.bf16.mxu0 %v20057_v13  ;;  %v1924_v35 = vand.u32 4294901760, %v1923_v32  ;;  %v16016_v32 = vld [vmem:[%s16741_s10 + $0x78] sm:$0xff] }
 0x16a   : > { %14566 = vmatpush3.bf16.msra.mxu1 %v20060_v5 }
 0x16b   : > { %14567 = vmatprep.subr.bf16.mxu1 %v20057_v13  ;;  %v14589_v30 = vpack.c.bf16 %v1924_v35, %v1917_v56  ;;  %v16017_v35 = vld [vmem:[%s16741_s10 + $0xa0] sm:$0xff] }
 0x16d   : > { %13271 = vmatmul.mubr.f32.vlgmr.msra.gmra.mrb[0].mxu1 %v1395_v48  ;;  %v15689_v48 = vld [vmem:[#allocation9 + $0x10] sm:$0xff]  }
 0x16e   : > { %14569 = vmatpush3.bf16.msra.mxu1 %v14532_v38  ;;  %13281 = vmatprep.mubr.msk.f32.mxu1 %vm16365_vm1, %v20056_v58  ;;  %v3296_v38 = vld [vmem:[#allocation2 + $0x9] sm:$0xff] }
 0x16f   : > { %14570 = vmatprep.subr.bf16.mxu1 %v20057_v13  ;;  %v3327_v4 = vpack.c.bf16 %v3296_v38, %v3295_v11 }
 0x172   : > { %14572 = vmatpush3.bf16.msra.mxu1 %v14535_v43 }
 0x173   : > { %14573 = vmatprep.subr.bf16.mxu1 %v20057_v13 }
 0x175   : > { %13282 = vmatmul.mubr.f32.vlgmr.msra.gmra.mrb[0].mxu1 %v1393_v2 }
 0x176   : > { %14575 = vmatpush3.bf16.msra.mxu1 %v20059_v40  ;;  %13292 = vmatprep.mubr.msk.f32.mxu1 %vm16365_vm1, %v20056_v58 }
 0x177   : > { %14576 = vmatprep.subr.bf16.mxu1 %v20057_v13 }
 0x17a   : > { %14578 = vmatpush3.bf16.msra.mxu1 %v20060_v5  ;;  %v15690_v5 = vld [vmem:[#allocation9 + $0x18] sm:$0xff]  }
 0x17b   : > { %14615 = vmatprep.subr.bf16.mxu1 %v20057_v13 }
 0x17d   : > { %13293 = vmatmul.mubr.f32.vlgmr.msra.gmra.mrb[0].mxu1 %v1393_v2 }
 0x17e   : > { %13369 = vmatprep.mubr.msk.f32.mxu1 %vm16365_vm1, %v20056_v58  ;;  %14617 = vmatpush3.bf16.msra.mxu1 %v17229_v34 }
 0x17f   : > { %14618 = vmatprep.subr.bf16.mxu1 %v20057_v13 }
 0x182   : > { %14620 = vmatpush3.bf16.msra.mxu1 %v17241_v37 }
 0x183   : > { %14621 = vmatprep.subr.bf16.mxu1 %v20057_v13 }
 0x236   : > { %v1317_v12 = vpop.f32.mrb[0].mxu0 }
 0x237   : > { %v1810_v31 = vmul.f32 0.00390625, %v1317_v12  ;;  %v13228_v39 = vpop.f32.mrb[1].mxu0  ;;  %v16019_v12 = vld [vmem:[%s16741_s10 + $0xb0] sm:$0xff] }
 0x238   : > { %v16020_v39 = vld [vmem:[%s16741_s10 + $0xb8] sm:$0xff] }
 0x239   : > { %v1817_v46 = vsel %vm648_vm0, %v1810_v31, 0  ;;  %v1812_v47 = vmul.f32 %v1810_v31, %v1810_v31 }
 0x23a   : > { %v1888_v22 = vand.u32 4294901760, %v1817_v46 }
 0x23c   : > { %v1889_v10 = vsub.f32 %v1817_v46, %v1888_v22 }
 0x23e   : > { %v1890_v15 = vand.u32 4294901760, %v1889_v10 }
 0x240   : > { %v1891_v9 = vsub.f32 %v1889_v10, %v1890_v15 }
 0x242   : > { %v1892_v63 = vand.u32 4294901760, %v1891_v9  ;;  %v16022_v9 = vld [vmem:[%s16741_s10 + $0xc8] sm:$0xff] }
 0x244   : > { %13304 = vmatmul.mubr.f32.vlgmr.msra.gmra.mrb[2].mxu0 %v1892_v63 }
 0x245   : > { %14587 = vmatpush3.bf16.msra.mxu0 %v14586_v41  ;;  %13314 = vmatprep.mubr.msk.f32.mxu0 %vm16365_vm1, %v20056_v58 }
 0x246   : > { %14588 = vmatprep.subr.bf16.mxu0 %v20057_v13 }
 0x249   : > { %14590 = vmatpush3.bf16.msra.mxu0 %v14589_v30 }
 0x24a   : > { %14591 = vmatprep.subr.bf16.mxu0 %v20057_v13 }
 0x24c   : > { %13315 = vmatmul.mubr.f32.vlgmr.msra.gmra.mrb[2].mxu0 %v1888_v22 }
 0x24d   : > { %14593 = vmatpush3.bf16.msra.mxu0 %v17243_v29  ;;  %13325 = vmatprep.mubr.msk.f32.mxu0 %vm16365_vm1, %v20056_v58 }
 0x24e   : > { %14594 = vmatprep.subr.bf16.mxu0 %v20057_v13 }
 0x250   : > { %v1805_v27 = vpop.f32.mrb[0].mxu1 }
 0x251   : > { %v1811_v17 = vmul.f32 0.00390625, %v1805_v27  ;;  %v13294_v28 = vpop.f32.mrb[1].mxu1  ;;  %14596 = vmatpush3.bf16.msra.mxu0 %v17248_v1 }
 0x252   : > { %14597 = vmatprep.subr.bf16.mxu0 %v20057_v13 }
 0x253   : > { %v1813_v21 = vsub.f32 %v1811_v17, %v1812_v47  ;;  %v16023_v47 = vld [vmem:[%s16741_s10 + $0xd0] sm:$0xff]  ;;  %v16024_v17 = vld [vmem:[%s16741_s10 + $0xd8] sm:$0xff] }
 0x254   : > { %13326 = vmatmul.mubr.f32.vlgmr.msra.gmra.mrb[2].mxu0 %v1889_v10 }
 0x255   : > { %v1814_v6 = vadd.f32 1e-05, %v1813_v21  ;;  %14599 = vmatpush3.bf16.msra.mxu0 %v17229_v34  ;;  %13336 = vmatprep.mubr.msk.f32.mxu0 %vm16365_vm1, %v20056_v58 }
 0x256   : > { %14600 = vmatprep.subr.bf16.mxu0 %v20057_v13 }
 0x257   : > { %15745 = vrsqrt.f32 %v1814_v6 }
 0x259   : > { %14602 = vmatpush3.bf16.msra.mxu0 %v17241_v37 }
 0x25a   : > { %14603 = vmatprep.subr.bf16.mxu0 %v20057_v13 }
 0x25c   : > { %13337 = vmatmul.mubr.f32.vlgmr.msra.gmra.mrb[2].mxu0 %v1890_v15 }
 0x25d   : > { %14605 = vmatpush3.bf16.msra.mxu0 %v17251_v23  ;;  %13347 = vmatprep.mubr.msk.f32.mxu0 %vm16365_vm1, %v20056_v58 }
 0x25e   : > { %14606 = vmatprep.subr.bf16.mxu0 %v20057_v13 }
 0x261   : > { %v15746_v14 = vpop.eup %15745  ;;  %14608 = vmatpush3.bf16.msra.mxu0 %v17253_v57 }
 0x262   : > { %v2305_v18 = vsel %vm648_vm0, %v15746_v14, 0  ;;  %14609 = vmatprep.subr.bf16.mxu0 %v20057_v13  ;;  %v16025_v14 = vld [vmem:[%s16741_s10 + $0xe0] sm:$0xff] }
 0x263   : > { %v2376_v3 = vand.u32 4294901760, %v2305_v18 }
 0x264   : > { %13348 = vmatmul.mubr.f32.vlgmr.msra.gmra.mrb[2].mxu0 %v1888_v22 }
 0x265   : > { %v2377_v20 = vsub.f32 %v2305_v18, %v2376_v3  ;;  %14611 = vmatpush3.bf16.msra.mxu0 %v17229_v34  ;;  %13358 = vmatprep.mubr.msk.f32.mxu0 %vm16365_vm1, %v20056_v58 }
 0x266   : > { %14612 = vmatprep.subr.bf16.mxu0 %v20057_v13 }
 0x267   : > { %v2378_v2 = vand.u32 4294901760, %v2377_v20 }
 0x269   : > { %v2379_v40 = vsub.f32 %v2377_v20, %v2378_v2  ;;  %14614 = vmatpush3.bf16.msra.mxu0 %v17241_v37 }
 0x26a   : > { %13427 = vmatprep.subr.bf16.mxu0 %v15689_v48 }
 0x26b   : > { %v2380_v0 = vand.u32 4294901760, %v2379_v40 }
 0x26c   : > { %13359 = vmatmul.mubr.f32.vlgmr.msra.gmra.mrb[2].mxu0 %v1888_v22  ;;  %v16021_v22 = vld [vmem:[%s16741_s10 + $0xc0] sm:$0xff] }
 0x26d   : > { %13370 = vmatmul.mubr.f32.vlgmr.msra.gmra.mrb[2].mxu1 %v2380_v0  ;;  %13428 = vmatpush3.bf16.msra.mxu0 %v15689_v48  ;;  %v16028_v0 = vld [vmem:[%s16741_s10 + $0xf8] sm:$0xff] }
 0x26e   : > { %14623 = vmatpush3.bf16.msra.mxu1 %v14586_v41  ;;  %13380 = vmatprep.mubr.msk.f32.mxu1 %vm16365_vm1, %v20056_v58  ;;  %v16015_v41 = vld [vmem:[%s16741_s10 + $0x70] sm:$0xff] }
 0x26f   : > { %14624 = vmatprep.subr.bf16.mxu1 %v20057_v13  ;;  %13429 = vmatprep.subr.bf16.mxu0 %v15690_v5 }
 0x270   : > { %13431 = vmatprep.mubr.msk.bf16.mxu0 %vm648_vm0, %v3327_v4 }
 0x271   : > { %13430 = vmatpush3.bf16.msra.mxu0 %v15690_v5 }
 0x272   : > { %14626 = vmatpush3.bf16.msra.mxu1 %v14589_v30  ;;  %13463 = vmatprep.subr.bf16.mxu0 %v17316_v54 }
 0x273   : > { %14627 = vmatprep.subr.bf16.mxu1 %v20057_v13 }
 0x275   : > { %13381 = vmatmul.mubr.f32.vlgmr.msra.gmra.mrb[2].mxu1 %v2376_v3 }
 0x276   : > { %14629 = vmatpush3.bf16.msra.mxu1 %v17243_v29  ;;  %13391 = vmatprep.mubr.msk.f32.mxu1 %vm16365_vm1, %v20056_v58  ;;  %v16012_v29 = vld [vmem:[%s16741_s10 + $0x58] sm:$0xff] }
 0x277   : > { %14630 = vmatprep.subr.bf16.mxu1 %v20057_v13 }
 0x27a   : > { %14632 = vmatpush3.bf16.msra.mxu1 %v17248_v1 }
 0x27b   : > { %14633 = vmatprep.subr.bf16.mxu1 %v20057_v13 }
 0x27d   : > { %13392 = vmatmul.mubr.f32.vlgmr.msra.gmra.mrb[2].mxu1 %v2377_v20 }
 0x27e   : > { %14635 = vmatpush3.bf16.msra.mxu1 %v17229_v34  ;;  %13402 = vmatprep.mubr.msk.f32.mxu1 %vm16365_vm1, %v20056_v58 }
 0x27f   : > { %14636 = vmatprep.subr.bf16.mxu1 %v20057_v13 }
 0x282   : > { %14638 = vmatpush3.bf16.msra.mxu1 %v17241_v37 }
 0x283   : > { %14639 = vmatprep.subr.bf16.mxu1 %v20057_v13 }
 0x285   : > { %13403 = vmatmul.mubr.f32.vlgmr.msra.gmra.mrb[2].mxu1 %v2378_v2  ;;  %v16027_v2 = vld [vmem:[%s16741_s10 + $0xf0] sm:$0xff] }
 0x286   : > { %14641 = vmatpush3.bf16.msra.mxu1 %v17251_v23  ;;  %13413 = vmatprep.mubr.msk.f32.mxu1 %vm16365_vm1, %v20056_v58  ;;  %v16018_v23 = vld [vmem:[%s16741_s10 + $0xa8] sm:$0xff] }
 0x287   : > { %14642 = vmatprep.subr.bf16.mxu1 %v20057_v13 }
 0x28a   : > { %14644 = vmatpush3.bf16.msra.mxu1 %v17253_v57 }
 0x28b   : > { %14645 = vmatprep.subr.bf16.mxu1 %v20057_v13 }
 0x28d   : > { %13414 = vmatmul.mubr.f32.vlgmr.msra.gmra.mrb[2].mxu1 %v2376_v3 }
 0x28e   : > { %14647 = vmatpush3.bf16.msra.mxu1 %v17229_v34  ;;  %13424 = vmatprep.mubr.msk.f32.mxu1 %vm16365_vm1, %v20056_v58  ;;  %v16005_v34 = vld [vmem:[%s16741_s10 + $0x20] sm:$0xff] }
 0x28f   : > { %14648 = vmatprep.subr.bf16.mxu1 %v20057_v13 }
 0x292   : > { %14650 = vmatpush3.bf16.msra.mxu1 %v17241_v37 }
 0x293   : > { %14651 = vmatprep.subr.bf16.mxu1 %v20057_v13 }
 0x295   : > { %13425 = vmatmul.mubr.f32.vlgmr.msra.gmra.mrb[2].mxu1 %v2376_v3  ;;  %v16026_v3 = vld [vmem:[%s16741_s10 + $0xe8] sm:$0xff] }
 0x296   : > { %13767 = vmatprep.mubr.msk.f32.mxu1 %vm16365_vm1, %v20056_v58 }
 0x33f   : > { %v2300_v53 = vpop.f32.mrb[2].mxu0 }
 0x340   : > { %v13360_v43 = vpop.f32.mrb[3].mxu0  ;;  %v17395_v42 = vrot.slane %v2300_v53, %v17392_v60 }
 0x342   : > { %v2800_v61 = vsub.f32 %v16005_v34, %v17395_v42  ;;  %v2801_v36 = vsub.f32 %v16006_v59, %v17395_v42  ;;  %v2802_v25 = vsub.f32 %v16007_v24, %v17395_v42  ;;  %v2803_v62 = vsub.f32 %v16008_v44, %v17395_v42 }
 0x343   : > { %v2804_v37 = vsub.f32 %v16009_v45, %v17395_v42  ;;  %v2805_v16 = vsub.f32 %v16010_v7, %v17395_v42  ;;  %v2806_v26 = vsub.f32 %v16011_v49, %v17395_v42  ;;  %v2807_v33 = vsub.f32 %v16012_v29, %v17395_v42  ;;  %v17483_v45 = vld [vmem:[%s20064_s22] ss:$0 sm:$0xff]  ;;  %s16273_s22 = scalar_lea.vmem %s16272_s28, 8192 }
 0x344   : > { %v2808_v52 = vsub.f32 %v16013_v8, %v17395_v42  ;;  %v2809_v1 = vsub.f32 %v16014_v50, %v17395_v42  ;;  %v2810_v51 = vsub.f32 %v16015_v41, %v17395_v42  ;;  %v2811_v56 = vsub.f32 %v16016_v32, %v17395_v42  ;;  %v17496_v41 = vld [vmem:[#allocation7] ss:$0 sm:$0xff] }
 0x345   : > { %v2816_v30 = vsub.f32 %v16017_v35, %v17395_v42  ;;  %v2817_v57 = vsub.f32 %v16018_v23, %v17395_v42  ;;  %v2818_v31 = vsub.f32 %v16019_v12, %v17395_v42  ;;  %v2819_v46 = vsub.f32 %v16020_v39, %v17395_v42  ;;  %v16030_v39 = vld [vmem:[%s16741_s10 + $0x8] sm:$0xff] }
 0x346   : > { %v2820_v10 = vsub.f32 %v16021_v22, %v17395_v42  ;;  %v2821_v63 = vsub.f32 %v16022_v9, %v17395_v42  ;;  %v2822_v27 = vsub.f32 %v16023_v47, %v17395_v42  ;;  %v2823_v28 = vsub.f32 %v16024_v17, %v17395_v42  ;;  %v16031_v22 = vld [vmem:[%s16741_s10 + $0x10] sm:$0xff] }
 0x347   : > { %v2824_v18 = vsub.f32 %v16025_v14, %v17395_v42  ;;  %v2825_v20 = vsub.f32 %v16026_v3, %v17395_v42  ;;  %v2826_v40 = vsub.f32 %v16027_v2, %v17395_v42  ;;  %v2827_v48 = vsub.f32 %v16028_v0, %v17395_v42 }
 0x368   : > { %v2788_v15 = vpop.f32.mrb[2].mxu1 }
 0x369   : > { %v17438_v21 = vrot.slane %v2788_v15, %v17392_v60  ;;  %v13426_v6 = vpop.f32.mrb[3].mxu1 }
 0x36b   : > { %v17449_v5 = vmul.f32 %v17438_v21, %v2800_v61  ;;  %v17452_v11 = vmul.f32 %v17438_v21, %v2801_v36  ;;  %v17455_v38 = vmul.f32 %v17438_v21, %v2802_v25  ;;  %v17458_v4 = vmul.f32 %v17438_v21, %v2803_v62 }
 0x36c   : > { %v2840_v53 = vmul.f32 %v17438_v21, %v2804_v37  ;;  %v2841_v43 = vmul.f32 %v17438_v21, %v2805_v16  ;;  %v2842_v55 = vmul.f32 %v17438_v21, %v2806_v26  ;;  %v2843_v19 = vmul.f32 %v17438_v21, %v2807_v33 }
 0x36d   : > { %v2844_v34 = vmul.f32 %v17438_v21, %v2808_v52  ;;  %v2845_v61 = vmul.f32 %v17438_v21, %v2809_v1  ;;  %v2846_v59 = vmul.f32 %v17438_v21, %v2810_v51  ;;  %v2847_v36 = vmul.f32 %v17438_v21, %v2811_v56 }
 0x36e   : > { %v17469_v24 = vmul.f32 %v17438_v21, %v2816_v30  ;;  %v17472_v25 = vmul.f32 %v17438_v21, %v2817_v57  ;;  %v17475_v44 = vmul.f32 %v17438_v21, %v2818_v31  ;;  %v17478_v62 = vmul.f32 %v17438_v21, %v2819_v46  ;;  %v16029_v30 = vld [vmem:[%s16741_s10] sm:$0xff] }
 0x36f   : > { %v2856_v37 = vmul.f32 %v17438_v21, %v2820_v10  ;;  %v2857_v7 = vmul.f32 %v17438_v21, %v2821_v63  ;;  %v2858_v16 = vmul.f32 %v17438_v21, %v2822_v27  ;;  %v2859_v49 = vmul.f32 %v17438_v21, %v2823_v28  ;;  %v16032_v63 = vld [vmem:[%s16741_s10 + $0x18] sm:$0xff] }
 0x370   : > { %v2860_v26 = vmul.f32 %v17438_v21, %v2824_v18  ;;  %v2861_v29 = vmul.f32 %v17438_v21, %v2825_v20  ;;  %v2862_v33 = vmul.f32 %v17438_v21, %v2826_v40  ;;  %v2863_v8 = vmul.f32 %v17438_v21, %v2827_v48 }
 0x371   : > { %v2878_v52 = vmul.f32 %v17483_v45, %v2840_v53  ;;  %v2879_v50 = vmul.f32 %v17483_v45, %v2841_v43  ;;  %v2880_v1 = vmul.f32 %v17483_v45, %v2842_v55  ;;  %v2881_v51 = vmul.f32 %v17483_v45, %v2843_v19 }
 0x372   : > { %v2882_v32 = vmul.f32 %v17483_v45, %v2844_v34  ;;  %v2883_v56 = vmul.f32 %v17483_v45, %v2845_v61  ;;  %v2884_v35 = vmul.f32 %v17483_v45, %v2846_v59  ;;  %v2796_v23 = vsub.f32 %v16029_v30, %v17395_v42 }
 0x373   : > { %v17505_v57 = vadd.f32 %v17496_v41, %v2878_v52  ;;  %v17508_v12 = vadd.f32 %v17496_v41, %v2879_v50  ;;  %v17511_v31 = vadd.f32 %v17496_v41, %v2880_v1  ;;  %v2797_v46 = vsub.f32 %v16030_v39, %v17395_v42  ;;  %v16033_v39 = vld [vmem:[%s16741_s10 + $0x80] sm:$0xff] }
 0x374   : > { %v2798_v10 = vsub.f32 %v16031_v22, %v17395_v42  ;;  %v2885_v15 = vmul.f32 %v17483_v45, %v2847_v36  ;;  %v17519_v9 = vadd.f32 %v17496_v41, %v2881_v51  ;;  %v2799_v47 = vsub.f32 %v16032_v63, %v17395_v42  ;;  %v16034_v63 = vld [vmem:[%s16741_s10 + $0x88] sm:$0xff] }
 0x375   : > { %v2894_v27 = vmul.f32 %v17483_v45, %v2856_v37  ;;  %v2895_v17 = vmul.f32 %v17483_v45, %v2857_v7  ;;  %v17526_v28 = vadd.f32 %v17496_v41, %v2882_v32  ;;  %v2896_v6 = vmul.f32 %v17483_v45, %v2858_v16 }
 0x376   : > { %v2897_v14 = vmul.f32 %v17483_v45, %v2859_v49  ;;  %v17531_v18 = vadd.f32 %v17496_v41, %v2883_v56  ;;  %v17534_v3 = vadd.f32 %v17496_v41, %v2884_v35  ;;  %v12087_v20 = vmul.f32 -1.442695, %v17505_v57 }
 0x377   : > { %v12088_v2 = vmul.f32 -1.442695, %v17508_v12  ;;  %v12089_v40 = vmul.f32 -1.442695, %v17511_v31  ;;  %v17540_v0 = vmul.f32 %v17438_v21, %v2796_v23  ;;  %v2898_v48 = vmul.f32 %v17483_v45, %v2860_v26 }
 0x378   : > { %v17544_v53 = vadd.f32 %v17496_v41, %v2885_v15  ;;  %v12090_v43 = vmul.f32 -1.442695, %v17519_v9  ;;  %v17548_v55 = vmul.f32 %v17438_v21, %v2797_v46  ;;  %v2899_v19 = vmul.f32 %v17483_v45, %v2861_v29 }
 0x379   : > { %v17552_v34 = vadd.f32 %v17496_v41, %v2894_v27  ;;  %15747 = vpow2.f32 %v12087_v20  ;;  %v12091_v61 = vmul.f32 -1.442695, %v17526_v28  ;;  %v2900_v59 = vmul.f32 %v17483_v45, %v2862_v33  ;;  %v16036_v20 = vld [vmem:[%s16741_s10 + $0x98] sm:$0xff] }
 0x37a   : > { %v17557_v36 = vadd.f32 %v17496_v41, %v2895_v17  ;;  %15749 = vpow2.f32 %v12088_v2  ;;  %v12092_v37 = vmul.f32 -1.442695, %v17531_v18  ;;  %v2901_v7 = vmul.f32 %v17483_v45, %v2863_v8 }
 0x37b   : > { %v17562_v16 = vadd.f32 %v17496_v41, %v2896_v6  ;;  %15751 = vpow2.f32 %v12089_v40  ;;  %v12093_v49 = vmul.f32 -1.442695, %v17534_v3  ;;  %v17566_v26 = vadd.f32 %v17496_v41, %v2897_v14  ;;  %v16035_v6 = vld [vmem:[%s16741_s10 + $0x90] sm:$0xff] }
 0x37c   : > { %v17569_v29 = vadd.f32 %v17496_v41, %v2898_v48  ;;  %15753 = vpow2.f32 %v12090_v43  ;;  %v12094_v33 = vmul.f32 -1.442695, %v17544_v53  ;;  %v12103_v52 = vmul.f32 -1.442695, %v17552_v34 }
 0x37d   : > { %15755 = vpow2.f32 %v12091_v61  ;;  %v17574_v8 = vmul.f32 %v17438_v21, %v2798_v10  ;;  %v17577_v50 = vmul.f32 %v17438_v21, %v2799_v47  ;;  %v17580_v1 = vadd.f32 %v17496_v41, %v2899_v19 }
 0x37e   : > { %15757 = vpow2.f32 %v12092_v37  ;;  %v12104_v51 = vmul.f32 -1.442695, %v17557_v36  ;;  %v17584_v32 = vadd.f32 %v17496_v41, %v2900_v59  ;;  %v12105_v56 = vmul.f32 -1.442695, %v17562_v16 }
 0x37f   : > { %15759 = vpow2.f32 %v12093_v49  ;;  %v17588_v35 = vadd.f32 %v17496_v41, %v2901_v7  ;;  %v12106_v30 = vmul.f32 -1.442695, %v17566_v26  ;;  %v12107_v23 = vmul.f32 -1.442695, %v17569_v29 }
 0x380   : > { %15761 = vpow2.f32 %v12094_v33  ;;  %v2812_v46 = vsub.f32 %v16033_v39, %v17395_v42  ;;  %v12108_v22 = vmul.f32 -1.442695, %v17580_v1  ;;  %v12109_v15 = vmul.f32 -1.442695, %v17584_v32 }
 0x381   : > { %15763 = vpow2.f32 %v12103_v52  ;;  %v2813_v47 = vsub.f32 %v16034_v63, %v17395_v42  ;;  %v2814_v14 = vsub.f32 %v16035_v6, %v17395_v42  ;;  %v2815_v2 = vsub.f32 %v16036_v20, %v17395_v42 }
 0x382   : > { %15765 = vpow2.f32 %v12104_v51  ;;  %v17599_v27 = vmul.f32 %v17438_v21, %v2812_v46  ;;  %v12110_v40 = vmul.f32 -1.442695, %v17588_v35  ;;  %v2871_v46 = vmul.f32 %v17483_v45, %v17548_v55 }
 0x383   : > { %v15748_v10 = vpop.eup %15747  ;;  %15767 = vpow2.f32 %v12105_v56  ;;  %v17607_v19 = vmul.f32 %v17438_v21, %v2813_v47  ;;  %v17610_v37 = vmul.f32 %v17438_v21, %v2814_v14  ;;  %v17613_v7 = vmul.f32 %v17438_v21, %v2815_v2 }
 0x384   : > { %v15750_v17 = vpop.eup %15749  ;;  %15769 = vpow2.f32 %v12106_v30  ;;  %v3044_v43 = vadd.f32 1.0, %v15748_v10  ;;  %v2870_v30 = vmul.f32 %v17483_v45, %v17540_v0  ;;  %v2874_v63 = vmul.f32 %v17483_v45, %v17449_v5 }
 0x385   : > { %v15752_v48 = vpop.eup %15751  ;;  %15771 = vpow2.f32 %v12107_v23  ;;  %v3045_v59 = vadd.f32 1.0, %v15750_v17  ;;  %v17625_v55 = vadd.f32 %v17496_v41, %v2871_v46  ;;  %v2875_v20 = vmul.f32 %v17483_v45, %v17452_v11 }
 0x386   : > { %v15754_v61 = vpop.eup %15753  ;;  %15773 = vpow2.f32 %v12108_v22  ;;  %v3046_v42 = vadd.f32 1.0, %v15752_v48  ;;  %v17622_v0 = vadd.f32 %v17496_v41, %v2870_v30  ;;  %v2872_v5 = vmul.f32 %v17483_v45, %v17574_v8 }
 0x387   : > { %v15756_v49 = vpop.eup %15755  ;;  %15775 = vpow2.f32 %v12109_v15  ;;  %v3047_v52 = vadd.f32 1.0, %v15754_v61  ;;  %v2873_v48 = vmul.f32 %v17483_v45, %v17577_v50  ;;  %v2876_v61 = vmul.f32 %v17483_v45, %v17455_v38 }
 0x388   : > { %v15758_v33 = vpop.eup %15757  ;;  %15777 = vpow2.f32 %v12110_v40  ;;  %v3048_v56 = vadd.f32 1.0, %v15756_v49  ;;  %v17636_v49 = vadd.f32 %v17496_v41, %v2874_v63  ;;  %v2877_v11 = vmul.f32 %v17483_v45, %v17458_v4 }
 0x389   : > { %v15760_v51 = vpop.eup %15759  ;;  %15779 = vrcp.f32 %v3044_v43  ;;  %v3049_v39 = vadd.f32 1.0, %v15758_v33  ;;  %v12079_v8 = vmul.f32 -1.442695, %v17622_v0  ;;  %v12080_v50 = vmul.f32 -1.442695, %v17625_v55 }
 0x38a   : > { %v15762_v23 = vpop.eup %15761  ;;  %15781 = vrcp.f32 %v3045_v59  ;;  %v3050_v22 = vadd.f32 1.0, %v15760_v51  ;;  %v17643_v38 = vadd.f32 %v17496_v41, %v2875_v20  ;;  %v17649_v4 = vadd.f32 %v17496_v41, %v2873_v48 }
 0x38b   : > { %v15764_v21 = vpop.eup %15763  ;;  %15783 = vrcp.f32 %v3046_v42  ;;  %v3051_v15 = vadd.f32 1.0, %v15762_v23  ;;  %v17646_v23 = vadd.f32 %v17496_v41, %v2872_v5 }
 0x38c   : > { %v15766_v10 = vpop.eup %15765  ;;  %15785 = vrcp.f32 %v3047_v52  ;;  %v3060_v17 = vadd.f32 1.0, %v15764_v21  ;;  %v12083_v21 = vmul.f32 -1.442695, %v17636_v49  ;;  %v12082_v5 = vmul.f32 -1.442695, %v17649_v4 }
 0x38d   : > { %v15768_v47 = vpop.eup %15767  ;;  %15787 = vrcp.f32 %v3048_v56  ;;  %v3061_v14 = vadd.f32 1.0, %v15766_v10 }
 0x38e   : > { %v15770_v6 = vpop.eup %15769  ;;  %15789 = vrcp.f32 %v3049_v39  ;;  %v3062_v40 = vadd.f32 1.0, %v15768_v47  ;;  %v2886_v47 = vmul.f32 %v17483_v45, %v17599_v27  ;;  %v2888_v27 = vmul.f32 %v17483_v45, %v17610_v37 }
 0x38f   : > { %v15772_v2 = vpop.eup %15771  ;;  %15791 = vrcp.f32 %v3050_v22  ;;  %v3063_v59 = vadd.f32 1.0, %v15770_v6  ;;  %v2890_v37 = vmul.f32 %v17483_v45, %v17469_v24 }
 0x390   : > { %v15774_v43 = vpop.eup %15773  ;;  %15793 = vrcp.f32 %v3051_v15  ;;  %v3064_v33 = vadd.f32 1.0, %v15772_v2  ;;  %v17654_v15 = vadd.f32 %v17496_v41, %v2876_v61  ;;  %v17693_v24 = vadd.f32 %v17496_v41, %v2888_v27 }
 0x391   : > { %v15776_v42 = vpop.eup %15775  ;;  %15795 = vrcp.f32 %v3060_v17  ;;  %v3065_v51 = vadd.f32 1.0, %v15774_v43  ;;  %v17679_v43 = vadd.f32 %v17496_v41, %v2886_v47 }
 0x392   : > { %v15778_v52 = vpop.eup %15777  ;;  %15797 = vrcp.f32 %v3061_v14  ;;  %v3066_v30 = vadd.f32 1.0, %v15776_v42  ;;  %v17661_v14 = vadd.f32 %v17496_v41, %v2877_v11  ;;  %v12085_v11 = vmul.f32 -1.442695, %v17654_v15 }
 0x393   : > { %v15780_v56 = vpop.eup %15779  ;;  %15799 = vrcp.f32 %v3062_v40  ;;  %v3067_v46 = vadd.f32 1.0, %v15778_v52 }
 0x394   : > { %v15782_v39 = vpop.eup %15781  ;;  %15801 = vrcp.f32 %v3063_v59  ;;  %v3140_v22 = vmul.f32 %v15780_v56, %v17505_v57  ;;  %v2887_v57 = vmul.f32 %v17483_v45, %v17607_v19  ;;  %v2889_v19 = vmul.f32 %v17483_v45, %v17613_v7 }
 0x395   : > { %v15784_v10 = vpop.eup %15783  ;;  %15803 = vrcp.f32 %v3064_v33  ;;  %v3141_v63 = vmul.f32 %v15782_v39, %v17508_v12  ;;  %v12081_v12 = vmul.f32 -1.442695, %v17646_v23  ;;  %v12084_v7 = vmul.f32 -1.442695, %v17643_v38 }
 0x396   : > { %v15786_v17 = vpop.eup %15785  ;;  %15805 = vrcp.f32 %v3065_v51  ;;  %v3142_v6 = vmul.f32 %v15784_v10, %v17511_v31  ;;  %3219 = vst.msk [vmem:[#allocation2 + $0x79] sm:$0xff] %vm648_vm0, %v3140_v22  ;;  %v17687_v59 = vadd.f32 %v17496_v41, %v2887_v57  ;;  %v12086_v33 = vmul.f32 -1.442695, %v17661_v14 }
 0x397   : > { %v15788_v20 = vpop.eup %15787  ;;  %15807 = vrcp.f32 %v3066_v30  ;;  %v3143_v2 = vmul.f32 %v15786_v17, %v17519_v9  ;;  %3220 = vst.msk [vmem:[#allocation2 + $0x81] sm:$0xff] %vm648_vm0, %v3141_v63  ;;  %v12095_v51 = vmul.f32 -1.442695, %v17679_v43 }
 0x398   : > { %v15790_v31 = vpop.eup %15789  ;;  %15809 = vrcp.f32 %v3067_v46  ;;  %v3144_v40 = vmul.f32 %v15788_v20, %v17526_v28  ;;  %3221 = vst.msk [vmem:[#allocation2 + $0x91] sm:$0xff] %vm648_vm0, %v3142_v6  ;;  %v12096_v46 = vmul.f32 -1.442695, %v17687_v59 }
 0x399   : > { %v15792_v48 = vpop.eup %15791  ;;  %v3145_v9 = vmul.f32 %v15790_v31, %v17531_v18  ;;  %3222 = vst.msk [vmem:[#allocation2 + $0x99] sm:$0xff] %vm648_vm0, %v3143_v2  ;;  %15811 = vpow2.f32 %v12079_v8  ;;  %v17698_v8 = vadd.f32 %v17496_v41, %v2889_v19  ;;  %v2891_v31 = vmul.f32 %v17483_v45, %v17472_v25 }
 0x39a   : > { %v15794_v28 = vpop.eup %15793  ;;  %v3146_v61 = vmul.f32 %v15792_v48, %v17534_v3  ;;  %3223 = vst.msk [vmem:[#allocation2 + $0xa9] sm:$0xff] %vm648_vm0, %v3144_v40  ;;  %15813 = vpow2.f32 %v12080_v50  ;;  %v17704_v50 = vadd.f32 %v17496_v41, %v2890_v37  ;;  %v2892_v19 = vmul.f32 %v17483_v45, %v17475_v44 }
 0x39b   : > { %v15796_v18 = vpop.eup %15795  ;;  %v3147_v42 = vmul.f32 %v15794_v28, %v17544_v53  ;;  %3224 = vst.msk [vmem:[#allocation2 + $0xb1] sm:$0xff] %vm648_vm0, %v3145_v9  ;;  %15815 = vpow2.f32 %v12081_v12  ;;  %v2893_v37 = vmul.f32 %v17483_v45, %v17478_v62  ;;  %v17732_v25 = vadd.f32 %v17496_v41, %v2891_v31 }
 0x39c   : > { %v15798_v3 = vpop.eup %15797  ;;  %3225 = vst.msk [vmem:[#allocation2 + $0xc1] sm:$0xff] %vm648_vm0, %v3146_v61  ;;  %15817 = vpow2.f32 %v12082_v5  ;;  %v3156_v52 = vmul.f32 %v15796_v18, %v17552_v34 }
 0x39d   : > { %v15800_v53 = vpop.eup %15799  ;;  %3226 = vst.msk [vmem:[#allocation2 + $0xc9] sm:$0xff] %vm648_vm0, %v3147_v42  ;;  %15819 = vpow2.f32 %v12083_v21  ;;  %v3157_v56 = vmul.f32 %v15798_v3, %v17557_v36  ;;  %v12097_v21 = vmul.f32 -1.442695, %v17693_v24  ;;  %v12098_v36 = vmul.f32 -1.442695, %v17698_v8 }
 0x39e   : > { %v15802_v30 = vpop.eup %15801  ;;  %v3158_v39 = vmul.f32 %v15800_v53, %v17562_v16  ;;  %15821 = vpow2.f32 %v12084_v7  ;;  %3235 = vst.msk [vmem:[#allocation2 + $0x139] sm:$0xff] %vm648_vm0, %v3156_v52  ;;  %v17735_v3 = vadd.f32 %v17496_v41, %v2892_v19  ;;  %v17738_v45 = vadd.f32 %v17496_v41, %v2893_v37 }
 0x39f   : > { %v15804_v34 = vpop.eup %15803  ;;  %v3159_v22 = vmul.f32 %v15802_v30, %v17566_v26  ;;  %15823 = vpow2.f32 %v12085_v11  ;;  %3236 = vst.msk [vmem:[#allocation2 + $0x141] sm:$0xff] %vm648_vm0, %v3157_v56  ;;  %v12099_v26 = vmul.f32 -1.442695, %v17704_v50 }
 0x3a0   : > { %v15806_v10 = vpop.eup %15805  ;;  %v3160_v63 = vmul.f32 %v15804_v34, %v17569_v29  ;;  %3237 = vst.msk [vmem:[#allocation2 + $0x151] sm:$0xff] %vm648_vm0, %v3158_v39  ;;  %15825 = vpow2.f32 %v12086_v33  ;;  %v12101_v34 = vmul.f32 -1.442695, %v17735_v3  ;;  %v12102_v41 = vmul.f32 -1.442695, %v17738_v45 }
 0x3a1   : > { %v15808_v16 = vpop.eup %15807  ;;  %v3161_v47 = vmul.f32 %v15806_v10, %v17580_v1  ;;  %3238 = vst.msk [vmem:[#allocation2 + $0x159] sm:$0xff] %vm648_vm0, %v3159_v22  ;;  %15827 = vpow2.f32 %v12095_v51  ;;  %v12100_v51 = vmul.f32 -1.442695, %v17732_v25 }
 0x3a2   : > { %v15810_v17 = vpop.eup %15809  ;;  %v3162_v6 = vmul.f32 %v15808_v16, %v17584_v32  ;;  %3239 = vst.msk [vmem:[#allocation2 + $0x169] sm:$0xff] %vm648_vm0, %v3160_v63  ;;  %15829 = vpow2.f32 %v12096_v46 }
 0x3a3   : > { %v15812_v29 = vpop.eup %15811  ;;  %v3163_v57 = vmul.f32 %v15810_v17, %v17588_v35  ;;  %3240 = vst.msk [vmem:[#allocation2 + $0x171] sm:$0xff] %vm648_vm0, %v3161_v47  ;;  %15831 = vpow2.f32 %v12097_v21 }
 0x3a4   : > { %v15814_v20 = vpop.eup %15813  ;;  %3241 = vst.msk [vmem:[#allocation2 + $0x181] sm:$0xff] %vm648_vm0, %v3162_v6  ;;  %v3036_v1 = vadd.f32 1.0, %v15812_v29  ;;  %15833 = vpow2.f32 %v12098_v36 }
 0x3a5   : > { %v15816_v2 = vpop.eup %15815  ;;  %3242 = vst.msk [vmem:[#allocation2 + $0x189] sm:$0xff] %vm648_vm0, %v3163_v57  ;;  %v3037_v12 = vadd.f32 1.0, %v15814_v20  ;;  %15835 = vpow2.f32 %v12099_v26 }
 0x3a6   : > { %v15818_v32 = vpop.eup %15817  ;;  %15837 = vrcp.f32 %v3036_v1  ;;  %v3038_v27 = vadd.f32 1.0, %v15816_v2 }
 0x3a7   : > { %v15820_v35 = vpop.eup %15819  ;;  %15839 = vrcp.f32 %v3037_v12  ;;  %v3039_v40 = vadd.f32 1.0, %v15818_v32 }
 0x3a8   : > { %v15822_v5 = vpop.eup %15821  ;;  %15841 = vrcp.f32 %v3038_v27  ;;  %v3040_v48 = vadd.f32 1.0, %v15820_v35  ;;  %v15692_v35 = vld [vmem:[#allocation9 + $0x8] sm:$0xff]  }
 0x3a9   : > { %v15824_v9 = vpop.eup %15823  ;;  %15843 = vrcp.f32 %v3039_v40  ;;  %v3041_v28 = vadd.f32 1.0, %v15822_v5 }
 0x3aa   : > { %v15826_v61 = vpop.eup %15825  ;;  %15845 = vrcp.f32 %v3040_v48  ;;  %v3042_v7 = vadd.f32 1.0, %v15824_v9 }
 0x3ab   : > { %v15828_v18 = vpop.eup %15827  ;;  %15847 = vrcp.f32 %v3041_v28  ;;  %v3043_v42 = vadd.f32 1.0, %v15826_v61  ;;  %v17778_v28 = vld [vmem:[#allocation9 + $0x20] sm:$0xff]  }
 0x3ac   : > { %v15830_v11 = vpop.eup %15829  ;;  %15849 = vrcp.f32 %v3042_v7  ;;  %v3052_v44 = vadd.f32 1.0, %v15828_v18 }
 0x3ad   : > { %v15832_v33 = vpop.eup %15831  ;;  %15851 = vrcp.f32 %v3043_v42  ;;  %v3053_v62 = vadd.f32 1.0, %v15830_v11 }
 0x3ae   : > { %v15834_v52 = vpop.eup %15833  ;;  %15853 = vrcp.f32 %v3052_v44  ;;  %v3054_v53 = vadd.f32 1.0, %v15832_v33  ;;  %v3305_v44 = vld [vmem:[#allocation2 + $0x79] sm:$0xff]  ;;  %v3306_v33 = vld [vmem:[#allocation2 + $0x81] sm:$0xff] }
 0x3af   : > { %v15836_v56 = vpop.eup %15835  ;;  %15855 = vrcp.f32 %v3053_v62  ;;  %v3055_v30 = vadd.f32 1.0, %v15834_v52  ;;  %v3307_v62 = vld [vmem:[#allocation2 + $0x91] sm:$0xff]  ;;  %v3308_v52 = vld [vmem:[#allocation2 + $0x99] sm:$0xff] }
 0x3b0   : > { %v15838_v39 = vpop.eup %15837  ;;  %15857 = vrcp.f32 %v3054_v53  ;;  %v3056_v46 = vadd.f32 1.0, %v15836_v56 }
 0x3b1   : > { %v15840_v22 = vpop.eup %15839  ;;  %v3132_v21 = vmul.f32 %v15838_v39, %v17622_v0  ;;  %15859 = vrcp.f32 %v3055_v30  ;;  %v17790_v30 = vpack.c.bf16 %v3306_v33, %v3305_v44  ;;  %v3255_v44 = vld [vmem:[#allocation2 + $0x90] sm:$0xff]  ;;  %v3256_v33 = vld [vmem:[#allocation2 + $0x98] sm:$0xff] }
 0x3b2   : > { %v15842_v10 = vpop.eup %15841  ;;  %v3133_v63 = vmul.f32 %v15840_v22, %v17625_v55  ;;  %15861 = vpow2.f32 %v12100_v51  ;;  %v3310_v22 = vld [vmem:[#allocation2 + $0xb1] sm:$0xff] }
 0x3b3   : > { %v15844_v36 = vpop.eup %15843  ;;  %3211 = vst.msk [vmem:[#allocation2 + $0x19] sm:$0xff] %vm648_vm0, %v3132_v21  ;;  %v3134_v16 = vmul.f32 %v15842_v10, %v17646_v23  ;;  %15863 = vrcp.f32 %v3056_v46  ;;  %v17794_v46 = vpack.c.bf16 %v3308_v52, %v3307_v62  ;;  %v3311_v21 = vld [vmem:[#allocation2 + $0xc1] sm:$0xff]  ;;  %v17862_v52 = vpack.c.bf16 %v3256_v33, %v3255_v44 }
 0x3b4   : > { %v15846_v47 = vpop.eup %15845  ;;  %3212 = vst.msk [vmem:[#allocation2 + $0x21] sm:$0xff] %vm648_vm0, %v3133_v63  ;;  %v3135_v26 = vmul.f32 %v15844_v36, %v17649_v4  ;;  %15865 = vpow2.f32 %v12101_v34  ;;  %v15697_v44 = vld [vmem:[#allocation9 + $0x40] sm:$0xff]  }
 0x3b5   : > { %v15848_v0 = vpop.eup %15847  ;;  %3213 = vst.msk [vmem:[#allocation2 + $0x31] sm:$0xff] %vm648_vm0, %v3134_v16  ;;  %v3136_v17 = vmul.f32 %v15846_v47, %v17636_v49  ;;  %15867 = vpow2.f32 %v12102_v41  ;;  %v3312_v41 = vld [vmem:[#allocation2 + $0xc9] sm:$0xff] }
 0x3b6   : > { %v15850_v55 = vpop.eup %15849  ;;  %3214 = vst.msk [vmem:[#allocation2 + $0x39] sm:$0xff] %vm648_vm0, %v3135_v26  ;;  %v3137_v6 = vmul.f32 %v15848_v0, %v17643_v38 }
 0x3b7   : > { %v15852_v29 = vpop.eup %15851  ;;  %3215 = vst.msk [vmem:[#allocation2 + $0x49] sm:$0xff] %vm648_vm0, %v3136_v17  ;;  %v3138_v23 = vmul.f32 %v15850_v55, %v17654_v15 }
 0x3b8   : > { %v15854_v57 = vpop.eup %15853  ;;  %3216 = vst.msk [vmem:[#allocation2 + $0x51] sm:$0xff] %vm648_vm0, %v3137_v6  ;;  %v3139_v4 = vmul.f32 %v15852_v29, %v17661_v14 }
 0x3b9   : > { %v15856_v20 = vpop.eup %15855  ;;  %3217 = vst.msk [vmem:[#allocation2 + $0x61] sm:$0xff] %vm648_vm0, %v3138_v23  ;;  %v3148_v49 = vmul.f32 %v15854_v57, %v17679_v43  ;;  %v3321_v57 = vld [vmem:[#allocation2 + $0x139] sm:$0xff] }
 0x3ba   : > { %v15858_v1 = vpop.eup %15857  ;;  %v3297_v2 = vld [vmem:[#allocation2 + $0x19] sm:$0xff]  ;;  %3218 = vst.msk [vmem:[#allocation2 + $0x69] sm:$0xff] %vm648_vm0, %v3139_v4  ;;  %v3149_v38 = vmul.f32 %v15856_v20, %v17687_v59  ;;  %v3322_v4 = vld [vmem:[#allocation2 + $0x141] sm:$0xff]  ;;  %v3323_v20 = vld [vmem:[#allocation2 + $0x151] sm:$0xff] }
 0x3bb   : > { %v15860_v12 = vpop.eup %15859  ;;  %v3298_v32 = vld [vmem:[#allocation2 + $0x21] sm:$0xff]  ;;  %3227 = vst.msk [vmem:[#allocation2 + $0xd9] sm:$0xff] %vm648_vm0, %v3148_v49  ;;  %v3150_v15 = vmul.f32 %v15858_v1, %v17693_v24  ;;  %v3324_v49 = vld [vmem:[#allocation2 + $0x159] sm:$0xff]  ;;  %v17827_v1 = vpack.c.bf16 %v3322_v4, %v3321_v57 }
 0x3bc   : > { %v15862_v27 = vpop.eup %15861  ;;  %v17763_v31 = vpack.c.bf16 %v3298_v32, %v3297_v2  ;;  %v3299_v14 = vld [vmem:[#allocation2 + $0x31] sm:$0xff]  ;;  %3228 = vst.msk [vmem:[#allocation2 + $0xe1] sm:$0xff] %vm648_vm0, %v3149_v38  ;;  %v3151_v43 = vmul.f32 %v15860_v12, %v17698_v8  ;;  %v17829_v2 = vpack.c.bf16 %v3324_v49, %v3323_v20  ;;  %v3243_v38 = vld [vmem:[#allocation2] sm:$0xff]  ;;  %v3244_v12 = vld [vmem:[#allocation2 + $0x8] sm:$0xff] }
 0x3bd   : > { %v15864_v40 = vpop.eup %15863  ;;  %v3300_v5 = vld [vmem:[#allocation2 + $0x39] sm:$0xff]  ;;  %3229 = vst.msk [vmem:[#allocation2 + $0xf1] sm:$0xff] %vm648_vm0, %v3150_v15  ;;  %v3057_v59 = vadd.f32 1.0, %v15862_v27  ;;  %v3325_v32 = vld [vmem:[#allocation2 + $0x169] sm:$0xff]  ;;  %v3326_v15 = vld [vmem:[#allocation2 + $0x171] sm:$0xff]  ;;  %v3275_v27 = vpack.c.bf16 %v3244_v12, %v3243_v38 }
 0x3be   : > { %v15866_v19 = vpop.eup %15865  ;;  %13432 = vmatmul.mubr.msk.bf16.vlgmr.msra.gmra.mrb[4].mxu0 %vm648_vm0, %v17763_v31  ;;  %v17770_v48 = vpack.c.bf16 %v3300_v5, %v3299_v14  ;;  %3230 = vst.msk [vmem:[#allocation2 + $0xf9] sm:$0xff] %vm648_vm0, %v3151_v43  ;;  %v3152_v24 = vmul.f32 %v15864_v40, %v17704_v50  ;;  %v3301_v61 = vld [vmem:[#allocation2 + $0x49] sm:$0xff]  ;;  %v17835_v14 = vpack.c.bf16 %v3326_v15, %v3325_v32  ;;  %v3246_v43 = vld [vmem:[#allocation2 + $0x20] sm:$0xff]  ;;  %v3248_v5 = vld [vmem:[#allocation2 + $0x38] sm:$0xff] }
 0x3bf   : > { %v15868_v9 = vpop.eup %15867  ;;  %13464 = vmatpush3.bf16.msra.mxu0 %v17316_v54  ;;  %15869 = vrcp.f32 %v3057_v59  ;;  %v3058_v8 = vadd.f32 1.0, %v15866_v19  ;;  %v3302_v7 = vld [vmem:[#allocation2 + $0x51] sm:$0xff]  ;;  %v3270_v20 = vld [vmem:[#allocation2 + $0x140] sm:$0xff] }
 0x3c0   : > { %13435 = vmatprep.mubr.msk.bf16.mxu0 %vm648_vm0, %v17770_v48  ;;  %13465 = vmatprep.subr.bf16.mxu0 %v15692_v35  ;;  %3231 = vst.msk [vmem:[#allocation2 + $0x109] sm:$0xff] %vm648_vm0, %v3152_v24  ;;  %v3059_v37 = vadd.f32 1.0, %v15868_v9  ;;  %v3303_v18 = vld [vmem:[#allocation2 + $0x61] sm:$0xff]  ;;  %v17780_v50 = vpack.c.bf16 %v3302_v7, %v3301_v61  ;;  %v3247_v40 = vld [vmem:[#allocation2 + $0x30] sm:$0xff]  ;;  %v3269_v4 = vld [vmem:[#allocation2 + $0x138] sm:$0xff] }
 0x3c1   : > { %15871 = vrcp.f32 %v3058_v8  ;;  %v3304_v42 = vld [vmem:[#allocation2 + $0x69] sm:$0xff]  ;;  %v17842_v24 = vpack.c.bf16 %v3248_v5, %v3247_v40  ;;  %v17849_v9 = vld [vmem:[#allocation9 + $0x30] sm:$0xff]   ;;  %v3251_v61 = vld [vmem:[#allocation2 + $0x60] sm:$0xff]  ;;  %v17892_v12 = vpack.c.bf16 %v3270_v20, %v3269_v4 }
 0x3c2   : > { %15873 = vrcp.f32 %v3059_v37  ;;  %v17783_v54 = vpack.c.bf16 %v3304_v42, %v3303_v18  ;;  %v15694_v19 = vld [vmem:[#allocation9 + $0x28] sm:$0xff]   ;;  %v3272_v38 = vld [vmem:[#allocation2 + $0x158] sm:$0xff]  ;;  %v3790_v15 = vld [vmem:[#allocation2 + $0x2] sm:$0xff] }
 0x3c3   : > { %13466 = vmatpush3.bf16.msra.mxu0 %v15692_v35  ;;  %v3314_v63 = vld [vmem:[#allocation2 + $0xe1] sm:$0xff]  ;;  %v3245_v35 = vld [vmem:[#allocation2 + $0x18] sm:$0xff]  ;;  %v3250_v37 = vld [vmem:[#allocation2 + $0x50] sm:$0xff] }
 0x3c4   : > { %13499 = vmatprep.subr.bf16.mxu0 %v17778_v28  ;;  %v3315_v36 = vld [vmem:[#allocation2 + $0xf1] sm:$0xff]  ;;  %v17840_v59 = vpack.c.bf16 %v3246_v43, %v3245_v35  ;;  %v3249_v8 = vld [vmem:[#allocation2 + $0x48] sm:$0xff] }
 0x3c5   : > { %v3316_v16 = vld [vmem:[#allocation2 + $0xf9] sm:$0xff]  ;;  %v3252_v7 = vld [vmem:[#allocation2 + $0x68] sm:$0xff]  ;;  %v17851_v18 = vpack.c.bf16 %v3250_v37, %v3249_v8  ;;  %v3271_v49 = vld [vmem:[#allocation2 + $0x150] sm:$0xff] }
 0x3c6   : > { %13436 = vmatmul.mubr.msk.bf16.gmra.mrb[8].mxu0 %vm648_vm0, %v17780_v50  ;;  %v17813_v26 = vpack.c.bf16 %v3316_v16, %v3315_v36  ;;  %v17854_v42 = vpack.c.bf16 %v3252_v7, %v3251_v61  ;;  %v17894_v32 = vpack.c.bf16 %v3272_v38, %v3271_v49  ;;  %v3273_v35 = vld [vmem:[#allocation2 + $0x168] sm:$0xff]  ;;  %v3274_v43 = vld [vmem:[#allocation2 + $0x170] sm:$0xff]  ;;  %v3795_v61 = vld [vmem:[#allocation2 + $0x3a] sm:$0xff] }
 0x3c7   : > { %13439 = vmatprep.mubr.msk.bf16.mxu0 %vm648_vm0, %v17783_v54  ;;  %v3317_v0 = vld [vmem:[#allocation2 + $0x109] sm:$0xff]  ;;  %v17900_v5 = vpack.c.bf16 %v3274_v43, %v3273_v35  ;;  %v3794_v37 = vld [vmem:[#allocation2 + $0x32] sm:$0xff]  ;;  %v3811_v43 = vld [vmem:[#allocation2 + $0xfa] sm:$0xff] }
 0x3c8   : > { %v3265_v16 = vld [vmem:[#allocation2 + $0x108] sm:$0xff]  ;;  %v3810_v35 = vld [vmem:[#allocation2 + $0xf2] sm:$0xff] }
 0x3c9   : > { %v15870_v11 = vpop.eup %15869  ;;  %v3793_v8 = vld [vmem:[#allocation2 + $0x22] sm:$0xff]  ;;  %v3796_v33 = vld [vmem:[#allocation2 + $0x4a] sm:$0xff] }
 0x3ca   : > { %v3153_v53 = vmul.f32 %v15870_v11, %v17732_v25  ;;  %v3309_v25 = vld [vmem:[#allocation2 + $0xa9] sm:$0xff]  ;;  %v3254_v11 = vld [vmem:[#allocation2 + $0x80] sm:$0xff] }
 0x3cb   : > { %v15872_v51 = vpop.eup %15871  ;;  %v17803_v10 = vpack.c.bf16 %v3310_v22, %v3309_v25  ;;  %v3261_v22 = vld [vmem:[#allocation2 + $0xd8] sm:$0xff]  ;;  %v3806_v4 = vld [vmem:[#allocation2 + $0xc2] sm:$0xff]  ;;  %v3807_v20 = vld [vmem:[#allocation2 + $0xca] sm:$0xff] }
 0x3cc   : > { %v15874_v56 = vpop.eup %15873  ;;  %3232 = vst.msk [vmem:[#allocation2 + $0x111] sm:$0xff] %vm648_vm0, %v3153_v53  ;;  %v3154_v39 = vmul.f32 %v15872_v51, %v17735_v3  ;;  %v17805_v3 = vpack.c.bf16 %v3312_v41, %v3311_v21  ;;  %v3257_v53 = vld [vmem:[#allocation2 + $0xa8] sm:$0xff]  ;;  %v3258_v51 = vld [vmem:[#allocation2 + $0xb0] sm:$0xff]  ;;  %v3262_v21 = vld [vmem:[#allocation2 + $0xe0] sm:$0xff]  ;;  %v17932_v38 = vpack.c.bf16 %v3807_v20, %v3806_v4 }
 0x3cd   : > { %v3155_v34 = vmul.f32 %v15874_v56, %v17738_v45  ;;  %v3313_v45 = vld [vmem:[#allocation2 + $0xd9] sm:$0xff]  ;;  %v3263_v41 = vld [vmem:[#allocation2 + $0xf0] sm:$0xff] }
 0x3ce   : > { %13440 = vmatmul.mubr.msk.bf16.gmra.mrb[12].mxu0 %vm648_vm0, %v17790_v30  ;;  %3233 = vst.msk [vmem:[#allocation2 + $0x121] sm:$0xff] %vm648_vm0, %v3154_v39  ;;  %v17811_v47 = vpack.c.bf16 %v3314_v63, %v3313_v45  ;;  %v3259_v56 = vld [vmem:[#allocation2 + $0xc0] sm:$0xff]  ;;  %v3260_v39 = vld [vmem:[#allocation2 + $0xc8] sm:$0xff]  ;;  %v3264_v45 = vld [vmem:[#allocation2 + $0xf8] sm:$0xff]  ;;  %v17876_v63 = vpack.c.bf16 %v3262_v21, %v3261_v22 }
 0x3cf   : > { %13443 = vmatprep.mubr.msk.bf16.mxu0 %vm648_vm0, %v17794_v46  ;;  %3234 = vst.msk [vmem:[#allocation2 + $0x129] sm:$0xff] %vm648_vm0, %v3155_v34  ;;  %v17868_v34 = vpack.c.bf16 %v3258_v51, %v3257_v53  ;;  %v17870_v25 = vpack.c.bf16 %v3260_v39, %v3259_v56  ;;  %v17878_v36 = vpack.c.bf16 %v3264_v45, %v3263_v41  ;;  %v3797_v53 = vld [vmem:[#allocation2 + $0x52] sm:$0xff]  ;;  %v3798_v51 = vld [vmem:[#allocation2 + $0x62] sm:$0xff]  ;;  %v3799_v56 = vld [vmem:[#allocation2 + $0x6a] sm:$0xff] }
 0x3d0   : > { %v17914_v39 = vpack.c.bf16 %v3797_v53, %v3796_v33  ;;  %v17916_v22 = vpack.c.bf16 %v3799_v56, %v3798_v51  ;;  %v3801_v21 = vld [vmem:[#allocation2 + $0x82] sm:$0xff]  ;;  %v3802_v41 = vld [vmem:[#allocation2 + $0x92] sm:$0xff]  ;;  %v3803_v45 = vld [vmem:[#allocation2 + $0x9a] sm:$0xff] }
 0x3d1   : > { %v3816_v51 = vld [vmem:[#allocation2 + $0x13a] sm:$0xff]  ;;  %v3817_v56 = vld [vmem:[#allocation2 + $0x142] sm:$0xff]  ;;  %v15698_v20 = vld [vmem:[#allocation9 + $0x48] sm:$0xff]  }
 0x3d3   : > { %v3318_v17 = vld [vmem:[#allocation2 + $0x111] sm:$0xff] }
 0x3d4   : > { %v17819_v29 = vpack.c.bf16 %v3318_v17, %v3317_v0  ;;  %v3266_v0 = vld [vmem:[#allocation2 + $0x110] sm:$0xff] }
 0x3d5   : > { %v3319_v55 = vld [vmem:[#allocation2 + $0x121] sm:$0xff] }
 0x3d6   : > { %13444 = vmatmul.mubr.msk.bf16.gmra.mrb[16].mxu0 %vm648_vm0, %v17803_v10  ;;  %v3320_v6 = vld [vmem:[#allocation2 + $0x129] sm:$0xff]  ;;  %v3267_v17 = vld [vmem:[#allocation2 + $0x120] sm:$0xff] }
 0x3d7   : > { %13447 = vmatprep.mubr.msk.bf16.mxu0 %vm648_vm0, %v17805_v3  ;;  %v17821_v23 = vpack.c.bf16 %v3320_v6, %v3319_v55  ;;  %v3268_v55 = vld [vmem:[#allocation2 + $0x128] sm:$0xff]  ;;  %v17884_v6 = vpack.c.bf16 %v3266_v0, %v3265_v16  ;;  %v17924_v0 = vpack.c.bf16 %v3803_v45, %v3802_v41  ;;  %v17954_v41 = vpack.c.bf16 %v3817_v56, %v3816_v51  ;;  %v5335_v56 = vld [vmem:[#allocation2 + $0xd9] sm:$0xff] }
 0x3d8   : > { %v17886_v57 = vpack.c.bf16 %v3268_v55, %v3267_v17  ;;  %v3804_v17 = vld [vmem:[#allocation2 + $0xaa] sm:$0xff]  ;;  %v3805_v55 = vld [vmem:[#allocation2 + $0xb2] sm:$0xff] }
 0x3d9   : > { %v17930_v49 = vpack.c.bf16 %v3805_v55, %v3804_v17  ;;  %v3820_v17 = vld [vmem:[#allocation2 + $0x16a] sm:$0xff]  ;;  %v3821_v55 = vld [vmem:[#allocation2 + $0x172] sm:$0xff] }
 0x3da   : > { %v17962_v4 = vpack.c.bf16 %v3821_v55, %v3820_v17  ;;  %v5338_v17 = vld [vmem:[#allocation2 + $0xf9] sm:$0xff] }
 0x3de   : > { %13448 = vmatmul.mubr.msk.bf16.gmra.mrb[20].mxu0 %vm648_vm0, %v17811_v47 }
 0x3df   : > { %13451 = vmatprep.mubr.msk.bf16.mxu0 %vm648_vm0, %v17813_v26 }
 0x3e6   : > { %13452 = vmatmul.mubr.msk.bf16.gmra.mrb[24].mxu0 %vm648_vm0, %v17819_v29 }
 0x3e7   : > { %13455 = vmatprep.mubr.msk.bf16.mxu0 %vm648_vm0, %v17821_v23 }
 0x3ee   : > { %13456 = vmatmul.mubr.msk.bf16.gmra.mrb[28].mxu0 %vm648_vm0, %v17827_v1 }
 0x3ef   : > { %13459 = vmatprep.mubr.msk.bf16.mxu0 %vm648_vm0, %v17829_v2 }
 0x3f6   : > { %13460 = vmatmul.mubr.msk.bf16.gmra.mrb[32].mxu0 %vm648_vm0, %v17835_v14 }
 0x3f7   : > { %13467 = vmatprep.mubr.msk.bf16.mxu0 %vm648_vm0, %v3275_v27  ;;  %v3791_v27 = vld [vmem:[#allocation2 + $0xa] sm:$0xff] }
 0x3f8   : > { %v3822_v40 = vpack.c.bf16 %v3791_v27, %v3790_v15  ;;  %v3808_v15 = vld [vmem:[#allocation2 + $0xda] sm:$0xff]  ;;  %v3809_v27 = vld [vmem:[#allocation2 + $0xe2] sm:$0xff] }
 0x3fe   : > { %13468 = vmatmul.mubr.msk.bf16.vlgmr.msra.gmra.mrb[4].mxu0 %vm648_vm0, %v17840_v59 }
 0x3ff   : > { %13500 = vmatpush3.bf16.msra.mxu0 %v17778_v28  ;;  %13471 = vmatprep.mubr.msk.bf16.mxu0 %vm648_vm0, %v17842_v24  ;;  %v3253_v28 = vld [vmem:[#allocation2 + $0x78] sm:$0xff] }
 0x400   : > { %13501 = vmatprep.subr.bf16.mxu0 %v15694_v19  ;;  %v17860_v62 = vpack.c.bf16 %v3254_v11, %v3253_v28  ;;  %v15696_v28 = vld [vmem:[#allocation9 + $0x38] sm:$0xff]   ;;  %v17907_v11 = vpack.c.bf16 %v3795_v61, %v3794_v37  ;;  %v3813_v37 = vld [vmem:[#allocation2 + $0x112] sm:$0xff]  ;;  %v3814_v61 = vld [vmem:[#allocation2 + $0x122] sm:$0xff] }
 0x403   : > { %13502 = vmatpush3.bf16.msra.mxu0 %v15694_v19  ;;  %v3792_v19 = vld [vmem:[#allocation2 + $0x1a] sm:$0xff] }
 0x404   : > { %13535 = vmatprep.subr.bf16.mxu0 %v17849_v9  ;;  %v17905_v7 = vpack.c.bf16 %v3793_v8, %v3792_v19  ;;  %v17940_v19 = vpack.c.bf16 %v3811_v43, %v3810_v35  ;;  %v3812_v8 = vld [vmem:[#allocation2 + $0x10a] sm:$0xff]  ;;  %v15700_v35 = vld [vmem:[#allocation9 + $0x58] sm:$0xff]   ;;  %v15701_v43 = vld [vmem:[#allocation9 + $0x60] sm:$0xff]  }
 0x405   : > { %v17946_v33 = vpack.c.bf16 %v3813_v37, %v3812_v8  ;;  %v5332_v8 = vld [vmem:[#allocation2 + $0xb1] sm:$0xff]  ;;  %v5333_v37 = vld [vmem:[#allocation2 + $0xc1] sm:$0xff] }
 0x406   : > { %13472 = vmatmul.mubr.msk.bf16.gmra.mrb[8].mxu0 %vm648_vm0, %v17851_v18 }
 0x407   : > { %13475 = vmatprep.mubr.msk.bf16.mxu0 %vm648_vm0, %v17854_v42 }
 0x40e   : > { %13476 = vmatmul.mubr.msk.bf16.gmra.mrb[12].mxu0 %vm648_vm0, %v17860_v62 }
 0x40f   : > { %13479 = vmatprep.mubr.msk.bf16.mxu0 %vm648_vm0, %v17862_v52 }
 0x416   : > { %13480 = vmatmul.mubr.msk.bf16.gmra.mrb[16].mxu0 %vm648_vm0, %v17868_v34 }
 0x417   : > { %13483 = vmatprep.mubr.msk.bf16.mxu0 %vm648_vm0, %v17870_v25 }
 0x41e   : > { %13484 = vmatmul.mubr.msk.bf16.gmra.mrb[20].mxu0 %vm648_vm0, %v17876_v63 }
 0x41f   : > { %13487 = vmatprep.mubr.msk.bf16.mxu0 %vm648_vm0, %v17878_v36 }
 0x426   : > { %13488 = vmatmul.mubr.msk.bf16.gmra.mrb[24].mxu0 %vm648_vm0, %v17884_v6 }
 0x427   : > { %13491 = vmatprep.mubr.msk.bf16.mxu0 %vm648_vm0, %v17886_v57 }
 0x42e   : > { %13492 = vmatmul.mubr.msk.bf16.gmra.mrb[28].mxu0 %vm648_vm0, %v17892_v12 }
 0x42f   : > { %13495 = vmatprep.mubr.msk.bf16.mxu0 %vm648_vm0, %v17894_v32 }
 0x436   : > { %13496 = vmatmul.mubr.msk.bf16.gmra.mrb[32].mxu0 %vm648_vm0, %v17900_v5 }
 0x437   : > { %13503 = vmatprep.mubr.msk.bf16.mxu0 %vm648_vm0, %v3822_v40  ;;  %v17938_v40 = vpack.c.bf16 %v3809_v27, %v3808_v15  ;;  %v15699_v15 = vld [vmem:[#allocation9 + $0x50] sm:$0xff]  }
 0x43e   : > { %13504 = vmatmul.mubr.msk.bf16.vlgmr.msra.gmra.mrb[4].mxu0 %vm648_vm0, %v17905_v7 }
 0x43f   : > { %13536 = vmatpush3.bf16.msra.mxu0 %v17849_v9  ;;  %13507 = vmatprep.mubr.msk.bf16.mxu0 %vm648_vm0, %v17907_v11  ;;  %v3800_v9 = vld [vmem:[#allocation2 + $0x7a] sm:$0xff] }
 0x440   : > { %13537 = vmatprep.subr.bf16.mxu0 %v15696_v28  ;;  %v17922_v16 = vpack.c.bf16 %v3801_v21, %v3800_v9  ;;  %v3818_v9 = vld [vmem:[#allocation2 + $0x152] sm:$0xff]  ;;  %v3819_v21 = vld [vmem:[#allocation2 + $0x15a] sm:$0xff] }
 0x441   : > { %v17956_v45 = vpack.c.bf16 %v3819_v21, %v3818_v9  ;;  %v5336_v9 = vld [vmem:[#allocation2 + $0xe1] sm:$0xff]  ;;  %v5337_v21 = vld [vmem:[#allocation2 + $0xf1] sm:$0xff] }
 0x442   : > { %v5360_v55 = vpack.c.bf16 %v5336_v9, %v5335_v56 }
 0x443   : > { %13538 = vmatpush3.bf16.msra.mxu0 %v15696_v28  ;;  %v3815_v28 = vld [vmem:[#allocation2 + $0x12a] sm:$0xff] }
 0x444   : > { %13571 = vmatprep.subr.bf16.mxu0 %v15697_v44  ;;  %v17948_v53 = vpack.c.bf16 %v3815_v28, %v3814_v61  ;;  %v5334_v61 = vld [vmem:[#allocation2 + $0xc9] sm:$0xff] }
 0x445   : > { %v5359_v51 = vpack.c.bf16 %v5334_v61, %v5333_v37 }
 0x446   : > { %13508 = vmatmul.mubr.msk.bf16.gmra.mrb[8].mxu0 %vm648_vm0, %v17914_v39 }
 0x447   : > { %13511 = vmatprep.mubr.msk.bf16.mxu0 %vm648_vm0, %v17916_v22 }
 0x44e   : > { %13512 = vmatmul.mubr.msk.bf16.gmra.mrb[12].mxu0 %vm648_vm0, %v17922_v16 }
 0x44f   : > { %13515 = vmatprep.mubr.msk.bf16.mxu0 %vm648_vm0, %v17924_v0 }
 0x456   : > { %13516 = vmatmul.mubr.msk.bf16.gmra.mrb[16].mxu0 %vm648_vm0, %v17930_v49 }
 0x457   : > { %13519 = vmatprep.mubr.msk.bf16.mxu0 %vm648_vm0, %v17932_v38 }
 0x45e   : > { %13520 = vmatmul.mubr.msk.bf16.gmra.mrb[20].mxu0 %vm648_vm0, %v17938_v40 }
 0x45f   : > { %13523 = vmatprep.mubr.msk.bf16.mxu0 %vm648_vm0, %v17940_v19 }
 0x466   : > { %13524 = vmatmul.mubr.msk.bf16.gmra.mrb[24].mxu0 %vm648_vm0, %v17946_v33 }
 0x467   : > { %13527 = vmatprep.mubr.msk.bf16.mxu0 %vm648_vm0, %v17948_v53 }
 0x46e   : > { %13528 = vmatmul.mubr.msk.bf16.gmra.mrb[28].mxu0 %vm648_vm0, %v17954_v41 }
 0x46f   : > { %13531 = vmatprep.mubr.msk.bf16.mxu0 %vm648_vm0, %v17956_v45 }
 0x476   : > { %13532 = vmatmul.mubr.msk.bf16.gmra.mrb[32].mxu0 %vm648_vm0, %v17962_v4 }
 0x477   : > { %13539 = vmatprep.mubr.msk.bf16.mxu0 %vm648_vm0, %v17840_v59  ;;  %v4126_v59 = vld [vmem:[#allocation2 + $0x180] sm:$0xff] }
 0x47e   : > { %13540 = vmatmul.mubr.msk.bf16.vlgmr.msra.gmra.mrb[4].mxu0 %vm648_vm0, %v17842_v24 }
 0x47f   : > { %13572 = vmatpush3.bf16.msra.mxu0 %v15697_v44  ;;  %13543 = vmatprep.mubr.msk.bf16.mxu0 %vm648_vm0, %v17851_v18  ;;  %v4127_v44 = vld [vmem:[#allocation2 + $0x188] sm:$0xff] }
 0x480   : > { %13573 = vmatprep.subr.bf16.mxu0 %v15698_v20  ;;  %v17996_v27 = vpack.c.bf16 %v4127_v44, %v4126_v59  ;;  %v5340_v59 = vld [vmem:[#allocation2 + $0x111] sm:$0xff]  ;;  %v5341_v44 = vld [vmem:[#allocation2 + $0x121] sm:$0xff] }
 0x483   : > { %13574 = vmatpush3.bf16.msra.mxu0 %v15698_v20  ;;  %v5361_v20 = vpack.c.bf16 %v5338_v17, %v5337_v21 }
 0x484   : > { %13607 = vmatprep.subr.bf16.mxu0 %v15699_v15 }
 0x486   : > { %13544 = vmatmul.mubr.msk.bf16.gmra.mrb[8].mxu0 %vm648_vm0, %v17854_v42 }
 0x487   : > { %13547 = vmatprep.mubr.msk.bf16.mxu0 %vm648_vm0, %v17860_v62 }
 0x48e   : > { %13548 = vmatmul.mubr.msk.bf16.gmra.mrb[12].mxu0 %vm648_vm0, %v17862_v52 }
 0x48f   : > { %13551 = vmatprep.mubr.msk.bf16.mxu0 %vm648_vm0, %v17868_v34 }
 0x496   : > { %13552 = vmatmul.mubr.msk.bf16.gmra.mrb[16].mxu0 %vm648_vm0, %v17870_v25 }
 0x497   : > { %13555 = vmatprep.mubr.msk.bf16.mxu0 %vm648_vm0, %v17876_v63 }
 0x49e   : > { %13556 = vmatmul.mubr.msk.bf16.gmra.mrb[20].mxu0 %vm648_vm0, %v17878_v36 }
 0x49f   : > { %13559 = vmatprep.mubr.msk.bf16.mxu0 %vm648_vm0, %v17884_v6 }
 0x4a6   : > { %13560 = vmatmul.mubr.msk.bf16.gmra.mrb[24].mxu0 %vm648_vm0, %v17886_v57 }
 0x4a7   : > { %13563 = vmatprep.mubr.msk.bf16.mxu0 %vm648_vm0, %v17892_v12 }
 0x4ae   : > { %13564 = vmatmul.mubr.msk.bf16.gmra.mrb[28].mxu0 %vm648_vm0, %v17894_v32 }
 0x4af   : > { %13567 = vmatprep.mubr.msk.bf16.mxu0 %vm648_vm0, %v17900_v5 }
 0x4b6   : > { %13568 = vmatmul.mubr.msk.bf16.gmra.mrb[32].mxu0 %vm648_vm0, %v17996_v27 }
 0x4b7   : > { %13575 = vmatprep.mubr.msk.bf16.mxu0 %vm648_vm0, %v17763_v31  ;;  %v4432_v31 = vld [vmem:[#allocation2 + $0x181] sm:$0xff] }
 0x4be   : > { %13576 = vmatmul.mubr.msk.bf16.vlgmr.msra.gmra.mrb[4].mxu0 %vm648_vm0, %v17770_v48  ;;  %v4433_v48 = vld [vmem:[#allocation2 + $0x189] sm:$0xff] }
 0x4bf   : > { %13608 = vmatpush3.bf16.msra.mxu0 %v15699_v15  ;;  %13579 = vmatprep.mubr.msk.bf16.mxu0 %vm648_vm0, %v17780_v50  ;;  %v18030_v50 = vpack.c.bf16 %v4433_v48, %v4432_v31  ;;  %v5339_v15 = vld [vmem:[#allocation2 + $0x109] sm:$0xff]  ;;  %v5343_v31 = vld [vmem:[#allocation2 + $0x139] sm:$0xff]  ;;  %v5344_v48 = vld [vmem:[#allocation2 + $0x141] sm:$0xff] }
 0x4c0   : > { %13609 = vmatprep.subr.bf16.mxu0 %v15700_v35 }
 0x4c3   : > { %13610 = vmatpush3.bf16.msra.mxu0 %v15700_v35  ;;  %v5362_v35 = vpack.c.bf16 %v5340_v59, %v5339_v15 }
 0x4c4   : > { %13643 = vmatprep.subr.bf16.mxu0 %v15701_v43 }
 0x4c6   : > { %13580 = vmatmul.mubr.msk.bf16.gmra.mrb[8].mxu0 %vm648_vm0, %v17783_v54  ;;  %v15702_v54 = vld [vmem:[#allocation9 + $0x68] sm:$0xff]  }
 0x4c7   : > { %13583 = vmatprep.mubr.msk.bf16.mxu0 %vm648_vm0, %v17790_v30  ;;  %v15703_v30 = vld [vmem:[#allocation9 + $0x70] sm:$0xff]  }
 0x4ce   : > { %13584 = vmatmul.mubr.msk.bf16.gmra.mrb[12].mxu0 %vm648_vm0, %v17794_v46  ;;  %v4738_v46 = vld [vmem:[#allocation2 + $0x182] sm:$0xff] }
 0x4cf   : > { %13587 = vmatprep.mubr.msk.bf16.mxu0 %vm648_vm0, %v17803_v10  ;;  %v4739_v10 = vld [vmem:[#allocation2 + $0x18a] sm:$0xff] }
 0x4d6   : > { %13588 = vmatmul.mubr.msk.bf16.gmra.mrb[16].mxu0 %vm648_vm0, %v17805_v3  ;;  %v18064_v3 = vpack.c.bf16 %v4739_v10, %v4738_v46  ;;  %v5364_v46 = vpack.c.bf16 %v5344_v48, %v5343_v31 }
 0x4d7   : > { %13591 = vmatprep.mubr.msk.bf16.mxu0 %vm648_vm0, %v17811_v47  ;;  %v15704_v47 = vld [vmem:[#allocation9 + $0x78] sm:$0xff]  }
 0x4de   : > { %13592 = vmatmul.mubr.msk.bf16.gmra.mrb[20].mxu0 %vm648_vm0, %v17813_v26  ;;  %v15705_v26 = vld [vmem:[#allocation9 + $0x80] sm:$0xff]  }
 0x4df   : > { %13595 = vmatprep.mubr.msk.bf16.mxu0 %vm648_vm0, %v17819_v29  ;;  %v5045_v29 = vld [vmem:[#allocation2 + $0x198] sm:$0xff] }
 0x4e6   : > { %13596 = vmatmul.mubr.msk.bf16.gmra.mrb[24].mxu0 %vm648_vm0, %v17821_v23  ;;  %v5046_v23 = vld [vmem:[#allocation2 + $0x1a0] sm:$0xff] }
 0x4e7   : > { %13599 = vmatprep.mubr.msk.bf16.mxu0 %vm648_vm0, %v17827_v1  ;;  %v5062_v1 = vpack.c.bf16 %v5046_v23, %v5045_v29  ;;  %v5351_v23 = vld [vmem:[#allocation2 + $0x199] sm:$0xff] }
 0x4ee   : > { %13600 = vmatmul.mubr.msk.bf16.gmra.mrb[28].mxu0 %vm648_vm0, %v17829_v2  ;;  %v5321_v2 = vld [vmem:[#allocation2 + $0x31] sm:$0xff] }
 0x4ef   : > { %13603 = vmatprep.mubr.msk.bf16.mxu0 %vm648_vm0, %v17835_v14  ;;  %v5322_v14 = vld [vmem:[#allocation2 + $0x39] sm:$0xff] }
 0x4f6   : > { %13604 = vmatmul.mubr.msk.bf16.gmra.mrb[32].mxu0 %vm648_vm0, %v18030_v50 }
 0x4f7   : > { %13611 = vmatprep.mubr.msk.bf16.mxu0 %vm648_vm0, %v17905_v7  ;;  %v5331_v7 = vld [vmem:[#allocation2 + $0xa9] sm:$0xff] }
 0x4f8   : > { %v5358_v28 = vpack.c.bf16 %v5332_v8, %v5331_v7 }
 0x4fe   : > { %13612 = vmatmul.mubr.msk.bf16.vlgmr.msra.gmra.mrb[4].mxu0 %vm648_vm0, %v17907_v11 }
 0x4ff   : > { %13644 = vmatpush3.bf16.msra.mxu0 %v15701_v43  ;;  %13615 = vmatprep.mubr.msk.bf16.mxu0 %vm648_vm0, %v17914_v39 }
 0x500   : > { %13645 = vmatprep.subr.bf16.mxu0 %v15702_v54 }
 0x503   : > { %13646 = vmatpush3.bf16.msra.mxu0 %v15702_v54  ;;  %v5345_v54 = vld [vmem:[#allocation2 + $0x151] sm:$0xff] }
 0x504   : > { %13679 = vmatprep.subr.bf16.mxu0 %v15703_v30 }
 0x506   : > { %13616 = vmatmul.mubr.msk.bf16.gmra.mrb[8].mxu0 %vm648_vm0, %v17916_v22 }
 0x507   : > { %13619 = vmatprep.mubr.msk.bf16.mxu0 %vm648_vm0, %v17922_v16 }
 0x50e   : > { %13620 = vmatmul.mubr.msk.bf16.gmra.mrb[12].mxu0 %vm648_vm0, %v17924_v0 }
 0x50f   : > { %13623 = vmatprep.mubr.msk.bf16.mxu0 %vm648_vm0, %v17930_v49 }
 0x516   : > { %13624 = vmatmul.mubr.msk.bf16.gmra.mrb[16].mxu0 %vm648_vm0, %v17932_v38 }
 0x517   : > { %13627 = vmatprep.mubr.msk.bf16.mxu0 %vm648_vm0, %v17938_v40 }
 0x51e   : > { %13628 = vmatmul.mubr.msk.bf16.gmra.mrb[20].mxu0 %vm648_vm0, %v17940_v19 }
 0x51f   : > { %13631 = vmatprep.mubr.msk.bf16.mxu0 %vm648_vm0, %v17946_v33 }
 0x526   : > { %13632 = vmatmul.mubr.msk.bf16.gmra.mrb[24].mxu0 %vm648_vm0, %v17948_v53 }
 0x527   : > { %13635 = vmatprep.mubr.msk.bf16.mxu0 %vm648_vm0, %v17954_v41 }
 0x52e   : > { %13636 = vmatmul.mubr.msk.bf16.gmra.mrb[28].mxu0 %vm648_vm0, %v17956_v45 }
 0x52f   : > { %13639 = vmatprep.mubr.msk.bf16.mxu0 %vm648_vm0, %v17962_v4 }
 0x536   : > { %13640 = vmatmul.mubr.msk.bf16.gmra.mrb[32].mxu0 %vm648_vm0, %v18064_v3 }
 0x537   : > { %13647 = vmatprep.mubr.msk.bf16.mxu0 %vm648_vm0, %v17842_v24  ;;  %v5353_v24 = vpack.c.bf16 %v5322_v14, %v5321_v2 }
 0x53e   : > { %13648 = vmatmul.mubr.msk.bf16.vlgmr.msra.gmra.mrb[4].mxu0 %vm648_vm0, %v17851_v18  ;;  %v5323_v18 = vld [vmem:[#allocation2 + $0x49] sm:$0xff] }
 0x53f   : > { %13680 = vmatpush3.bf16.msra.mxu0 %v15703_v30  ;;  %13651 = vmatprep.mubr.msk.bf16.mxu0 %vm648_vm0, %v17854_v42  ;;  %v5324_v42 = vld [vmem:[#allocation2 + $0x51] sm:$0xff]  ;;  %v5346_v30 = vld [vmem:[#allocation2 + $0x159] sm:$0xff] }
 0x540   : > { %13681 = vmatprep.subr.bf16.mxu0 %v15704_v47  ;;  %v5365_v10 = vpack.c.bf16 %v5346_v30, %v5345_v54 }
 0x543   : > { %13682 = vmatpush3.bf16.msra.mxu0 %v15704_v47  ;;  %v5347_v47 = vld [vmem:[#allocation2 + $0x169] sm:$0xff] }
 0x544   : > { %13715 = vmatprep.subr.bf16.mxu0 %v15705_v26 }
 0x546   : > { %13652 = vmatmul.mubr.msk.bf16.gmra.mrb[8].mxu0 %vm648_vm0, %v17860_v62  ;;  %v5325_v62 = vld [vmem:[#allocation2 + $0x61] sm:$0xff] }
 0x547   : > { %13655 = vmatprep.mubr.msk.bf16.mxu0 %vm648_vm0, %v17862_v52  ;;  %v5326_v52 = vld [vmem:[#allocation2 + $0x69] sm:$0xff] }
 0x54e   : > { %13656 = vmatmul.mubr.msk.bf16.gmra.mrb[12].mxu0 %vm648_vm0, %v17868_v34  ;;  %v5354_v34 = vpack.c.bf16 %v5324_v42, %v5323_v18  ;;  %v5980_v18 = vld [vmem:[%s20065_s23 + $0x38] sm:$0xff] }
 0x54f   : > { %13659 = vmatprep.mubr.msk.bf16.mxu0 %vm648_vm0, %v17870_v25  ;;  %v15706_v25 = vld [vmem:[#allocation9 + $0x88] sm:$0xff]  }
 0x556   : > { %13660 = vmatmul.mubr.msk.bf16.gmra.mrb[16].mxu0 %vm648_vm0, %v17876_v63  ;;  %v5355_v63 = vpack.c.bf16 %v5326_v52, %v5325_v62  ;;  %v6195_v52 = vand.u32 4294901760, %v5980_v18 }
 0x557   : > { %13663 = vmatprep.mubr.msk.bf16.mxu0 %vm648_vm0, %v17878_v36  ;;  %v5327_v36 = vld [vmem:[#allocation2 + $0x79] sm:$0xff] }
 0x55e   : > { %13664 = vmatmul.mubr.msk.bf16.gmra.mrb[20].mxu0 %vm648_vm0, %v17884_v6  ;;  %v5328_v6 = vld [vmem:[#allocation2 + $0x81] sm:$0xff] }
 0x55f   : > { %13667 = vmatprep.mubr.msk.bf16.mxu0 %vm648_vm0, %v17886_v57  ;;  %v5329_v57 = vld [vmem:[#allocation2 + $0x91] sm:$0xff] }
 0x566   : > { %13668 = vmatmul.mubr.msk.bf16.gmra.mrb[24].mxu0 %vm648_vm0, %v17892_v12  ;;  %v5330_v12 = vld [vmem:[#allocation2 + $0x99] sm:$0xff] }
 0x567   : > { %13671 = vmatprep.mubr.msk.bf16.mxu0 %vm648_vm0, %v17894_v32  ;;  %v5356_v32 = vpack.c.bf16 %v5328_v6, %v5327_v36 }
 0x56e   : > { %13672 = vmatmul.mubr.msk.bf16.gmra.mrb[28].mxu0 %vm648_vm0, %v17900_v5  ;;  %v5357_v5 = vpack.c.bf16 %v5330_v12, %v5329_v57 }
 0x56f   : > { %13675 = vmatprep.mubr.msk.bf16.mxu0 %vm648_vm0, %v17996_v27  ;;  %v5342_v27 = vld [vmem:[#allocation2 + $0x129] sm:$0xff] }
 0x570   : > { %v5363_v43 = vpack.c.bf16 %v5342_v27, %v5341_v44  ;;  %v18229_v27 = vsub.f32 %v5980_v18, %v6195_v52 }
 0x572   : > { %v6308_v48 = vand.u32 4294901760, %v18229_v27 }
 0x576   : > { %13676 = vmatmul.mubr.msk.bf16.gmra.mrb[32].mxu0 %vm648_vm0, %v5062_v1  ;;  %v5352_v1 = vld [vmem:[#allocation2 + $0x1a1] sm:$0xff] }
 0x577   : > { %13683 = vmatprep.mubr.msk.bf16.mxu0 %vm648_vm0, %v5353_v24  ;;  %v5368_v2 = vpack.c.bf16 %v5352_v1, %v5351_v23  ;;  %v5979_v24 = vld [vmem:[%s20065_s23 + $0x30] sm:$0xff] }
 0x578   : > { %v6192_v62 = vand.u32 4294901760, %v5979_v24 }
 0x57a   : > { %v18227_v44 = vsub.f32 %v5979_v24, %v6192_v62 }
 0x57c   : > { %v6301_v31 = vand.u32 4294901760, %v18227_v44 }
 0x57e   : > { %13684 = vmatmul.mubr.msk.bf16.vlgmr.msra.gmra.mrb[4].mxu0 %vm648_vm0, %v5354_v34  ;;  %v18190_v34 = vpack.c.bf16 %v6195_v52, %v6192_v62 }
 0x57f   : > { %13716 = vmatpush3.bf16.msra.mxu0 %v15705_v26  ;;  %13687 = vmatprep.mubr.msk.bf16.mxu0 %vm648_vm0, %v5355_v63  ;;  %v5348_v26 = vld [vmem:[#allocation2 + $0x171] sm:$0xff] }
 0x580   : > { %13717 = vmatprep.subr.bf16.mxu0 %v15706_v25  ;;  %v5366_v29 = vpack.c.bf16 %v5348_v26, %v5347_v47  ;;  %20066 = vst [vmem:[#allocation29_spill] sm:$0xff] %v18190_v34 }
 0x583   : > { %13718 = vmatpush3.bf16.msra.mxu0 %v15706_v25 }
 0x586   : > { %13688 = vmatmul.mubr.msk.bf16.gmra.mrb[8].mxu0 %vm648_vm0, %v5356_v32 }
 0x587   : > { %13691 = vmatprep.mubr.msk.bf16.mxu0 %vm648_vm0, %v5357_v5 }
 0x58e   : > { %13692 = vmatmul.mubr.msk.bf16.gmra.mrb[12].mxu0 %vm648_vm0, %v5358_v28 }
 0x58f   : > { %13695 = vmatprep.mubr.msk.bf16.mxu0 %vm648_vm0, %v5359_v51 }
 0x596   : > { %13696 = vmatmul.mubr.msk.bf16.gmra.mrb[16].mxu0 %vm648_vm0, %v5360_v55 }
 0x597   : > { %13699 = vmatprep.mubr.msk.bf16.mxu0 %vm648_vm0, %v5361_v20 }
 0x59e   : > { %13700 = vmatmul.mubr.msk.bf16.gmra.mrb[20].mxu0 %vm648_vm0, %v5362_v35 }
 0x59f   : > { %13703 = vmatprep.mubr.msk.bf16.mxu0 %vm648_vm0, %v5363_v43 }
 0x5a6   : > { %13704 = vmatmul.mubr.msk.bf16.gmra.mrb[24].mxu0 %vm648_vm0, %v5364_v46  ;;  %v6302_v46 = vsub.f32 %v18227_v44, %v6301_v31 }
 0x5a7   : > { %13707 = vmatprep.mubr.msk.bf16.mxu0 %vm648_vm0, %v5365_v10  ;;  %v6309_v10 = vsub.f32 %v18229_v27, %v6308_v48 }
 0x5a8   : > { %v6303_v26 = vand.u32 4294901760, %v6302_v46 }
 0x5ae   : > { %13708 = vmatmul.mubr.msk.bf16.gmra.mrb[28].mxu0 %vm648_vm0, %v5366_v29  ;;  %v6310_v29 = vand.u32 4294901760, %v6309_v10 }
 0x5af   : > { %13711 = vmatprep.mubr.msk.bf16.mxu0 %vm648_vm0, %v18030_v50 }
 0x5b0   : > { %v18243_v1 = vpack.c.bf16 %v6310_v29, %v6303_v26 }
 0x5b6   : > { %13712 = vmatmul.mubr.msk.bf16.gmra.mrb[32].mxu0 %vm648_vm0, %v5368_v2 }
 0x5b7   : > { %13719 = vmatprep.mubr.msk.bf16.mxu0 %vm648_vm0, %v17907_v11  ;;  %v5657_v11 = vld [vmem:[#allocation2 + $0x19a] sm:$0xff] }
 0x5be   : > { %13720 = vmatmul.mubr.msk.bf16.vlgmr.msra.gmra.mrb[4].mxu0 %vm648_vm0, %v17914_v39  ;;  %v5658_v39 = vld [vmem:[#allocation2 + $0x1a2] sm:$0xff] }
 0x5bf   : > { %13723 = vmatprep.mubr.msk.bf16.mxu0 %vm648_vm0, %v17916_v22  ;;  %v5674_v22 = vpack.c.bf16 %v5658_v39, %v5657_v11  ;;  %v18255_v39 = vpack.c.bf16 %v18229_v27, %v18227_v44 }
 0x5c6   : > { %13724 = vmatmul.mubr.msk.bf16.gmra.mrb[8].mxu0 %vm648_vm0, %v17922_v16  ;;  %v5973_v16 = vld [vmem:[%s20065_s23] sm:$0xff] }
 0x5c7   : > { %13727 = vmatprep.mubr.msk.bf16.mxu0 %vm648_vm0, %v17924_v0  ;;  %v5974_v0 = vld [vmem:[%s20065_s23 + $0x8] sm:$0xff] }
 0x5ce   : > { %13728 = vmatmul.mubr.msk.bf16.gmra.mrb[12].mxu0 %vm648_vm0, %v17930_v49  ;;  %v5975_v49 = vld [vmem:[%s20065_s23 + $0x10] sm:$0xff] }
 0x5cf   : > { %13731 = vmatprep.mubr.msk.bf16.mxu0 %vm648_vm0, %v17932_v38  ;;  %v6174_v38 = vand.u32 4294901760, %v5973_v16 }
 0x5d1   : > { %v18193_v25 = vsub.f32 %v5973_v16, %v6174_v38 }
 0x5d3   : > { %v6259_v36 = vand.u32 4294901760, %v18193_v25 }
 0x5d5   : > { %v6260_v32 = vsub.f32 %v18193_v25, %v6259_v36 }
 0x5d6   : > { %13732 = vmatmul.mubr.msk.bf16.gmra.mrb[16].mxu0 %vm648_vm0, %v17938_v40  ;;  %v6177_v40 = vand.u32 4294901760, %v5974_v0 }
 0x5d7   : > { %13735 = vmatprep.mubr.msk.bf16.mxu0 %vm648_vm0, %v17940_v19  ;;  %v5976_v19 = vld [vmem:[%s20065_s23 + $0x18] sm:$0xff]  ;;  %v6261_v37 = vand.u32 4294901760, %v6260_v32 }
 0x5d8   : > { %v18195_v63 = vsub.f32 %v5974_v0, %v6177_v40 }
 0x5da   : > { %v6266_v6 = vand.u32 4294901760, %v18195_v63  ;;  %v18241_v23 = vpack.c.bf16 %v18195_v63, %v18193_v25 }
 0x5dc   : > { %v6267_v5 = vsub.f32 %v18195_v63, %v6266_v6 }
 0x5de   : > { %13736 = vmatmul.mubr.msk.bf16.gmra.mrb[20].mxu0 %vm648_vm0, %v17946_v33  ;;  %v6180_v33 = vand.u32 4294901760, %v5975_v49  ;;  %v6268_v61 = vand.u32 4294901760, %v6267_v5 }
 0x5df   : > { %13739 = vmatprep.mubr.msk.bf16.mxu0 %vm648_vm0, %v17948_v53  ;;  %v6183_v53 = vand.u32 4294901760, %v5976_v19 }
 0x5e0   : > { %v18200_v57 = vsub.f32 %v5975_v49, %v6180_v33  ;;  %v18221_v21 = vpack.c.bf16 %v6268_v61, %v6261_v37 }
 0x5e1   : > { %v18176_v50 = vpack.c.bf16 %v6183_v53, %v6180_v33  ;;  %v18202_v12 = vsub.f32 %v5976_v19, %v6183_v53 }
 0x5e2   : > { %v6273_v7 = vand.u32 4294901760, %v18200_v57 }
 0x5e3   : > { %v6280_v8 = vand.u32 4294901760, %v18202_v12  ;;  %v18247_v2 = vpack.c.bf16 %v18202_v12, %v18200_v57 }
 0x5e4   : > { %v6274_v28 = vsub.f32 %v18200_v57, %v6273_v7 }
 0x5e5   : > { %v6281_v51 = vsub.f32 %v18202_v12, %v6280_v8 }
 0x5e6   : > { %13740 = vmatmul.mubr.msk.bf16.gmra.mrb[24].mxu0 %vm648_vm0, %v17954_v41  ;;  %v5977_v41 = vld [vmem:[%s20065_s23 + $0x20] sm:$0xff]  ;;  %v6275_v17 = vand.u32 4294901760, %v6274_v28 }
 0x5e7   : > { %13743 = vmatprep.mubr.msk.bf16.mxu0 %vm648_vm0, %v17956_v45  ;;  %v5978_v45 = vld [vmem:[%s20065_s23 + $0x28] sm:$0xff]  ;;  %v6282_v55 = vand.u32 4294901760, %v6281_v51 }
 0x5e8   : > { %v6189_v14 = vand.u32 4294901760, %v5978_v45 }
 0x5e9   : > { %v18225_v59 = vpack.c.bf16 %v6282_v55, %v6275_v17  ;;  %v18296_v55 = vpack.c.bf16 %v6266_v6, %v6259_v36 }
 0x5ea   : > { %v18219_v9 = vsub.f32 %v5978_v45, %v6189_v14 }
 0x5eb   : > { %20067 = vst [vmem:[#allocation30_spill] sm:$0xff] %v18296_v55 }
 0x5ec   : > { %v6294_v15 = vand.u32 4294901760, %v18219_v9 }
 0x5ee   : > { %13744 = vmatmul.mubr.msk.bf16.gmra.mrb[28].mxu0 %vm648_vm0, %v17962_v4  ;;  %v18173_v4 = vpack.c.bf16 %v6177_v40, %v6174_v38  ;;  %v6295_v43 = vsub.f32 %v18219_v9, %v6294_v15 }
 0x5ef   : > { %13747 = vmatprep.mubr.msk.bf16.mxu0 %vm648_vm0, %v18064_v3  ;;  %v6186_v3 = vand.u32 4294901760, %v5977_v41 }
 0x5f0   : > { %14653 = vmatpush3.bf16.msra.mxu1 %v18173_v4  ;;  %v6296_v30 = vand.u32 4294901760, %v6295_v43  ;;  %v18300_v43 = vpack.c.bf16 %v6280_v8, %v6273_v7 }
 0x5f1   : > { %14654 = vmatprep.subr.bf16.mxu1 %v20057_v13  ;;  %v18186_v42 = vpack.c.bf16 %v6189_v14, %v6186_v3  ;;  %v18217_v56 = vsub.f32 %v5977_v41, %v6186_v3 }
 0x5f2   : > { %20068 = vst [vmem:[#allocation27_spill] sm:$0xff] %v18300_v43 }
 0x5f3   : > { %v6287_v20 = vand.u32 4294901760, %v18217_v56  ;;  %v18251_v11 = vpack.c.bf16 %v18219_v9, %v18217_v56 }
 0x5f4   : > { %14656 = vmatpush3.bf16.msra.mxu1 %v18176_v50 }
 0x5f5   : > { %14657 = vmatprep.subr.bf16.mxu1 %v20057_v13  ;;  %v6288_v35 = vsub.f32 %v18217_v56, %v6287_v20  ;;  %v18310_v63 = vpack.c.bf16 %v6294_v15, %v6287_v20 }
 0x5f6   : > { %13748 = vmatmul.mubr.msk.bf16.gmra.mrb[32].mxu0 %vm648_vm0, %v5674_v22  ;;  %v18257_v22 = vld [vmem:[#allocation10] ss:$0 sm:$0xff] }
 0x5f7   : > { %v6289_v54 = vand.u32 4294901760, %v6288_v35  ;;  %20069 = vst [vmem:[#allocation25_spill] sm:$0xff] %v18310_v63 }
 0x5f8   : > { %14659 = vmatpush3.bf16.msra.mxu1 %v18186_v42 }
 0x5f9   : > { %14660 = vmatprep.subr.bf16.mxu1 %v20057_v13  ;;  %v18237_v47 = vpack.c.bf16 %v6296_v30, %v6289_v54 }
 0x5fc   : > { %14662 = vmatpush3.bf16.msra.mxu1 %v18190_v34 }
 0x5fd   : > { %14663 = vmatprep.subr.bf16.mxu1 %v20057_v13 }
 0x691   : > { %v13721_v16 = vpop.f32.mrb[4].mxu0 }
 0x692   : > { %v5774_v0 = vpop.f32.mrb[5].mxu0  ;;  %v18263_v19 = vadd.f32 %v13721_v16, %v18257_v22  ;;  %v18319_v16 = vpack.c.bf16 %v6308_v48, %v6301_v31 }
 0x693   : > { %v18260_v49 = vadd.f32 %v18257_v22, %v5774_v0  ;;  %v13722_v38 = vpop.f32.mrb[6].mxu0 }
 0x694   : > { %v5777_v40 = vpop.f32.mrb[7].mxu0  ;;  %v18271_v41 = vadd.f32 %v13722_v38, %v18257_v22  ;;  %v5989_v14 = vsel %vm5985_vm4, %v18263_v19, 0.0  ;;  %20070 = vst [vmem:[#allocation26_spill] sm:$0xff] %v18319_v16 }
 0x695   : > { %v18266_v33 = vadd.f32 %v18257_v22, %v5777_v40  ;;  %v5986_v53 = vsel %vm5985_vm4, %v18260_v49, 0.0 }
 0x696   : > { %v5991_v52 = vsel %vm5985_vm4, %v18271_v41, 0.0 }
 0x697   : > { %v5987_v45 = vsel %vm5985_vm4, %v18266_v33, 0.0 }
 0x698   : > { %v5988_v3 = vadd.f32 %v5987_v45, %v5986_v53 }
 0x699   : > { %v13725_v24 = vpop.f32.mrb[8].mxu0 }
 0x69a   : > { %v5990_v18 = vadd.f32 %v5989_v14, %v5988_v3  ;;  %v5790_v62 = vpop.f32.mrb[9].mxu0  ;;  %v18290_v9 = vadd.f32 %v13725_v24, %v18257_v22 }
 0x69b   : > { %v18280_v12 = vadd.f32 %v18257_v22, %v5790_v62  ;;  %v13726_v32 = vpop.f32.mrb[10].mxu0 }
 0x69c   : > { %v5992_v5 = vadd.f32 %v5991_v52, %v5990_v18  ;;  %v5793_v37 = vpop.f32.mrb[11].mxu0  ;;  %v5997_v30 = vsel %vm5985_vm4, %v18290_v9, 0.0  ;;  %v18305_v46 = vadd.f32 %v13726_v32, %v18257_v22 }
 0x69d   : > { %v5993_v61 = vsel %vm5985_vm4, %v18280_v12, 0.0  ;;  %v18285_v28 = vadd.f32 %v18257_v22, %v5793_v37 }
 0x69e   : > { %v5994_v51 = vadd.f32 %v5993_v61, %v5992_v5  ;;  %v5999_v36 = vsel %vm5985_vm4, %v18305_v46, 0.0 }
 0x69f   : > { %v5995_v56 = vsel %vm5985_vm4, %v18285_v28, 0.0 }
 0x6a0   : > { %v5996_v44 = vadd.f32 %v5995_v56, %v5994_v51 }
 0x6a1   : > { %v13729_v17 = vpop.f32.mrb[12].mxu0 }
 0x6a2   : > { %v5806_v27 = vpop.f32.mrb[13].mxu0  ;;  %v5998_v10 = vadd.f32 %v5997_v30, %v5996_v44  ;;  %v18324_v15 = vadd.f32 %v13729_v17, %v18257_v22 }
 0x6a3   : > { %v13730_v35 = vpop.f32.mrb[14].mxu0  ;;  %v18308_v25 = vadd.f32 %v18257_v22, %v5806_v27 }
 0x6a4   : > { %v5809_v54 = vpop.f32.mrb[15].mxu0  ;;  %v6000_v57 = vadd.f32 %v5999_v36, %v5998_v10  ;;  %v6005_v31 = vsel %vm5985_vm4, %v18324_v15, 0.0  ;;  %v18332_v48 = vadd.f32 %v13730_v35, %v18257_v22 }
 0x6a5   : > { %v6001_v8 = vsel %vm5985_vm4, %v18308_v25, 0.0  ;;  %v18317_v26 = vadd.f32 %v18257_v22, %v5809_v54 }
 0x6a6   : > { %v6002_v38 = vadd.f32 %v6001_v8, %v6000_v57  ;;  %v6007_v56 = vsel %vm5985_vm4, %v18332_v48, 0.0 }
 0x6a7   : > { %v6003_v20 = vsel %vm5985_vm4, %v18317_v26, 0.0 }
 0x6a8   : > { %v6004_v53 = vadd.f32 %v6003_v20, %v6002_v38 }
 0x6a9   : > { %v13733_v6 = vpop.f32.mrb[16].mxu0 }
 0x6aa   : > { %v5822_v7 = vpop.f32.mrb[17].mxu0  ;;  %v6006_v52 = vadd.f32 %v6005_v31, %v6004_v53 }
 0x6ab   : > { %v13734_v29 = vpop.f32.mrb[18].mxu0  ;;  %v18341_v32 = vadd.f32 %v18257_v22, %v5822_v7 }
 0x6ac   : > { %v5825_v0 = vpop.f32.mrb[19].mxu0  ;;  %v6008_v27 = vadd.f32 %v6007_v56, %v6006_v52 }
 0x6ad   : > { %v6009_v30 = vsel %vm5985_vm4, %v18341_v32, 0.0  ;;  %v18357_v10 = vadd.f32 %v18257_v22, %v5825_v0 }
 0x6af   : > { %v6011_v53 = vsel %vm5985_vm4, %v18357_v10, 0.0 }
 0x6b1   : > { %v13737_v40 = vpop.f32.mrb[20].mxu0 }
 0x6b2   : > { %v5838_v45 = vpop.f32.mrb[21].mxu0  ;;  %v18335_v18 = vadd.f32 %v13737_v40, %v18257_v22  ;;  %v6010_v40 = vadd.f32 %v6009_v30, %v6008_v27  ;;  %v18390_v30 = vadd.f32 %v13734_v29, %v18257_v22 }
 0x6b3   : > { %v18327_v3 = vadd.f32 %v18257_v22, %v5838_v45  ;;  %v13738_v14 = vpop.f32.mrb[22].mxu0 }
 0x6b4   : > { %v5841_v24 = vpop.f32.mrb[23].mxu0  ;;  %v18348_v61 = vadd.f32 %v13738_v14, %v18257_v22  ;;  %v6081_v17 = vsel %vm5985_vm4, %v18335_v18, 0.0  ;;  %v6015_v29 = vsel %vm5985_vm4, %v18390_v30, 0.0 }
 0x6b5   : > { %v18338_v62 = vadd.f32 %v18257_v22, %v5841_v24  ;;  %v6078_v5 = vsel %vm5985_vm4, %v18327_v3, 0.0  ;;  %v18375_v24 = vadd.f32 %v13733_v6, %v18257_v22 }
 0x6b6   : > { %v6083_v7 = vsel %vm5985_vm4, %v18348_v61, 0.0 }
 0x6b7   : > { %20071 = vst [vmem:[#allocation31_spill] sm:$0xff] %v18338_v62  ;;  %v6079_v37 = vsel %vm5985_vm4, %v18338_v62, 0.0  ;;  %v6013_v6 = vsel %vm5985_vm4, %v18375_v24, 0.0 }
 0x6b8   : > { %v6080_v51 = vadd.f32 %v6079_v37, %v6078_v5  ;;  %v6012_v37 = vadd.f32 %v6011_v53, %v6010_v40 }
 0x6b9   : > { %v13741_v44 = vpop.f32.mrb[24].mxu0 }
 0x6ba   : > { %v6082_v35 = vadd.f32 %v6081_v17, %v6080_v51  ;;  %v5854_v54 = vpop.f32.mrb[25].mxu0  ;;  %v18369_v45 = vadd.f32 %v13741_v44, %v18257_v22 }
 0x6bb   : > { %v18360_v36 = vadd.f32 %v18257_v22, %v5854_v54  ;;  %v13742_v57 = vpop.f32.mrb[26].mxu0 }
 0x6bc   : > { %v5857_v8 = vpop.f32.mrb[27].mxu0  ;;  %v6084_v38 = vadd.f32 %v6083_v7, %v6082_v35  ;;  %v18378_v31 = vadd.f32 %v13742_v57, %v18257_v22  ;;  %v6089_v17 = vsel %vm5985_vm4, %v18369_v45, 0.0 }
 0x6bd   : > { %v6085_v20 = vsel %vm5985_vm4, %v18360_v36, 0.0  ;;  %v18372_v14 = vadd.f32 %v18257_v22, %v5857_v8 }
 0x6be   : > { %v6086_v0 = vadd.f32 %v6085_v20, %v6084_v38  ;;  %v6091_v57 = vsel %vm5985_vm4, %v18378_v31, 0.0  ;;  %v6014_v38 = vadd.f32 %v6013_v6, %v6012_v37 }
 0x6bf   : > { %v6087_v52 = vsel %vm5985_vm4, %v18372_v14, 0.0 }
 0x6c0   : > { %v6088_v51 = vadd.f32 %v6087_v52, %v6086_v0 }
 0x6c1   : > { %v13745_v5 = vpop.f32.mrb[28].mxu0 }
 0x6c2   : > { %v5870_v56 = vpop.f32.mrb[29].mxu0  ;;  %v6090_v35 = vadd.f32 %v6089_v17, %v6088_v51  ;;  %v18400_v40 = vadd.f32 %v13745_v5, %v18257_v22 }
 0x6c3   : > { %v18385_v44 = vadd.f32 %v18257_v22, %v5870_v56  ;;  %v13746_v27 = vpop.f32.mrb[30].mxu0  ;;  %v6016_v56 = vadd.f32 %v6015_v29, %v6014_v38 }
 0x6c4   : > { %v5873_v54 = vpop.f32.mrb[31].mxu0  ;;  %v6092_v20 = vadd.f32 %v6091_v57, %v6090_v35  ;;  %v18407_v52 = vadd.f32 %v13746_v27, %v18257_v22  ;;  %v6097_v37 = vsel %vm5985_vm4, %v18400_v40, 0.0 }
 0x6c5   : > { %v6093_v7 = vsel %vm5985_vm4, %v18385_v44, 0.0  ;;  %v18397_v8 = vadd.f32 %v18257_v22, %v5873_v54  ;;  %v6017_v38 = vrot.slane %v6016_v56, 4 }
 0x6c6   : > { %v6094_v0 = vadd.f32 %v6093_v7, %v6092_v20  ;;  %v6099_v7 = vsel %vm5985_vm4, %v18407_v52, 0.0 }
 0x6c7   : > { %v6095_v53 = vsel %vm5985_vm4, %v18397_v8, 0.0 }
 0x6c8   : > { %v6096_v17 = vadd.f32 %v6095_v53, %v6094_v0 }
 0x6c9   : > { %v13749_v51 = vpop.f32.mrb[32].mxu0 }
 0x6ca   : > { %v5886_v54 = vpop.f32.mrb[33].mxu0  ;;  %v6098_v35 = vadd.f32 %v6097_v37, %v6096_v17  ;;  %v18422_v0 = vadd.f32 %v13749_v51, %v18257_v22  ;;  %v6018_v37 = vadd.f32 %v6017_v38, %v6016_v56  ;;  %v6025_v56 = vmul.f32 %v18266_v33, %v18266_v33 }
 0x6cb   : > { %v18412_v5 = vadd.f32 %v18257_v22, %v5886_v54  ;;  %v13750_v6 = vpop.f32.mrb[34].mxu0  ;;  %v6024_v38 = vmul.f32 %v18260_v49, %v18260_v49 }
 0x6cc   : > { %v5889_v57 = vpop.f32.mrb[35].mxu0  ;;  %v6100_v53 = vadd.f32 %v6099_v7, %v6098_v35  ;;  %v18427_v17 = vadd.f32 %v13750_v6, %v18257_v22  ;;  %v6105_v16 = vsel %vm5985_vm4, %v18422_v0, 0.0  ;;  %v6019_v35 = vrot.slane %v6018_v37, 2 }
 0x6cd   : > { %v6101_v27 = vsel %vm5985_vm4, %v18412_v5, 0.0  ;;  %v18419_v20 = vadd.f32 %v18257_v22, %v5889_v57 }
 0x6ce   : > { %v6102_v54 = vadd.f32 %v6101_v27, %v6100_v53  ;;  %v6107_v57 = vsel %vm5985_vm4, %v18427_v17, 0.0  ;;  %v6020_v43 = vadd.f32 %v6019_v35, %v6018_v37  ;;  %v6117_v27 = vmul.f32 %v18338_v62, %v18338_v62 }
 0x6cf   : > { %v6103_v29 = vsel %vm5985_vm4, %v18419_v20, 0.0  ;;  %v6118_v37 = vmul.f32 %v18335_v18, %v18335_v18  ;;  %v6026_v35 = vmul.f32 %v18263_v19, %v18263_v19 }
 0x6d0   : > { %v6104_v60 = vadd.f32 %v6103_v29, %v6102_v54  ;;  %v6021_v22 = vrot.slane %v6020_v43, 1  ;;  %v6041_v54 = vsel %vm5985_vm4, %v6025_v56, 0.0 }
 0x6d1   : > { %v6043_v56 = vsel %vm5985_vm4, %v6026_v35, 0.0 }
 0x6d2   : > { %v6106_v63 = vadd.f32 %v6105_v16, %v6104_v60  ;;  %v6116_v60 = vmul.f32 %v18327_v3, %v18327_v3  ;;  %v6022_v53 = vadd.f32 %v6021_v22, %v6020_v43  ;;  %v6135_v43 = vsel %vm5985_vm4, %v6118_v37, 0.0 }
 0x6d4   : > { %v6108_v7 = vadd.f32 %v6107_v57, %v6106_v63  ;;  %v6133_v63 = vsel %vm5985_vm4, %v6117_v27, 0.0  ;;  %v6119_v27 = vmul.f32 %v18348_v61, %v18348_v61 }
 0x6d6   : > { %v6109_v51 = vrot.slane %v6108_v7, 4 }
 0x6d8   : > { %v6110_v55 = vadd.f32 %v6109_v51, %v6108_v7  ;;  %v6040_v7 = vsel %vm5985_vm4, %v6024_v38, 0.0 }
 0x6d9   : > { %v6042_v51 = vadd.f32 %v6041_v54, %v6040_v7 }
 0x6da   : > { %v6111_v34 = vrot.slane %v6110_v55, 2 }
 0x6dc   : > { %v6112_v6 = vadd.f32 %v6111_v34, %v6110_v55  ;;  %v6132_v34 = vsel %vm5985_vm4, %v6116_v60, 0.0  ;;  %v6027_v60 = vmul.f32 %v18271_v41, %v18271_v41 }
 0x6dd   : > { %v6134_v55 = vadd.f32 %v6133_v63, %v6132_v34  ;;  %v6044_v63 = vadd.f32 %v6043_v56, %v6042_v51  ;;  %v6029_v51 = vmul.f32 %v18285_v28, %v18285_v28 }
 0x6de   : > { %v6113_v16 = vrot.slane %v6112_v6, 1  ;;  %v6045_v34 = vsel %vm5985_vm4, %v6027_v60, 0.0 }
 0x6df   : > { %v6046_v35 = vadd.f32 %v6045_v34, %v6044_v63  ;;  %v6049_v60 = vsel %vm5985_vm4, %v6029_v51, 0.0  ;;  %v6123_v34 = vmul.f32 %v18378_v31, %v18378_v31  ;;  %v6032_v51 = vmul.f32 %v18308_v25, %v18308_v25 }
 0x6e0   : > { %v6114_v29 = vadd.f32 %v6113_v16, %v6112_v6  ;;  %v6136_v6 = vadd.f32 %v6135_v43, %v6134_v55  ;;  %v6120_v16 = vmul.f32 %v18360_v36, %v18360_v36 }
 0x6e2   : > { %v6115_v57 = vadd.f32 %v6114_v29, %v6022_v53  ;;  %v6028_v53 = vmul.f32 %v18280_v12, %v18280_v12  ;;  %v6137_v29 = vsel %vm5985_vm4, %v6119_v27, 0.0  ;;  %v6139_v55 = vsel %vm5985_vm4, %v6120_v16, 0.0 }
 0x6e3   : > { %v6138_v37 = vadd.f32 %v6137_v29, %v6136_v6  ;;  %v6122_v16 = vmul.f32 %v18369_v45, %v18369_v45 }
 0x6e4   : > { %v6171_v62 = vsel %vm5985_vm4, %v6115_v57, 0  ;;  %v6121_v57 = vmul.f32 %v18372_v14, %v18372_v14  ;;  %v6047_v7 = vsel %vm5985_vm4, %v6028_v53, 0.0  ;;  %v6030_v53 = vmul.f32 %v18290_v9, %v18290_v9 }
 0x6e5   : > { %v18453_v22 = vand.u32 4294901760, %v6171_v62  ;;  %v6140_v27 = vadd.f32 %v6139_v55, %v6138_v37  ;;  %v6048_v56 = vadd.f32 %v6047_v7, %v6046_v35  ;;  %v6143_v37 = vsel %vm5985_vm4, %v6122_v16, 0.0 }
 0x6e6   : > { %v6141_v6 = vsel %vm5985_vm4, %v6121_v57, 0.0  ;;  %v6051_v57 = vsel %vm5985_vm4, %v6030_v53, 0.0  ;;  %v6124_v35 = vmul.f32 %v18385_v44, %v18385_v44  ;;  %v6033_v53 = vmul.f32 %v18317_v26, %v18317_v26 }
 0x6e7   : > { %v18461_v38 = vsub.f32 %v6171_v62, %v18453_v22  ;;  %v6142_v63 = vadd.f32 %v6141_v6, %v6140_v27  ;;  %v6050_v29 = vadd.f32 %v6049_v60, %v6048_v56  ;;  %v6125_v60 = vmul.f32 %v18397_v8, %v18397_v8 }
 0x6e8   : > { %v6147_v56 = vsel %vm5985_vm4, %v6124_v35, 0.0  ;;  %v6034_v35 = vmul.f32 %v18324_v15, %v18324_v15 }
 0x6e9   : > { %v6248_v54 = vand.u32 4294901760, %v18461_v38  ;;  %v6144_v55 = vadd.f32 %v6143_v37, %v6142_v63  ;;  %v6052_v7 = vadd.f32 %v6051_v57, %v6050_v29  ;;  %v6055_v63 = vsel %vm5985_vm4, %v6032_v51, 0.0 }
 0x6ea   : > { %v6149_v37 = vsel %vm5985_vm4, %v6125_v60, 0.0  ;;  %v6126_v57 = vmul.f32 %v18400_v40, %v18400_v40  ;;  %v6128_v60 = vmul.f32 %v18412_v5, %v18412_v5 }
 0x6eb   : > { %v6249_v62 = vsub.f32 %v18461_v38, %v6248_v54 }
 0x6ec   : > { %v6151_v51 = vsel %vm5985_vm4, %v6126_v57, 0.0 }
 0x6ed   : > { %v6250_v43 = vand.u32 4294901760, %v6249_v62  ;;  %v6031_v62 = vmul.f32 %v18305_v46, %v18305_v46 }
 0x6ef   : > { %13768 = vmatmul.mubr.f32.vlgmr.msra.gmra.mrb[4].mxu1 %v6250_v43  ;;  %v6145_v43 = vsel %vm5985_vm4, %v6123_v34, 0.0  ;;  %v6053_v6 = vsel %vm5985_vm4, %v6031_v62, 0.0 }
 0x6f0   : > { %14665 = vmatpush3.bf16.msra.mxu1 %v18221_v21  ;;  %13786 = vmatprep.mubr.msk.f32.mxu1 %vm16365_vm1, %v20056_v58  ;;  %v6146_v27 = vadd.f32 %v6145_v43, %v6144_v55  ;;  %v6054_v16 = vadd.f32 %v6053_v6, %v6052_v7  ;;  %v6057_v55 = vsel %vm5985_vm4, %v6033_v53, 0.0  ;;  %v6127_v43 = vmul.f32 %v18407_v52, %v18407_v52 }
 0x6f1   : > { %14666 = vmatprep.subr.bf16.mxu1 %v20057_v13  ;;  %v6059_v6 = vsel %vm5985_vm4, %v6034_v35, 0.0  ;;  %v6037_v35 = vmul.f32 %v18357_v10, %v18357_v10 }
 0x6f2   : > { %v6148_v29 = vadd.f32 %v6147_v56, %v6146_v27  ;;  %v6056_v34 = vadd.f32 %v6055_v63, %v6054_v16  ;;  %v6035_v56 = vmul.f32 %v18332_v48, %v18332_v48  ;;  %v6036_v63 = vmul.f32 %v18341_v32, %v18341_v32 }
 0x6f3   : > { %v6153_v53 = vsel %vm5985_vm4, %v6127_v43, 0.0 }
 0x6f4   : > { %14668 = vmatpush3.bf16.msra.mxu1 %v18225_v59  ;;  %v6150_v62 = vadd.f32 %v6149_v37, %v6148_v29  ;;  %v6058_v7 = vadd.f32 %v6057_v55, %v6056_v34  ;;  %v6061_v37 = vsel %vm5985_vm4, %v6035_v56, 0.0  ;;  %v6155_v34 = vsel %vm5985_vm4, %v6128_v60, 0.0 }
 0x6f5   : > { %14669 = vmatprep.subr.bf16.mxu1 %v20057_v13  ;;  %v6129_v55 = vmul.f32 %v18419_v20, %v18419_v20  ;;  %v6038_v60 = vmul.f32 %v18375_v24, %v18375_v24 }
 0x6f6   : > { %v6152_v27 = vadd.f32 %v6151_v51, %v6150_v62  ;;  %v6060_v16 = vadd.f32 %v6059_v6, %v6058_v7  ;;  %v6063_v62 = vsel %vm5985_vm4, %v6036_v63, 0.0  ;;  %v6130_v6 = vmul.f32 %v18422_v0, %v18422_v0 }
 0x6f7   : > { %v6157_v51 = vsel %vm5985_vm4, %v6129_v55, 0.0 }
 0x6f8   : > { %14671 = vmatpush3.bf16.msra.mxu1 %v18237_v47  ;;  %v6154_v29 = vadd.f32 %v6153_v53, %v6152_v27  ;;  %v6062_v57 = vadd.f32 %v6061_v37, %v6060_v16  ;;  %v6065_v27 = vsel %vm5985_vm4, %v6037_v35, 0.0  ;;  %v6159_v63 = vsel %vm5985_vm4, %v6130_v6, 0.0  ;;  %v20073_v6 = vld [vmem:[#allocation30_spill] sm:$0xff] }
 0x6f9   : > { %14672 = vmatprep.subr.bf16.mxu1 %v20057_v13  ;;  %v6131_v53 = vmul.f32 %v18427_v17, %v18427_v17  ;;  %v6067_v37 = vsel %vm5985_vm4, %v6038_v60, 0.0 }
 0x6fa   : > { %v6156_v7 = vadd.f32 %v6155_v34, %v6154_v29  ;;  %v6064_v43 = vadd.f32 %v6063_v62, %v6062_v57  ;;  %v6039_v34 = vmul.f32 %v18390_v30, %v18390_v30 }
 0x6fb   : > { %v6161_v57 = vsel %vm5985_vm4, %v6131_v53, 0.0 }
 0x6fc   : > { %14674 = vmatpush3.bf16.msra.mxu1 %v18243_v1  ;;  %v6158_v56 = vadd.f32 %v6157_v51, %v6156_v7  ;;  %v6066_v16 = vadd.f32 %v6065_v27, %v6064_v43  ;;  %v6069_v35 = vsel %vm5985_vm4, %v6039_v34, 0.0  ;;  %v20072_v51 = vld [vmem:[#allocation29_spill] sm:$0xff] }
 0x6fd   : > { %14675 = vmatprep.subr.bf16.mxu1 %v20057_v13 }
 0x6fe   : > { %v6160_v29 = vadd.f32 %v6159_v63, %v6158_v56  ;;  %v6068_v55 = vadd.f32 %v6067_v37, %v6066_v16  ;;  %v20074_v16 = vld [vmem:[#allocation27_spill] sm:$0xff]  ;;  %v20076_v37 = vld [vmem:[#allocation26_spill] sm:$0xff] }
 0x6ff   : > { %13787 = vmatmul.mubr.f32.vlgmr.msra.gmra.mrb[4].mxu1 %v18453_v22 }
 0x700   : > { %14677 = vmatpush3.bf16.msra.mxu1 %v18241_v23  ;;  %13805 = vmatprep.mubr.msk.f32.mxu1 %vm16365_vm1, %v20056_v58  ;;  %v6162_v62 = vadd.f32 %v6161_v57, %v6160_v29  ;;  %v6070_v7 = vadd.f32 %v6069_v35, %v6068_v55  ;;  %v20075_v29 = vld [vmem:[#allocation25_spill] sm:$0xff] }
 0x701   : > { %14678 = vmatprep.subr.bf16.mxu1 %v20057_v13 }
 0x702   : > { %v6163_v43 = vrot.slane %v6162_v62, 4  ;;  %v6071_v27 = vrot.slane %v6070_v7, 4 }
 0x704   : > { %14680 = vmatpush3.bf16.msra.mxu1 %v18247_v2  ;;  %v6164_v56 = vadd.f32 %v6163_v43, %v6162_v62  ;;  %v6072_v60 = vadd.f32 %v6071_v27, %v6070_v7 }
 0x705   : > { %14681 = vmatprep.subr.bf16.mxu1 %v20057_v13 }
 0x706   : > { %v6165_v63 = vrot.slane %v6164_v56, 2  ;;  %v6073_v53 = vrot.slane %v6072_v60, 2 }
 0x708   : > { %14683 = vmatpush3.bf16.msra.mxu1 %v18251_v11 }
 0x709   : > { %14684 = vmatprep.subr.bf16.mxu1 %v20057_v13 }
 0x70c   : > { %14686 = vmatpush3.bf16.msra.mxu1 %v18255_v39 }
 0x70d   : > { %14687 = vmatprep.subr.bf16.mxu1 %v20057_v13 }
 0x70f   : > { %13806 = vmatmul.mubr.f32.vlgmr.msra.gmra.mrb[4].mxu1 %v18461_v38  ;;  %v6166_v38 = vadd.f32 %v6165_v63, %v6164_v56 }
 0x710   : > { %14689 = vmatpush3.bf16.msra.mxu1 %v18173_v4  ;;  %13824 = vmatprep.mubr.msk.f32.mxu1 %vm16365_vm1, %v20056_v58 }
 0x711   : > { %14690 = vmatprep.subr.bf16.mxu1 %v20057_v13  ;;  %v6167_v34 = vrot.slane %v6166_v38, 1 }
 0x713   : > { %v6168_v57 = vadd.f32 %v6167_v34, %v6166_v38 }
 0x714   : > { %14692 = vmatpush3.bf16.msra.mxu1 %v18176_v50 }
 0x715   : > { %14693 = vmatprep.subr.bf16.mxu1 %v20057_v13 }
 0x718   : > { %14695 = vmatpush3.bf16.msra.mxu1 %v18186_v42 }
 0x719   : > { %14696 = vmatprep.subr.bf16.mxu1 %v20057_v13 }
 0x71c   : > { %14698 = vmatpush3.bf16.msra.mxu1 %v20072_v51 }
 0x71d   : > { %14699 = vmatprep.subr.bf16.mxu1 %v20057_v13 }
 0x71f   : > { %13825 = vmatmul.mubr.f32.vlgmr.msra.gmra.mrb[4].mxu1 %v6248_v54  ;;  %v6074_v54 = vadd.f32 %v6073_v53, %v6072_v60 }
 0x720   : > { %14701 = vmatpush3.bf16.msra.mxu1 %v20073_v6  ;;  %13843 = vmatprep.mubr.msk.f32.mxu1 %vm16365_vm1, %v20056_v58 }
 0x721   : > { %14702 = vmatprep.subr.bf16.mxu1 %v20057_v13  ;;  %v6075_v55 = vrot.slane %v6074_v54, 1 }
 0x723   : > { %v6076_v62 = vadd.f32 %v6075_v55, %v6074_v54 }
 0x724   : > { %14704 = vmatpush3.bf16.msra.mxu1 %v20074_v16 }
 0x725   : > { %14705 = vmatprep.subr.bf16.mxu1 %v20057_v13  ;;  %v6169_v35 = vadd.f32 %v6168_v57, %v6076_v62 }
 0x727   : > { %v6711_v7 = vsel %vm5985_vm4, %v6169_v35, 0 }
 0x728   : > { %14707 = vmatpush3.bf16.msra.mxu1 %v20075_v29  ;;  %v18595_v43 = vand.u32 4294901760, %v6711_v7 }
 0x729   : > { %14708 = vmatprep.subr.bf16.mxu1 %v20057_v13 }
 0x72a   : > { %v6787_v27 = vsub.f32 %v6711_v7, %v18595_v43 }
 0x72c   : > { %14710 = vmatpush3.bf16.msra.mxu1 %v20076_v37  ;;  %v6788_v56 = vand.u32 4294901760, %v6787_v27 }
 0x72d   : > { %14711 = vmatprep.subr.bf16.mxu1 %v20057_v13 }
 0x72e   : > { %v6789_v60 = vsub.f32 %v6787_v27, %v6788_v56 }
 0x72f   : > { %13844 = vmatmul.mubr.f32.vlgmr.msra.gmra.mrb[4].mxu1 %v18453_v22 }
 0x730   : > { %14713 = vmatpush3.bf16.msra.mxu1 %v18173_v4  ;;  %13862 = vmatprep.mubr.msk.f32.mxu1 %vm16365_vm1, %v20056_v58 }
 0x731   : > { %14714 = vmatprep.subr.bf16.mxu1 %v20057_v13 }
 0x734   : > { %14716 = vmatpush3.bf16.msra.mxu1 %v18176_v50 }
 0x735   : > { %14717 = vmatprep.subr.bf16.mxu1 %v20057_v13 }
 0x738   : > { %14719 = vmatpush3.bf16.msra.mxu1 %v18186_v42 }
 0x739   : > { %14720 = vmatprep.subr.bf16.mxu1 %v20057_v13 }
 0x73c   : > { %14722 = vmatpush3.bf16.msra.mxu1 %v20072_v51 }
 0x73d   : > { %14723 = vmatprep.subr.bf16.mxu1 %v20057_v13 }
 0x73f   : > { %13863 = vmatmul.mubr.f32.vlgmr.msra.gmra.mrb[4].mxu1 %v18453_v22  ;;  %v6790_v22 = vand.u32 4294901760, %v6789_v60 }
 0x740   : > { %14725 = vmatpush3.bf16.msra.mxu1 %v18173_v4  ;;  %13881 = vmatprep.mubr.msk.f32.mxu1 %vm16365_vm1, %v20056_v58 }
 0x741   : > { %14726 = vmatprep.subr.bf16.mxu1 %v20057_v13 }
 0x744   : > { %14728 = vmatpush3.bf16.msra.mxu1 %v18176_v50 }
 0x745   : > { %14729 = vmatprep.subr.bf16.mxu1 %v20057_v13 }
 0x748   : > { %14731 = vmatpush3.bf16.msra.mxu1 %v18186_v42 }
 0x749   : > { %14732 = vmatprep.subr.bf16.mxu1 %v20057_v13 }
 0x74c   : > { %14734 = vmatpush3.bf16.msra.mxu1 %v20072_v51 }
 0x74d   : > { %14735 = vmatprep.subr.bf16.mxu1 %v20057_v13 }
 0x74f   : > { %13882 = vmatmul.mubr.f32.vlgmr.msra.gmra.mrb[6].mxu1 %v6790_v22 }
 0x750   : > { %14737 = vmatpush3.bf16.msra.mxu1 %v18221_v21  ;;  %13900 = vmatprep.mubr.msk.f32.mxu1 %vm16365_vm1, %v20056_v58  ;;  %v5981_v21 = vld [vmem:[%s20077_s26] sm:$0xff] }
 0x751   : > { %14738 = vmatprep.subr.bf16.mxu1 %v20057_v13 }
 0x754   : > { %14740 = vmatpush3.bf16.msra.mxu1 %v18225_v59  ;;  %v5983_v59 = vld [vmem:[%s20077_s26 + $0x10] sm:$0xff] }
 0x755   : > { %14741 = vmatprep.subr.bf16.mxu1 %v20057_v13 }
 0x758   : > { %14743 = vmatpush3.bf16.msra.mxu1 %v18237_v47  ;;  %v7261_v47 = vand.u32 4294901760, %v5981_v21 }
 0x759   : > { %14744 = vmatprep.subr.bf16.mxu1 %v20057_v13 }
 0x75c   : > { %14746 = vmatpush3.bf16.msra.mxu1 %v18243_v1 }
 0x75d   : > { %14747 = vmatprep.subr.bf16.mxu1 %v20057_v13 }
 0x75f   : > { %13901 = vmatmul.mubr.f32.vlgmr.msra.gmra.mrb[6].mxu1 %v18595_v43 }
 0x760   : > { %14749 = vmatpush3.bf16.msra.mxu1 %v18241_v23  ;;  %13919 = vmatprep.mubr.msk.f32.mxu1 %vm16365_vm1, %v20056_v58  ;;  %v7267_v23 = vand.u32 4294901760, %v5983_v59 }
 0x761   : > { %14750 = vmatprep.subr.bf16.mxu1 %v20057_v13 }
 0x762   : > { %v7355_v63 = vsub.f32 %v5983_v59, %v7267_v23 }
 0x764   : > { %14752 = vmatpush3.bf16.msra.mxu1 %v18247_v2  ;;  %v7356_v54 = vand.u32 4294901760, %v7355_v63 }
 0x765   : > { %14753 = vmatprep.subr.bf16.mxu1 %v20057_v13 }
 0x766   : > { %v7357_v57 = vsub.f32 %v7355_v63, %v7356_v54 }
 0x768   : > { %14755 = vmatpush3.bf16.msra.mxu1 %v18251_v11  ;;  %v7358_v7 = vand.u32 4294901760, %v7357_v57 }
 0x769   : > { %14756 = vmatprep.subr.bf16.mxu1 %v20057_v13 }
 0x76c   : > { %14758 = vmatpush3.bf16.msra.mxu1 %v18255_v39  ;;  %v7341_v39 = vsub.f32 %v5981_v21, %v7261_v47 }
 0x76d   : > { %14759 = vmatprep.subr.bf16.mxu1 %v20057_v13 }
 0x76f   : > { %13920 = vmatmul.mubr.f32.vlgmr.msra.gmra.mrb[6].mxu1 %v6787_v27 }
 0x770   : > { %14761 = vmatpush3.bf16.msra.mxu1 %v18173_v4  ;;  %13938 = vmatprep.mubr.msk.f32.mxu1 %vm16365_vm1, %v20056_v58 }
 0x771   : > { %14762 = vmatprep.subr.bf16.mxu1 %v20057_v13 }
 0x774   : > { %14764 = vmatpush3.bf16.msra.mxu1 %v18176_v50 }
 0x775   : > { %14765 = vmatprep.subr.bf16.mxu1 %v20057_v13 }
 0x778   : > { %14767 = vmatpush3.bf16.msra.mxu1 %v18186_v42 }
 0x779   : > { %14768 = vmatprep.subr.bf16.mxu1 %v20057_v13 }
 0x77c   : > { %14770 = vmatpush3.bf16.msra.mxu1 %v20072_v51 }
 0x77d   : > { %14771 = vmatprep.subr.bf16.mxu1 %v20057_v13 }
 0x77f   : > { %13939 = vmatmul.mubr.f32.vlgmr.msra.gmra.mrb[6].mxu1 %v6788_v56 }
 0x780   : > { %14773 = vmatpush3.bf16.msra.mxu1 %v20073_v6  ;;  %13957 = vmatprep.mubr.msk.f32.mxu1 %vm16365_vm1, %v20056_v58 }
 0x781   : > { %14774 = vmatprep.subr.bf16.mxu1 %v20057_v13 }
 0x784   : > { %14776 = vmatpush3.bf16.msra.mxu1 %v20074_v16 }
 0x785   : > { %14777 = vmatprep.subr.bf16.mxu1 %v20057_v13 }
 0x788   : > { %14779 = vmatpush3.bf16.msra.mxu1 %v20075_v29 }
 0x789   : > { %14780 = vmatprep.subr.bf16.mxu1 %v20057_v13 }
 0x78c   : > { %14782 = vmatpush3.bf16.msra.mxu1 %v20076_v37 }
 0x78d   : > { %14783 = vmatprep.subr.bf16.mxu1 %v20057_v13 }
 0x78f   : > { %13958 = vmatmul.mubr.f32.vlgmr.msra.gmra.mrb[6].mxu1 %v18595_v43 }
 0x790   : > { %14785 = vmatpush3.bf16.msra.mxu1 %v18173_v4  ;;  %13976 = vmatprep.mubr.msk.f32.mxu1 %vm16365_vm1, %v20056_v58  ;;  %v5982_v4 = vld [vmem:[%s20077_s26 + $0x8] sm:$0xff] }
 0x791   : > { %14786 = vmatprep.subr.bf16.mxu1 %v20057_v13 }
 0x794   : > { %14788 = vmatpush3.bf16.msra.mxu1 %v18176_v50  ;;  %v7264_v50 = vand.u32 4294901760, %v5982_v4 }
 0x795   : > { %14789 = vmatprep.subr.bf16.mxu1 %v20057_v13 }
 0x796   : > { %v18673_v2 = vpack.c.bf16 %v7264_v50, %v7261_v47  ;;  %v7348_v6 = vsub.f32 %v5982_v4, %v7264_v50 }
 0x798   : > { %14791 = vmatpush3.bf16.msra.mxu1 %v18186_v42  ;;  %v5984_v42 = vld [vmem:[%s20077_s26 + $0x18] sm:$0xff]  ;;  %v7349_v16 = vand.u32 4294901760, %v7348_v6  ;;  %v18686_v27 = vpack.c.bf16 %v7348_v6, %v7341_v39 }
 0x799   : > { %14792 = vmatprep.subr.bf16.mxu1 %v20057_v13  ;;  %v7270_v1 = vand.u32 4294901760, %v5984_v42 }
 0x79a   : > { %v7350_v38 = vsub.f32 %v7348_v6, %v7349_v16 }
 0x79b   : > { %v18677_v11 = vpack.c.bf16 %v7270_v1, %v7267_v23  ;;  %v7362_v53 = vsub.f32 %v5984_v42, %v7270_v1 }
 0x79c   : > { %14794 = vmatpush3.bf16.msra.mxu1 %v20072_v51  ;;  %v7342_v51 = vand.u32 4294901760, %v7341_v39  ;;  %v7351_v55 = vand.u32 4294901760, %v7350_v38 }
 0x79d   : > { %14795 = vmatprep.subr.bf16.mxu1 %v20057_v13  ;;  %v7363_v37 = vand.u32 4294901760, %v7362_v53  ;;  %v18690_v60 = vpack.c.bf16 %v7362_v53, %v7355_v63 }
 0x79e   : > { %v7343_v29 = vsub.f32 %v7341_v39, %v7342_v51  ;;  %v18692_v22 = vpack.c.bf16 %v7349_v16, %v7342_v51 }
 0x79f   : > { %13977 = vmatmul.mubr.f32.vlgmr.msra.gmra.mrb[6].mxu1 %v18595_v43  ;;  %v7364_v62 = vsub.f32 %v7362_v53, %v7363_v37  ;;  %v18694_v21 = vpack.c.bf16 %v7363_v37, %v7356_v54 }
 0x7a0   : > { %14797 = vmatpush3.bf16.msra.mxu1 %v18673_v2  ;;  %13987 = vmatprep.mubr.msk.f32.mxu1 %vm16365_vm1, %v20056_v58  ;;  %v7344_v34 = vand.u32 4294901760, %v7343_v29 }
 0x7a1   : > { %14798 = vmatprep.subr.bf16.mxu1 %v20057_v13  ;;  %v7365_v43 = vand.u32 4294901760, %v7364_v62 }
 0x7a2   : > { %v18684_v35 = vpack.c.bf16 %v7351_v55, %v7344_v34 }
 0x7a3   : > { %v18688_v56 = vpack.c.bf16 %v7365_v43, %v7358_v7 }
 0x7a4   : > { %14800 = vmatpush3.bf16.msra.mxu1 %v18677_v11 }
 0x7a5   : > { %14801 = vmatprep.subr.bf16.mxu1 %v20057_v13 }
 0x812   : > { %v6706_v4 = vpop.f32.mrb[4].mxu1 }
 0x813   : > { %v7251_v59 = vmul.f32 0.001953125, %v6706_v4  ;;  %v13864_v47 = vpop.f32.mrb[5].mxu1  ;;  %v8740_v4 = vld [vmem:[#allocation3 + $0x1] sm:$0xff] }
 0x814   : > { %v8741_v47 = vld [vmem:[#allocation3 + $0x9] sm:$0xff] }
 0x815   : > { %v7258_v50 = vsel %vm648_vm0, %v7251_v59, 0  ;;  %v7253_v6 = vmul.f32 %v7251_v59, %v7251_v59  ;;  %v18843_v59 = vld [vmem:[#allocation15 + $0x60] sm:$0xff]  }
 0x816   : > { %v7329_v42 = vand.u32 4294901760, %v7258_v50  ;;  %20079 = vst [vmem:[#allocation30_spill] sm:$0xff] %v18843_v59 }
 0x818   : > { %v7330_v23 = vsub.f32 %v7258_v50, %v7329_v42  ;;  %v8772_v50 = vpack.c.bf16 %v8741_v47, %v8740_v4 }
 0x81a   : > { %v7331_v1 = vand.u32 4294901760, %v7330_v23  ;;  %14119 = vmatprep.mubr.msk.bf16.mxu0 %vm5985_vm4, %v8772_v50 }
 0x81c   : > { %v7332_v29 = vsub.f32 %v7330_v23, %v7331_v1 }
 0x81e   : > { %v7333_v38 = vand.u32 4294901760, %v7332_v29 }
 0x820   : > { %13988 = vmatmul.mubr.f32.vlgmr.msra.gmra.mrb[8].mxu1 %v7333_v38 }
 0x821   : > { %14803 = vmatpush3.bf16.msra.mxu1 %v18684_v35  ;;  %13998 = vmatprep.mubr.msk.f32.mxu1 %vm16365_vm1, %v20056_v58 }
 0x822   : > { %14804 = vmatprep.subr.bf16.mxu1 %v20057_v13 }
 0x825   : > { %14806 = vmatpush3.bf16.msra.mxu1 %v18688_v56 }
 0x826   : > { %14807 = vmatprep.subr.bf16.mxu1 %v20057_v13 }
 0x828   : > { %13999 = vmatmul.mubr.f32.vlgmr.msra.gmra.mrb[8].mxu1 %v7329_v42 }
 0x829   : > { %14809 = vmatpush3.bf16.msra.mxu1 %v18686_v27  ;;  %14009 = vmatprep.mubr.msk.f32.mxu1 %vm16365_vm1, %v20056_v58 }
 0x82a   : > { %14810 = vmatprep.subr.bf16.mxu1 %v20057_v13 }
 0x82d   : > { %14812 = vmatpush3.bf16.msra.mxu1 %v18690_v60 }
 0x82e   : > { %14813 = vmatprep.subr.bf16.mxu1 %v20057_v13 }
 0x830   : > { %14010 = vmatmul.mubr.f32.vlgmr.msra.gmra.mrb[8].mxu1 %v7330_v23 }
 0x831   : > { %14815 = vmatpush3.bf16.msra.mxu1 %v18673_v2  ;;  %14020 = vmatprep.mubr.msk.f32.mxu1 %vm16365_vm1, %v20056_v58 }
 0x832   : > { %14816 = vmatprep.subr.bf16.mxu1 %v20057_v13 }
 0x835   : > { %14818 = vmatpush3.bf16.msra.mxu1 %v18677_v11 }
 0x836   : > { %14819 = vmatprep.subr.bf16.mxu1 %v20057_v13 }
 0x838   : > { %14021 = vmatmul.mubr.f32.vlgmr.msra.gmra.mrb[8].mxu1 %v7331_v1 }
 0x839   : > { %14821 = vmatpush3.bf16.msra.mxu1 %v18692_v22  ;;  %14031 = vmatprep.mubr.msk.f32.mxu1 %vm16365_vm1, %v20056_v58 }
 0x83a   : > { %14822 = vmatprep.subr.bf16.mxu1 %v20057_v13 }
 0x83d   : > { %14824 = vmatpush3.bf16.msra.mxu1 %v18694_v21 }
 0x83e   : > { %14825 = vmatprep.subr.bf16.mxu1 %v20057_v13 }
 0x840   : > { %14032 = vmatmul.mubr.f32.vlgmr.msra.gmra.mrb[8].mxu1 %v7329_v42 }
 0x841   : > { %14827 = vmatpush3.bf16.msra.mxu1 %v18673_v2  ;;  %14042 = vmatprep.mubr.msk.f32.mxu1 %vm16365_vm1, %v20056_v58 }
 0x842   : > { %14828 = vmatprep.subr.bf16.mxu1 %v20057_v13 }
 0x845   : > { %14830 = vmatpush3.bf16.msra.mxu1 %v18677_v11 }
 0x846   : > { %14831 = vmatprep.subr.bf16.mxu1 %v20057_v13 }
 0x848   : > { %14043 = vmatmul.mubr.f32.vlgmr.msra.gmra.mrb[8].mxu1 %v7329_v42  ;;  %v20080_v42 = vld [vmem:[#allocation28_spill] sm:$0xff] }
 0x849   : > { %14833 = vmatpush3.bf16.msra.mxu1 %v18673_v2  ;;  %14053 = vmatprep.mubr.msk.f32.mxu1 %vm16365_vm1, %v20056_v58 }
 0x84a   : > { %14834 = vmatprep.subr.bf16.mxu1 %v20057_v13 }
 0x84d   : > { %14836 = vmatpush3.bf16.msra.mxu1 %v18677_v11 }
 0x84e   : > { %14837 = vmatprep.subr.bf16.mxu1 %v20057_v13 }
 0x872   : > { %v7246_v39 = vpop.f32.mrb[6].mxu1 }
 0x873   : > { %v7252_v51 = vmul.f32 0.001953125, %v7246_v39  ;;  %v13978_v16 = vpop.f32.mrb[7].mxu1 }
 0x875   : > { %v7254_v63 = vsub.f32 %v7252_v51, %v7253_v6 }
 0x877   : > { %v7255_v53 = vadd.f32 1e-05, %v7254_v63 }
 0x879   : > { %15875 = vrsqrt.f32 %v7255_v53 }
 0x883   : > { %v15876_v54 = vpop.eup %15875 }
 0x884   : > { %v7746_v37 = vsel %vm648_vm0, %v15876_v54, 0 }
 0x885   : > { %v7817_v34 = vand.u32 4294901760, %v7746_v37 }
 0x887   : > { %v7818_v55 = vsub.f32 %v7746_v37, %v7817_v34 }
 0x889   : > { %v7819_v57 = vand.u32 4294901760, %v7818_v55 }
 0x88b   : > { %v7820_v62 = vsub.f32 %v7818_v55, %v7819_v57 }
 0x88d   : > { %v7821_v7 = vand.u32 4294901760, %v7820_v62 }
 0x88f   : > { %14054 = vmatmul.mubr.f32.vlgmr.msra.gmra.mrb[10].mxu1 %v7821_v7 }
 0x890   : > { %14839 = vmatpush3.bf16.msra.mxu1 %v18684_v35  ;;  %14064 = vmatprep.mubr.msk.f32.mxu1 %vm16365_vm1, %v20056_v58 }
 0x891   : > { %14840 = vmatprep.subr.bf16.mxu1 %v20057_v13 }
 0x894   : > { %14842 = vmatpush3.bf16.msra.mxu1 %v18688_v56  ;;  %v18765_v56 = vld [vmem:[#allocation15 + $0x40] sm:$0xff]  }
 0x895   : > { %14843 = vmatprep.subr.bf16.mxu1 %v20057_v13  ;;  %20078 = vst [vmem:[#allocation29_spill] sm:$0xff] %v18765_v56 }
 0x897   : > { %14065 = vmatmul.mubr.f32.vlgmr.msra.gmra.mrb[10].mxu1 %v7817_v34 }
 0x898   : > { %14845 = vmatpush3.bf16.msra.mxu1 %v18686_v27  ;;  %14075 = vmatprep.mubr.msk.f32.mxu1 %vm16365_vm1, %v20056_v58  ;;  %v15707_v27 = vld [vmem:[#allocation15 + $0x20] sm:$0xff]  }
 0x899   : > { %14846 = vmatprep.subr.bf16.mxu1 %v20057_v13  ;;  %14111 = vmatprep.subr.bf16.mxu0 %v15707_v27 }
 0x89a   : > { %14112 = vmatpush3.bf16.msra.mxu0 %v15707_v27 }
 0x89c   : > { %14848 = vmatpush3.bf16.msra.mxu1 %v18690_v60  ;;  %v15710_v60 = vld [vmem:[#allocation15 + $0x48] sm:$0xff]  }
 0x89d   : > { %14849 = vmatprep.subr.bf16.mxu1 %v20057_v13 }
 0x89f   : > { %14076 = vmatmul.mubr.f32.vlgmr.msra.gmra.mrb[10].mxu1 %v7818_v55 }
 0x8a0   : > { %14851 = vmatpush3.bf16.msra.mxu1 %v18673_v2  ;;  %14086 = vmatprep.mubr.msk.f32.mxu1 %vm16365_vm1, %v20056_v58 }
 0x8a1   : > { %14852 = vmatprep.subr.bf16.mxu1 %v20057_v13 }
 0x8a4   : > { %14854 = vmatpush3.bf16.msra.mxu1 %v18677_v11 }
 0x8a5   : > { %14855 = vmatprep.subr.bf16.mxu1 %v20057_v13 }
 0x8a7   : > { %14087 = vmatmul.mubr.f32.vlgmr.msra.gmra.mrb[10].mxu1 %v7819_v57 }
 0x8a8   : > { %14857 = vmatpush3.bf16.msra.mxu1 %v18692_v22  ;;  %14097 = vmatprep.mubr.msk.f32.mxu1 %vm16365_vm1, %v20056_v58  ;;  %v15713_v22 = vld [vmem:[#allocation15 + $0x38] sm:$0xff]  }
 0x8a9   : > { %14858 = vmatprep.subr.bf16.mxu1 %v20057_v13 }
 0x8ac   : > { %14860 = vmatpush3.bf16.msra.mxu1 %v18694_v21  ;;  %v15714_v21 = vld [vmem:[#allocation15 + $0x58] sm:$0xff]  }
 0x8ad   : > { %14861 = vmatprep.subr.bf16.mxu1 %v20057_v13 }
 0x8af   : > { %14098 = vmatmul.mubr.f32.vlgmr.msra.gmra.mrb[10].mxu1 %v7817_v34 }
 0x8b0   : > { %14863 = vmatpush3.bf16.msra.mxu1 %v18673_v2  ;;  %14108 = vmatprep.mubr.msk.f32.mxu1 %vm16365_vm1, %v20056_v58  ;;  %v15709_v2 = vld [vmem:[#allocation15 + $0x28] sm:$0xff]  }
 0x8b1   : > { %14864 = vmatprep.subr.bf16.mxu1 %v20057_v13  ;;  %14113 = vmatprep.subr.bf16.mxu0 %v15709_v2  ;;  %v15711_v13 = vld [vmem:[#allocation15 + $0x30] sm:$0xff]  }
 0x8b2   : > { %14114 = vmatpush3.bf16.msra.mxu0 %v15709_v2 }
 0x8b3   : > { %14115 = vmatprep.subr.bf16.mxu0 %v15711_v13 }
 0x8b4   : > { %14866 = vmatpush3.bf16.msra.mxu1 %v18677_v11  ;;  %v15712_v11 = vld [vmem:[#allocation15 + $0x50] sm:$0xff]  }
 0x8b5   : > { %14867 = vmatprep.subr.bf16.mxu1 %v18765_v56 }
 0x8b6   : > { %14116 = vmatpush3.bf16.msra.mxu0 %v15711_v13 }
 0x8b7   : > { %14109 = vmatmul.mubr.f32.vlgmr.msra.gmra.mrb[10].mxu1 %v7817_v34  ;;  %14117 = vmatprep.subr.bf16.mxu0 %v15713_v22 }
 0x8b8   : > { %14871 = vmatpush3.bf16.msra.mxu1 %v18765_v56 }
 0x8b9   : > { %14868 = vmatprep.subr.bf16.mxu1 %v15710_v60 }
 0x8ba   : > { %14118 = vmatpush3.bf16.msra.mxu0 %v15713_v22 }
 0x8bc   : > { %14872 = vmatpush3.bf16.msra.mxu1 %v15710_v60 }
 0x8bd   : > { %14869 = vmatprep.subr.bf16.mxu1 %v15712_v11 }
 0x8c0   : > { %14873 = vmatpush3.bf16.msra.mxu1 %v15712_v11 }
 0x8c1   : > { %14870 = vmatprep.subr.bf16.mxu1 %v15714_v21 }
 0x8c4   : > { %14874 = vmatpush3.bf16.msra.mxu1 %v15714_v21 }
 0x8c5   : > { %14231 = vmatprep.subr.bf16.mxu1 %v18843_v59 }
 0x91b   : > { %v18763_v35 = vpop.f32.mrb[8].mxu1 }
 0x91c   : > { %v14044_v43 = vpop.f32.mrb[9].mxu1  ;;  %v18849_v58 = vrot.slane %v18763_v35, %v20080_v42 }
 0x91e   : > { %v8237_v23 = vsub.f32 %v18260_v49, %v18849_v58  ;;  %v8238_v1 = vsub.f32 %v18266_v33, %v18849_v58  ;;  %v8239_v29 = vsub.f32 %v18263_v19, %v18849_v58  ;;  %v8240_v38 = vsub.f32 %v18271_v41, %v18849_v58 }
 0x91f   : > { %v8241_v39 = vsub.f32 %v18280_v12, %v18849_v58  ;;  %v8242_v6 = vsub.f32 %v18285_v28, %v18849_v58  ;;  %v8243_v51 = vsub.f32 %v18290_v9, %v18849_v58  ;;  %v8244_v49 = vsub.f32 %v18305_v46, %v18849_v58 }
 0x920   : > { %v8245_v33 = vsub.f32 %v18308_v25, %v18849_v58  ;;  %v8246_v19 = vsub.f32 %v18317_v26, %v18849_v58  ;;  %v8247_v41 = vsub.f32 %v18324_v15, %v18849_v58  ;;  %v8248_v12 = vsub.f32 %v18332_v48, %v18849_v58  ;;  %v20081_v15 = vld [vmem:[#allocation31_spill] sm:$0xff] }
 0x921   : > { %v8249_v28 = vsub.f32 %v18341_v32, %v18849_v58  ;;  %v8250_v9 = vsub.f32 %v18357_v10, %v18849_v58  ;;  %v8251_v46 = vsub.f32 %v18375_v24, %v18849_v58  ;;  %v8252_v25 = vsub.f32 %v18390_v30, %v18849_v58 }
 0x922   : > { %v8253_v26 = vsub.f32 %v18327_v3, %v18849_v58  ;;  %v8254_v16 = vsub.f32 %v20081_v15, %v18849_v58  ;;  %v8255_v48 = vsub.f32 %v18335_v18, %v18849_v58  ;;  %v8256_v32 = vsub.f32 %v18348_v61, %v18849_v58 }
 0x923   : > { %v8257_v10 = vsub.f32 %v18360_v36, %v18849_v58  ;;  %v8258_v24 = vsub.f32 %v18372_v14, %v18849_v58  ;;  %v8259_v30 = vsub.f32 %v18369_v45, %v18849_v58  ;;  %v8260_v3 = vsub.f32 %v18378_v31, %v18849_v58 }
 0x924   : > { %v8261_v63 = vsub.f32 %v18385_v44, %v18849_v58  ;;  %v8262_v18 = vsub.f32 %v18397_v8, %v18849_v58  ;;  %v8263_v61 = vsub.f32 %v18400_v40, %v18849_v58  ;;  %v8264_v36 = vsub.f32 %v18407_v52, %v18849_v58 }
 0x925   : > { %v8265_v45 = vsub.f32 %v18412_v5, %v18849_v58  ;;  %v8266_v31 = vsub.f32 %v18419_v20, %v18849_v58  ;;  %v8267_v44 = vsub.f32 %v18422_v0, %v18849_v58  ;;  %v8268_v8 = vsub.f32 %v18427_v17, %v18849_v58 }
 0x98a   : > { %v8229_v53 = vpop.f32.mrb[10].mxu1 }
 0x98b   : > { %v8272_v14 = vrot.slane %v8229_v53, %v20080_v42  ;;  %v14110_v54 = vpop.f32.mrb[11].mxu1 }
 0x98d   : > { %v8273_v37 = vmul.f32 %v8272_v14, %v8237_v23  ;;  %v8274_v40 = vmul.f32 %v8272_v14, %v8238_v1  ;;  %v8275_v34 = vmul.f32 %v8272_v14, %v8239_v29  ;;  %v8276_v55 = vmul.f32 %v8272_v14, %v8240_v38 }
 0x98e   : > { %v8277_v52 = vmul.f32 %v8272_v14, %v8241_v39  ;;  %v8278_v57 = vmul.f32 %v8272_v14, %v8242_v6  ;;  %v8279_v62 = vmul.f32 %v8272_v14, %v8243_v51  ;;  %v8280_v7 = vmul.f32 %v8272_v14, %v8244_v49  ;;  %v18946_v51 = vld [vmem:[#allocation12] ss:$0 sm:$0xff] }
 0x98f   : > { %v8281_v35 = vmul.f32 %v8272_v14, %v8245_v33  ;;  %v8282_v43 = vmul.f32 %v8272_v14, %v8246_v19  ;;  %v8283_v5 = vmul.f32 %v8272_v14, %v8247_v41  ;;  %v8284_v27 = vmul.f32 %v8272_v14, %v8248_v12  ;;  %v18951_v41 = vld [vmem:[#allocation13] ss:$0 sm:$0xff] }
 0x990   : > { %v8285_v2 = vmul.f32 %v8272_v14, %v8249_v28  ;;  %v8286_v20 = vmul.f32 %v8272_v14, %v8250_v9  ;;  %v8287_v60 = vmul.f32 %v8272_v14, %v8251_v46  ;;  %v8288_v13 = vmul.f32 %v8272_v14, %v8252_v25  ;;  %v18956_v46 = vld [vmem:[#allocation15] sm:$0xff]  }
 0x991   : > { %v8289_v0 = vmul.f32 %v8272_v14, %v8253_v26  ;;  %v18916_v11 = vmul.f32 %v8272_v14, %v8254_v16  ;;  %v18918_v17 = vmul.f32 %v8272_v14, %v8255_v48  ;;  %v18920_v22 = vmul.f32 %v8272_v14, %v8256_v32  ;;  %14151 = vmatprep.subr.bf16.mxu0 %v18956_v46 }
 0x992   : > { %v18922_v21 = vmul.f32 %v8272_v14, %v8257_v10  ;;  %v18924_v4 = vmul.f32 %v8272_v14, %v8258_v24  ;;  %v18926_v47 = vmul.f32 %v8272_v14, %v8259_v30  ;;  %v18928_v50 = vmul.f32 %v8272_v14, %v8260_v3 }
 0x993   : > { %v18930_v42 = vmul.f32 %v8272_v14, %v8261_v63  ;;  %v18932_v58 = vmul.f32 %v8272_v14, %v8262_v18  ;;  %v18934_v23 = vmul.f32 %v8272_v14, %v8263_v61  ;;  %v18936_v1 = vmul.f32 %v8272_v14, %v8264_v36 }
 0x994   : > { %v18938_v29 = vmul.f32 %v8272_v14, %v8265_v45  ;;  %v18940_v38 = vmul.f32 %v8272_v14, %v8266_v31  ;;  %v18942_v39 = vmul.f32 %v8272_v14, %v8267_v44  ;;  %v18944_v6 = vmul.f32 %v8272_v14, %v8268_v8 }
 0x995   : > { %v8311_v49 = vmul.f32 %v18946_v51, %v8273_v37  ;;  %v8312_v33 = vmul.f32 %v18946_v51, %v8274_v40  ;;  %v8313_v19 = vmul.f32 %v18946_v51, %v8275_v34  ;;  %v8314_v12 = vmul.f32 %v18946_v51, %v8276_v55 }
 0x996   : > { %v8315_v28 = vmul.f32 %v18946_v51, %v8277_v52  ;;  %v8316_v9 = vmul.f32 %v18946_v51, %v8278_v57  ;;  %v8317_v25 = vmul.f32 %v18946_v51, %v8279_v62  ;;  %v8318_v48 = vmul.f32 %v18946_v51, %v8280_v7 }
 0x997   : > { %v18960_v26 = vadd.f32 %v18951_v41, %v8311_v49  ;;  %v18963_v15 = vadd.f32 %v18951_v41, %v8312_v33  ;;  %v18966_v16 = vadd.f32 %v18951_v41, %v8313_v19  ;;  %v18970_v32 = vadd.f32 %v18951_v41, %v8314_v12 }
 0x998   : > { %v8319_v10 = vmul.f32 %v18946_v51, %v8281_v35  ;;  %v18975_v24 = vadd.f32 %v18951_v41, %v8315_v28  ;;  %v8320_v30 = vmul.f32 %v18946_v51, %v8282_v43  ;;  %v8321_v3 = vmul.f32 %v18946_v51, %v8283_v5 }
 0x999   : > { %v18980_v63 = vadd.f32 %v18951_v41, %v8316_v9  ;;  %v18983_v53 = vadd.f32 %v18951_v41, %v8317_v25  ;;  %v12276_v18 = vmul.f32 -1.442695, %v18960_v26  ;;  %v12277_v61 = vmul.f32 -1.442695, %v18963_v15 }
 0x99a   : > { %v12278_v36 = vmul.f32 -1.442695, %v18966_v16  ;;  %v8322_v14 = vmul.f32 %v18946_v51, %v8284_v27  ;;  %v18990_v54 = vadd.f32 %v18951_v41, %v8318_v48  ;;  %v12279_v45 = vmul.f32 -1.442695, %v18970_v32 }
 0x99b   : > { %v8323_v31 = vmul.f32 %v18946_v51, %v8285_v2  ;;  %v18995_v44 = vadd.f32 %v18951_v41, %v8319_v10  ;;  %15877 = vpow2.f32 %v12276_v18  ;;  %v12280_v8 = vmul.f32 -1.442695, %v18975_v24 }
 0x99c   : > { %v8324_v37 = vmul.f32 %v18946_v51, %v8286_v20  ;;  %v19000_v40 = vadd.f32 %v18951_v41, %v8320_v30  ;;  %15879 = vpow2.f32 %v12277_v61  ;;  %v12281_v34 = vmul.f32 -1.442695, %v18980_v63 }
 0x99d   : > { %v8325_v55 = vmul.f32 %v18946_v51, %v8287_v60  ;;  %v19005_v52 = vadd.f32 %v18951_v41, %v8321_v3  ;;  %15881 = vpow2.f32 %v12278_v36  ;;  %v12282_v57 = vmul.f32 -1.442695, %v18983_v53 }
 0x99e   : > { %v8326_v62 = vmul.f32 %v18946_v51, %v8288_v13  ;;  %v19010_v7 = vadd.f32 %v18951_v41, %v8322_v14  ;;  %15883 = vpow2.f32 %v12279_v45  ;;  %v12283_v35 = vmul.f32 -1.442695, %v18990_v54 }
 0x99f   : > { %v8327_v43 = vmul.f32 %v18946_v51, %v8289_v0  ;;  %v19015_v5 = vadd.f32 %v18951_v41, %v8323_v31  ;;  %15885 = vpow2.f32 %v12280_v8  ;;  %v12284_v27 = vmul.f32 -1.442695, %v18995_v44 }
 0x9a0   : > { %v8328_v2 = vmul.f32 %v18946_v51, %v18916_v11  ;;  %v19021_v20 = vadd.f32 %v18951_v41, %v8324_v37  ;;  %15887 = vpow2.f32 %v12281_v34  ;;  %v12285_v60 = vmul.f32 -1.442695, %v19000_v40 }
 0x9a1   : > { %v8329_v13 = vmul.f32 %v18946_v51, %v18918_v17  ;;  %v19027_v0 = vadd.f32 %v18951_v41, %v8325_v55  ;;  %15889 = vpow2.f32 %v12282_v57  ;;  %v12286_v49 = vmul.f32 -1.442695, %v19005_v52 }
 0x9a2   : > { %v8330_v33 = vmul.f32 %v18946_v51, %v18920_v22  ;;  %v19033_v11 = vadd.f32 %v18951_v41, %v8326_v62  ;;  %15891 = vpow2.f32 %v12283_v35  ;;  %v12287_v19 = vmul.f32 -1.442695, %v19010_v7 }
 0x9a3   : > { %v8331_v12 = vmul.f32 %v18946_v51, %v18922_v21  ;;  %v19039_v17 = vadd.f32 %v18951_v41, %v8327_v43  ;;  %15893 = vpow2.f32 %v12284_v27  ;;  %v12288_v28 = vmul.f32 -1.442695, %v19015_v5 }
 0x9a4   : > { %v8332_v9 = vmul.f32 %v18946_v51, %v18924_v4  ;;  %v19045_v22 = vadd.f32 %v18951_v41, %v8328_v2  ;;  %15895 = vpow2.f32 %v12285_v60  ;;  %v12289_v25 = vmul.f32 -1.442695, %v19021_v20 }
 0x9a5   : > { %v19048_v48 = vpop.eup %15877  ;;  %v8333_v21 = vmul.f32 %v18946_v51, %v18926_v47  ;;  %v19053_v10 = vadd.f32 %v18951_v41, %v8329_v13  ;;  %15897 = vpow2.f32 %v12286_v49  ;;  %v12290_v30 = vmul.f32 -1.442695, %v19027_v0 }
 0x9a6   : > { %v19056_v3 = vpop.eup %15879  ;;  %v8334_v4 = vmul.f32 %v18946_v51, %v18928_v50  ;;  %v19061_v18 = vadd.f32 %v18951_v41, %v8330_v33  ;;  %15899 = vpow2.f32 %v12287_v19  ;;  %v12291_v61 = vmul.f32 -1.442695, %v19033_v11 }
 0x9a7   : > { %v19064_v36 = vpop.eup %15881  ;;  %v8335_v47 = vmul.f32 %v18946_v51, %v18930_v42  ;;  %v19069_v14 = vadd.f32 %v18951_v41, %v8331_v12  ;;  %15901 = vpow2.f32 %v12288_v28  ;;  %v12292_v45 = vmul.f32 -1.442695, %v19039_v17 }
 0x9a8   : > { %v19072_v31 = vpop.eup %15883  ;;  %v8336_v50 = vmul.f32 %v18946_v51, %v18932_v58  ;;  %v19077_v8 = vadd.f32 %v18951_v41, %v8332_v9  ;;  %15903 = vpow2.f32 %v12289_v25  ;;  %v12293_v37 = vmul.f32 -1.442695, %v19045_v22 }
 0x9a9   : > { %v19080_v34 = vpop.eup %15885  ;;  %v8337_v42 = vmul.f32 %v18946_v51, %v18934_v23  ;;  %v19085_v55 = vadd.f32 %v18951_v41, %v8333_v21  ;;  %15905 = vpow2.f32 %v12290_v30  ;;  %v12294_v57 = vmul.f32 -1.442695, %v19053_v10 }
 0x9aa   : > { %v19088_v62 = vpop.eup %15887  ;;  %v8338_v58 = vmul.f32 %v18946_v51, %v18936_v1  ;;  %v19093_v35 = vadd.f32 %v18951_v41, %v8334_v4  ;;  %15907 = vpow2.f32 %v12291_v61  ;;  %v12295_v43 = vmul.f32 -1.442695, %v19061_v18 }
 0x9ab   : > { %v19096_v27 = vpop.eup %15889  ;;  %v8339_v23 = vmul.f32 %v18946_v51, %v18938_v29  ;;  %v19101_v2 = vadd.f32 %v18951_v41, %v8335_v47  ;;  %15909 = vpow2.f32 %v12292_v45  ;;  %v12296_v60 = vmul.f32 -1.442695, %v19069_v14 }
 0x9ac   : > { %v19104_v13 = vpop.eup %15891  ;;  %v8340_v1 = vmul.f32 %v18946_v51, %v18940_v38  ;;  %v19109_v49 = vadd.f32 %v18951_v41, %v8336_v50  ;;  %15911 = vpow2.f32 %v12293_v37  ;;  %v12297_v33 = vmul.f32 -1.442695, %v19077_v8 }
 0x9ad   : > { %v15894_v19 = vpop.eup %15893  ;;  %v8341_v29 = vmul.f32 %v18946_v51, %v18942_v39  ;;  %v19115_v12 = vadd.f32 %v18951_v41, %v8337_v42  ;;  %15913 = vpow2.f32 %v12294_v57  ;;  %v12298_v28 = vmul.f32 -1.442695, %v19085_v55 }
 0x9ae   : > { %v15896_v9 = vpop.eup %15895  ;;  %v8342_v38 = vmul.f32 %v18946_v51, %v18944_v6  ;;  %v19121_v25 = vadd.f32 %v18951_v41, %v8338_v58  ;;  %15915 = vpow2.f32 %v12295_v43  ;;  %v12299_v21 = vmul.f32 -1.442695, %v19093_v35 }
 0x9af   : > { %v15898_v30 = vpop.eup %15897  ;;  %v19125_v4 = vadd.f32 %v18951_v41, %v8339_v23  ;;  %15917 = vpow2.f32 %v12296_v60  ;;  %v12300_v39 = vmul.f32 -1.442695, %v19101_v2  ;;  %v19129_v47 = vadd.f32 %v18951_v41, %v8340_v1 }
 0x9b0   : > { %v15900_v61 = vpop.eup %15899  ;;  %15919 = vpow2.f32 %v12297_v33  ;;  %v12301_v6 = vmul.f32 -1.442695, %v19109_v49  ;;  %v19133_v45 = vadd.f32 %v18951_v41, %v8341_v29  ;;  %v12302_v50 = vmul.f32 -1.442695, %v19115_v12 }
 0x9b1   : > { %20082 = vst [vmem:[#allocation27_spill] sm:$0xff] %v19125_v4  ;;  %20083 = vst [vmem:[#allocation25_spill] sm:$0xff] %v19129_v47  ;;  %v15902_v51 = vpop.eup %15901  ;;  %15921 = vpow2.f32 %v12298_v28  ;;  %v19137_v42 = vadd.f32 %v18951_v41, %v8342_v38  ;;  %v12303_v57 = vmul.f32 -1.442695, %v19121_v25  ;;  %v12304_v43 = vmul.f32 -1.442695, %v19125_v4 }
 0x9b2   : > { %20084 = vst [vmem:[#allocation26_spill] sm:$0xff] %v19133_v45  ;;  %v15904_v37 = vpop.eup %15903  ;;  %15923 = vpow2.f32 %v12299_v21  ;;  %v12305_v60 = vmul.f32 -1.442695, %v19129_v47  ;;  %v12306_v33 = vmul.f32 -1.442695, %v19133_v45  ;;  %v8477_v38 = vadd.f32 1.0, %v19048_v48 }
 0x9b3   : > { %20085 = vst [vmem:[#allocation28_spill] sm:$0xff] %v19137_v42  ;;  %v15906_v58 = vpop.eup %15905  ;;  %15925 = vpow2.f32 %v12300_v39  ;;  %v12307_v41 = vmul.f32 -1.442695, %v19137_v42  ;;  %v8478_v39 = vadd.f32 1.0, %v19056_v3  ;;  %v8481_v42 = vadd.f32 1.0, %v19080_v34 }
 0x9b4   : > { %v15908_v23 = vpop.eup %15907  ;;  %15927 = vpow2.f32 %v12301_v6  ;;  %v8479_v6 = vadd.f32 1.0, %v19064_v36  ;;  %v8482_v48 = vadd.f32 1.0, %v19088_v62  ;;  %v8491_v4 = vadd.f32 1.0, %v15906_v58 }
 0x9b5   : > { %v15910_v1 = vpop.eup %15909  ;;  %15929 = vpow2.f32 %v12302_v50  ;;  %v8480_v50 = vadd.f32 1.0, %v19072_v31 }
 0x9b6   : > { %v15912_v29 = vpop.eup %15911  ;;  %15931 = vpow2.f32 %v12303_v57  ;;  %v8493_v56 = vadd.f32 1.0, %v15910_v1 }
 0x9b7   : > { %v15914_v28 = vpop.eup %15913  ;;  %15933 = vpow2.f32 %v12304_v43 }
 0x9b8   : > { %v15916_v21 = vpop.eup %15915  ;;  %15935 = vpow2.f32 %v12305_v60  ;;  %v8483_v60 = vadd.f32 1.0, %v19096_v27  ;;  %v8488_v27 = vadd.f32 1.0, %v15900_v61  ;;  %v8495_v58 = vadd.f32 1.0, %v15914_v28 }
 0x9b9   : > { %v15918_v59 = vpop.eup %15917  ;;  %15937 = vpow2.f32 %v12306_v33  ;;  %v8484_v33 = vadd.f32 1.0, %v19104_v13  ;;  %v8489_v13 = vadd.f32 1.0, %v15902_v51  ;;  %v8494_v51 = vadd.f32 1.0, %v15912_v29 }
 0x9ba   : > { %v19147_v47 = vpop.eup %15919  ;;  %15939 = vpow2.f32 %v12307_v41  ;;  %v8485_v41 = vadd.f32 1.0, %v15894_v19  ;;  %v8490_v19 = vadd.f32 1.0, %v15904_v37  ;;  %v8497_v29 = vadd.f32 1.0, %v15918_v59 }
 0x9bb   : > { %v19150_v57 = vpop.eup %15921  ;;  %15941 = vrcp.f32 %v8477_v38  ;;  %v8486_v38 = vadd.f32 1.0, %v15896_v9 }
 0x9bc   : > { %v19153_v43 = vpop.eup %15923  ;;  %15943 = vrcp.f32 %v8478_v39  ;;  %v8487_v39 = vadd.f32 1.0, %v15898_v30 }
 0x9bd   : > { %v19156_v3 = vpop.eup %15925  ;;  %15945 = vrcp.f32 %v8479_v6  ;;  %v8500_v59 = vadd.f32 1.0, %v19153_v43 }
 0x9be   : > { %v19159_v36 = vpop.eup %15927  ;;  %15947 = vrcp.f32 %v8480_v50 }
 0x9bf   : > { %v19162_v31 = vpop.eup %15929  ;;  %15949 = vrcp.f32 %v8481_v42 }
 0x9c0   : > { %v19164_v34 = vpop.eup %15931  ;;  %15951 = vrcp.f32 %v8482_v48  ;;  %v8492_v48 = vadd.f32 1.0, %v15908_v23 }
 0x9c1   : > { %v19166_v62 = vpop.eup %15933  ;;  %15953 = vrcp.f32 %v8483_v60 }
 0x9c2   : > { %v19168_v45 = vpop.eup %15935  ;;  %15955 = vrcp.f32 %v8484_v33 }
 0x9c3   : > { %v19170_v6 = vpop.eup %15937  ;;  %15957 = vrcp.f32 %v8485_v41 }
 0x9c4   : > { %v19172_v50 = vpop.eup %15939  ;;  %15959 = vrcp.f32 %v8486_v38  ;;  %v8496_v38 = vadd.f32 1.0, %v15916_v21 }
 0x9c5   : > { %v15942_v42 = vpop.eup %15941  ;;  %15961 = vrcp.f32 %v8487_v39 }
 0x9c6   : > { %v15944_v9 = vpop.eup %15943  ;;  %15963 = vrcp.f32 %v8488_v27  ;;  %v8573_v30 = vmul.f32 %v15942_v42, %v18960_v26  ;;  %v8503_v42 = vadd.f32 1.0, %v19162_v31  ;;  %v8505_v31 = vadd.f32 1.0, %v19166_v62 }
 0x9c7   : > { %v15946_v60 = vpop.eup %15945  ;;  %15965 = vrcp.f32 %v8489_v13  ;;  %v8574_v61 = vmul.f32 %v15944_v9, %v18963_v15  ;;  %v8502_v13 = vadd.f32 1.0, %v19159_v36  ;;  %v8504_v36 = vadd.f32 1.0, %v19164_v34 }
 0x9c8   : > { %v15948_v33 = vpop.eup %15947  ;;  %15967 = vrcp.f32 %v8490_v19  ;;  %v8575_v41 = vmul.f32 %v15946_v60, %v18966_v16  ;;  %8652 = vst.msk [vmem:[#allocation3 + $0x19] sm:$0xff] %vm5985_vm4, %v8573_v30 }
 0x9c9   : > { %v15950_v37 = vpop.eup %15949  ;;  %15969 = vrcp.f32 %v8491_v4  ;;  %v8576_v23 = vmul.f32 %v15948_v33, %v18970_v32  ;;  %8653 = vst.msk [vmem:[#allocation3 + $0x21] sm:$0xff] %vm5985_vm4, %v8574_v61  ;;  %v8498_v4 = vadd.f32 1.0, %v19147_v47 }
 0x9ca   : > { %v15952_v26 = vpop.eup %15951  ;;  %15971 = vrcp.f32 %v8492_v48  ;;  %v8577_v1 = vmul.f32 %v15950_v37, %v18975_v24  ;;  %8654 = vst.msk [vmem:[#allocation3 + $0x31] sm:$0xff] %vm5985_vm4, %v8575_v41  ;;  %v8499_v24 = vadd.f32 1.0, %v19150_v57  ;;  %v15723_v48 = vld [vmem:[#allocation15 + $0x8] sm:$0xff]  }
 0x9cb   : > { %v15954_v15 = vpop.eup %15953  ;;  %15973 = vrcp.f32 %v8493_v56  ;;  %v8578_v16 = vmul.f32 %v15952_v26, %v18980_v63  ;;  %8655 = vst.msk [vmem:[#allocation3 + $0x39] sm:$0xff] %vm5985_vm4, %v8576_v23 }
 0x9cc   : > { %v15956_v28 = vpop.eup %15955  ;;  %15975 = vrcp.f32 %v8494_v51  ;;  %v8579_v32 = vmul.f32 %v15954_v15, %v18983_v53  ;;  %8656 = vst.msk [vmem:[#allocation3 + $0x49] sm:$0xff] %vm5985_vm4, %v8577_v1  ;;  %v8501_v53 = vadd.f32 1.0, %v19156_v3  ;;  %v8506_v51 = vadd.f32 1.0, %v19168_v45  ;;  %v15724_v45 = vld [vmem:[#allocation15 + $0x10] sm:$0xff]  }
 0x9cd   : > { %v15958_v21 = vpop.eup %15957  ;;  %15977 = vrcp.f32 %v8495_v58  ;;  %v8580_v39 = vmul.f32 %v15956_v28, %v18990_v54  ;;  %8657 = vst.msk [vmem:[#allocation3 + $0x51] sm:$0xff] %vm5985_vm4, %v8578_v16 }
 0x9ce   : > { %v15960_v56 = vpop.eup %15959  ;;  %15979 = vrcp.f32 %v8496_v38  ;;  %v8581_v63 = vmul.f32 %v15958_v21, %v18995_v44  ;;  %8658 = vst.msk [vmem:[#allocation3 + $0x61] sm:$0xff] %vm5985_vm4, %v8579_v32 }
 0x9cf   : > { %v15962_v47 = vpop.eup %15961  ;;  %15981 = vrcp.f32 %v8497_v29  ;;  %v8582_v27 = vmul.f32 %v15960_v56, %v19000_v40  ;;  %8659 = vst.msk [vmem:[#allocation3 + $0x69] sm:$0xff] %vm5985_vm4, %v8580_v39  ;;  %v8742_v57 = vld [vmem:[#allocation3 + $0x19] sm:$0xff] }
 0x9d0   : > { %v15964_v54 = vpop.eup %15963  ;;  %15983 = vrcp.f32 %v8498_v4  ;;  %v8583_v43 = vmul.f32 %v15962_v47, %v19005_v52  ;;  %8660 = vst.msk [vmem:[#allocation3 + $0x79] sm:$0xff] %vm5985_vm4, %v8581_v63  ;;  %v8743_v44 = vld [vmem:[#allocation3 + $0x21] sm:$0xff] }
 0x9d1   : > { %v15966_v19 = vpop.eup %15965  ;;  %15985 = vrcp.f32 %v8499_v24  ;;  %v8584_v3 = vmul.f32 %v15964_v54, %v19010_v7  ;;  %8661 = vst.msk [vmem:[#allocation3 + $0x81] sm:$0xff] %vm5985_vm4, %v8582_v27  ;;  %v19202_v40 = vpack.c.bf16 %v8743_v44, %v8742_v57  ;;  %v8744_v9 = vld [vmem:[#allocation3 + $0x31] sm:$0xff] }
 0x9d2   : > { %v15968_v30 = vpop.eup %15967  ;;  %15987 = vrcp.f32 %v8500_v59  ;;  %v8585_v52 = vmul.f32 %v15966_v19, %v19015_v5  ;;  %8662 = vst.msk [vmem:[#allocation3 + $0x91] sm:$0xff] %vm5985_vm4, %v8583_v43  ;;  %v8745_v60 = vld [vmem:[#allocation3 + $0x39] sm:$0xff] }
 0x9d3   : > { %v15970_v61 = vpop.eup %15969  ;;  %15989 = vrcp.f32 %v8501_v53  ;;  %v8586_v7 = vmul.f32 %v15968_v30, %v19021_v20  ;;  %8663 = vst.msk [vmem:[#allocation3 + $0x99] sm:$0xff] %vm5985_vm4, %v8584_v3  ;;  %14120 = vmatmul.mubr.msk.bf16.vlgmr.msra.gmra.mrb[36].mxu0 %vm5985_vm4, %v19202_v40  ;;  %v19212_v33 = vpack.c.bf16 %v8745_v60, %v8744_v9  ;;  %v8507_v20 = vadd.f32 1.0, %v19170_v6  ;;  %v20087_v43 = vld [vmem:[#allocation27_spill] sm:$0xff]  ;;  %v20089_v9 = vld [vmem:[#allocation26_spill] sm:$0xff]  ;;  %v20090_v30 = vld [vmem:[#allocation28_spill] sm:$0xff] }
 0x9d4   : > { %v15972_v34 = vpop.eup %15971  ;;  %15991 = vrcp.f32 %v8502_v13  ;;  %v8587_v5 = vmul.f32 %v15970_v61, %v19027_v0  ;;  %8664 = vst.msk [vmem:[#allocation3 + $0xa9] sm:$0xff] %vm5985_vm4, %v8585_v52  ;;  %14152 = vmatpush3.bf16.msra.mxu0 %v18956_v46  ;;  %v8508_v0 = vadd.f32 1.0, %v19172_v50  ;;  %v8746_v46 = vld [vmem:[#allocation3 + $0x49] sm:$0xff]  ;;  %v8747_v6 = vld [vmem:[#allocation3 + $0x51] sm:$0xff] }
 0x9d5   : > { %v15974_v62 = vpop.eup %15973  ;;  %15993 = vrcp.f32 %v8503_v42  ;;  %v8588_v41 = vmul.f32 %v15972_v34, %v19033_v11  ;;  %8665 = vst.msk [vmem:[#allocation3 + $0xb1] sm:$0xff] %vm5985_vm4, %v8586_v7  ;;  %14123 = vmatprep.mubr.msk.bf16.mxu0 %vm5985_vm4, %v19212_v33  ;;  %14153 = vmatprep.subr.bf16.mxu0 %v15723_v48  ;;  %v8748_v26 = vld [vmem:[#allocation3 + $0x61] sm:$0xff]  ;;  %v19232_v29 = vpack.c.bf16 %v8747_v6, %v8746_v46  ;;  %v20086_v13 = vld [vmem:[#allocation29_spill] sm:$0xff]  ;;  %v20091_v6 = vld [vmem:[#allocation30_spill] sm:$0xff] }
 0x9d6   : > { %v15976_v37 = vpop.eup %15975  ;;  %15995 = vrcp.f32 %v8504_v36  ;;  %v8589_v58 = vmul.f32 %v15974_v62, %v19039_v17  ;;  %8666 = vst.msk [vmem:[#allocation3 + $0xc1] sm:$0xff] %vm5985_vm4, %v8587_v5  ;;  %v8749_v38 = vld [vmem:[#allocation3 + $0x69] sm:$0xff] }
 0x9d7   : > { %v15978_v23 = vpop.eup %15977  ;;  %15997 = vrcp.f32 %v8505_v31  ;;  %v8590_v11 = vmul.f32 %v15976_v37, %v19045_v22  ;;  %8667 = vst.msk [vmem:[#allocation3 + $0xc9] sm:$0xff] %vm5985_vm4, %v8588_v41  ;;  %v15725_v22 = vld [vmem:[#allocation15 + $0x18] sm:$0xff]   ;;  %v20088_v42 = vld [vmem:[#allocation25_spill] sm:$0xff] }
 0x9d8   : > { %v15980_v1 = vpop.eup %15979  ;;  %15999 = vrcp.f32 %v8506_v51  ;;  %v8591_v15 = vmul.f32 %v15978_v23, %v19053_v10  ;;  %8668 = vst.msk [vmem:[#allocation3 + $0xd9] sm:$0xff] %vm5985_vm4, %v8589_v58  ;;  %14154 = vmatpush3.bf16.msra.mxu0 %v15723_v48  ;;  %v19236_v10 = vpack.c.bf16 %v8749_v38, %v8748_v26  ;;  %v8750_v56 = vld [vmem:[#allocation3 + $0x79] sm:$0xff]  ;;  %v8751_v59 = vld [vmem:[#allocation3 + $0x81] sm:$0xff]  ;;  %v15716_v41 = vld [vmem:[#allocation15 + $0x68] sm:$0xff]  }
 0x9d9   : > { %v15982_v17 = vpop.eup %15981  ;;  %16001 = vrcp.f32 %v8507_v20  ;;  %v8592_v50 = vmul.f32 %v15980_v1, %v19061_v18  ;;  %8669 = vst.msk [vmem:[#allocation3 + $0xe1] sm:$0xff] %vm5985_vm4, %v8590_v11  ;;  %14155 = vmatprep.subr.bf16.mxu0 %v15724_v45  ;;  %v8752_v47 = vld [vmem:[#allocation3 + $0x91] sm:$0xff]  ;;  %v19256_v54 = vpack.c.bf16 %v8751_v59, %v8750_v56  ;;  %v9589_v56 = vld [vmem:[#allocation3 + $0x48] sm:$0xff] }
 0x9da   : > { %v15984_v16 = vpop.eup %15983  ;;  %16003 = vrcp.f32 %v8508_v0  ;;  %v8593_v28 = vmul.f32 %v15982_v17, %v19069_v14  ;;  %8670 = vst.msk [vmem:[#allocation3 + $0xf1] sm:$0xff] %vm5985_vm4, %v8591_v15  ;;  %v8753_v53 = vld [vmem:[#allocation3 + $0x99] sm:$0xff]  ;;  %v9590_v59 = vld [vmem:[#allocation3 + $0x50] sm:$0xff] }
 0x9db   : > { %v15986_v4 = vpop.eup %15985  ;;  %v8594_v32 = vmul.f32 %v15984_v16, %v19077_v8  ;;  %8671 = vst.msk [vmem:[#allocation3 + $0xf9] sm:$0xff] %vm5985_vm4, %v8592_v50  ;;  %14124 = vmatmul.mubr.msk.bf16.gmra.mrb[40].mxu0 %vm5985_vm4, %v19232_v29  ;;  %v19261_v19 = vpack.c.bf16 %v8753_v53, %v8752_v47  ;;  %v8754_v52 = vld [vmem:[#allocation3 + $0xa9] sm:$0xff]  ;;  %v15717_v23 = vld [vmem:[#allocation15 + $0x70] sm:$0xff]   ;;  %v9586_v17 = vld [vmem:[#allocation3 + $0x20] sm:$0xff] }
 0x9dc   : > { %v15988_v18 = vpop.eup %15987  ;;  %v8595_v21 = vmul.f32 %v15986_v4, %v19085_v55  ;;  %8672 = vst.msk [vmem:[#allocation3 + $0x109] sm:$0xff] %vm5985_vm4, %v8593_v28  ;;  %14127 = vmatprep.mubr.msk.bf16.mxu0 %vm5985_vm4, %v19236_v10  ;;  %14156 = vmatpush3.bf16.msra.mxu0 %v15724_v45  ;;  %v8755_v31 = vld [vmem:[#allocation3 + $0xb1] sm:$0xff]  ;;  %v15718_v28 = vld [vmem:[#allocation15 + $0x78] sm:$0xff]  }
 0x9dd   : > { %v15990_v14 = vpop.eup %15989  ;;  %v8596_v24 = vmul.f32 %v15988_v18, %v19093_v35  ;;  %8673 = vst.msk [vmem:[#allocation3 + $0x111] sm:$0xff] %vm5985_vm4, %v8594_v32  ;;  %14157 = vmatprep.subr.bf16.mxu0 %v15725_v22  ;;  %v8756_v34 = vld [vmem:[#allocation3 + $0xc1] sm:$0xff]  ;;  %v19281_v45 = vpack.c.bf16 %v8755_v31, %v8754_v52  ;;  %v9585_v15 = vld [vmem:[#allocation3 + $0x18] sm:$0xff]  ;;  %v15720_v53 = vld [vmem:[#allocation15 + $0x88] sm:$0xff]  }
 0x9de   : > { %v15992_v8 = vpop.eup %15991  ;;  %v8597_v39 = vmul.f32 %v15990_v14, %v19101_v2  ;;  %8674 = vst.msk [vmem:[#allocation3 + $0x121] sm:$0xff] %vm5985_vm4, %v8595_v21  ;;  %v8757_v51 = vld [vmem:[#allocation3 + $0xc9] sm:$0xff]  ;;  %v19300_v32 = vpack.c.bf16 %v9586_v17, %v9585_v15  ;;  %v15726_v52 = vld [vmem:[#allocation15 + $0x98] sm:$0xff]  }
 0x9df   : > { %v15994_v55 = vpop.eup %15993  ;;  %v8598_v63 = vmul.f32 %v15992_v8, %v19109_v49  ;;  %8675 = vst.msk [vmem:[#allocation3 + $0x129] sm:$0xff] %vm5985_vm4, %v8596_v24  ;;  %v19283_v58 = vpack.c.bf16 %v8757_v51, %v8756_v34  ;;  %v8758_v11 = vld [vmem:[#allocation3 + $0xd9] sm:$0xff]  ;;  %v15719_v21 = vld [vmem:[#allocation15 + $0x80] sm:$0xff]   ;;  %v9587_v14 = vld [vmem:[#allocation3 + $0x30] sm:$0xff] }
 0x9e0   : > { %v15996_v27 = vpop.eup %15995  ;;  %v8599_v35 = vmul.f32 %v15994_v55, %v19115_v12  ;;  %8676 = vst.msk [vmem:[#allocation3 + $0x139] sm:$0xff] %vm5985_vm4, %v8597_v39  ;;  %14158 = vmatpush3.bf16.msra.mxu0 %v15725_v22  ;;  %v8759_v1 = vld [vmem:[#allocation3 + $0xe1] sm:$0xff]  ;;  %v9588_v24 = vld [vmem:[#allocation3 + $0x38] sm:$0xff] }
 0x9e1   : > { %v15998_v57 = vpop.eup %15997  ;;  %v8600_v2 = vmul.f32 %v15996_v27, %v19121_v25  ;;  %8677 = vst.msk [vmem:[#allocation3 + $0x141] sm:$0xff] %vm5985_vm4, %v8598_v63  ;;  %14191 = vmatprep.subr.bf16.mxu0 %v20086_v13  ;;  %v8760_v50 = vld [vmem:[#allocation3 + $0xf1] sm:$0xff]  ;;  %v19298_v4 = vpack.c.bf16 %v8759_v1, %v8758_v11  ;;  %v19312_v47 = vpack.c.bf16 %v9588_v24, %v9587_v14  ;;  %v9592_v13 = vld [vmem:[#allocation3 + $0x68] sm:$0xff]  ;;  %v9602_v15 = vld [vmem:[#allocation3 + $0xe0] sm:$0xff] }
 0x9e2   : > { %v16000_v49 = vpop.eup %15999  ;;  %v8601_v44 = vmul.f32 %v15998_v57, %v20087_v43  ;;  %8678 = vst.msk [vmem:[#allocation3 + $0x151] sm:$0xff] %vm5985_vm4, %v8599_v35  ;;  %v8761_v22 = vld [vmem:[#allocation3 + $0xf9] sm:$0xff]  ;;  %v19316_v35 = vpack.c.bf16 %v9590_v59, %v9589_v56  ;;  %v8685_v31 = vld [vmem:[#allocation3 + $0x8] sm:$0xff]  ;;  %v16038_v14 = vld [vmem:[#allocation15 + $0x48] sm:$0xff]  }
 0x9e3   : > { %v16002_v12 = vpop.eup %16001  ;;  %v8602_v3 = vmul.f32 %v16000_v49, %v20088_v42  ;;  %8679 = vst.msk [vmem:[#allocation3 + $0x159] sm:$0xff] %vm5985_vm4, %v8600_v2  ;;  %14128 = vmatmul.mubr.msk.bf16.gmra.mrb[44].mxu0 %vm5985_vm4, %v19256_v54  ;;  %v19306_v18 = vpack.c.bf16 %v8761_v22, %v8760_v50  ;;  %v8762_v8 = vld [vmem:[#allocation3 + $0x109] sm:$0xff]  ;;  %v9591_v2 = vld [vmem:[#allocation3 + $0x60] sm:$0xff]  ;;  %v15722_v49 = vld [vmem:[#allocation15 + $0x90] sm:$0xff]  }
 0x9e4   : > { %v16004_v25 = vpop.eup %16003  ;;  %v8603_v48 = vmul.f32 %v16002_v12, %v20089_v9  ;;  %8680 = vst.msk [vmem:[#allocation3 + $0x169] sm:$0xff] %vm5985_vm4, %v8601_v44  ;;  %14131 = vmatprep.mubr.msk.bf16.mxu0 %vm5985_vm4, %v19261_v19  ;;  %v8763_v39 = vld [vmem:[#allocation3 + $0x111] sm:$0xff]  ;;  %v9594_v42 = vld [vmem:[#allocation3 + $0x80] sm:$0xff]  ;;  %v19328_v9 = vpack.c.bf16 %v9592_v13, %v9591_v2  ;;  %v19344_v34 = vld [vmem:[#allocation15 + $0xa0] sm:$0xff]  }
 0x9e5   : > { %v8604_v36 = vmul.f32 %v16004_v25, %v20090_v30  ;;  %8681 = vst.msk [vmem:[#allocation3 + $0x171] sm:$0xff] %vm5985_vm4, %v8602_v3  ;;  %v8764_v55 = vld [vmem:[#allocation3 + $0x121] sm:$0xff]  ;;  %v19314_v27 = vpack.c.bf16 %v8763_v39, %v8762_v8  ;;  %v9593_v43 = vld [vmem:[#allocation3 + $0x78] sm:$0xff]  ;;  %v9606_v8 = vld [vmem:[#allocation3 + $0x110] sm:$0xff] }
 0x9e6   : > { %8682 = vst.msk [vmem:[#allocation3 + $0x181] sm:$0xff] %vm5985_vm4, %v8603_v48  ;;  %v9287_v60 = vld [vmem:[#allocation3 + $0x122] sm:$0xff]  ;;  %v9288_v61 = vld [vmem:[#allocation3 + $0x12a] sm:$0xff]  ;;  %v19332_v30 = vpack.c.bf16 %v9594_v42, %v9593_v43  ;;  %v9596_v51 = vld [vmem:[#allocation3 + $0x98] sm:$0xff] }
 0x9e7   : > { %8683 = vst.msk [vmem:[#allocation3 + $0x189] sm:$0xff] %vm5985_vm4, %v8604_v36  ;;  %v19275_v7 = vpack.c.bf16 %v9288_v61, %v9287_v60  ;;  %v8765_v63 = vld [vmem:[#allocation3 + $0x129] sm:$0xff]  ;;  %v8766_v44 = vld [vmem:[#allocation3 + $0x139] sm:$0xff] }
 0x9e8   : > { %v9289_v5 = vld [vmem:[#allocation3 + $0x13a] sm:$0xff]  ;;  %v9290_v62 = vld [vmem:[#allocation3 + $0x142] sm:$0xff]  ;;  %v19322_v57 = vpack.c.bf16 %v8765_v63, %v8764_v55  ;;  %v9595_v61 = vld [vmem:[#allocation3 + $0x90] sm:$0xff] }
 0x9e9   : > { %14223 = vmatprep.mubr.msk.bf16.mxu1 %vm5985_vm4, %v19275_v7  ;;  %v19279_v20 = vpack.c.bf16 %v9290_v62, %v9289_v5  ;;  %v8767_v12 = vld [vmem:[#allocation3 + $0x141] sm:$0xff]  ;;  %v8768_v3 = vld [vmem:[#allocation3 + $0x151] sm:$0xff] }
 0x9ea   : > { %v9291_v37 = vld [vmem:[#allocation3 + $0x152] sm:$0xff]  ;;  %v9292_v0 = vld [vmem:[#allocation3 + $0x15a] sm:$0xff]  ;;  %v19330_v48 = vpack.c.bf16 %v8767_v12, %v8766_v44  ;;  %v16037_v22 = vld [vmem:[#allocation15 + $0x40] sm:$0xff]  }
 0x9eb   : > { %14224 = vmatmul.mubr.msk.bf16.vlgmr.msra.gmra.mrb[12].mxu1 %vm5985_vm4, %v19279_v20  ;;  %v19287_v46 = vpack.c.bf16 %v9292_v0, %v9291_v37  ;;  %14132 = vmatmul.mubr.msk.bf16.gmra.mrb[48].mxu0 %vm5985_vm4, %v19281_v45  ;;  %v8769_v25 = vld [vmem:[#allocation3 + $0x159] sm:$0xff]  ;;  %v8770_v5 = vld [vmem:[#allocation3 + $0x169] sm:$0xff] }
 0x9ec   : > { %14232 = vmatpush3.bf16.msra.mxu1 %v20091_v6  ;;  %14135 = vmatprep.mubr.msk.bf16.mxu0 %vm5985_vm4, %v19283_v58  ;;  %v9293_v26 = vld [vmem:[#allocation3 + $0x16a] sm:$0xff]  ;;  %v9294_v38 = vld [vmem:[#allocation3 + $0x172] sm:$0xff]  ;;  %v19334_v36 = vpack.c.bf16 %v8769_v25, %v8768_v3  ;;  %v8684_v60 = vld [vmem:[#allocation3] sm:$0xff]  ;;  %v19346_v6 = vpack.c.bf16 %v9596_v51, %v9595_v61 }
 0x9ed   : > { %14227 = vmatprep.mubr.msk.bf16.mxu1 %vm5985_vm4, %v19287_v46  ;;  %14233 = vmatprep.subr.bf16.mxu1 %v15716_v41  ;;  %v19296_v16 = vpack.c.bf16 %v9294_v38, %v9293_v26  ;;  %v8771_v62 = vld [vmem:[#allocation3 + $0x171] sm:$0xff]  ;;  %v8716_v0 = vpack.c.bf16 %v8685_v31, %v8684_v60  ;;  %v9599_v26 = vld [vmem:[#allocation3 + $0xc0] sm:$0xff]  ;;  %v9600_v38 = vld [vmem:[#allocation3 + $0xc8] sm:$0xff] }
 0x9ee   : > { %v9598_v37 = vld [vmem:[#allocation3 + $0xb0] sm:$0xff]  ;;  %v9601_v1 = vld [vmem:[#allocation3 + $0xd8] sm:$0xff]  ;;  %v19360_v17 = vpack.c.bf16 %v9600_v38, %v9599_v26  ;;  %v9605_v24 = vld [vmem:[#allocation3 + $0x108] sm:$0xff] }
 0x9ef   : > { %v19362_v50 = vpack.c.bf16 %v9602_v15, %v9601_v1  ;;  %v19374_v56 = vpack.c.bf16 %v9606_v8, %v9605_v24  ;;  %v9607_v59 = vld [vmem:[#allocation3 + $0x120] sm:$0xff]  ;;  %v9608_v55 = vld [vmem:[#allocation3 + $0x128] sm:$0xff]  ;;  %v9611_v43 = vld [vmem:[#allocation3 + $0x150] sm:$0xff] }
 0x9f0   : > { %14234 = vmatpush3.bf16.msra.mxu1 %v15716_v41  ;;  %v9597_v41 = vld [vmem:[#allocation3 + $0xa8] sm:$0xff]  ;;  %v16040_v63 = vld [vmem:[#allocation15 + $0x58] sm:$0xff]   ;;  %v19384_v13 = vpack.c.bf16 %v9608_v55, %v9607_v59  ;;  %v9612_v44 = vld [vmem:[#allocation3 + $0x158] sm:$0xff] }
 0x9f1   : > { %14235 = vmatprep.subr.bf16.mxu1 %v15717_v23  ;;  %v19350_v11 = vpack.c.bf16 %v9598_v37, %v9597_v41  ;;  %v9610_v2 = vld [vmem:[#allocation3 + $0x140] sm:$0xff]  ;;  %v9613_v12 = vld [vmem:[#allocation3 + $0x168] sm:$0xff]  ;;  %v9614_v42 = vld [vmem:[#allocation3 + $0x170] sm:$0xff]  ;;  %v19396_v3 = vpack.c.bf16 %v9612_v44, %v9611_v43 }
 0x9f2   : > { %v19398_v25 = vpack.c.bf16 %v9614_v42, %v9613_v12  ;;  %v9616_v60 = vld [vmem:[#allocation3 + $0x188] sm:$0xff]  ;;  %v15728_v31 = vld [vmem:[#allocation15 + $0xa8] sm:$0xff]   ;;  %v15730_v51 = vld [vmem:[#allocation15 + $0xb8] sm:$0xff]  }
 0x9f3   : > { %14228 = vmatmul.mubr.msk.bf16.gmra.mrb[16].mxu1 %vm5985_vm4, %v19296_v16  ;;  %14136 = vmatmul.mubr.msk.bf16.gmra.mrb[52].mxu0 %vm5985_vm4, %v19298_v4  ;;  %v9268_v41 = vld [vmem:[#allocation3 + $0x3a] sm:$0xff]  ;;  %v9271_v26 = vld [vmem:[#allocation3 + $0x62] sm:$0xff]  ;;  %v9272_v38 = vld [vmem:[#allocation3 + $0x6a] sm:$0xff] }
 0x9f4   : > { %14236 = vmatpush3.bf16.msra.mxu1 %v15717_v23  ;;  %14239 = vmatprep.mubr.msk.bf16.mxu1 %vm5985_vm4, %v19300_v32  ;;  %v19348_v23 = vpack.c.bf16 %v8771_v62, %v8770_v5  ;;  %v9267_v62 = vld [vmem:[#allocation3 + $0x32] sm:$0xff]  ;;  %v19456_v15 = vpack.c.bf16 %v9272_v38, %v9271_v26  ;;  %v9279_v8 = vld [vmem:[#allocation3 + $0xc2] sm:$0xff]  ;;  %v9284_v12 = vld [vmem:[#allocation3 + $0xfa] sm:$0xff] }
 0x9f5   : > { %14237 = vmatprep.subr.bf16.mxu1 %v15718_v28  ;;  %14139 = vmatprep.mubr.msk.bf16.mxu0 %vm5985_vm4, %v19306_v18  ;;  %v9278_v24 = vld [vmem:[#allocation3 + $0xb2] sm:$0xff]  ;;  %v9282_v43 = vld [vmem:[#allocation3 + $0xe2] sm:$0xff] }
 0x9f6   : > { %v9283_v44 = vld [vmem:[#allocation3 + $0xf2] sm:$0xff]  ;;  %v15742_v26 = vld [vmem:[#allocation15 + $0x118] sm:$0xff]  }
 0x9f8   : > { %14238 = vmatpush3.bf16.msra.mxu1 %v15718_v28  ;;  %v9603_v28 = vld [vmem:[#allocation3 + $0xf0] sm:$0xff] }
 0x9f9   : > { %14271 = vmatprep.subr.bf16.mxu1 %v15719_v21 }
 0x9fb   : > { %14240 = vmatmul.mubr.msk.bf16.vlgmr.msra.gmra.mrb[20].mxu1 %vm5985_vm4, %v19312_v47  ;;  %14140 = vmatmul.mubr.msk.bf16.gmra.mrb[56].mxu0 %vm5985_vm4, %v19314_v27 }
 0x9fc   : > { %14272 = vmatpush3.bf16.msra.mxu1 %v15719_v21  ;;  %14243 = vmatprep.mubr.msk.bf16.mxu1 %vm5985_vm4, %v19316_v35  ;;  %v9604_v21 = vld [vmem:[#allocation3 + $0xf8] sm:$0xff] }
 0x9fd   : > { %14273 = vmatprep.subr.bf16.mxu1 %v15720_v53  ;;  %14143 = vmatprep.mubr.msk.bf16.mxu0 %vm5985_vm4, %v19322_v57  ;;  %v19372_v39 = vpack.c.bf16 %v9604_v21, %v9603_v28  ;;  %v9276_v28 = vld [vmem:[#allocation3 + $0x9a] sm:$0xff] }
 0xa00   : > { %14274 = vmatpush3.bf16.msra.mxu1 %v15720_v53  ;;  %v9609_v53 = vld [vmem:[#allocation3 + $0x138] sm:$0xff] }
 0xa01   : > { %14275 = vmatprep.subr.bf16.mxu1 %v15722_v49 }
 0xa03   : > { %14244 = vmatmul.mubr.msk.bf16.gmra.mrb[24].mxu1 %vm5985_vm4, %v19328_v9  ;;  %14144 = vmatmul.mubr.msk.bf16.gmra.mrb[60].mxu0 %vm5985_vm4, %v19330_v48 }
 0xa04   : > { %14247 = vmatprep.mubr.msk.bf16.mxu1 %vm5985_vm4, %v19332_v30  ;;  %14147 = vmatprep.mubr.msk.bf16.mxu0 %vm5985_vm4, %v19334_v36 }
 0xa05   : > { %14276 = vmatpush3.bf16.msra.mxu1 %v15722_v49  ;;  %v19386_v49 = vpack.c.bf16 %v9610_v2, %v9609_v53  ;;  %v9937_v53 = vld [vmem:[#allocation3 + $0x181] sm:$0xff]  ;;  %v9938_v2 = vld [vmem:[#allocation3 + $0x189] sm:$0xff] }
 0xa06   : > { %14277 = vmatprep.subr.bf16.mxu1 %v15726_v52  ;;  %v19490_v42 = vpack.c.bf16 %v9938_v2, %v9937_v53  ;;  %v10890_v53 = vld [vmem:[#allocation3 + $0xf1] sm:$0xff]  ;;  %v10891_v2 = vld [vmem:[#allocation3 + $0xf9] sm:$0xff] }
 0xa09   : > { %14278 = vmatpush3.bf16.msra.mxu1 %v15726_v52  ;;  %v9615_v52 = vld [vmem:[#allocation3 + $0x180] sm:$0xff] }
 0xa0a   : > { %14311 = vmatprep.subr.bf16.mxu1 %v19344_v34  ;;  %v19408_v61 = vpack.c.bf16 %v9616_v60, %v9615_v52  ;;  %v19494_v60 = vpack.c.bf16 %v9284_v12, %v9283_v44  ;;  %v10914_v44 = vpack.c.bf16 %v10891_v2, %v10890_v53  ;;  %v11562_v53 = vld [vmem:[%s16741_s10 + $0x30] sm:$0xff]  ;;  %v11563_v2 = vld [vmem:[%s16741_s10 + $0x38] sm:$0xff] }
 0xa0b   : > { %14248 = vmatmul.mubr.msk.bf16.gmra.mrb[28].mxu1 %vm5985_vm4, %v19346_v6  ;;  %14148 = vmatmul.mubr.msk.bf16.gmra.mrb[64].mxu0 %vm5985_vm4, %v19348_v23 }
 0xa0c   : > { %14251 = vmatprep.mubr.msk.bf16.mxu1 %vm5985_vm4, %v19350_v11  ;;  %14159 = vmatprep.mubr.msk.bf16.mxu0 %vm5985_vm4, %v8716_v0  ;;  %v19445_v0 = vpack.c.bf16 %v9268_v41, %v9267_v62  ;;  %v10881_v41 = vld [vmem:[#allocation3 + $0x81] sm:$0xff] }
 0xa13   : > { %14252 = vmatmul.mubr.msk.bf16.gmra.mrb[32].mxu1 %vm5985_vm4, %v19360_v17  ;;  %14160 = vmatmul.mubr.msk.bf16.vlgmr.msra.gmra.mrb[36].mxu0 %vm5985_vm4, %v19300_v32  ;;  %v16039_v32 = vld [vmem:[#allocation15 + $0x50] sm:$0xff]  }
 0xa14   : > { %14255 = vmatprep.mubr.msk.bf16.mxu1 %vm5985_vm4, %v19362_v50  ;;  %14163 = vmatprep.mubr.msk.bf16.mxu0 %vm5985_vm4, %v19312_v47 }
 0xa15   : > { %14192 = vmatpush3.bf16.msra.mxu0 %v16037_v22  ;;  %v9275_v22 = vld [vmem:[#allocation3 + $0x92] sm:$0xff] }
 0xa16   : > { %14193 = vmatprep.subr.bf16.mxu0 %v16038_v14 }
 0xa19   : > { %14194 = vmatpush3.bf16.msra.mxu0 %v16038_v14  ;;  %v19468_v14 = vpack.c.bf16 %v9276_v28, %v9275_v22  ;;  %v10885_v22 = vld [vmem:[#allocation3 + $0xb1] sm:$0xff]  ;;  %v10886_v28 = vld [vmem:[#allocation3 + $0xc1] sm:$0xff] }
 0xa1a   : > { %14195 = vmatprep.subr.bf16.mxu0 %v16039_v32 }
 0xa1b   : > { %14256 = vmatmul.mubr.msk.bf16.gmra.mrb[36].mxu1 %vm5985_vm4, %v19372_v39  ;;  %14164 = vmatmul.mubr.msk.bf16.gmra.mrb[40].mxu0 %vm5985_vm4, %v19316_v35 }
 0xa1c   : > { %14259 = vmatprep.mubr.msk.bf16.mxu1 %vm5985_vm4, %v19374_v56  ;;  %14167 = vmatprep.mubr.msk.bf16.mxu0 %vm5985_vm4, %v19328_v9 }
 0xa1d   : > { %14196 = vmatpush3.bf16.msra.mxu0 %v16039_v32  ;;  %v9280_v32 = vld [vmem:[#allocation3 + $0xca] sm:$0xff] }
 0xa1e   : > { %14197 = vmatprep.subr.bf16.mxu0 %v16040_v63  ;;  %v19480_v55 = vpack.c.bf16 %v9280_v32, %v9279_v8  ;;  %v10888_v32 = vld [vmem:[#allocation3 + $0xd9] sm:$0xff] }
 0xa21   : > { %14198 = vmatpush3.bf16.msra.mxu0 %v16040_v63  ;;  %v9281_v63 = vld [vmem:[#allocation3 + $0xda] sm:$0xff] }
 0xa22   : > { %v19492_v52 = vpack.c.bf16 %v9282_v43, %v9281_v63  ;;  %v10889_v63 = vld [vmem:[#allocation3 + $0xe1] sm:$0xff] }
 0xa23   : > { %14260 = vmatmul.mubr.msk.bf16.gmra.mrb[40].mxu1 %vm5985_vm4, %v19384_v13  ;;  %14168 = vmatmul.mubr.msk.bf16.gmra.mrb[44].mxu0 %vm5985_vm4, %v19332_v30  ;;  %v10913_v43 = vpack.c.bf16 %v10889_v63, %v10888_v32 }
 0xa24   : > { %14263 = vmatprep.mubr.msk.bf16.mxu1 %vm5985_vm4, %v19386_v49  ;;  %14171 = vmatprep.mubr.msk.bf16.mxu0 %vm5985_vm4, %v19346_v6 }
 0xa2b   : > { %14264 = vmatmul.mubr.msk.bf16.gmra.mrb[12].mxu1 %vm5985_vm4, %v19396_v3  ;;  %14172 = vmatmul.mubr.msk.bf16.gmra.mrb[48].mxu0 %vm5985_vm4, %v19350_v11 }
 0xa2c   : > { %14267 = vmatprep.mubr.msk.bf16.mxu1 %vm5985_vm4, %v19398_v25  ;;  %14175 = vmatprep.mubr.msk.bf16.mxu0 %vm5985_vm4, %v19360_v17 }
 0xa33   : > { %14268 = vmatmul.mubr.msk.bf16.gmra.mrb[16].mxu1 %vm5985_vm4, %v19408_v61  ;;  %14176 = vmatmul.mubr.msk.bf16.gmra.mrb[52].mxu0 %vm5985_vm4, %v19362_v50 }
 0xa34   : > { %14279 = vmatprep.mubr.msk.bf16.mxu1 %vm5985_vm4, %v19202_v40  ;;  %14179 = vmatprep.mubr.msk.bf16.mxu0 %vm5985_vm4, %v19372_v39  ;;  %v15729_v40 = vld [vmem:[#allocation15 + $0xb0] sm:$0xff]  }
 0xa3b   : > { %14280 = vmatmul.mubr.msk.bf16.vlgmr.msra.gmra.mrb[20].mxu1 %vm5985_vm4, %v19212_v33  ;;  %14180 = vmatmul.mubr.msk.bf16.gmra.mrb[56].mxu0 %vm5985_vm4, %v19374_v56  ;;  %v9263_v33 = vld [vmem:[#allocation3 + $0x2] sm:$0xff] }
 0xa3c   : > { %14312 = vmatpush3.bf16.msra.mxu1 %v19344_v34  ;;  %14283 = vmatprep.mubr.msk.bf16.mxu1 %vm5985_vm4, %v19232_v29  ;;  %v9264_v29 = vld [vmem:[#allocation3 + $0xa] sm:$0xff] }
 0xa3d   : > { %14313 = vmatprep.subr.bf16.mxu1 %v15728_v31  ;;  %14183 = vmatprep.mubr.msk.bf16.mxu0 %vm5985_vm4, %v19384_v13  ;;  %v19435_v34 = vld [vmem:[#allocation15 + $0xc0] sm:$0xff]   ;;  %v9295_v5 = vpack.c.bf16 %v9264_v29, %v9263_v33  ;;  %v15733_v29 = vld [vmem:[#allocation15 + $0xd0] sm:$0xff]  }
 0xa40   : > { %14314 = vmatpush3.bf16.msra.mxu1 %v15728_v31  ;;  %v9285_v31 = vld [vmem:[#allocation3 + $0x10a] sm:$0xff] }
 0xa41   : > { %14315 = vmatprep.subr.bf16.mxu1 %v15729_v40 }
 0xa43   : > { %14284 = vmatmul.mubr.msk.bf16.gmra.mrb[24].mxu1 %vm5985_vm4, %v19236_v10  ;;  %14184 = vmatmul.mubr.msk.bf16.gmra.mrb[60].mxu0 %vm5985_vm4, %v19386_v49  ;;  %v9265_v10 = vld [vmem:[#allocation3 + $0x1a] sm:$0xff] }
 0xa44   : > { %14287 = vmatprep.mubr.msk.bf16.mxu1 %vm5985_vm4, %v19256_v54  ;;  %14187 = vmatprep.mubr.msk.bf16.mxu0 %vm5985_vm4, %v19396_v3  ;;  %v9266_v54 = vld [vmem:[#allocation3 + $0x22] sm:$0xff] }
 0xa45   : > { %14316 = vmatpush3.bf16.msra.mxu1 %v15729_v40  ;;  %v9296_v37 = vpack.c.bf16 %v9266_v54, %v9265_v10  ;;  %v9286_v40 = vld [vmem:[#allocation3 + $0x112] sm:$0xff]  ;;  %v15735_v10 = vld [vmem:[#allocation15 + $0xe0] sm:$0xff]  }
 0xa46   : > { %14317 = vmatprep.subr.bf16.mxu1 %v15730_v51  ;;  %v19503_v33 = vpack.c.bf16 %v9286_v40, %v9285_v31  ;;  %v10260_v54 = vld [vmem:[#allocation3 + $0x18a] sm:$0xff] }
 0xa49   : > { %14318 = vmatpush3.bf16.msra.mxu1 %v15730_v51  ;;  %v15732_v51 = vld [vmem:[#allocation15 + $0xc8] sm:$0xff]  }
 0xa4a   : > { %14351 = vmatprep.subr.bf16.mxu1 %v19435_v34 }
 0xa4b   : > { %14288 = vmatmul.mubr.msk.bf16.gmra.mrb[28].mxu1 %vm5985_vm4, %v19261_v19  ;;  %14188 = vmatmul.mubr.msk.bf16.gmra.mrb[64].mxu0 %vm5985_vm4, %v19398_v25  ;;  %v9269_v19 = vld [vmem:[#allocation3 + $0x4a] sm:$0xff] }
 0xa4c   : > { %14291 = vmatprep.mubr.msk.bf16.mxu1 %vm5985_vm4, %v19281_v45  ;;  %14199 = vmatprep.mubr.msk.bf16.mxu0 %vm5985_vm4, %v9295_v5  ;;  %v9270_v45 = vld [vmem:[#allocation3 + $0x52] sm:$0xff]  ;;  %v15734_v5 = vld [vmem:[#allocation15 + $0xd8] sm:$0xff]  }
 0xa4d   : > { %v19454_v1 = vpack.c.bf16 %v9270_v45, %v9269_v19  ;;  %v10883_v19 = vld [vmem:[#allocation3 + $0x99] sm:$0xff] }
 0xa53   : > { %14292 = vmatmul.mubr.msk.bf16.gmra.mrb[32].mxu1 %vm5985_vm4, %v19283_v58  ;;  %14200 = vmatmul.mubr.msk.bf16.vlgmr.msra.gmra.mrb[36].mxu0 %vm5985_vm4, %v9296_v37  ;;  %v9273_v58 = vld [vmem:[#allocation3 + $0x7a] sm:$0xff] }
 0xa54   : > { %14295 = vmatprep.mubr.msk.bf16.mxu1 %vm5985_vm4, %v19298_v4  ;;  %14203 = vmatprep.mubr.msk.bf16.mxu0 %vm5985_vm4, %v19445_v0  ;;  %v9274_v4 = vld [vmem:[#allocation3 + $0x82] sm:$0xff] }
 0xa55   : > { %v19466_v21 = vpack.c.bf16 %v9274_v4, %v9273_v58  ;;  %v15743_v58 = vld [vmem:[%s20092_s29] sm:$0xff]  }
 0xa56   : > { %v10884_v4 = vld [vmem:[#allocation3 + $0xa9] sm:$0xff] }
 0xa5b   : > { %14296 = vmatmul.mubr.msk.bf16.gmra.mrb[36].mxu1 %vm5985_vm4, %v19306_v18  ;;  %14204 = vmatmul.mubr.msk.bf16.gmra.mrb[40].mxu0 %vm5985_vm4, %v19454_v1  ;;  %v9277_v18 = vld [vmem:[#allocation3 + $0xaa] sm:$0xff] }
 0xa5c   : > { %14299 = vmatprep.mubr.msk.bf16.mxu1 %vm5985_vm4, %v19314_v27  ;;  %14207 = vmatprep.mubr.msk.bf16.mxu0 %vm5985_vm4, %v19456_v15  ;;  %v19478_v59 = vpack.c.bf16 %v9278_v24, %v9277_v18  ;;  %v10887_v18 = vld [vmem:[#allocation3 + $0xc9] sm:$0xff]  ;;  %v10911_v24 = vpack.c.bf16 %v10885_v22, %v10884_v4  ;;  %v11557_v4 = vld [vmem:[%s16741_s10 + $0x8] sm:$0xff] }
 0xa5d   : > { %v10912_v8 = vpack.c.bf16 %v10887_v18, %v10886_v28  ;;  %v11558_v18 = vld [vmem:[%s16741_s10 + $0x10] sm:$0xff] }
 0xa63   : > { %14300 = vmatmul.mubr.msk.bf16.gmra.mrb[40].mxu1 %vm5985_vm4, %v19322_v57  ;;  %14208 = vmatmul.mubr.msk.bf16.gmra.mrb[44].mxu0 %vm5985_vm4, %v19466_v21 }
 0xa64   : > { %14303 = vmatprep.mubr.msk.bf16.mxu1 %vm5985_vm4, %v19330_v48  ;;  %14211 = vmatprep.mubr.msk.bf16.mxu0 %vm5985_vm4, %v19468_v14 }
 0xa6b   : > { %14304 = vmatmul.mubr.msk.bf16.gmra.mrb[12].mxu1 %vm5985_vm4, %v19334_v36  ;;  %14212 = vmatmul.mubr.msk.bf16.gmra.mrb[48].mxu0 %vm5985_vm4, %v19478_v59 }
 0xa6c   : > { %14307 = vmatprep.mubr.msk.bf16.mxu1 %vm5985_vm4, %v19348_v23  ;;  %14215 = vmatprep.mubr.msk.bf16.mxu0 %vm5985_vm4, %v19480_v55 }
 0xa73   : > { %14308 = vmatmul.mubr.msk.bf16.gmra.mrb[16].mxu1 %vm5985_vm4, %v19490_v42  ;;  %14216 = vmatmul.mubr.msk.bf16.gmra.mrb[52].mxu0 %vm5985_vm4, %v19492_v52 }
 0xa74   : > { %14319 = vmatprep.mubr.msk.bf16.mxu1 %vm5985_vm4, %v9296_v37  ;;  %14219 = vmatprep.mubr.msk.bf16.mxu0 %vm5985_vm4, %v19494_v60  ;;  %v10882_v37 = vld [vmem:[#allocation3 + $0x91] sm:$0xff] }
 0xa75   : > { %v10910_v38 = vpack.c.bf16 %v10883_v19, %v10882_v37  ;;  %v11221_v37 = vld [vmem:[#allocation3 + $0x15a] sm:$0xff] }
 0xa7b   : > { %14320 = vmatmul.mubr.msk.bf16.vlgmr.msra.gmra.mrb[20].mxu1 %vm5985_vm4, %v19445_v0  ;;  %14220 = vmatmul.mubr.msk.bf16.gmra.mrb[56].mxu0 %vm5985_vm4, %v19503_v33 }
 0xa7c   : > { %14352 = vmatpush3.bf16.msra.mxu1 %v19435_v34  ;;  %14323 = vmatprep.mubr.msk.bf16.mxu1 %vm5985_vm4, %v19454_v1  ;;  %v10259_v34 = vld [vmem:[#allocation3 + $0x182] sm:$0xff] }
 0xa7d   : > { %14353 = vmatprep.subr.bf16.mxu1 %v15732_v51  ;;  %v19536_v62 = vpack.c.bf16 %v10260_v54, %v10259_v34 }
 0xa80   : > { %14354 = vmatpush3.bf16.msra.mxu1 %v15732_v51 }
 0xa81   : > { %14355 = vmatprep.subr.bf16.mxu1 %v15733_v29 }
 0xa83   : > { %14324 = vmatmul.mubr.msk.bf16.gmra.mrb[24].mxu1 %vm5985_vm4, %v19456_v15 }
 0xa84   : > { %14327 = vmatprep.mubr.msk.bf16.mxu1 %vm5985_vm4, %v19466_v21  ;;  %14356 = vmatpush3.bf16.msra.mxu1 %v15733_v29 }
 0xa85   : > { %14357 = vmatprep.subr.bf16.mxu1 %v15734_v5 }
 0xa88   : > { %14358 = vmatpush3.bf16.msra.mxu1 %v15734_v5 }
 0xa89   : > { %14391 = vmatprep.subr.bf16.mxu1 %v15735_v10 }
 0xa8b   : > { %14328 = vmatmul.mubr.msk.bf16.gmra.mrb[28].mxu1 %vm5985_vm4, %v19468_v14 }
 0xa8c   : > { %14331 = vmatprep.mubr.msk.bf16.mxu1 %vm5985_vm4, %v19478_v59 }
 0xa93   : > { %14332 = vmatmul.mubr.msk.bf16.gmra.mrb[32].mxu1 %vm5985_vm4, %v19480_v55 }
 0xa94   : > { %14335 = vmatprep.mubr.msk.bf16.mxu1 %vm5985_vm4, %v19492_v52 }
 0xa9b   : > { %14336 = vmatmul.mubr.msk.bf16.gmra.mrb[36].mxu1 %vm5985_vm4, %v19494_v60 }
 0xa9c   : > { %14339 = vmatprep.mubr.msk.bf16.mxu1 %vm5985_vm4, %v19503_v33 }
 0xaa3   : > { %14340 = vmatmul.mubr.msk.bf16.gmra.mrb[40].mxu1 %vm5985_vm4, %v19275_v7  ;;  %v15736_v7 = vld [vmem:[#allocation15 + $0xe8] sm:$0xff]  }
 0xaa4   : > { %14343 = vmatprep.mubr.msk.bf16.mxu1 %vm5985_vm4, %v19279_v20  ;;  %v15737_v20 = vld [vmem:[#allocation15 + $0xf0] sm:$0xff]  }
 0xaab   : > { %14344 = vmatmul.mubr.msk.bf16.gmra.mrb[12].mxu1 %vm5985_vm4, %v19287_v46  ;;  %v15738_v46 = vld [vmem:[#allocation15 + $0xf8] sm:$0xff]  }
 0xaac   : > { %14347 = vmatprep.mubr.msk.bf16.mxu1 %vm5985_vm4, %v19296_v16  ;;  %v15739_v16 = vld [vmem:[#allocation15 + $0x100] sm:$0xff]  }
 0xab3   : > { %14348 = vmatmul.mubr.msk.bf16.gmra.mrb[16].mxu1 %vm5985_vm4, %v19536_v62 }
 0xab4   : > { %14359 = vmatprep.mubr.msk.bf16.mxu1 %vm5985_vm4, %v19312_v47  ;;  %v10582_v47 = vld [vmem:[#allocation3 + $0x198] sm:$0xff] }
 0xabb   : > { %14360 = vmatmul.mubr.msk.bf16.vlgmr.msra.gmra.mrb[20].mxu1 %vm5985_vm4, %v19316_v35  ;;  %v10583_v35 = vld [vmem:[#allocation3 + $0x1a0] sm:$0xff] }
 0xabc   : > { %14392 = vmatpush3.bf16.msra.mxu1 %v15735_v10  ;;  %14363 = vmatprep.mubr.msk.bf16.mxu1 %vm5985_vm4, %v19328_v9  ;;  %v10599_v9 = vpack.c.bf16 %v10583_v35, %v10582_v47 }
 0xabd   : > { %14393 = vmatprep.subr.bf16.mxu1 %v15736_v7 }
 0xac0   : > { %14394 = vmatpush3.bf16.msra.mxu1 %v15736_v7 }
 0xac1   : > { %14395 = vmatprep.subr.bf16.mxu1 %v15737_v20 }
 0xac3   : > { %14364 = vmatmul.mubr.msk.bf16.gmra.mrb[24].mxu1 %vm5985_vm4, %v19332_v30  ;;  %v10874_v30 = vld [vmem:[#allocation3 + $0x31] sm:$0xff] }
 0xac4   : > { %14367 = vmatprep.mubr.msk.bf16.mxu1 %vm5985_vm4, %v19346_v6  ;;  %14396 = vmatpush3.bf16.msra.mxu1 %v15737_v20  ;;  %v10875_v6 = vld [vmem:[#allocation3 + $0x39] sm:$0xff] }
 0xac5   : > { %14397 = vmatprep.subr.bf16.mxu1 %v15738_v46  ;;  %v10904_v20 = vld [vmem:[#allocation3 + $0x199] sm:$0xff] }
 0xac8   : > { %14398 = vmatpush3.bf16.msra.mxu1 %v15738_v46  ;;  %v10905_v46 = vld [vmem:[#allocation3 + $0x1a1] sm:$0xff] }
 0xac9   : > { %14431 = vmatprep.subr.bf16.mxu1 %v15739_v16 }
 0xacb   : > { %14368 = vmatmul.mubr.msk.bf16.gmra.mrb[28].mxu1 %vm5985_vm4, %v19350_v11  ;;  %v10906_v11 = vpack.c.bf16 %v10875_v6, %v10874_v30  ;;  %v15744_v6 = vld [vmem:[%s20092_s29 + $0x8] sm:$0xff]  }
 0xacc   : > { %14371 = vmatprep.mubr.msk.bf16.mxu1 %vm5985_vm4, %v19360_v17  ;;  %v10876_v17 = vld [vmem:[#allocation3 + $0x49] sm:$0xff] }
 0xad3   : > { %14372 = vmatmul.mubr.msk.bf16.gmra.mrb[32].mxu1 %vm5985_vm4, %v19362_v50  ;;  %v10877_v50 = vld [vmem:[#allocation3 + $0x51] sm:$0xff] }
 0xad4   : > { %14375 = vmatprep.mubr.msk.bf16.mxu1 %vm5985_vm4, %v19372_v39  ;;  %v10878_v39 = vld [vmem:[#allocation3 + $0x61] sm:$0xff] }
 0xadb   : > { %14376 = vmatmul.mubr.msk.bf16.gmra.mrb[36].mxu1 %vm5985_vm4, %v19374_v56  ;;  %v10879_v56 = vld [vmem:[#allocation3 + $0x69] sm:$0xff] }
 0xadc   : > { %14379 = vmatprep.mubr.msk.bf16.mxu1 %vm5985_vm4, %v19384_v13  ;;  %v10907_v13 = vpack.c.bf16 %v10877_v50, %v10876_v17 }
 0xae3   : > { %14380 = vmatmul.mubr.msk.bf16.gmra.mrb[40].mxu1 %vm5985_vm4, %v19386_v49  ;;  %v15740_v49 = vld [vmem:[#allocation15 + $0x108] sm:$0xff]  }
 0xae4   : > { %14383 = vmatprep.mubr.msk.bf16.mxu1 %vm5985_vm4, %v19396_v3  ;;  %v10908_v3 = vpack.c.bf16 %v10879_v56, %v10878_v39 }
 0xaeb   : > { %14384 = vmatmul.mubr.msk.bf16.gmra.mrb[12].mxu1 %vm5985_vm4, %v19398_v25  ;;  %v15741_v25 = vld [vmem:[#allocation15 + $0x110] sm:$0xff]  }
 0xaec   : > { %14387 = vmatprep.mubr.msk.bf16.mxu1 %vm5985_vm4, %v19408_v61  ;;  %v10880_v61 = vld [vmem:[#allocation3 + $0x79] sm:$0xff] }
 0xaed   : > { %v10909_v45 = vpack.c.bf16 %v10881_v41, %v10880_v61  ;;  %v11219_v61 = vld [vmem:[#allocation3 + $0x142] sm:$0xff]  ;;  %v11220_v41 = vld [vmem:[#allocation3 + $0x152] sm:$0xff] }
 0xaf3   : > { %14388 = vmatmul.mubr.msk.bf16.gmra.mrb[16].mxu1 %vm5985_vm4, %v10599_v9 }
 0xaf4   : > { %14399 = vmatprep.mubr.msk.bf16.mxu1 %vm5985_vm4, %v10906_v11 }
 0xafb   : > { %14400 = vmatmul.mubr.msk.bf16.vlgmr.msra.gmra.mrb[20].mxu1 %vm5985_vm4, %v10907_v13 }
 0xafc   : > { %14432 = vmatpush3.bf16.msra.mxu1 %v15739_v16  ;;  %14403 = vmatprep.mubr.msk.bf16.mxu1 %vm5985_vm4, %v10908_v3  ;;  %v10921_v16 = vpack.c.bf16 %v10905_v46, %v10904_v20  ;;  %v11216_v3 = vld [vmem:[#allocation3 + $0x122] sm:$0xff]  ;;  %v11591_v20 = vpack.c.bf16 %v11563_v2, %v11562_v53  ;;  %v11584_v53 = vld [vmem:[%s16741_s10 + $0xe0] sm:$0xff]  ;;  %v11585_v2 = vld [vmem:[%s16741_s10 + $0xe8] sm:$0xff] }
 0xafd   : > { %14433 = vmatprep.subr.bf16.mxu1 %v15740_v49 }
 0xb00   : > { %14434 = vmatpush3.bf16.msra.mxu1 %v15740_v49 }
 0xb01   : > { %14435 = vmatprep.subr.bf16.mxu1 %v15741_v25 }
 0xb03   : > { %14404 = vmatmul.mubr.msk.bf16.gmra.mrb[24].mxu1 %vm5985_vm4, %v10909_v45  ;;  %v11240_v45 = vpack.c.bf16 %v11221_v37, %v11220_v41  ;;  %v11571_v41 = vld [vmem:[%s16741_s10 + $0x78] sm:$0xff]  ;;  %v11572_v37 = vld [vmem:[%s16741_s10 + $0x80] sm:$0xff] }
 0xb04   : > { %14407 = vmatprep.mubr.msk.bf16.mxu1 %vm5985_vm4, %v10910_v38  ;;  %14436 = vmatpush3.bf16.msra.mxu1 %v15741_v25  ;;  %v11217_v25 = vld [vmem:[#allocation3 + $0x12a] sm:$0xff]  ;;  %v11227_v38 = vld [vmem:[#allocation3 + $0x1a2] sm:$0xff] }
 0xb05   : > { %14437 = vmatprep.subr.bf16.mxu1 %v15742_v26 }
 0xb08   : > { %14438 = vmatpush3.bf16.msra.mxu1 %v15742_v26  ;;  %v11226_v26 = vld [vmem:[#allocation3 + $0x19a] sm:$0xff] }
 0xb09   : > { %14471 = vmatprep.subr.bf16.mxu1 %v15743_v58  ;;  %v11243_v22 = vpack.c.bf16 %v11227_v38, %v11226_v26  ;;  %v11576_v26 = vld [vmem:[%s16741_s10 + $0xa0] sm:$0xff]  ;;  %v11577_v38 = vld [vmem:[%s16741_s10 + $0xa8] sm:$0xff] }
 0xb0b   : > { %14408 = vmatmul.mubr.msk.bf16.gmra.mrb[28].mxu1 %vm5985_vm4, %v10911_v24  ;;  %v11559_v24 = vld [vmem:[%s16741_s10 + $0x18] sm:$0xff] }
 0xb0c   : > { %14411 = vmatprep.mubr.msk.bf16.mxu1 %vm5985_vm4, %v10912_v8  ;;  %v11560_v8 = vld [vmem:[%s16741_s10 + $0x20] sm:$0xff]  ;;  %v11589_v32 = vpack.c.bf16 %v11559_v24, %v11558_v18  ;;  %v11581_v24 = vld [vmem:[%s16741_s10 + $0xc8] sm:$0xff] }
 0xb0d   : > { %v11580_v18 = vld [vmem:[%s16741_s10 + $0xc0] sm:$0xff] }
 0xb13   : > { %14412 = vmatmul.mubr.msk.bf16.gmra.mrb[32].mxu1 %vm5985_vm4, %v10913_v43  ;;  %v11564_v43 = vld [vmem:[%s16741_s10 + $0x40] sm:$0xff] }
 0xb14   : > { %14415 = vmatprep.mubr.msk.bf16.mxu1 %vm5985_vm4, %v10914_v44  ;;  %v11565_v44 = vld [vmem:[%s16741_s10 + $0x48] sm:$0xff] }
 0xb15   : > { %v11592_v46 = vpack.c.bf16 %v11565_v44, %v11564_v43  ;;  %v11602_v44 = vpack.c.bf16 %v11585_v2, %v11584_v53 }
 0xb16   : > { %v19583_v12 = vpop.f32.mrb[60].mxu0 }
 0xb17   : > { %v19585_v31 = vpop.f32.mrb[61].mxu0 }
 0xb18   : > { %v19587_v40 = vpop.f32.mrb[62].mxu0 }
 0xb19   : > { %v19589_v51 = vpop.f32.mrb[63].mxu0 }
 0xb1b   : > { %14416 = vmatmul.mubr.msk.bf16.gmra.mrb[36].mxu1 %vm5985_vm4, %v19314_v27 }
 0xb1c   : > { %14419 = vmatprep.mubr.msk.bf16.mxu1 %vm5985_vm4, %v19322_v57 }
 0xb1e   : > { %v19595_v29 = vpop.f32.mrb[64].mxu0 }
 0xb1f   : > { %v19597_v5 = vpop.f32.mrb[65].mxu0 }
 0xb20   : > { %v19599_v10 = vpop.f32.mrb[66].mxu0 }
 0xb21   : > { %v19601_v34 = vpop.f32.mrb[67].mxu0 }
 0xb23   : > { %14420 = vmatmul.mubr.msk.bf16.gmra.mrb[40].mxu1 %vm5985_vm4, %v19330_v48 }
 0xb24   : > { %14423 = vmatprep.mubr.msk.bf16.mxu1 %vm5985_vm4, %v19334_v36 }
 0xb26   : > { %v19607_v54 = vpop.f32.mrb[36].mxu0 }
 0xb27   : > { %v19609_v27 = vpop.f32.mrb[37].mxu0 }
 0xb28   : > { %v19611_v7 = vpop.f32.mrb[38].mxu0 }
 0xb29   : > { %v19613_v57 = vpop.f32.mrb[39].mxu0 }
 0xb2b   : > { %14424 = vmatmul.mubr.msk.bf16.gmra.mrb[12].mxu1 %vm5985_vm4, %v19348_v23 }
 0xb2c   : > { %14427 = vmatprep.mubr.msk.bf16.mxu1 %vm5985_vm4, %v19490_v42 }
 0xb2e   : > { %v19619_v48 = vpop.f32.mrb[40].mxu0 }
 0xb2f   : > { %v19621_v36 = vpop.f32.mrb[41].mxu0 }
 0xb30   : > { %v19623_v47 = vpop.f32.mrb[42].mxu0 }
 0xb31   : > { %v19625_v35 = vpop.f32.mrb[43].mxu0 }
 0xb33   : > { %14428 = vmatmul.mubr.msk.bf16.gmra.mrb[16].mxu1 %vm5985_vm4, %v10921_v16  ;;  %v11566_v16 = vld [vmem:[%s16741_s10 + $0x50] sm:$0xff] }
 0xb34   : > { %14439 = vmatprep.mubr.msk.bf16.mxu1 %vm5985_vm4, %v19445_v0 }
 0xb36   : > { %v19630_v23 = vpop.f32.mrb[44].mxu0 }
 0xb37   : > { %v19632_v9 = vpop.f32.mrb[45].mxu0 }
 0xb38   : > { %v19634_v42 = vpop.f32.mrb[46].mxu0 }
 0xb39   : > { %v19636_v30 = vpop.f32.mrb[47].mxu0 }
 0xb3b   : > { %14440 = vmatmul.mubr.msk.bf16.vlgmr.msra.gmra.mrb[20].mxu1 %vm5985_vm4, %v19454_v1 }
 0xb3c   : > { %14472 = vmatpush3.bf16.msra.mxu1 %v15743_v58  ;;  %14443 = vmatprep.mubr.msk.bf16.mxu1 %vm5985_vm4, %v19456_v15  ;;  %v11556_v58 = vld [vmem:[%s16741_s10] sm:$0xff] }
 0xb3d   : > { %14473 = vmatprep.subr.bf16.mxu1 %v15744_v6  ;;  %v11588_v28 = vpack.c.bf16 %v11557_v4, %v11556_v58  ;;  %v11598_v4 = vpack.c.bf16 %v11577_v38, %v11576_v26 }
 0xb3e   : > { %v19645_v0 = vpop.f32.mrb[48].mxu0 }
 0xb3f   : > { %v19647_v11 = vpop.f32.mrb[49].mxu0 }
 0xb40   : > { %v19649_v17 = vpop.f32.mrb[50].mxu0  ;;  %14474 = vmatpush3.bf16.msra.mxu1 %v15744_v6  ;;  %v11567_v6 = vld [vmem:[%s16741_s10 + $0x58] sm:$0xff] }
 0xb41   : > { %v19651_v50 = vpop.f32.mrb[51].mxu0 }
 0xb43   : > { %14444 = vmatmul.mubr.msk.bf16.gmra.mrb[24].mxu1 %vm5985_vm4, %v19466_v21 }
 0xb44   : > { %14447 = vmatprep.mubr.msk.bf16.mxu1 %vm5985_vm4, %v19468_v14 }
 0xb46   : > { %v19657_v1 = vpop.f32.mrb[52].mxu0 }
 0xb47   : > { %v19659_v39 = vpop.f32.mrb[53].mxu0 }
 0xb48   : > { %v19661_v15 = vpop.f32.mrb[54].mxu0 }
 0xb49   : > { %v19663_v56 = vpop.f32.mrb[55].mxu0 }
 0xb4b   : > { %14448 = vmatmul.mubr.msk.bf16.gmra.mrb[28].mxu1 %vm5985_vm4, %v19478_v59  ;;  %v11238_v59 = vpack.c.bf16 %v11217_v25, %v11216_v3  ;;  %v11568_v3 = vld [vmem:[%s16741_s10 + $0x60] sm:$0xff]  ;;  %v11569_v25 = vld [vmem:[%s16741_s10 + $0x68] sm:$0xff] }
 0xb4c   : > { %14451 = vmatprep.mubr.msk.bf16.mxu1 %vm5985_vm4, %v19480_v55  ;;  %v11218_v55 = vld [vmem:[#allocation3 + $0x13a] sm:$0xff] }
 0xb4d   : > { %v11239_v19 = vpack.c.bf16 %v11219_v61, %v11218_v55  ;;  %v11594_v55 = vpack.c.bf16 %v11569_v25, %v11568_v3  ;;  %v11570_v61 = vld [vmem:[%s16741_s10 + $0x70] sm:$0xff] }
 0xb4e   : > { %v19669_v13 = vpop.f32.mrb[56].mxu0 }
 0xb4f   : > { %v19671_v21 = vpop.f32.mrb[57].mxu0 }
 0xb50   : > { %v19673_v49 = vpop.f32.mrb[58].mxu0 }
 0xb51   : > { %v19675_v14 = vpop.f32.mrb[59].mxu0 }
 0xb53   : > { %14452 = vmatmul.mubr.msk.bf16.gmra.mrb[32].mxu1 %vm5985_vm4, %v19492_v52  ;;  %v11222_v52 = vld [vmem:[#allocation3 + $0x16a] sm:$0xff] }
 0xb54   : > { %14455 = vmatprep.mubr.msk.bf16.mxu1 %vm5985_vm4, %v19494_v60  ;;  %v11223_v60 = vld [vmem:[#allocation3 + $0x172] sm:$0xff] }
 0xb5b   : > { %14456 = vmatmul.mubr.msk.bf16.gmra.mrb[36].mxu1 %vm5985_vm4, %v19503_v33  ;;  %v11241_v33 = vpack.c.bf16 %v11223_v60, %v11222_v52  ;;  %v11574_v60 = vld [vmem:[%s16741_s10 + $0x90] sm:$0xff] }
 0xb5c   : > { %14459 = vmatprep.mubr.msk.bf16.mxu1 %vm5985_vm4, %v11238_v59  ;;  %v11593_v59 = vpack.c.bf16 %v11567_v6, %v11566_v16  ;;  %v19738_v6 = vld [vmem:[#allocation16] ss:$0 sm:$0xff] }
 0xb5d   : > { %v14881_v3 = vadd.f32 %v19611_v7, %v19738_v6  ;;  %v14884_v25 = vadd.f32 %v19738_v6, %v19613_v57  ;;  %v14890_v26 = vadd.f32 %v19738_v6, %v19621_v36  ;;  %v14902_v2 = vadd.f32 %v19738_v6, %v19632_v9 }
 0xb63   : > { %14460 = vmatmul.mubr.msk.bf16.gmra.mrb[40].mxu1 %vm5985_vm4, %v11239_v19  ;;  %v11573_v19 = vld [vmem:[%s16741_s10 + $0x88] sm:$0xff] }
 0xb64   : > { %14463 = vmatprep.mubr.msk.bf16.mxu1 %vm5985_vm4, %v11240_v45  ;;  %v11595_v45 = vpack.c.bf16 %v11571_v41, %v11570_v61  ;;  %v11596_v52 = vpack.c.bf16 %v11573_v19, %v11572_v37  ;;  %v19751_v41 = vld [vmem:[%s20093_s1] ss:$0 sm:$0xff]  ;;  %s16267_s1 = scalar_lea.vmem %s19910_s2, 4096 }
 0xb65   : > { %v14882_v7 = vadd.f32 %v14881_v3, %v19751_v41  ;;  %v14885_v57 = vadd.f32 %v14884_v25, %v19751_v41  ;;  %v14903_v9 = vadd.f32 %v14902_v2, %v19751_v41  ;;  %v14941_v2 = vadd.f32 %v19673_v49, %v19738_v6  ;;  %p16268_p4 = scmp.ne.s32.totalorder %s19910_s2, %s16267_s1  ;;  %p16275_p8 = scmp.lt.s32.totalorder %s16273_s22, %s16267_s1 }
 0xb67   : > { %p16269_p13 = pnand %p16268_p4, %p20096_p1  ;;  %p16276_p6 = por %p16275_p8, %p16274_p2 }
 0xb69   : > { %p16270_p0 = pneg %p16269_p13 }
 0xb6b   : > { %14464 = vmatmul.mubr.msk.bf16.gmra.mrb[12].mxu1 %vm5985_vm4, %v11241_v33  ;;  %v11575_v33 = vld [vmem:[%s16741_s10 + $0x98] sm:$0xff]  ;;  %p16277_p11 = pnand %p16276_p6, %p16270_p0 }
 0xb6c   : > { %14467 = vmatprep.mubr.msk.bf16.mxu1 %vm5985_vm4, %v19536_v62  ;;  %v11561_v62 = vld [vmem:[%s16741_s10 + $0x28] sm:$0xff]  ;;  %v11597_v58 = vpack.c.bf16 %v11575_v33, %v11574_v60 }
 0xb6d   : > { %v11590_v63 = vpack.c.bf16 %v11561_v62, %v11560_v8  ;;  %v11600_v62 = vpack.c.bf16 %v11581_v24, %v11580_v18 }
 0xb73   : > { %14468 = vmatmul.mubr.msk.bf16.gmra.mrb[16].mxu1 %vm5985_vm4, %v11243_v22  ;;  %v11578_v22 = vld [vmem:[%s16741_s10 + $0xb0] sm:$0xff] }
 0xb74   : > { %14475 = vmatprep.mubr.msk.bf16.mxu1 %vm648_vm0, %v11588_v28  ;;  %v11579_v28 = vld [vmem:[%s16741_s10 + $0xb8] sm:$0xff] }
 0xb75   : > { %v11599_v8 = vpack.c.bf16 %v11579_v28, %v11578_v22  ;;  %v14891_v22 = vadd.f32 %v14890_v26, %v19751_v41 }
 0xb7b   : > { %14476 = vmatmul.mubr.msk.bf16.vlgmr.msra.gmra.mrb[20].mxu1 %vm648_vm0, %v11589_v32  ;;  %v11582_v32 = vld [vmem:[%s16741_s10 + $0xd0] sm:$0xff] }
 0xb7c   : > { %14479 = vmatprep.mubr.msk.bf16.mxu1 %vm648_vm0, %v11590_v63  ;;  %v11583_v63 = vld [vmem:[%s16741_s10 + $0xd8] sm:$0xff] }
 0xb7d   : > { %v11601_v43 = vpack.c.bf16 %v11583_v63, %v11582_v32  ;;  %v14899_v32 = vadd.f32 %v19630_v23, %v19738_v6 }
 0xb7f   : > { %v14900_v23 = vadd.f32 %v14899_v32, %v19751_v41 }
 0xb83   : > { %14480 = vmatmul.mubr.msk.bf16.gmra.mrb[24].mxu1 %vm648_vm0, %v11591_v20  ;;  %v11586_v20 = vld [vmem:[%s16741_s10 + $0xf0] sm:$0xff] }
 0xb84   : > { %14483 = vmatprep.mubr.msk.bf16.mxu1 %vm648_vm0, %v11592_v46  ;;  %v11587_v46 = vld [vmem:[%s16741_s10 + $0xf8] sm:$0xff] }
 0xb85   : > { %v11603_v16 = vpack.c.bf16 %v11587_v46, %v11586_v20  ;;  %v14908_v20 = vadd.f32 %v19738_v6, %v19636_v30  ;;  %v14911_v30 = vadd.f32 %v19645_v0, %v19738_v6 }
 0xb87   : > { %v14912_v0 = vadd.f32 %v14911_v30, %v19751_v41  ;;  %v14956_v30 = vadd.f32 %v19738_v6, %v19589_v51  ;;  %v14959_v51 = vadd.f32 %v19595_v29, %v19738_v6 }
 0xb89   : > { %v14960_v29 = vadd.f32 %v14959_v51, %v19751_v41 }
 0xb8b   : > { %14484 = vmatmul.mubr.msk.bf16.gmra.mrb[28].mxu1 %vm648_vm0, %v11593_v59  ;;  %v14875_v59 = vadd.f32 %v19607_v54, %v19738_v6  ;;  %v14887_v54 = vadd.f32 %v19619_v48, %v19738_v6  ;;  %v14896_v48 = vadd.f32 %v19738_v6, %v19625_v35 }
 0xb8c   : > { %14487 = vmatprep.mubr.msk.bf16.mxu1 %vm648_vm0, %v11594_v55  ;;  %v14878_v55 = vadd.f32 %v19738_v6, %v19609_v27 }
 0xb8d   : > { %v14888_v36 = vadd.f32 %v14887_v54, %v19751_v41  ;;  %v14897_v35 = vadd.f32 %v14896_v48, %v19751_v41 }
 0xb93   : > { %14488 = vmatmul.mubr.msk.bf16.gmra.mrb[32].mxu1 %vm648_vm0, %v11595_v45 }
 0xb94   : > { %14491 = vmatprep.mubr.msk.bf16.mxu1 %vm648_vm0, %v11596_v52 }
 0xb9b   : > { %14492 = vmatmul.mubr.msk.bf16.gmra.mrb[36].mxu1 %vm648_vm0, %v11597_v58 }
 0xb9c   : > { %14495 = vmatprep.mubr.msk.bf16.mxu1 %vm648_vm0, %v11598_v4  ;;  %v14893_v4 = vadd.f32 %v19623_v47, %v19738_v6 }
 0xb9e   : > { %v14894_v24 = vadd.f32 %v14893_v4, %v19751_v41  ;;  %v14926_v4 = vadd.f32 %v19738_v6, %v19659_v39 }
 0xba0   : > { %v14927_v39 = vadd.f32 %v14926_v4, %v19751_v41 }
 0xba3   : > { %14496 = vmatmul.mubr.msk.bf16.gmra.mrb[40].mxu1 %vm648_vm0, %v11599_v8 }
 0xba4   : > { %14499 = vmatprep.mubr.msk.bf16.mxu1 %vm648_vm0, %v11600_v62 }
 0xbab   : > { %14500 = vmatmul.mubr.msk.bf16.gmra.mrb[12].mxu1 %vm648_vm0, %v11601_v43 }
 0xbac   : > { %14503 = vmatprep.mubr.msk.bf16.mxu1 %vm648_vm0, %v11602_v44  ;;  %v14905_v44 = vadd.f32 %v19634_v42, %v19738_v6 }
 0xbae   : > { %v14906_v25 = vadd.f32 %v14905_v44, %v19751_v41 }
 0xbb3   : > { %14504 = vmatmul.mubr.msk.bf16.gmra.mrb[16].mxu1 %vm648_vm0, %v11603_v16 }
 0xc4e   : > { %v14477_v61 = vpop.f32.mrb[20].mxu1 }
 0xc4f   : > { %v14876_v37 = vadd.f32 %v14875_v59, %v14477_v61  ;;  %v11709_v19 = vpop.f32.mrb[21].mxu1 }
 0xc50   : > { %v14879_v45 = vadd.f32 %v14878_v55, %v11709_v19  ;;  %v14478_v52 = vpop.f32.mrb[22].mxu1  ;;  %v14909_v55 = vadd.f32 %v14908_v20, %v19751_v41  ;;  %v14914_v19 = vadd.f32 %v19738_v6, %v19647_v11 }
 0xc51   : > { %v14877_v27 = vadd.f32 %v14876_v37, %v19751_v41  ;;  %v14883_v60 = vadd.f32 %v14882_v7, %v14478_v52  ;;  %v11712_v33 = vpop.f32.mrb[23].mxu1  ;;  %v14920_v52 = vadd.f32 %v19738_v6, %v19651_v50  ;;  %v14923_v50 = vadd.f32 %v19657_v1, %v19738_v6 }
 0xc52   : > { %v14880_v38 = vadd.f32 %v14879_v45, %v19751_v41  ;;  %v14886_v58 = vadd.f32 %v14885_v57, %v11712_v33  ;;  %v14917_v45 = vadd.f32 %v19649_v17, %v19738_v6  ;;  %v14915_v11 = vadd.f32 %v14914_v19, %v19751_v41 }
 0xc53   : > { %11870 = vst.msk [vmem:[%s19765_s27 + $0x10] sm:$0xff] %vm5985_vm4, %v14877_v27  ;;  %11871 = vst.msk [vmem:[%s19765_s27 + $0x18] sm:$0xff] %vm5985_vm4, %v14883_v60  ;;  %v14921_v26 = vadd.f32 %v14920_v52, %v19751_v41  ;;  %v14924_v1 = vadd.f32 %v14923_v50, %v19751_v41  ;;  %v14957_v52 = vadd.f32 %v14956_v30, %v19751_v41 }
 0xc54   : > { %11868 = vst.msk [vmem:[%s19765_s27] sm:$0xff] %vm5985_vm4, %v14880_v38  ;;  %11869 = vst.msk [vmem:[%s19765_s27 + $0x8] sm:$0xff] %vm5985_vm4, %v14886_v58  ;;  %v14918_v60 = vadd.f32 %v14917_v45, %v19751_v41 }
 0xc56   : > { %v14481_v47 = vpop.f32.mrb[24].mxu1 }
 0xc57   : > { %v14889_v28 = vadd.f32 %v14888_v36, %v14481_v47  ;;  %v11725_v18 = vpop.f32.mrb[25].mxu1  ;;  %v14929_v36 = vadd.f32 %v19661_v15, %v19738_v6  ;;  %v14932_v47 = vadd.f32 %v19738_v6, %v19663_v56  ;;  %v14935_v56 = vadd.f32 %v19669_v13, %v19738_v6 }
 0xc58   : > { %v14892_v8 = vadd.f32 %v14891_v22, %v11725_v18  ;;  %v14482_v62 = vpop.f32.mrb[26].mxu1 }
 0xc59   : > { %11874 = vst.msk [vmem:[%s19765_s27 + $0x30] sm:$0xff] %vm5985_vm4, %v14889_v28  ;;  %v14895_v63 = vadd.f32 %v14894_v24, %v14482_v62  ;;  %v11728_v53 = vpop.f32.mrb[27].mxu1  ;;  %v14930_v24 = vadd.f32 %v14929_v36, %v19751_v41  ;;  %v14933_v62 = vadd.f32 %v14932_v47, %v19751_v41  ;;  %v14936_v13 = vadd.f32 %v14935_v56, %v19751_v41 }
 0xc5a   : > { %11872 = vst.msk [vmem:[%s19765_s27 + $0x20] sm:$0xff] %vm5985_vm4, %v14892_v8  ;;  %v14898_v43 = vadd.f32 %v14897_v35, %v11728_v53 }
 0xc5b   : > { %11875 = vst.msk [vmem:[%s19765_s27 + $0x38] sm:$0xff] %vm5985_vm4, %v14895_v63  ;;  %v14938_v63 = vadd.f32 %v19738_v6, %v19671_v21 }
 0xc5c   : > { %11873 = vst.msk [vmem:[%s19765_s27 + $0x28] sm:$0xff] %vm5985_vm4, %v14898_v43  ;;  %v14944_v43 = vadd.f32 %v19738_v6, %v19675_v14  ;;  %v14947_v14 = vadd.f32 %v19583_v12, %v19738_v6 }
 0xc5d   : > { %v14939_v21 = vadd.f32 %v14938_v63, %v19751_v41 }
 0xc5e   : > { %v14485_v46 = vpop.f32.mrb[28].mxu1  ;;  %v14948_v12 = vadd.f32 %v14947_v14, %v19751_v41 }
 0xc5f   : > { %v14901_v16 = vadd.f32 %v14900_v23, %v14485_v46  ;;  %v11741_v3 = vpop.f32.mrb[29].mxu1  ;;  %v14942_v46 = vadd.f32 %v14941_v2, %v19751_v41 }
 0xc60   : > { %v14904_v42 = vadd.f32 %v14903_v9, %v11741_v3  ;;  %v14486_v59 = vpop.f32.mrb[30].mxu1 }
 0xc61   : > { %11878 = vst.msk [vmem:[%s19765_s27 + $0x50] sm:$0xff] %vm5985_vm4, %v14901_v16  ;;  %v14907_v61 = vadd.f32 %v14906_v25, %v14486_v59  ;;  %v11744_v37 = vpop.f32.mrb[31].mxu1  ;;  %v14945_v16 = vadd.f32 %v14944_v43, %v19751_v41 }
 0xc62   : > { %11876 = vst.msk [vmem:[%s19765_s27 + $0x40] sm:$0xff] %vm5985_vm4, %v14904_v42  ;;  %v14910_v7 = vadd.f32 %v14909_v55, %v11744_v37  ;;  %v14950_v42 = vadd.f32 %v19738_v6, %v19585_v31  ;;  %v14953_v55 = vadd.f32 %v19587_v40, %v19738_v6 }
 0xc63   : > { %11879 = vst.msk [vmem:[%s19765_s27 + $0x58] sm:$0xff] %vm5985_vm4, %v14907_v61 }
 0xc64   : > { %11877 = vst.msk [vmem:[%s19765_s27 + $0x48] sm:$0xff] %vm5985_vm4, %v14910_v7  ;;  %v14951_v31 = vadd.f32 %v14950_v42, %v19751_v41  ;;  %v14954_v7 = vadd.f32 %v14953_v55, %v19751_v41 }
 0xc66   : > { %v14489_v57 = vpop.f32.mrb[32].mxu1 }
 0xc67   : > { %v14913_v54 = vadd.f32 %v14912_v0, %v14489_v57  ;;  %v11757_v27 = vpop.f32.mrb[33].mxu1 }
 0xc68   : > { %v14916_v17 = vadd.f32 %v14915_v11, %v11757_v27  ;;  %v14490_v33 = vpop.f32.mrb[34].mxu1  ;;  %v14962_v11 = vadd.f32 %v19738_v6, %v19597_v5  ;;  %v14965_v27 = vadd.f32 %v19599_v10, %v19738_v6 }
 0xc69   : > { %11882 = vst.msk [vmem:[%s19765_s27 + $0x70] sm:$0xff] %vm5985_vm4, %v14913_v54  ;;  %v14919_v38 = vadd.f32 %v14918_v60, %v14490_v33  ;;  %v11760_v58 = vpop.f32.mrb[35].mxu1  ;;  %v14968_v60 = vadd.f32 %v19738_v6, %v19601_v34 }
 0xc6a   : > { %11880 = vst.msk [vmem:[%s19765_s27 + $0x60] sm:$0xff] %vm5985_vm4, %v14916_v17  ;;  %v14922_v48 = vadd.f32 %v14921_v26, %v11760_v58  ;;  %v14963_v5 = vadd.f32 %v14962_v11, %v19751_v41  ;;  %v14966_v26 = vadd.f32 %v14965_v27, %v19751_v41 }
 0xc6b   : > { %11883 = vst.msk [vmem:[%s19765_s27 + $0x78] sm:$0xff] %vm5985_vm4, %v14919_v38  ;;  %v14969_v6 = vadd.f32 %v14968_v60, %v19751_v41 }
 0xc6c   : > { %11881 = vst.msk [vmem:[%s19765_s27 + $0x68] sm:$0xff] %vm5985_vm4, %v14922_v48 }
 0xc6e   : > { %v14493_v22 = vpop.f32.mrb[36].mxu1 }
 0xc6f   : > { %v14925_v28 = vadd.f32 %v14924_v1, %v14493_v22  ;;  %v11773_v18 = vpop.f32.mrb[37].mxu1 }
 0xc70   : > { %v14928_v15 = vadd.f32 %v14927_v39, %v11773_v18  ;;  %v14494_v8 = vpop.f32.mrb[38].mxu1 }
 0xc71   : > { %11886 = vst.msk [vmem:[%s19765_s27 + $0x90] sm:$0xff] %vm5985_vm4, %v14925_v28  ;;  %v14931_v35 = vadd.f32 %v14930_v24, %v14494_v8  ;;  %v11776_v32 = vpop.f32.mrb[39].mxu1 }
 0xc72   : > { %11884 = vst.msk [vmem:[%s19765_s27 + $0x80] sm:$0xff] %vm5985_vm4, %v14928_v15  ;;  %v14934_v53 = vadd.f32 %v14933_v62, %v11776_v32 }
 0xc73   : > { %11887 = vst.msk [vmem:[%s19765_s27 + $0x98] sm:$0xff] %vm5985_vm4, %v14931_v35 }
 0xc74   : > { %11885 = vst.msk [vmem:[%s19765_s27 + $0x88] sm:$0xff] %vm5985_vm4, %v14934_v53 }
 0xc76   : > { %v14497_v44 = vpop.f32.mrb[40].mxu1 }
 0xc77   : > { %v14937_v20 = vadd.f32 %v14936_v13, %v14497_v44  ;;  %v11789_v23 = vpop.f32.mrb[41].mxu1 }
 0xc78   : > { %v14940_v49 = vadd.f32 %v14939_v21, %v11789_v23  ;;  %v14498_v9 = vpop.f32.mrb[42].mxu1 }
 0xc79   : > { %11890 = vst.msk [vmem:[%s19765_s27 + $0xb0] sm:$0xff] %vm5985_vm4, %v14937_v20  ;;  %v14943_v3 = vadd.f32 %v14942_v46, %v14498_v9  ;;  %v11792_v25 = vpop.f32.mrb[43].mxu1 }
 0xc7a   : > { %11888 = vst.msk [vmem:[%s19765_s27 + $0xa0] sm:$0xff] %vm5985_vm4, %v14940_v49  ;;  %v14946_v59 = vadd.f32 %v14945_v16, %v11792_v25 }
 0xc7b   : > { %11891 = vst.msk [vmem:[%s19765_s27 + $0xb8] sm:$0xff] %vm5985_vm4, %v14943_v3 }
 0xc7c   : > { %11889 = vst.msk [vmem:[%s19765_s27 + $0xa8] sm:$0xff] %vm5985_vm4, %v14946_v59 }
 0xc7e   : > { %v14501_v61 = vpop.f32.mrb[12].mxu1 }
 0xc7f   : > { %v14949_v37 = vadd.f32 %v14948_v12, %v14501_v61  ;;  %v11805_v19 = vpop.f32.mrb[13].mxu1 }
 0xc80   : > { %v14952_v40 = vadd.f32 %v14951_v31, %v11805_v19  ;;  %v14502_v45 = vpop.f32.mrb[14].mxu1 }
 0xc81   : > { %11894 = vst.msk [vmem:[%s19765_s27 + $0xd0] sm:$0xff] %vm5985_vm4, %v14949_v37  ;;  %v14955_v0 = vadd.f32 %v14954_v7, %v14502_v45  ;;  %v11808_v57 = vpop.f32.mrb[15].mxu1 }
 0xc82   : > { %11892 = vst.msk [vmem:[%s19765_s27 + $0xc0] sm:$0xff] %vm5985_vm4, %v14952_v40  ;;  %v14958_v54 = vadd.f32 %v14957_v52, %v11808_v57 }
 0xc83   : > { %11895 = vst.msk [vmem:[%s19765_s27 + $0xd8] sm:$0xff] %vm5985_vm4, %v14955_v0 }
 0xc84   : > { %11893 = vst.msk [vmem:[%s19765_s27 + $0xc8] sm:$0xff] %vm5985_vm4, %v14958_v54 }
 0xc86   : > { %v14505_v17 = vpop.f32.mrb[16].mxu1 }
 0xc87   : > { %v14961_v33 = vadd.f32 %v14960_v29, %v14505_v17  ;;  %v11821_v10 = vpop.f32.mrb[17].mxu1 }
 0xc88   : > { %v14964_v50 = vadd.f32 %v14963_v5, %v11821_v10  ;;  %v14506_v34 = vpop.f32.mrb[18].mxu1 }
 0xc89   : > { %11898 = vst.msk [vmem:[%s19765_s27 + $0xf0] sm:$0xff] %vm5985_vm4, %v14961_v33  ;;  %v14967_v38 = vadd.f32 %v14966_v26, %v14506_v34  ;;  %v11824_v58 = vpop.f32.mrb[19].mxu1 }
 0xc8a   : > { %11896 = vst.msk [vmem:[%s19765_s27 + $0xe0] sm:$0xff] %vm5985_vm4, %v14964_v50  ;;  %v14970_v4 = vadd.f32 %v14969_v6, %v11824_v58 }
 0xc8b   : > { %11899 = vst.msk [vmem:[%s19765_s27 + $0xf8] sm:$0xff] %vm5985_vm4, %v14967_v38 }
 0xc8c   : > { %11897 = vst.msk [vmem:[%s19765_s27 + $0xe8] sm:$0xff] %vm5985_vm4, %v14970_v4 }
 0xc8d   : > { %16280 = shalt.err (!%p16277_p11)
}
 0xc8e   : > { %s16281_s27 = scalar_lea.hbm %s19908_s24, 4096  ;;  %s16285_s14 = scalar_lea.hbm %s20095_s25, 8192 }
 0xc8f   : > { %p16282_p12 = scmp.ne.s32.totalorder %s19908_s24, %s16281_s27  ;;  %p16286_p9 = scmp.lt.u32.totalorder %s19908_s24, %s20095_s25 }
 0xc90   : > { %p16287_p7 = scmp.lt.u32.totalorder %s16285_s14, %s16281_s27  ;;  %p16289_p4 = scmp.lt.u32.totalorder %s16281_s27, %s19908_s24 }
 0xc91   : > { %p16283_p3 = pnand %p16282_p12, %p20096_p1 }
 0xc92   : > { %p16288_p10 = por %p16287_p7, %p16286_p9 }
 0xc93   : > { %p16284_p5 = pneg %p16283_p3 }
 0xc94   : > { %p16290_p13 = por %p16289_p4, %p16288_p10 }
 0xc96   : > { %p16291_p0 = pnand %p16290_p13, %p16284_p5 }
 0xc98   : > { %16294 = shalt.err (!%p16291_p0)
}
 0xc99   : > { %s16367_s1 = smov 128   ;;  %s16368_s22 = smov 8  }
 0xc9a   : > { %s20097_s3 = scalar_lea.sflag [#allocation6], %s16735_s16 }
 0xc9b   : > { %15593 = dma.vmem_to_hbm [thread:$0]  (%p20096_p1), %s19910_s2, 4096, %s19908_s24, %s20097_s3, %s16367_s1, %s16367_s1, %s16368_s22  }
 0xc9c PF: > { %s11929_s0 = sand.u32 1, %s16337_s18   ;;  %p20098_p2 = scmp.ne.s32.totalorder %s20032_s9, 0 }
 0xc9d   : > { %p20099_p8 = scmp.ge.s32.totalorder %s16349_s21, 2  ;;  %s11930_s10 = scalar_lea.sflag [#allocation6], %s11929_s0 }
 0xc9f   : > { %p15622_p6 = pnand %p20099_p8, %p20098_p2 }
 0xca1   : > { %16332 = dma.done.wait (!%p15622_p6), %s11930_s10, 4096  }
 0xca2   : > { %16334 = vsyncadd (!%p15622_p6), %s11930_s10, 4294963200  ;;  %p32_p11 = scmp.ge.s32.totalorder %s16662_s30, 4   ;;  %s20100_s18 = smov %s16341_s19 }
 0xca3   : > { %s20101_s19 = smov %s16345_s20  ;;  %s20102_s20 = smov %s16674_s15 }
 0xca4   : > { %s20103_s21 = smov %s16662_s30  ;;  %34 = sbr.rel (!%p32_p11) target bundleno = 19 (0x13), region = 175 }
 0xcab   :  { %11935 = vsyncpa [#allocation5], 1 }
 0xcac   :  { %11937 = vsyncpa [#allocation5 + $0x1], 1 }
 0xcad   :  { %11938 = vsyncpa [#allocation8], 1 }
 0xcae   :  { %11939 = vsyncpa [#allocation11], 1 }
 0xcaf   :  { %11940 = vsyncpa [#allocation14], 1 }
 0xcb0   :  { %11941 = vsyncpa [#allocation17], 1 }
 0xcb1   :  { %11942 = vsyncpa [#allocation6], 1 }
 0xcb2   :  { %11944 = vsyncpa [#allocation6 + $0x1], 1 }

</bundles_post_ra>
